<compile_context>
chip_gen: v7x
topology: tpu7x:2x2x1
jax: 0.10.0
libtpu: 0.0.40
codegen_flags: <defaults>
</compile_context>

<pallas_src>
import functools

import jax
import jax.numpy as jnp
from jax import lax
from jax.experimental import pallas as pl
from jax.experimental.pallas import tpu as pltpu


def _round_up(v, m):
    return (v + m - 1) // m * m


# ---------------------------------------------------------------------------
# Pallas kernel: one GATv2Conv layer, one target-row tile per grid step
# ---------------------------------------------------------------------------
def _gatv2_conv_kernel(*refs, heads, c_pad, concat, use_edge, apply_elu,
                       negative_slope=0.2):
    if use_edge:
        (xrow_ref, xt_ref, adj_ref, ea_ref,
         wlT_ref, blT_ref, wr_ref, br_ref,
         we_ref, att_ref, bias_ref, out_ref) = refs
    else:
        (xrow_ref, xt_ref, adj_ref,
         wlT_ref, blT_ref, wr_ref, br_ref,
         att_ref, bias_ref, out_ref) = refs

    f32 = jnp.float32
    tile_i, n_pad = adj_ref.shape

    # ---- linear projections (MXU, bf16 operands, f32 accumulation) ----------
    # source-side transform, lane-dense on the node axis: xlT[k, j] = (W_l^T x^T)[k, j]
    xlT = jnp.dot(wlT_ref[...], xt_ref[...],
                  preferred_element_type=f32) + blT_ref[...]            # [H*Cp, N_pad]
    # target-side transform for this row tile: xr[i, k]
    xr = jnp.dot(xrow_ref[...], wr_ref[...],
                 preferred_element_type=f32) + br_ref[...]              # [TILE_I, H*Cp]

    mask = adj_ref[...] != 0                                            # [TILE_I, N_pad]

    if use_edge:
        d_dim = ea_ref.shape[0]
        ea = [ea_ref[d].astype(f32) for d in range(d_dim)]              # D x [TILE_I, N_pad]

    outs = []
    for h in range(heads):                                              # static unroll
        # ---- attention logits, accumulated channel by channel so that every
        #      vector op is a lane-dense [TILE_I, N_pad] tile -----------------
        e = jnp.zeros((tile_i, n_pad), f32)
        for c in range(c_pad):
            k = h * c_pad + c
            s = xr[:, k:k + 1] + xlT[k:k + 1, :]                        # [TILE_I, N_pad]
            if use_edge:
                for d in range(d_dim):
                    s = s + we_ref[d, k] * ea[d]                        # scalar from SMEM
            s = jnp.where(s > 0, s, negative_slope * s)                 # leaky_relu
            e = e + att_ref[h, c] * s                                   # scalar from SMEM

        # ---- masked softmax over incoming edges (lane axis) ------------------
        e = jnp.where(mask, e, f32(-1e30))
        m = jnp.max(e, axis=-1, keepdims=True)                          # [TILE_I, 1]
        p = jnp.where(mask, jnp.exp(e - m), f32(0.0))
        denom = jnp.sum(p, axis=-1, keepdims=True)
        # guard: padded target rows have denom == 0 (they are sliced away outside)
        alpha = p * pl.reciprocal(jnp.maximum(denom, f32(1e-20)), approx=True)

        # ---- aggregate: out_h[i, c] = sum_j alpha[i, j] * xl[j, c]  (MXU, bf16)
        xlT_h = xlT[h * c_pad:(h + 1) * c_pad, :]                       # [Cp, N_pad]
        out_h = lax.dot_general(
            alpha.astype(jnp.bfloat16), xlT_h.astype(jnp.bfloat16),
            dimension_numbers=(((1,), (1,)), ((), ())),
            preferred_element_type=f32)                                 # [TILE_I, Cp]
        outs.append(out_h)

    if concat:
        out = jnp.concatenate(outs, axis=-1)                            # [TILE_I, H*Cp]
    else:
        out = outs[0]
        for o in outs[1:]:
            out = out + o
        out = out * (1.0 / heads)                                       # mean over heads

    # pad to the lane-dense output width (multiple of 128), add bias, fused ELU
    out_w = out_ref.shape[-1]
    if out.shape[-1] < out_w:
        out = jnp.concatenate(
            [out, jnp.zeros((tile_i, out_w - out.shape[-1]), f32)], axis=-1)
    out = out + bias_ref[...]
    if apply_elu:                                                       # fused F.elu
        out = jnp.where(out > 0, out, jnp.exp(jnp.minimum(out, 0.0)) - 1.0)
    out_ref[...] = out


# ---------------------------------------------------------------------------
# Parameter packing: pad channels per head to a multiple of 8, pad Fin to 8,
# transpose lin_l for the lane-dense source-side matmul, cast MXU operands to bf16.
# ---------------------------------------------------------------------------
def _pad_head_channels(a, heads, c, c_pad):
    if c_pad == c:
        return a
    lead = a.shape[:-1]
    a = a.reshape(lead + (heads, c))
    pad = [(0, 0)] * (a.ndim - 1) + [(0, c_pad - c)]
    a = jnp.pad(a, pad)
    return a.reshape(lead + (heads * c_pad,))


def _pack_layer(params, *, heads, c, c_pad, fin, fin_pad, concat, out_pad):
    hcp = heads * c_pad
    wl = _pad_head_channels(params["w_l"], heads, c, c_pad)
    wr = _pad_head_channels(params["w_r"], heads, c, c_pad)
    wl = jnp.pad(wl, ((0, fin_pad - fin), (0, 0)))
    wr = jnp.pad(wr, ((0, fin_pad - fin), (0, 0)))
    bl = _pad_head_channels(params["b_l"], heads, c, c_pad)
    br = _pad_head_channels(params["b_r"], heads, c, c_pad)
    att = jnp.pad(params["att"], ((0, 0), (0, c_pad - c)))
    if concat:
        bias = _pad_head_channels(params["bias"], heads, c, c_pad)
    else:
        bias = jnp.pad(params["bias"], ((0, c_pad - c),))
    bias = jnp.pad(bias, ((0, out_pad - bias.shape[0]),))

    packed = {
        "wlT": wl.T.astype(jnp.bfloat16),                    # [H*Cp, Fin_pad]
        "blT": bl.reshape(hcp, 1).astype(jnp.float32),       # [H*Cp, 1]
        "wr": wr.astype(jnp.bfloat16),                       # [Fin_pad, H*Cp]
        "br": br.reshape(1, hcp).astype(jnp.float32),        # [1, H*Cp]
        "att": att.astype(jnp.float32),                      # [H, Cp]     (SMEM)
        "bias": bias.reshape(1, out_pad).astype(jnp.float32) # [1, OUT_PAD]
    }
    if "w_edge" in params:
        packed["we"] = _pad_head_channels(
            params["w_edge"], heads, c, c_pad).astype(jnp.float32)   # [D, H*Cp] (SMEM)
    return packed


# ---------------------------------------------------------------------------
# Wrapper: one GATv2Conv layer as a tiled pallas_call
# ---------------------------------------------------------------------------
def gatv2_conv(x, adj_p, ea_p, params, *, heads, out_channels, concat,
               apply_elu, n_real, tile_i=32):
    n_pad = adj_p.shape[0]
    c = out_channels
    c_pad = max(8, _round_up(c, 8))
    hcp = heads * c_pad
    fin = x.shape[1]
    fin_pad = _round_up(fin, 8)
    out_pad = _round_up(max(hcp if concat else c_pad, 128), 128)   # lane-dense stores
    tile_i = min(tile_i, n_pad)
    assert n_pad % tile_i == 0 and tile_i % 32 == 0                # int8 adjacency tiling
    use_edge = ea_p is not None

    # pad node features (rows to N_pad, features to Fin_pad); bf16 MXU operands
    x_p = jnp.zeros((n_pad, fin_pad), jnp.float32).at[:n_real, :fin].set(x)
    x_rows = x_p.astype(jnp.bfloat16)                              # [N_pad, Fin_pad]
    xt = x_p.T.astype(jnp.bfloat16)                                # [Fin_pad, N_pad]

    packed = _pack_layer(params, heads=heads, c=c, c_pad=c_pad,
                         fin=fin, fin_pad=fin_pad, concat=concat, out_pad=out_pad)

    args = [x_rows, xt, adj_p]
    in_specs = [
        pl.BlockSpec((tile_i, fin_pad), lambda i: (i, 0)),         # target rows
        pl.BlockSpec((fin_pad, n_pad), lambda i: (0, 0)),          # full x^T (resident)
        pl.BlockSpec((tile_i, n_pad), lambda i: (i, 0)),           # adjacency rows (int8)
    ]
    if use_edge:
        d = ea_p.shape[0]
        args.append(ea_p)
        in_specs.append(pl.BlockSpec((d, tile_i, n_pad), lambda i: (0, i, 0)))
    args += [packed["wlT"], packed["blT"], packed["wr"], packed["br"]]
    in_specs += [
        pl.BlockSpec((hcp, fin_pad), lambda i: (0, 0)),
        pl.BlockSpec((hcp, 1), lambda i: (0, 0)),
        pl.BlockSpec((fin_pad, hcp), lambda i: (0, 0)),
        pl.BlockSpec((1, hcp), lambda i: (0, 0)),
    ]
    if use_edge:
        args.append(packed["we"])
        in_specs.append(pl.BlockSpec(memory_space=pltpu.MemorySpace.SMEM))
    args += [packed["att"], packed["bias"]]
    in_specs += [
        pl.BlockSpec(memory_space=pltpu.MemorySpace.SMEM),
        pl.BlockSpec((1, out_pad), lambda i: (0, 0)),
    ]

    kernel = functools.partial(
        _gatv2_conv_kernel, heads=heads, c_pad=c_pad,
        concat=concat, use_edge=use_edge, apply_elu=apply_elu)

    out = pl.pallas_call(
        kernel,
        grid=(n_pad // tile_i,),
        in_specs=in_specs,
        out_specs=pl.BlockSpec((tile_i, out_pad), lambda i: (i, 0)),
        out_shape=jax.ShapeDtypeStruct((n_pad, out_pad), jnp.float32),
        compiler_params=pltpu.CompilerParams(
            dimension_semantics=("parallel",),
            vmem_limit_bytes=32 * 1024 * 1024),
    )(*args)

    # de-pad: drop padded rows and the per-head channel padding (wrapper-side plumbing)
    if concat:
        o = out[:n_real, :heads * c_pad].reshape(n_real, heads, c_pad)[:, :, :c]
        return o.reshape(n_real, heads * c)
    return out[:n_real, :c]


# ---------------------------------------------------------------------------
# Parameter init (deterministic, glorot-uniform like PyG defaults)
# ---------------------------------------------------------------------------
def _glorot(key, shape):
    limit = (6.0 / (shape[0] + shape[-1])) ** 0.5
    return jax.random.uniform(key, shape, jnp.float32, -limit, limit)


def init_gatv2_conv_params(key, in_ch, out_ch, heads, edge_dim, concat):
    k = jax.random.split(key, 4)
    p = {
        "w_l": _glorot(k[0], (in_ch, heads * out_ch)),
        "b_l": jnp.zeros((heads * out_ch,), jnp.float32),
        "w_r": _glorot(k[1], (in_ch, heads * out_ch)),
        "b_r": jnp.zeros((heads * out_ch,), jnp.float32),
        "att": _glorot(k[2], (heads, out_ch)),
        "bias": jnp.zeros((heads * out_ch if concat else out_ch,), jnp.float32),
    }
    if edge_dim is not None:
        p["w_edge"] = _glorot(k[3], (edge_dim, heads * out_ch))
    return p


# ---------------------------------------------------------------------------
# GATv2 model (mirrors the PyTorch module; dropout = identity in eval mode)
# ---------------------------------------------------------------------------
class GATv2Pallas:
    def __init__(self, key, input_channels, hidden_channels, output_channels,
                 edge_dim=6, heads=1, num_layers=2):
        self.heads = heads
        self.hidden = hidden_channels
        self.out_ch = output_channels
        self.edge_dim = edge_dim
        keys = jax.random.split(key, max(num_layers, 2))
        self.conv1 = init_gatv2_conv_params(
            keys[0], input_channels, hidden_channels, heads, edge_dim, concat=True)
        self.convs = [
            init_gatv2_conv_params(keys[1 + i], hidden_channels * heads,
                                   hidden_channels * heads, 1, None, concat=True)
            for i in range(num_layers - 2)
        ]
        self.conv2 = init_gatv2_conv_params(
            keys[-1], hidden_channels * heads, output_channels, 1, None, concat=False)

    def __call__(self, x, adj, edge_attr_dense):
        n = x.shape[0]
        n_pad = _round_up(max(n, 128), 128)     # 128-lane-dense source-node axis
        adj_p = jnp.zeros((n_pad, n_pad), jnp.int8).at[:n, :n].set(adj.astype(jnp.int8))
        ea_p = None
        if edge_attr_dense is not None:
            d = edge_attr_dense.shape[-1]
            ea_p = jnp.zeros((d, n_pad, n_pad), jnp.bfloat16).at[:, :n, :n].set(
                jnp.transpose(edge_attr_dense, (2, 0, 1)).astype(jnp.bfloat16))
        # F.dropout -> identity (inference)
        h = gatv2_conv(x, adj_p, ea_p, self.conv1, heads=self.heads,
                       out_channels=self.hidden, concat=True, apply_elu=True, n_real=n)
        for p in self.convs:
            h = gatv2_conv(h, adj_p, None, p, heads=1,
                           out_channels=self.hidden * self.heads,
                           concat=True, apply_elu=True, n_real=n)
        # F.dropout -> identity (inference)
        out = gatv2_conv(h, adj_p, None, self.conv2, heads=1,
                         out_channels=self.out_ch, concat=False, apply_elu=False,
                         n_real=n)
        return out


# ---------------------------------------------------------------------------
# Glue: sparse (edge_index, edge_attr) -> dense adjacency / dense edge attrs
# Reproduces PyG's add_self_loops(fill_value='mean') behaviour.
# (Note: duplicate edges overwrite rather than being softmaxed separately.)
# ---------------------------------------------------------------------------
def densify_graph(edge_index, edge_attr, num_nodes, edge_dim):
    src, dst = edge_index[0], edge_index[1]          # edge j -> i : src=j, dst=i
    adj = jnp.zeros((num_nodes, num_nodes), jnp.int8).at[dst, src].set(1)
    ea = jnp.zeros((num_nodes, num_nodes, edge_dim), jnp.float32).at[dst, src].set(edge_attr)

    # self-loop edge attrs = mean of incoming edge attrs (fill_value='mean')
    sums = jnp.zeros((num_nodes, edge_dim), jnp.float32).at[dst].add(edge_attr)
    cnts = jnp.zeros((num_nodes,), jnp.float32).at[dst].add(1.0)
    loop_attr = sums / jnp.maximum(cnts, 1.0)[:, None]

    diag = jnp.arange(num_nodes)
    adj = adj.at[diag, diag].set(1)
    ea = ea.at[diag, diag].set(loop_attr)
    return adj, ea


if __name__ == "__main__":
    key = jax.random.PRNGKey(0)
    N = 16                      # nodes
    in_ch, hid, out_ch = 8, 16, 4
    edge_dim, heads = 6, 2
    num_edges = 48

    k_x, k_e, k_ea, k_p = jax.random.split(key, 4)

    # node features
    x = jax.random.normal(k_x, (N, in_ch), jnp.float32)

    # deterministic edge list: unique off-diagonal (src, dst) pairs, no self loops
    pairs = jnp.array([(j, i) for i in range(N) for j in range(N) if i != j],
                      dtype=jnp.int32)                       # [(src, dst), ...]
    perm = jax.random.permutation(k_e, pairs.shape[0])[:num_edges]
    chosen = pairs[perm]                                     # [E, 2]
    edge_index = chosen.T                                    # [2, E]  row0=src, row1=dst
    edge_attr = jax.random.normal(k_ea, (num_edges, edge_dim), jnp.float32)

    adj, ea_dense = densify_graph(edge_index, edge_attr, N, edge_dim)

    model = GATv2Pallas(k_p, in_ch, hid, out_ch,
                        edge_dim=edge_dim, heads=heads, num_layers=2)

    out = jax.block_until_ready(model(x, adj, ea_dense))
    assert out.shape == (N, out_ch), out.shape
    assert bool(jnp.all(jnp.isfinite(out)))
    print("KERNEL_OK")
</pallas_src>

<mosaic_0001>
module attributes {stable_mosaic.version = 11 : i64} {
  func.func @_gatv2_conv_kernel(%arg0: i32, %arg1: memref<32x8xbf16, #tpu.memory_space<vmem>>, %arg2: memref<8x128xbf16, #tpu.memory_space<vmem>>, %arg3: memref<32x128xi8, #tpu.memory_space<vmem>>, %arg4: memref<6x32x128xbf16, #tpu.memory_space<vmem>>, %arg5: memref<32x8xbf16, #tpu.memory_space<vmem>>, %arg6: memref<32x1xf32, #tpu.memory_space<vmem>>, %arg7: memref<8x32xbf16, #tpu.memory_space<vmem>>, %arg8: memref<1x32xf32, #tpu.memory_space<vmem>>, %arg9: memref<6x32xf32, #tpu.memory_space<smem>>, %arg10: memref<2x16xf32, #tpu.memory_space<smem>>, %arg11: memref<1x128xf32, #tpu.memory_space<vmem>>, %arg12: memref<32x128xf32, #tpu.memory_space<vmem>>) attributes {dimension_semantics = [#tpu.dimension_semantics<parallel>], iteration_bounds = array<i64: 4>, scalar_prefetch = 0 : i64, scratch_operands = 0 : i64, tpu.core_type = #tpu.core_type<tc>, window_params = [{transform_indices = @transform_0, window_bounds = array<i64: 32, 8>}, {pipeline_mode = #tpu.pipeline_mode<synchronous>, transform_indices = @transform_1, window_bounds = array<i64: 8, 128>}, {transform_indices = @transform_2, window_bounds = array<i64: 32, 128>}, {transform_indices = @transform_3, window_bounds = array<i64: 6, 32, 128>}, {pipeline_mode = #tpu.pipeline_mode<synchronous>, transform_indices = @transform_4, window_bounds = array<i64: 32, 8>}, {pipeline_mode = #tpu.pipeline_mode<synchronous>, transform_indices = @transform_5, window_bounds = array<i64: 32, 1>}, {pipeline_mode = #tpu.pipeline_mode<synchronous>, transform_indices = @transform_6, window_bounds = array<i64: 8, 32>}, {pipeline_mode = #tpu.pipeline_mode<synchronous>, transform_indices = @transform_7, window_bounds = array<i64: 1, 32>}, {transform_indices = @transform_8, window_bounds = array<i64: 6, 32>}, {transform_indices = @transform_9, window_bounds = array<i64: 2, 16>}, {pipeline_mode = #tpu.pipeline_mode<synchronous>, transform_indices = @transform_10, window_bounds = array<i64: 1, 128>}, {transform_indices = @transform_11, window_bounds = array<i64: 32, 128>}]} {
    %c0 = arith.constant 0 : index
    %c0_0 = arith.constant 0 : index
    %0 = vector.load %arg5[%c0, %c0_0] : memref<32x8xbf16, #tpu.memory_space<vmem>>, vector<32x8xbf16>
    %c0_1 = arith.constant 0 : index
    %c0_2 = arith.constant 0 : index
    %1 = vector.load %arg2[%c0_1, %c0_2] : memref<8x128xbf16, #tpu.memory_space<vmem>>, vector<8x128xbf16>
    %cst = arith.constant dense<0.000000e+00> : vector<32x128xf32>
    %2 = tpu.matmul %0, %1, %cst {dimension_numbers = #tpu.dot_dimension_numbers<[1], [0], [0], [1], [0, 0, 1, 1], [], []>} : vector<32x8xbf16>, vector<8x128xbf16>, vector<32x128xf32> -> vector<32x128xf32>
    %c0_3 = arith.constant 0 : index
    %c0_4 = arith.constant 0 : index
    %3 = vector.load %arg6[%c0_3, %c0_4] : memref<32x1xf32, #tpu.memory_space<vmem>>, vector<32x1xf32>
    %4 = vector.broadcast %3 : vector<32x1xf32> to vector<32x128xf32>
    %5 = arith.addf %2, %4 : vector<32x128xf32>
    %c0_5 = arith.constant 0 : index
    %c0_6 = arith.constant 0 : index
    %6 = vector.load %arg1[%c0_5, %c0_6] : memref<32x8xbf16, #tpu.memory_space<vmem>>, vector<32x8xbf16>
    %c0_7 = arith.constant 0 : index
    %c0_8 = arith.constant 0 : index
    %7 = vector.load %arg7[%c0_7, %c0_8] : memref<8x32xbf16, #tpu.memory_space<vmem>>, vector<8x32xbf16>
    %cst_9 = arith.constant dense<0.000000e+00> : vector<32x32xf32>
    %8 = tpu.matmul %6, %7, %cst_9 {dimension_numbers = #tpu.dot_dimension_numbers<[1], [0], [0], [1], [0, 0, 1, 1], [], []>} : vector<32x8xbf16>, vector<8x32xbf16>, vector<32x32xf32> -> vector<32x32xf32>
    %c0_10 = arith.constant 0 : index
    %c0_11 = arith.constant 0 : index
    %9 = vector.load %arg8[%c0_10, %c0_11] : memref<1x32xf32, #tpu.memory_space<vmem>>, vector<1x32xf32>
    %10 = vector.broadcast %9 : vector<1x32xf32> to vector<32x32xf32>
    %11 = arith.addf %8, %10 : vector<32x32xf32>
    %c0_12 = arith.constant 0 : index
    %c0_13 = arith.constant 0 : index
    %12 = vector.load %arg3[%c0_12, %c0_13] : memref<32x128xi8, #tpu.memory_space<vmem>>, vector<32x128xi8>
    %c0_i8 = arith.constant 0 : i8
    %13 = vector.broadcast %c0_i8 : i8 to vector<32x128xi8>
    %14 = arith.cmpi ne, %12, %13 : vector<32x128xi8>
    %c0_14 = arith.constant 0 : index
    %c0_15 = arith.constant 0 : index
    %c0_16 = arith.constant 0 : index
    %15 = vector.load %arg4[%c0_14, %c0_15, %c0_16] : memref<6x32x128xbf16, #tpu.memory_space<vmem>>, vector<1x32x128xbf16>
    %16 = vector.shape_cast %15 : vector<1x32x128xbf16> to vector<32x128xbf16>
    %17 = arith.extf %16 : vector<32x128xbf16> to vector<32x128xf32>
    %c1 = arith.constant 1 : index
    %c0_17 = arith.constant 0 : index
    %c0_18 = arith.constant 0 : index
    %18 = vector.load %arg4[%c1, %c0_17, %c0_18] : memref<6x32x128xbf16, #tpu.memory_space<vmem>>, vector<1x32x128xbf16>
    %19 = vector.shape_cast %18 : vector<1x32x128xbf16> to vector<32x128xbf16>
    %20 = arith.extf %19 : vector<32x128xbf16> to vector<32x128xf32>
    %c2 = arith.constant 2 : index
    %c0_19 = arith.constant 0 : index
    %c0_20 = arith.constant 0 : index
    %21 = vector.load %arg4[%c2, %c0_19, %c0_20] : memref<6x32x128xbf16, #tpu.memory_space<vmem>>, vector<1x32x128xbf16>
    %22 = vector.shape_cast %21 : vector<1x32x128xbf16> to vector<32x128xbf16>
    %23 = arith.extf %22 : vector<32x128xbf16> to vector<32x128xf32>
    %c3 = arith.constant 3 : index
    %c0_21 = arith.constant 0 : index
    %c0_22 = arith.constant 0 : index
    %24 = vector.load %arg4[%c3, %c0_21, %c0_22] : memref<6x32x128xbf16, #tpu.memory_space<vmem>>, vector<1x32x128xbf16>
    %25 = vector.shape_cast %24 : vector<1x32x128xbf16> to vector<32x128xbf16>
    %26 = arith.extf %25 : vector<32x128xbf16> to vector<32x128xf32>
    %c4 = arith.constant 4 : index
    %c0_23 = arith.constant 0 : index
    %c0_24 = arith.constant 0 : index
    %27 = vector.load %arg4[%c4, %c0_23, %c0_24] : memref<6x32x128xbf16, #tpu.memory_space<vmem>>, vector<1x32x128xbf16>
    %28 = vector.shape_cast %27 : vector<1x32x128xbf16> to vector<32x128xbf16>
    %29 = arith.extf %28 : vector<32x128xbf16> to vector<32x128xf32>
    %c5 = arith.constant 5 : index
    %c0_25 = arith.constant 0 : index
    %c0_26 = arith.constant 0 : index
    %30 = vector.load %arg4[%c5, %c0_25, %c0_26] : memref<6x32x128xbf16, #tpu.memory_space<vmem>>, vector<1x32x128xbf16>
    %31 = vector.shape_cast %30 : vector<1x32x128xbf16> to vector<32x128xbf16>
    %32 = arith.extf %31 : vector<32x128xbf16> to vector<32x128xf32>
    %cst_27 = arith.constant 0.000000e+00 : f32
    %33 = vector.broadcast %cst_27 : f32 to vector<32x128xf32>
    %34 = vector.extract_strided_slice %11 {offsets = [0, 0], sizes = [32, 1], strides = [1, 1]} : vector<32x32xf32> to vector<32x1xf32>
    %35 = vector.extract_strided_slice %5 {offsets = [0, 0], sizes = [1, 128], strides = [1, 1]} : vector<32x128xf32> to vector<1x128xf32>
    %36 = vector.broadcast %34 : vector<32x1xf32> to vector<32x128xf32>
    %37 = vector.broadcast %35 : vector<1x128xf32> to vector<32x128xf32>
    %38 = arith.addf %36, %37 : vector<32x128xf32>
    %c0_28 = arith.constant 0 : index
    %c0_29 = arith.constant 0 : index
    %39 = memref.load %arg9[%c0_28, %c0_29] : memref<6x32xf32, #tpu.memory_space<smem>>
    %40 = vector.broadcast %39 : f32 to vector<32x128xf32>
    %41 = arith.mulf %40, %17 : vector<32x128xf32>
    %42 = arith.addf %38, %41 : vector<32x128xf32>
    %c1_30 = arith.constant 1 : index
    %c0_31 = arith.constant 0 : index
    %43 = memref.load %arg9[%c1_30, %c0_31] : memref<6x32xf32, #tpu.memory_space<smem>>
    %44 = vector.broadcast %43 : f32 to vector<32x128xf32>
    %45 = arith.mulf %44, %20 : vector<32x128xf32>
    %46 = arith.addf %42, %45 : vector<32x128xf32>
    %c2_32 = arith.constant 2 : index
    %c0_33 = arith.constant 0 : index
    %47 = memref.load %arg9[%c2_32, %c0_33] : memref<6x32xf32, #tpu.memory_space<smem>>
    %48 = vector.broadcast %47 : f32 to vector<32x128xf32>
    %49 = arith.mulf %48, %23 : vector<32x128xf32>
    %50 = arith.addf %46, %49 : vector<32x128xf32>
    %c3_34 = arith.constant 3 : index
    %c0_35 = arith.constant 0 : index
    %51 = memref.load %arg9[%c3_34, %c0_35] : memref<6x32xf32, #tpu.memory_space<smem>>
    %52 = vector.broadcast %51 : f32 to vector<32x128xf32>
    %53 = arith.mulf %52, %26 : vector<32x128xf32>
    %54 = arith.addf %50, %53 : vector<32x128xf32>
    %c4_36 = arith.constant 4 : index
    %c0_37 = arith.constant 0 : index
    %55 = memref.load %arg9[%c4_36, %c0_37] : memref<6x32xf32, #tpu.memory_space<smem>>
    %56 = vector.broadcast %55 : f32 to vector<32x128xf32>
    %57 = arith.mulf %56, %29 : vector<32x128xf32>
    %58 = arith.addf %54, %57 : vector<32x128xf32>
    %c5_38 = arith.constant 5 : index
    %c0_39 = arith.constant 0 : index
    %59 = memref.load %arg9[%c5_38, %c0_39] : memref<6x32xf32, #tpu.memory_space<smem>>
    %60 = vector.broadcast %59 : f32 to vector<32x128xf32>
    %61 = arith.mulf %60, %32 : vector<32x128xf32>
    %62 = arith.addf %58, %61 : vector<32x128xf32>
    %cst_40 = arith.constant 0.000000e+00 : f32
    %63 = vector.broadcast %cst_40 : f32 to vector<32x128xf32>
    %64 = arith.cmpf ogt, %62, %63 : vector<32x128xf32>
    %cst_41 = arith.constant 2.000000e-01 : f32
    %65 = vector.broadcast %cst_41 : f32 to vector<32x128xf32>
    %66 = arith.mulf %65, %62 : vector<32x128xf32>
    %67 = arith.select %64, %62, %66 : vector<32x128xi1>, vector<32x128xf32>
    %c0_42 = arith.constant 0 : index
    %c0_43 = arith.constant 0 : index
    %68 = memref.load %arg10[%c0_42, %c0_43] : memref<2x16xf32, #tpu.memory_space<smem>>
    %69 = vector.broadcast %68 : f32 to vector<32x128xf32>
    %70 = arith.mulf %69, %67 : vector<32x128xf32>
    %71 = arith.addf %33, %70 : vector<32x128xf32>
    %72 = vector.extract_strided_slice %11 {offsets = [0, 1], sizes = [32, 1], strides = [1, 1]} : vector<32x32xf32> to vector<32x1xf32>
    %73 = vector.extract_strided_slice %5 {offsets = [1, 0], sizes = [1, 128], strides = [1, 1]} : vector<32x128xf32> to vector<1x128xf32>
    %74 = vector.broadcast %72 : vector<32x1xf32> to vector<32x128xf32>
    %75 = vector.broadcast %73 : vector<1x128xf32> to vector<32x128xf32>
    %76 = arith.addf %74, %75 : vector<32x128xf32>
    %c0_44 = arith.constant 0 : index
    %c1_45 = arith.constant 1 : index
    %77 = memref.load %arg9[%c0_44, %c1_45] : memref<6x32xf32, #tpu.memory_space<smem>>
    %78 = vector.broadcast %77 : f32 to vector<32x128xf32>
    %79 = arith.mulf %78, %17 : vector<32x128xf32>
    %80 = arith.addf %76, %79 : vector<32x128xf32>
    %c1_46 = arith.constant 1 : index
    %c1_47 = arith.constant 1 : index
    %81 = memref.load %arg9[%c1_46, %c1_47] : memref<6x32xf32, #tpu.memory_space<smem>>
    %82 = vector.broadcast %81 : f32 to vector<32x128xf32>
    %83 = arith.mulf %82, %20 : vector<32x128xf32>
    %84 = arith.addf %80, %83 : vector<32x128xf32>
    %c2_48 = arith.constant 2 : index
    %c1_49 = arith.constant 1 : index
    %85 = memref.load %arg9[%c2_48, %c1_49] : memref<6x32xf32, #tpu.memory_space<smem>>
    %86 = vector.broadcast %85 : f32 to vector<32x128xf32>
    %87 = arith.mulf %86, %23 : vector<32x128xf32>
    %88 = arith.addf %84, %87 : vector<32x128xf32>
    %c3_50 = arith.constant 3 : index
    %c1_51 = arith.constant 1 : index
    %89 = memref.load %arg9[%c3_50, %c1_51] : memref<6x32xf32, #tpu.memory_space<smem>>
    %90 = vector.broadcast %89 : f32 to vector<32x128xf32>
    %91 = arith.mulf %90, %26 : vector<32x128xf32>
    %92 = arith.addf %88, %91 : vector<32x128xf32>
    %c4_52 = arith.constant 4 : index
    %c1_53 = arith.constant 1 : index
    %93 = memref.load %arg9[%c4_52, %c1_53] : memref<6x32xf32, #tpu.memory_space<smem>>
    %94 = vector.broadcast %93 : f32 to vector<32x128xf32>
    %95 = arith.mulf %94, %29 : vector<32x128xf32>
    %96 = arith.addf %92, %95 : vector<32x128xf32>
    %c5_54 = arith.constant 5 : index
    %c1_55 = arith.constant 1 : index
    %97 = memref.load %arg9[%c5_54, %c1_55] : memref<6x32xf32, #tpu.memory_space<smem>>
    %98 = vector.broadcast %97 : f32 to vector<32x128xf32>
    %99 = arith.mulf %98, %32 : vector<32x128xf32>
    %100 = arith.addf %96, %99 : vector<32x128xf32>
    %cst_56 = arith.constant 0.000000e+00 : f32
    %101 = vector.broadcast %cst_56 : f32 to vector<32x128xf32>
    %102 = arith.cmpf ogt, %100, %101 : vector<32x128xf32>
    %cst_57 = arith.constant 2.000000e-01 : f32
    %103 = vector.broadcast %cst_57 : f32 to vector<32x128xf32>
    %104 = arith.mulf %103, %100 : vector<32x128xf32>
    %105 = arith.select %102, %100, %104 : vector<32x128xi1>, vector<32x128xf32>
    %c0_58 = arith.constant 0 : index
    %c1_59 = arith.constant 1 : index
    %106 = memref.load %arg10[%c0_58, %c1_59] : memref<2x16xf32, #tpu.memory_space<smem>>
    %107 = vector.broadcast %106 : f32 to vector<32x128xf32>
    %108 = arith.mulf %107, %105 : vector<32x128xf32>
    %109 = arith.addf %71, %108 : vector<32x128xf32>
    %110 = vector.extract_strided_slice %11 {offsets = [0, 2], sizes = [32, 1], strides = [1, 1]} : vector<32x32xf32> to vector<32x1xf32>
    %111 = vector.extract_strided_slice %5 {offsets = [2, 0], sizes = [1, 128], strides = [1, 1]} : vector<32x128xf32> to vector<1x128xf32>
    %112 = vector.broadcast %110 : vector<32x1xf32> to vector<32x128xf32>
    %113 = vector.broadcast %111 : vector<1x128xf32> to vector<32x128xf32>
    %114 = arith.addf %112, %113 : vector<32x128xf32>
    %c0_60 = arith.constant 0 : index
    %c2_61 = arith.constant 2 : index
    %115 = memref.load %arg9[%c0_60, %c2_61] : memref<6x32xf32, #tpu.memory_space<smem>>
    %116 = vector.broadcast %115 : f32 to vector<32x128xf32>
    %117 = arith.mulf %116, %17 : vector<32x128xf32>
    %118 = arith.addf %114, %117 : vector<32x128xf32>
    %c1_62 = arith.constant 1 : index
    %c2_63 = arith.constant 2 : index
    %119 = memref.load %arg9[%c1_62, %c2_63] : memref<6x32xf32, #tpu.memory_space<smem>>
    %120 = vector.broadcast %119 : f32 to vector<32x128xf32>
    %121 = arith.mulf %120, %20 : vector<32x128xf32>
    %122 = arith.addf %118, %121 : vector<32x128xf32>
    %c2_64 = arith.constant 2 : index
    %c2_65 = arith.constant 2 : index
    %123 = memref.load %arg9[%c2_64, %c2_65] : memref<6x32xf32, #tpu.memory_space<smem>>
    %124 = vector.broadcast %123 : f32 to vector<32x128xf32>
    %125 = arith.mulf %124, %23 : vector<32x128xf32>
    %126 = arith.addf %122, %125 : vector<32x128xf32>
    %c3_66 = arith.constant 3 : index
    %c2_67 = arith.constant 2 : index
    %127 = memref.load %arg9[%c3_66, %c2_67] : memref<6x32xf32, #tpu.memory_space<smem>>
    %128 = vector.broadcast %127 : f32 to vector<32x128xf32>
    %129 = arith.mulf %128, %26 : vector<32x128xf32>
    %130 = arith.addf %126, %129 : vector<32x128xf32>
    %c4_68 = arith.constant 4 : index
    %c2_69 = arith.constant 2 : index
    %131 = memref.load %arg9[%c4_68, %c2_69] : memref<6x32xf32, #tpu.memory_space<smem>>
    %132 = vector.broadcast %131 : f32 to vector<32x128xf32>
    %133 = arith.mulf %132, %29 : vector<32x128xf32>
    %134 = arith.addf %130, %133 : vector<32x128xf32>
    %c5_70 = arith.constant 5 : index
    %c2_71 = arith.constant 2 : index
    %135 = memref.load %arg9[%c5_70, %c2_71] : memref<6x32xf32, #tpu.memory_space<smem>>
    %136 = vector.broadcast %135 : f32 to vector<32x128xf32>
    %137 = arith.mulf %136, %32 : vector<32x128xf32>
    %138 = arith.addf %134, %137 : vector<32x128xf32>
    %cst_72 = arith.constant 0.000000e+00 : f32
    %139 = vector.broadcast %cst_72 : f32 to vector<32x128xf32>
    %140 = arith.cmpf ogt, %138, %139 : vector<32x128xf32>
    %cst_73 = arith.constant 2.000000e-01 : f32
    %141 = vector.broadcast %cst_73 : f32 to vector<32x128xf32>
    %142 = arith.mulf %141, %138 : vector<32x128xf32>
    %143 = arith.select %140, %138, %142 : vector<32x128xi1>, vector<32x128xf32>
    %c0_74 = arith.constant 0 : index
    %c2_75 = arith.constant 2 : index
    %144 = memref.load %arg10[%c0_74, %c2_75] : memref<2x16xf32, #tpu.memory_space<smem>>
    %145 = vector.broadcast %144 : f32 to vector<32x128xf32>
    %146 = arith.mulf %145, %143 : vector<32x128xf32>
    %147 = arith.addf %109, %146 : vector<32x128xf32>
    %148 = vector.extract_strided_slice %11 {offsets = [0, 3], sizes = [32, 1], strides = [1, 1]} : vector<32x32xf32> to vector<32x1xf32>
    %149 = vector.extract_strided_slice %5 {offsets = [3, 0], sizes = [1, 128], strides = [1, 1]} : vector<32x128xf32> to vector<1x128xf32>
    %150 = vector.broadcast %148 : vector<32x1xf32> to vector<32x128xf32>
    %151 = vector.broadcast %149 : vector<1x128xf32> to vector<32x128xf32>
    %152 = arith.addf %150, %151 : vector<32x128xf32>
    %c0_76 = arith.constant 0 : index
    %c3_77 = arith.constant 3 : index
    %153 = memref.load %arg9[%c0_76, %c3_77] : memref<6x32xf32, #tpu.memory_space<smem>>
    %154 = vector.broadcast %153 : f32 to vector<32x128xf32>
    %155 = arith.mulf %154, %17 : vector<32x128xf32>
    %156 = arith.addf %152, %155 : vector<32x128xf32>
    %c1_78 = arith.constant 1 : index
    %c3_79 = arith.constant 3 : index
    %157 = memref.load %arg9[%c1_78, %c3_79] : memref<6x32xf32, #tpu.memory_space<smem>>
    %158 = vector.broadcast %157 : f32 to vector<32x128xf32>
    %159 = arith.mulf %158, %20 : vector<32x128xf32>
    %160 = arith.addf %156, %159 : vector<32x128xf32>
    %c2_80 = arith.constant 2 : index
    %c3_81 = arith.constant 3 : index
    %161 = memref.load %arg9[%c2_80, %c3_81] : memref<6x32xf32, #tpu.memory_space<smem>>
    %162 = vector.broadcast %161 : f32 to vector<32x128xf32>
    %163 = arith.mulf %162, %23 : vector<32x128xf32>
    %164 = arith.addf %160, %163 : vector<32x128xf32>
    %c3_82 = arith.constant 3 : index
    %c3_83 = arith.constant 3 : index
    %165 = memref.load %arg9[%c3_82, %c3_83] : memref<6x32xf32, #tpu.memory_space<smem>>
    %166 = vector.broadcast %165 : f32 to vector<32x128xf32>
    %167 = arith.mulf %166, %26 : vector<32x128xf32>
    %168 = arith.addf %164, %167 : vector<32x128xf32>
    %c4_84 = arith.constant 4 : index
    %c3_85 = arith.constant 3 : index
    %169 = memref.load %arg9[%c4_84, %c3_85] : memref<6x32xf32, #tpu.memory_space<smem>>
    %170 = vector.broadcast %169 : f32 to vector<32x128xf32>
    %171 = arith.mulf %170, %29 : vector<32x128xf32>
    %172 = arith.addf %168, %171 : vector<32x128xf32>
    %c5_86 = arith.constant 5 : index
    %c3_87 = arith.constant 3 : index
    %173 = memref.load %arg9[%c5_86, %c3_87] : memref<6x32xf32, #tpu.memory_space<smem>>
    %174 = vector.broadcast %173 : f32 to vector<32x128xf32>
    %175 = arith.mulf %174, %32 : vector<32x128xf32>
    %176 = arith.addf %172, %175 : vector<32x128xf32>
    %cst_88 = arith.constant 0.000000e+00 : f32
    %177 = vector.broadcast %cst_88 : f32 to vector<32x128xf32>
    %178 = arith.cmpf ogt, %176, %177 : vector<32x128xf32>
    %cst_89 = arith.constant 2.000000e-01 : f32
    %179 = vector.broadcast %cst_89 : f32 to vector<32x128xf32>
    %180 = arith.mulf %179, %176 : vector<32x128xf32>
    %181 = arith.select %178, %176, %180 : vector<32x128xi1>, vector<32x128xf32>
    %c0_90 = arith.constant 0 : index
    %c3_91 = arith.constant 3 : index
    %182 = memref.load %arg10[%c0_90, %c3_91] : memref<2x16xf32, #tpu.memory_space<smem>>
    %183 = vector.broadcast %182 : f32 to vector<32x128xf32>
    %184 = arith.mulf %183, %181 : vector<32x128xf32>
    %185 = arith.addf %147, %184 : vector<32x128xf32>
    %186 = vector.extract_strided_slice %11 {offsets = [0, 4], sizes = [32, 1], strides = [1, 1]} : vector<32x32xf32> to vector<32x1xf32>
    %187 = vector.extract_strided_slice %5 {offsets = [4, 0], sizes = [1, 128], strides = [1, 1]} : vector<32x128xf32> to vector<1x128xf32>
    %188 = vector.broadcast %186 : vector<32x1xf32> to vector<32x128xf32>
    %189 = vector.broadcast %187 : vector<1x128xf32> to vector<32x128xf32>
    %190 = arith.addf %188, %189 : vector<32x128xf32>
    %c0_92 = arith.constant 0 : index
    %c4_93 = arith.constant 4 : index
    %191 = memref.load %arg9[%c0_92, %c4_93] : memref<6x32xf32, #tpu.memory_space<smem>>
    %192 = vector.broadcast %191 : f32 to vector<32x128xf32>
    %193 = arith.mulf %192, %17 : vector<32x128xf32>
    %194 = arith.addf %190, %193 : vector<32x128xf32>
    %c1_94 = arith.constant 1 : index
    %c4_95 = arith.constant 4 : index
    %195 = memref.load %arg9[%c1_94, %c4_95] : memref<6x32xf32, #tpu.memory_space<smem>>
    %196 = vector.broadcast %195 : f32 to vector<32x128xf32>
    %197 = arith.mulf %196, %20 : vector<32x128xf32>
    %198 = arith.addf %194, %197 : vector<32x128xf32>
    %c2_96 = arith.constant 2 : index
    %c4_97 = arith.constant 4 : index
    %199 = memref.load %arg9[%c2_96, %c4_97] : memref<6x32xf32, #tpu.memory_space<smem>>
    %200 = vector.broadcast %199 : f32 to vector<32x128xf32>
    %201 = arith.mulf %200, %23 : vector<32x128xf32>
    %202 = arith.addf %198, %201 : vector<32x128xf32>
    %c3_98 = arith.constant 3 : index
    %c4_99 = arith.constant 4 : index
    %203 = memref.load %arg9[%c3_98, %c4_99] : memref<6x32xf32, #tpu.memory_space<smem>>
    %204 = vector.broadcast %203 : f32 to vector<32x128xf32>
    %205 = arith.mulf %204, %26 : vector<32x128xf32>
    %206 = arith.addf %202, %205 : vector<32x128xf32>
    %c4_100 = arith.constant 4 : index
    %c4_101 = arith.constant 4 : index
    %207 = memref.load %arg9[%c4_100, %c4_101] : memref<6x32xf32, #tpu.memory_space<smem>>
    %208 = vector.broadcast %207 : f32 to vector<32x128xf32>
    %209 = arith.mulf %208, %29 : vector<32x128xf32>
    %210 = arith.addf %206, %209 : vector<32x128xf32>
    %c5_102 = arith.constant 5 : index
    %c4_103 = arith.constant 4 : index
    %211 = memref.load %arg9[%c5_102, %c4_103] : memref<6x32xf32, #tpu.memory_space<smem>>
    %212 = vector.broadcast %211 : f32 to vector<32x128xf32>
    %213 = arith.mulf %212, %32 : vector<32x128xf32>
    %214 = arith.addf %210, %213 : vector<32x128xf32>
    %cst_104 = arith.constant 0.000000e+00 : f32
    %215 = vector.broadcast %cst_104 : f32 to vector<32x128xf32>
    %216 = arith.cmpf ogt, %214, %215 : vector<32x128xf32>
    %cst_105 = arith.constant 2.000000e-01 : f32
    %217 = vector.broadcast %cst_105 : f32 to vector<32x128xf32>
    %218 = arith.mulf %217, %214 : vector<32x128xf32>
    %219 = arith.select %216, %214, %218 : vector<32x128xi1>, vector<32x128xf32>
    %c0_106 = arith.constant 0 : index
    %c4_107 = arith.constant 4 : index
    %220 = memref.load %arg10[%c0_106, %c4_107] : memref<2x16xf32, #tpu.memory_space<smem>>
    %221 = vector.broadcast %220 : f32 to vector<32x128xf32>
    %222 = arith.mulf %221, %219 : vector<32x128xf32>
    %223 = arith.addf %185, %222 : vector<32x128xf32>
    %224 = vector.extract_strided_slice %11 {offsets = [0, 5], sizes = [32, 1], strides = [1, 1]} : vector<32x32xf32> to vector<32x1xf32>
    %225 = vector.extract_strided_slice %5 {offsets = [5, 0], sizes = [1, 128], strides = [1, 1]} : vector<32x128xf32> to vector<1x128xf32>
    %226 = vector.broadcast %224 : vector<32x1xf32> to vector<32x128xf32>
    %227 = vector.broadcast %225 : vector<1x128xf32> to vector<32x128xf32>
    %228 = arith.addf %226, %227 : vector<32x128xf32>
    %c0_108 = arith.constant 0 : index
    %c5_109 = arith.constant 5 : index
    %229 = memref.load %arg9[%c0_108, %c5_109] : memref<6x32xf32, #tpu.memory_space<smem>>
    %230 = vector.broadcast %229 : f32 to vector<32x128xf32>
    %231 = arith.mulf %230, %17 : vector<32x128xf32>
    %232 = arith.addf %228, %231 : vector<32x128xf32>
    %c1_110 = arith.constant 1 : index
    %c5_111 = arith.constant 5 : index
    %233 = memref.load %arg9[%c1_110, %c5_111] : memref<6x32xf32, #tpu.memory_space<smem>>
    %234 = vector.broadcast %233 : f32 to vector<32x128xf32>
    %235 = arith.mulf %234, %20 : vector<32x128xf32>
    %236 = arith.addf %232, %235 : vector<32x128xf32>
    %c2_112 = arith.constant 2 : index
    %c5_113 = arith.constant 5 : index
    %237 = memref.load %arg9[%c2_112, %c5_113] : memref<6x32xf32, #tpu.memory_space<smem>>
    %238 = vector.broadcast %237 : f32 to vector<32x128xf32>
    %239 = arith.mulf %238, %23 : vector<32x128xf32>
    %240 = arith.addf %236, %239 : vector<32x128xf32>
    %c3_114 = arith.constant 3 : index
    %c5_115 = arith.constant 5 : index
    %241 = memref.load %arg9[%c3_114, %c5_115] : memref<6x32xf32, #tpu.memory_space<smem>>
    %242 = vector.broadcast %241 : f32 to vector<32x128xf32>
    %243 = arith.mulf %242, %26 : vector<32x128xf32>
    %244 = arith.addf %240, %243 : vector<32x128xf32>
    %c4_116 = arith.constant 4 : index
    %c5_117 = arith.constant 5 : index
    %245 = memref.load %arg9[%c4_116, %c5_117] : memref<6x32xf32, #tpu.memory_space<smem>>
    %246 = vector.broadcast %245 : f32 to vector<32x128xf32>
    %247 = arith.mulf %246, %29 : vector<32x128xf32>
    %248 = arith.addf %244, %247 : vector<32x128xf32>
    %c5_118 = arith.constant 5 : index
    %c5_119 = arith.constant 5 : index
    %249 = memref.load %arg9[%c5_118, %c5_119] : memref<6x32xf32, #tpu.memory_space<smem>>
    %250 = vector.broadcast %249 : f32 to vector<32x128xf32>
    %251 = arith.mulf %250, %32 : vector<32x128xf32>
    %252 = arith.addf %248, %251 : vector<32x128xf32>
    %cst_120 = arith.constant 0.000000e+00 : f32
    %253 = vector.broadcast %cst_120 : f32 to vector<32x128xf32>
    %254 = arith.cmpf ogt, %252, %253 : vector<32x128xf32>
    %cst_121 = arith.constant 2.000000e-01 : f32
    %255 = vector.broadcast %cst_121 : f32 to vector<32x128xf32>
    %256 = arith.mulf %255, %252 : vector<32x128xf32>
    %257 = arith.select %254, %252, %256 : vector<32x128xi1>, vector<32x128xf32>
    %c0_122 = arith.constant 0 : index
    %c5_123 = arith.constant 5 : index
    %258 = memref.load %arg10[%c0_122, %c5_123] : memref<2x16xf32, #tpu.memory_space<smem>>
    %259 = vector.broadcast %258 : f32 to vector<32x128xf32>
    %260 = arith.mulf %259, %257 : vector<32x128xf32>
    %261 = arith.addf %223, %260 : vector<32x128xf32>
    %262 = vector.extract_strided_slice %11 {offsets = [0, 6], sizes = [32, 1], strides = [1, 1]} : vector<32x32xf32> to vector<32x1xf32>
    %263 = vector.extract_strided_slice %5 {offsets = [6, 0], sizes = [1, 128], strides = [1, 1]} : vector<32x128xf32> to vector<1x128xf32>
    %264 = vector.broadcast %262 : vector<32x1xf32> to vector<32x128xf32>
    %265 = vector.broadcast %263 : vector<1x128xf32> to vector<32x128xf32>
    %266 = arith.addf %264, %265 : vector<32x128xf32>
    %c0_124 = arith.constant 0 : index
    %c6 = arith.constant 6 : index
    %267 = memref.load %arg9[%c0_124, %c6] : memref<6x32xf32, #tpu.memory_space<smem>>
    %268 = vector.broadcast %267 : f32 to vector<32x128xf32>
    %269 = arith.mulf %268, %17 : vector<32x128xf32>
    %270 = arith.addf %266, %269 : vector<32x128xf32>
    %c1_125 = arith.constant 1 : index
    %c6_126 = arith.constant 6 : index
    %271 = memref.load %arg9[%c1_125, %c6_126] : memref<6x32xf32, #tpu.memory_space<smem>>
    %272 = vector.broadcast %271 : f32 to vector<32x128xf32>
    %273 = arith.mulf %272, %20 : vector<32x128xf32>
    %274 = arith.addf %270, %273 : vector<32x128xf32>
    %c2_127 = arith.constant 2 : index
    %c6_128 = arith.constant 6 : index
    %275 = memref.load %arg9[%c2_127, %c6_128] : memref<6x32xf32, #tpu.memory_space<smem>>
    %276 = vector.broadcast %275 : f32 to vector<32x128xf32>
    %277 = arith.mulf %276, %23 : vector<32x128xf32>
    %278 = arith.addf %274, %277 : vector<32x128xf32>
    %c3_129 = arith.constant 3 : index
    %c6_130 = arith.constant 6 : index
    %279 = memref.load %arg9[%c3_129, %c6_130] : memref<6x32xf32, #tpu.memory_space<smem>>
    %280 = vector.broadcast %279 : f32 to vector<32x128xf32>
    %281 = arith.mulf %280, %26 : vector<32x128xf32>
    %282 = arith.addf %278, %281 : vector<32x128xf32>
    %c4_131 = arith.constant 4 : index
    %c6_132 = arith.constant 6 : index
    %283 = memref.load %arg9[%c4_131, %c6_132] : memref<6x32xf32, #tpu.memory_space<smem>>
    %284 = vector.broadcast %283 : f32 to vector<32x128xf32>
    %285 = arith.mulf %284, %29 : vector<32x128xf32>
    %286 = arith.addf %282, %285 : vector<32x128xf32>
    %c5_133 = arith.constant 5 : index
    %c6_134 = arith.constant 6 : index
    %287 = memref.load %arg9[%c5_133, %c6_134] : memref<6x32xf32, #tpu.memory_space<smem>>
    %288 = vector.broadcast %287 : f32 to vector<32x128xf32>
    %289 = arith.mulf %288, %32 : vector<32x128xf32>
    %290 = arith.addf %286, %289 : vector<32x128xf32>
    %cst_135 = arith.constant 0.000000e+00 : f32
    %291 = vector.broadcast %cst_135 : f32 to vector<32x128xf32>
    %292 = arith.cmpf ogt, %290, %291 : vector<32x128xf32>
    %cst_136 = arith.constant 2.000000e-01 : f32
    %293 = vector.broadcast %cst_136 : f32 to vector<32x128xf32>
    %294 = arith.mulf %293, %290 : vector<32x128xf32>
    %295 = arith.select %292, %290, %294 : vector<32x128xi1>, vector<32x128xf32>
    %c0_137 = arith.constant 0 : index
    %c6_138 = arith.constant 6 : index
    %296 = memref.load %arg10[%c0_137, %c6_138] : memref<2x16xf32, #tpu.memory_space<smem>>
    %297 = vector.broadcast %296 : f32 to vector<32x128xf32>
    %298 = arith.mulf %297, %295 : vector<32x128xf32>
    %299 = arith.addf %261, %298 : vector<32x128xf32>
    %300 = vector.extract_strided_slice %11 {offsets = [0, 7], sizes = [32, 1], strides = [1, 1]} : vector<32x32xf32> to vector<32x1xf32>
    %301 = vector.extract_strided_slice %5 {offsets = [7, 0], sizes = [1, 128], strides = [1, 1]} : vector<32x128xf32> to vector<1x128xf32>
    %302 = vector.broadcast %300 : vector<32x1xf32> to vector<32x128xf32>
    %303 = vector.broadcast %301 : vector<1x128xf32> to vector<32x128xf32>
    %304 = arith.addf %302, %303 : vector<32x128xf32>
    %c0_139 = arith.constant 0 : index
    %c7 = arith.constant 7 : index
    %305 = memref.load %arg9[%c0_139, %c7] : memref<6x32xf32, #tpu.memory_space<smem>>
    %306 = vector.broadcast %305 : f32 to vector<32x128xf32>
    %307 = arith.mulf %306, %17 : vector<32x128xf32>
    %308 = arith.addf %304, %307 : vector<32x128xf32>
    %c1_140 = arith.constant 1 : index
    %c7_141 = arith.constant 7 : index
    %309 = memref.load %arg9[%c1_140, %c7_141] : memref<6x32xf32, #tpu.memory_space<smem>>
    %310 = vector.broadcast %309 : f32 to vector<32x128xf32>
    %311 = arith.mulf %310, %20 : vector<32x128xf32>
    %312 = arith.addf %308, %311 : vector<32x128xf32>
    %c2_142 = arith.constant 2 : index
    %c7_143 = arith.constant 7 : index
    %313 = memref.load %arg9[%c2_142, %c7_143] : memref<6x32xf32, #tpu.memory_space<smem>>
    %314 = vector.broadcast %313 : f32 to vector<32x128xf32>
    %315 = arith.mulf %314, %23 : vector<32x128xf32>
    %316 = arith.addf %312, %315 : vector<32x128xf32>
    %c3_144 = arith.constant 3 : index
    %c7_145 = arith.constant 7 : index
    %317 = memref.load %arg9[%c3_144, %c7_145] : memref<6x32xf32, #tpu.memory_space<smem>>
    %318 = vector.broadcast %317 : f32 to vector<32x128xf32>
    %319 = arith.mulf %318, %26 : vector<32x128xf32>
    %320 = arith.addf %316, %319 : vector<32x128xf32>
    %c4_146 = arith.constant 4 : index
    %c7_147 = arith.constant 7 : index
    %321 = memref.load %arg9[%c4_146, %c7_147] : memref<6x32xf32, #tpu.memory_space<smem>>
    %322 = vector.broadcast %321 : f32 to vector<32x128xf32>
    %323 = arith.mulf %322, %29 : vector<32x128xf32>
    %324 = arith.addf %320, %323 : vector<32x128xf32>
    %c5_148 = arith.constant 5 : index
    %c7_149 = arith.constant 7 : index
    %325 = memref.load %arg9[%c5_148, %c7_149] : memref<6x32xf32, #tpu.memory_space<smem>>
    %326 = vector.broadcast %325 : f32 to vector<32x128xf32>
    %327 = arith.mulf %326, %32 : vector<32x128xf32>
    %328 = arith.addf %324, %327 : vector<32x128xf32>
    %cst_150 = arith.constant 0.000000e+00 : f32
    %329 = vector.broadcast %cst_150 : f32 to vector<32x128xf32>
    %330 = arith.cmpf ogt, %328, %329 : vector<32x128xf32>
    %cst_151 = arith.constant 2.000000e-01 : f32
    %331 = vector.broadcast %cst_151 : f32 to vector<32x128xf32>
    %332 = arith.mulf %331, %328 : vector<32x128xf32>
    %333 = arith.select %330, %328, %332 : vector<32x128xi1>, vector<32x128xf32>
    %c0_152 = arith.constant 0 : index
    %c7_153 = arith.constant 7 : index
    %334 = memref.load %arg10[%c0_152, %c7_153] : memref<2x16xf32, #tpu.memory_space<smem>>
    %335 = vector.broadcast %334 : f32 to vector<32x128xf32>
    %336 = arith.mulf %335, %333 : vector<32x128xf32>
    %337 = arith.addf %299, %336 : vector<32x128xf32>
    %338 = vector.extract_strided_slice %11 {offsets = [0, 8], sizes = [32, 1], strides = [1, 1]} : vector<32x32xf32> to vector<32x1xf32>
    %339 = vector.extract_strided_slice %5 {offsets = [8, 0], sizes = [1, 128], strides = [1, 1]} : vector<32x128xf32> to vector<1x128xf32>
    %340 = vector.broadcast %338 : vector<32x1xf32> to vector<32x128xf32>
    %341 = vector.broadcast %339 : vector<1x128xf32> to vector<32x128xf32>
    %342 = arith.addf %340, %341 : vector<32x128xf32>
    %c0_154 = arith.constant 0 : index
    %c8 = arith.constant 8 : index
    %343 = memref.load %arg9[%c0_154, %c8] : memref<6x32xf32, #tpu.memory_space<smem>>
    %344 = vector.broadcast %343 : f32 to vector<32x128xf32>
    %345 = arith.mulf %344, %17 : vector<32x128xf32>
    %346 = arith.addf %342, %345 : vector<32x128xf32>
    %c1_155 = arith.constant 1 : index
    %c8_156 = arith.constant 8 : index
    %347 = memref.load %arg9[%c1_155, %c8_156] : memref<6x32xf32, #tpu.memory_space<smem>>
    %348 = vector.broadcast %347 : f32 to vector<32x128xf32>
    %349 = arith.mulf %348, %20 : vector<32x128xf32>
    %350 = arith.addf %346, %349 : vector<32x128xf32>
    %c2_157 = arith.constant 2 : index
    %c8_158 = arith.constant 8 : index
    %351 = memref.load %arg9[%c2_157, %c8_158] : memref<6x32xf32, #tpu.memory_space<smem>>
    %352 = vector.broadcast %351 : f32 to vector<32x128xf32>
    %353 = arith.mulf %352, %23 : vector<32x128xf32>
    %354 = arith.addf %350, %353 : vector<32x128xf32>
    %c3_159 = arith.constant 3 : index
    %c8_160 = arith.constant 8 : index
    %355 = memref.load %arg9[%c3_159, %c8_160] : memref<6x32xf32, #tpu.memory_space<smem>>
    %356 = vector.broadcast %355 : f32 to vector<32x128xf32>
    %357 = arith.mulf %356, %26 : vector<32x128xf32>
    %358 = arith.addf %354, %357 : vector<32x128xf32>
    %c4_161 = arith.constant 4 : index
    %c8_162 = arith.constant 8 : index
    %359 = memref.load %arg9[%c4_161, %c8_162] : memref<6x32xf32, #tpu.memory_space<smem>>
    %360 = vector.broadcast %359 : f32 to vector<32x128xf32>
    %361 = arith.mulf %360, %29 : vector<32x128xf32>
    %362 = arith.addf %358, %361 : vector<32x128xf32>
    %c5_163 = arith.constant 5 : index
    %c8_164 = arith.constant 8 : index
    %363 = memref.load %arg9[%c5_163, %c8_164] : memref<6x32xf32, #tpu.memory_space<smem>>
    %364 = vector.broadcast %363 : f32 to vector<32x128xf32>
    %365 = arith.mulf %364, %32 : vector<32x128xf32>
    %366 = arith.addf %362, %365 : vector<32x128xf32>
    %cst_165 = arith.constant 0.000000e+00 : f32
    %367 = vector.broadcast %cst_165 : f32 to vector<32x128xf32>
    %368 = arith.cmpf ogt, %366, %367 : vector<32x128xf32>
    %cst_166 = arith.constant 2.000000e-01 : f32
    %369 = vector.broadcast %cst_166 : f32 to vector<32x128xf32>
    %370 = arith.mulf %369, %366 : vector<32x128xf32>
    %371 = arith.select %368, %366, %370 : vector<32x128xi1>, vector<32x128xf32>
    %c0_167 = arith.constant 0 : index
    %c8_168 = arith.constant 8 : index
    %372 = memref.load %arg10[%c0_167, %c8_168] : memref<2x16xf32, #tpu.memory_space<smem>>
    %373 = vector.broadcast %372 : f32 to vector<32x128xf32>
    %374 = arith.mulf %373, %371 : vector<32x128xf32>
    %375 = arith.addf %337, %374 : vector<32x128xf32>
    %376 = vector.extract_strided_slice %11 {offsets = [0, 9], sizes = [32, 1], strides = [1, 1]} : vector<32x32xf32> to vector<32x1xf32>
    %377 = vector.extract_strided_slice %5 {offsets = [9, 0], sizes = [1, 128], strides = [1, 1]} : vector<32x128xf32> to vector<1x128xf32>
    %378 = vector.broadcast %376 : vector<32x1xf32> to vector<32x128xf32>
    %379 = vector.broadcast %377 : vector<1x128xf32> to vector<32x128xf32>
    %380 = arith.addf %378, %379 : vector<32x128xf32>
    %c0_169 = arith.constant 0 : index
    %c9 = arith.constant 9 : index
    %381 = memref.load %arg9[%c0_169, %c9] : memref<6x32xf32, #tpu.memory_space<smem>>
    %382 = vector.broadcast %381 : f32 to vector<32x128xf32>
    %383 = arith.mulf %382, %17 : vector<32x128xf32>
    %384 = arith.addf %380, %383 : vector<32x128xf32>
    %c1_170 = arith.constant 1 : index
    %c9_171 = arith.constant 9 : index
    %385 = memref.load %arg9[%c1_170, %c9_171] : memref<6x32xf32, #tpu.memory_space<smem>>
    %386 = vector.broadcast %385 : f32 to vector<32x128xf32>
    %387 = arith.mulf %386, %20 : vector<32x128xf32>
    %388 = arith.addf %384, %387 : vector<32x128xf32>
    %c2_172 = arith.constant 2 : index
    %c9_173 = arith.constant 9 : index
    %389 = memref.load %arg9[%c2_172, %c9_173] : memref<6x32xf32, #tpu.memory_space<smem>>
    %390 = vector.broadcast %389 : f32 to vector<32x128xf32>
    %391 = arith.mulf %390, %23 : vector<32x128xf32>
    %392 = arith.addf %388, %391 : vector<32x128xf32>
    %c3_174 = arith.constant 3 : index
    %c9_175 = arith.constant 9 : index
    %393 = memref.load %arg9[%c3_174, %c9_175] : memref<6x32xf32, #tpu.memory_space<smem>>
    %394 = vector.broadcast %393 : f32 to vector<32x128xf32>
    %395 = arith.mulf %394, %26 : vector<32x128xf32>
    %396 = arith.addf %392, %395 : vector<32x128xf32>
    %c4_176 = arith.constant 4 : index
    %c9_177 = arith.constant 9 : index
    %397 = memref.load %arg9[%c4_176, %c9_177] : memref<6x32xf32, #tpu.memory_space<smem>>
    %398 = vector.broadcast %397 : f32 to vector<32x128xf32>
    %399 = arith.mulf %398, %29 : vector<32x128xf32>
    %400 = arith.addf %396, %399 : vector<32x128xf32>
    %c5_178 = arith.constant 5 : index
    %c9_179 = arith.constant 9 : index
    %401 = memref.load %arg9[%c5_178, %c9_179] : memref<6x32xf32, #tpu.memory_space<smem>>
    %402 = vector.broadcast %401 : f32 to vector<32x128xf32>
    %403 = arith.mulf %402, %32 : vector<32x128xf32>
    %404 = arith.addf %400, %403 : vector<32x128xf32>
    %cst_180 = arith.constant 0.000000e+00 : f32
    %405 = vector.broadcast %cst_180 : f32 to vector<32x128xf32>
    %406 = arith.cmpf ogt, %404, %405 : vector<32x128xf32>
    %cst_181 = arith.constant 2.000000e-01 : f32
    %407 = vector.broadcast %cst_181 : f32 to vector<32x128xf32>
    %408 = arith.mulf %407, %404 : vector<32x128xf32>
    %409 = arith.select %406, %404, %408 : vector<32x128xi1>, vector<32x128xf32>
    %c0_182 = arith.constant 0 : index
    %c9_183 = arith.constant 9 : index
    %410 = memref.load %arg10[%c0_182, %c9_183] : memref<2x16xf32, #tpu.memory_space<smem>>
    %411 = vector.broadcast %410 : f32 to vector<32x128xf32>
    %412 = arith.mulf %411, %409 : vector<32x128xf32>
    %413 = arith.addf %375, %412 : vector<32x128xf32>
    %414 = vector.extract_strided_slice %11 {offsets = [0, 10], sizes = [32, 1], strides = [1, 1]} : vector<32x32xf32> to vector<32x1xf32>
    %415 = vector.extract_strided_slice %5 {offsets = [10, 0], sizes = [1, 128], strides = [1, 1]} : vector<32x128xf32> to vector<1x128xf32>
    %416 = vector.broadcast %414 : vector<32x1xf32> to vector<32x128xf32>
    %417 = vector.broadcast %415 : vector<1x128xf32> to vector<32x128xf32>
    %418 = arith.addf %416, %417 : vector<32x128xf32>
    %c0_184 = arith.constant 0 : index
    %c10 = arith.constant 10 : index
    %419 = memref.load %arg9[%c0_184, %c10] : memref<6x32xf32, #tpu.memory_space<smem>>
    %420 = vector.broadcast %419 : f32 to vector<32x128xf32>
    %421 = arith.mulf %420, %17 : vector<32x128xf32>
    %422 = arith.addf %418, %421 : vector<32x128xf32>
    %c1_185 = arith.constant 1 : index
    %c10_186 = arith.constant 10 : index
    %423 = memref.load %arg9[%c1_185, %c10_186] : memref<6x32xf32, #tpu.memory_space<smem>>
    %424 = vector.broadcast %423 : f32 to vector<32x128xf32>
    %425 = arith.mulf %424, %20 : vector<32x128xf32>
    %426 = arith.addf %422, %425 : vector<32x128xf32>
    %c2_187 = arith.constant 2 : index
    %c10_188 = arith.constant 10 : index
    %427 = memref.load %arg9[%c2_187, %c10_188] : memref<6x32xf32, #tpu.memory_space<smem>>
    %428 = vector.broadcast %427 : f32 to vector<32x128xf32>
    %429 = arith.mulf %428, %23 : vector<32x128xf32>
    %430 = arith.addf %426, %429 : vector<32x128xf32>
    %c3_189 = arith.constant 3 : index
    %c10_190 = arith.constant 10 : index
    %431 = memref.load %arg9[%c3_189, %c10_190] : memref<6x32xf32, #tpu.memory_space<smem>>
    %432 = vector.broadcast %431 : f32 to vector<32x128xf32>
    %433 = arith.mulf %432, %26 : vector<32x128xf32>
    %434 = arith.addf %430, %433 : vector<32x128xf32>
    %c4_191 = arith.constant 4 : index
    %c10_192 = arith.constant 10 : index
    %435 = memref.load %arg9[%c4_191, %c10_192] : memref<6x32xf32, #tpu.memory_space<smem>>
    %436 = vector.broadcast %435 : f32 to vector<32x128xf32>
    %437 = arith.mulf %436, %29 : vector<32x128xf32>
    %438 = arith.addf %434, %437 : vector<32x128xf32>
    %c5_193 = arith.constant 5 : index
    %c10_194 = arith.constant 10 : index
    %439 = memref.load %arg9[%c5_193, %c10_194] : memref<6x32xf32, #tpu.memory_space<smem>>
    %440 = vector.broadcast %439 : f32 to vector<32x128xf32>
    %441 = arith.mulf %440, %32 : vector<32x128xf32>
    %442 = arith.addf %438, %441 : vector<32x128xf32>
    %cst_195 = arith.constant 0.000000e+00 : f32
    %443 = vector.broadcast %cst_195 : f32 to vector<32x128xf32>
    %444 = arith.cmpf ogt, %442, %443 : vector<32x128xf32>
    %cst_196 = arith.constant 2.000000e-01 : f32
    %445 = vector.broadcast %cst_196 : f32 to vector<32x128xf32>
    %446 = arith.mulf %445, %442 : vector<32x128xf32>
    %447 = arith.select %444, %442, %446 : vector<32x128xi1>, vector<32x128xf32>
    %c0_197 = arith.constant 0 : index
    %c10_198 = arith.constant 10 : index
    %448 = memref.load %arg10[%c0_197, %c10_198] : memref<2x16xf32, #tpu.memory_space<smem>>
    %449 = vector.broadcast %448 : f32 to vector<32x128xf32>
    %450 = arith.mulf %449, %447 : vector<32x128xf32>
    %451 = arith.addf %413, %450 : vector<32x128xf32>
    %452 = vector.extract_strided_slice %11 {offsets = [0, 11], sizes = [32, 1], strides = [1, 1]} : vector<32x32xf32> to vector<32x1xf32>
    %453 = vector.extract_strided_slice %5 {offsets = [11, 0], sizes = [1, 128], strides = [1, 1]} : vector<32x128xf32> to vector<1x128xf32>
    %454 = vector.broadcast %452 : vector<32x1xf32> to vector<32x128xf32>
    %455 = vector.broadcast %453 : vector<1x128xf32> to vector<32x128xf32>
    %456 = arith.addf %454, %455 : vector<32x128xf32>
    %c0_199 = arith.constant 0 : index
    %c11 = arith.constant 11 : index
    %457 = memref.load %arg9[%c0_199, %c11] : memref<6x32xf32, #tpu.memory_space<smem>>
    %458 = vector.broadcast %457 : f32 to vector<32x128xf32>
    %459 = arith.mulf %458, %17 : vector<32x128xf32>
    %460 = arith.addf %456, %459 : vector<32x128xf32>
    %c1_200 = arith.constant 1 : index
    %c11_201 = arith.constant 11 : index
    %461 = memref.load %arg9[%c1_200, %c11_201] : memref<6x32xf32, #tpu.memory_space<smem>>
    %462 = vector.broadcast %461 : f32 to vector<32x128xf32>
    %463 = arith.mulf %462, %20 : vector<32x128xf32>
    %464 = arith.addf %460, %463 : vector<32x128xf32>
    %c2_202 = arith.constant 2 : index
    %c11_203 = arith.constant 11 : index
    %465 = memref.load %arg9[%c2_202, %c11_203] : memref<6x32xf32, #tpu.memory_space<smem>>
    %466 = vector.broadcast %465 : f32 to vector<32x128xf32>
    %467 = arith.mulf %466, %23 : vector<32x128xf32>
    %468 = arith.addf %464, %467 : vector<32x128xf32>
    %c3_204 = arith.constant 3 : index
    %c11_205 = arith.constant 11 : index
    %469 = memref.load %arg9[%c3_204, %c11_205] : memref<6x32xf32, #tpu.memory_space<smem>>
    %470 = vector.broadcast %469 : f32 to vector<32x128xf32>
    %471 = arith.mulf %470, %26 : vector<32x128xf32>
    %472 = arith.addf %468, %471 : vector<32x128xf32>
    %c4_206 = arith.constant 4 : index
    %c11_207 = arith.constant 11 : index
    %473 = memref.load %arg9[%c4_206, %c11_207] : memref<6x32xf32, #tpu.memory_space<smem>>
    %474 = vector.broadcast %473 : f32 to vector<32x128xf32>
    %475 = arith.mulf %474, %29 : vector<32x128xf32>
    %476 = arith.addf %472, %475 : vector<32x128xf32>
    %c5_208 = arith.constant 5 : index
    %c11_209 = arith.constant 11 : index
    %477 = memref.load %arg9[%c5_208, %c11_209] : memref<6x32xf32, #tpu.memory_space<smem>>
    %478 = vector.broadcast %477 : f32 to vector<32x128xf32>
    %479 = arith.mulf %478, %32 : vector<32x128xf32>
    %480 = arith.addf %476, %479 : vector<32x128xf32>
    %cst_210 = arith.constant 0.000000e+00 : f32
    %481 = vector.broadcast %cst_210 : f32 to vector<32x128xf32>
    %482 = arith.cmpf ogt, %480, %481 : vector<32x128xf32>
    %cst_211 = arith.constant 2.000000e-01 : f32
    %483 = vector.broadcast %cst_211 : f32 to vector<32x128xf32>
    %484 = arith.mulf %483, %480 : vector<32x128xf32>
    %485 = arith.select %482, %480, %484 : vector<32x128xi1>, vector<32x128xf32>
    %c0_212 = arith.constant 0 : index
    %c11_213 = arith.constant 11 : index
    %486 = memref.load %arg10[%c0_212, %c11_213] : memref<2x16xf32, #tpu.memory_space<smem>>
    %487 = vector.broadcast %486 : f32 to vector<32x128xf32>
    %488 = arith.mulf %487, %485 : vector<32x128xf32>
    %489 = arith.addf %451, %488 : vector<32x128xf32>
    %490 = vector.extract_strided_slice %11 {offsets = [0, 12], sizes = [32, 1], strides = [1, 1]} : vector<32x32xf32> to vector<32x1xf32>
    %491 = vector.extract_strided_slice %5 {offsets = [12, 0], sizes = [1, 128], strides = [1, 1]} : vector<32x128xf32> to vector<1x128xf32>
    %492 = vector.broadcast %490 : vector<32x1xf32> to vector<32x128xf32>
    %493 = vector.broadcast %491 : vector<1x128xf32> to vector<32x128xf32>
    %494 = arith.addf %492, %493 : vector<32x128xf32>
    %c0_214 = arith.constant 0 : index
    %c12 = arith.constant 12 : index
    %495 = memref.load %arg9[%c0_214, %c12] : memref<6x32xf32, #tpu.memory_space<smem>>
    %496 = vector.broadcast %495 : f32 to vector<32x128xf32>
    %497 = arith.mulf %496, %17 : vector<32x128xf32>
    %498 = arith.addf %494, %497 : vector<32x128xf32>
    %c1_215 = arith.constant 1 : index
    %c12_216 = arith.constant 12 : index
    %499 = memref.load %arg9[%c1_215, %c12_216] : memref<6x32xf32, #tpu.memory_space<smem>>
    %500 = vector.broadcast %499 : f32 to vector<32x128xf32>
    %501 = arith.mulf %500, %20 : vector<32x128xf32>
    %502 = arith.addf %498, %501 : vector<32x128xf32>
    %c2_217 = arith.constant 2 : index
    %c12_218 = arith.constant 12 : index
    %503 = memref.load %arg9[%c2_217, %c12_218] : memref<6x32xf32, #tpu.memory_space<smem>>
    %504 = vector.broadcast %503 : f32 to vector<32x128xf32>
    %505 = arith.mulf %504, %23 : vector<32x128xf32>
    %506 = arith.addf %502, %505 : vector<32x128xf32>
    %c3_219 = arith.constant 3 : index
    %c12_220 = arith.constant 12 : index
    %507 = memref.load %arg9[%c3_219, %c12_220] : memref<6x32xf32, #tpu.memory_space<smem>>
    %508 = vector.broadcast %507 : f32 to vector<32x128xf32>
    %509 = arith.mulf %508, %26 : vector<32x128xf32>
    %510 = arith.addf %506, %509 : vector<32x128xf32>
    %c4_221 = arith.constant 4 : index
    %c12_222 = arith.constant 12 : index
    %511 = memref.load %arg9[%c4_221, %c12_222] : memref<6x32xf32, #tpu.memory_space<smem>>
    %512 = vector.broadcast %511 : f32 to vector<32x128xf32>
    %513 = arith.mulf %512, %29 : vector<32x128xf32>
    %514 = arith.addf %510, %513 : vector<32x128xf32>
    %c5_223 = arith.constant 5 : index
    %c12_224 = arith.constant 12 : index
    %515 = memref.load %arg9[%c5_223, %c12_224] : memref<6x32xf32, #tpu.memory_space<smem>>
    %516 = vector.broadcast %515 : f32 to vector<32x128xf32>
    %517 = arith.mulf %516, %32 : vector<32x128xf32>
    %518 = arith.addf %514, %517 : vector<32x128xf32>
    %cst_225 = arith.constant 0.000000e+00 : f32
    %519 = vector.broadcast %cst_225 : f32 to vector<32x128xf32>
    %520 = arith.cmpf ogt, %518, %519 : vector<32x128xf32>
    %cst_226 = arith.constant 2.000000e-01 : f32
    %521 = vector.broadcast %cst_226 : f32 to vector<32x128xf32>
    %522 = arith.mulf %521, %518 : vector<32x128xf32>
    %523 = arith.select %520, %518, %522 : vector<32x128xi1>, vector<32x128xf32>
    %c0_227 = arith.constant 0 : index
    %c12_228 = arith.constant 12 : index
    %524 = memref.load %arg10[%c0_227, %c12_228] : memref<2x16xf32, #tpu.memory_space<smem>>
    %525 = vector.broadcast %524 : f32 to vector<32x128xf32>
    %526 = arith.mulf %525, %523 : vector<32x128xf32>
    %527 = arith.addf %489, %526 : vector<32x128xf32>
    %528 = vector.extract_strided_slice %11 {offsets = [0, 13], sizes = [32, 1], strides = [1, 1]} : vector<32x32xf32> to vector<32x1xf32>
    %529 = vector.extract_strided_slice %5 {offsets = [13, 0], sizes = [1, 128], strides = [1, 1]} : vector<32x128xf32> to vector<1x128xf32>
    %530 = vector.broadcast %528 : vector<32x1xf32> to vector<32x128xf32>
    %531 = vector.broadcast %529 : vector<1x128xf32> to vector<32x128xf32>
    %532 = arith.addf %530, %531 : vector<32x128xf32>
    %c0_229 = arith.constant 0 : index
    %c13 = arith.constant 13 : index
    %533 = memref.load %arg9[%c0_229, %c13] : memref<6x32xf32, #tpu.memory_space<smem>>
    %534 = vector.broadcast %533 : f32 to vector<32x128xf32>
    %535 = arith.mulf %534, %17 : vector<32x128xf32>
    %536 = arith.addf %532, %535 : vector<32x128xf32>
    %c1_230 = arith.constant 1 : index
    %c13_231 = arith.constant 13 : index
    %537 = memref.load %arg9[%c1_230, %c13_231] : memref<6x32xf32, #tpu.memory_space<smem>>
    %538 = vector.broadcast %537 : f32 to vector<32x128xf32>
    %539 = arith.mulf %538, %20 : vector<32x128xf32>
    %540 = arith.addf %536, %539 : vector<32x128xf32>
    %c2_232 = arith.constant 2 : index
    %c13_233 = arith.constant 13 : index
    %541 = memref.load %arg9[%c2_232, %c13_233] : memref<6x32xf32, #tpu.memory_space<smem>>
    %542 = vector.broadcast %541 : f32 to vector<32x128xf32>
    %543 = arith.mulf %542, %23 : vector<32x128xf32>
    %544 = arith.addf %540, %543 : vector<32x128xf32>
    %c3_234 = arith.constant 3 : index
    %c13_235 = arith.constant 13 : index
    %545 = memref.load %arg9[%c3_234, %c13_235] : memref<6x32xf32, #tpu.memory_space<smem>>
    %546 = vector.broadcast %545 : f32 to vector<32x128xf32>
    %547 = arith.mulf %546, %26 : vector<32x128xf32>
    %548 = arith.addf %544, %547 : vector<32x128xf32>
    %c4_236 = arith.constant 4 : index
    %c13_237 = arith.constant 13 : index
    %549 = memref.load %arg9[%c4_236, %c13_237] : memref<6x32xf32, #tpu.memory_space<smem>>
    %550 = vector.broadcast %549 : f32 to vector<32x128xf32>
    %551 = arith.mulf %550, %29 : vector<32x128xf32>
    %552 = arith.addf %548, %551 : vector<32x128xf32>
    %c5_238 = arith.constant 5 : index
    %c13_239 = arith.constant 13 : index
    %553 = memref.load %arg9[%c5_238, %c13_239] : memref<6x32xf32, #tpu.memory_space<smem>>
    %554 = vector.broadcast %553 : f32 to vector<32x128xf32>
    %555 = arith.mulf %554, %32 : vector<32x128xf32>
    %556 = arith.addf %552, %555 : vector<32x128xf32>
    %cst_240 = arith.constant 0.000000e+00 : f32
    %557 = vector.broadcast %cst_240 : f32 to vector<32x128xf32>
    %558 = arith.cmpf ogt, %556, %557 : vector<32x128xf32>
    %cst_241 = arith.constant 2.000000e-01 : f32
    %559 = vector.broadcast %cst_241 : f32 to vector<32x128xf32>
    %560 = arith.mulf %559, %556 : vector<32x128xf32>
    %561 = arith.select %558, %556, %560 : vector<32x128xi1>, vector<32x128xf32>
    %c0_242 = arith.constant 0 : index
    %c13_243 = arith.constant 13 : index
    %562 = memref.load %arg10[%c0_242, %c13_243] : memref<2x16xf32, #tpu.memory_space<smem>>
    %563 = vector.broadcast %562 : f32 to vector<32x128xf32>
    %564 = arith.mulf %563, %561 : vector<32x128xf32>
    %565 = arith.addf %527, %564 : vector<32x128xf32>
    %566 = vector.extract_strided_slice %11 {offsets = [0, 14], sizes = [32, 1], strides = [1, 1]} : vector<32x32xf32> to vector<32x1xf32>
    %567 = vector.extract_strided_slice %5 {offsets = [14, 0], sizes = [1, 128], strides = [1, 1]} : vector<32x128xf32> to vector<1x128xf32>
    %568 = vector.broadcast %566 : vector<32x1xf32> to vector<32x128xf32>
    %569 = vector.broadcast %567 : vector<1x128xf32> to vector<32x128xf32>
    %570 = arith.addf %568, %569 : vector<32x128xf32>
    %c0_244 = arith.constant 0 : index
    %c14 = arith.constant 14 : index
    %571 = memref.load %arg9[%c0_244, %c14] : memref<6x32xf32, #tpu.memory_space<smem>>
    %572 = vector.broadcast %571 : f32 to vector<32x128xf32>
    %573 = arith.mulf %572, %17 : vector<32x128xf32>
    %574 = arith.addf %570, %573 : vector<32x128xf32>
    %c1_245 = arith.constant 1 : index
    %c14_246 = arith.constant 14 : index
    %575 = memref.load %arg9[%c1_245, %c14_246] : memref<6x32xf32, #tpu.memory_space<smem>>
    %576 = vector.broadcast %575 : f32 to vector<32x128xf32>
    %577 = arith.mulf %576, %20 : vector<32x128xf32>
    %578 = arith.addf %574, %577 : vector<32x128xf32>
    %c2_247 = arith.constant 2 : index
    %c14_248 = arith.constant 14 : index
    %579 = memref.load %arg9[%c2_247, %c14_248] : memref<6x32xf32, #tpu.memory_space<smem>>
    %580 = vector.broadcast %579 : f32 to vector<32x128xf32>
    %581 = arith.mulf %580, %23 : vector<32x128xf32>
    %582 = arith.addf %578, %581 : vector<32x128xf32>
    %c3_249 = arith.constant 3 : index
    %c14_250 = arith.constant 14 : index
    %583 = memref.load %arg9[%c3_249, %c14_250] : memref<6x32xf32, #tpu.memory_space<smem>>
    %584 = vector.broadcast %583 : f32 to vector<32x128xf32>
    %585 = arith.mulf %584, %26 : vector<32x128xf32>
    %586 = arith.addf %582, %585 : vector<32x128xf32>
    %c4_251 = arith.constant 4 : index
    %c14_252 = arith.constant 14 : index
    %587 = memref.load %arg9[%c4_251, %c14_252] : memref<6x32xf32, #tpu.memory_space<smem>>
    %588 = vector.broadcast %587 : f32 to vector<32x128xf32>
    %589 = arith.mulf %588, %29 : vector<32x128xf32>
    %590 = arith.addf %586, %589 : vector<32x128xf32>
    %c5_253 = arith.constant 5 : index
    %c14_254 = arith.constant 14 : index
    %591 = memref.load %arg9[%c5_253, %c14_254] : memref<6x32xf32, #tpu.memory_space<smem>>
    %592 = vector.broadcast %591 : f32 to vector<32x128xf32>
    %593 = arith.mulf %592, %32 : vector<32x128xf32>
    %594 = arith.addf %590, %593 : vector<32x128xf32>
    %cst_255 = arith.constant 0.000000e+00 : f32
    %595 = vector.broadcast %cst_255 : f32 to vector<32x128xf32>
    %596 = arith.cmpf ogt, %594, %595 : vector<32x128xf32>
    %cst_256 = arith.constant 2.000000e-01 : f32
    %597 = vector.broadcast %cst_256 : f32 to vector<32x128xf32>
    %598 = arith.mulf %597, %594 : vector<32x128xf32>
    %599 = arith.select %596, %594, %598 : vector<32x128xi1>, vector<32x128xf32>
    %c0_257 = arith.constant 0 : index
    %c14_258 = arith.constant 14 : index
    %600 = memref.load %arg10[%c0_257, %c14_258] : memref<2x16xf32, #tpu.memory_space<smem>>
    %601 = vector.broadcast %600 : f32 to vector<32x128xf32>
    %602 = arith.mulf %601, %599 : vector<32x128xf32>
    %603 = arith.addf %565, %602 : vector<32x128xf32>
    %604 = vector.extract_strided_slice %11 {offsets = [0, 15], sizes = [32, 1], strides = [1, 1]} : vector<32x32xf32> to vector<32x1xf32>
    %605 = vector.extract_strided_slice %5 {offsets = [15, 0], sizes = [1, 128], strides = [1, 1]} : vector<32x128xf32> to vector<1x128xf32>
    %606 = vector.broadcast %604 : vector<32x1xf32> to vector<32x128xf32>
    %607 = vector.broadcast %605 : vector<1x128xf32> to vector<32x128xf32>
    %608 = arith.addf %606, %607 : vector<32x128xf32>
    %c0_259 = arith.constant 0 : index
    %c15 = arith.constant 15 : index
    %609 = memref.load %arg9[%c0_259, %c15] : memref<6x32xf32, #tpu.memory_space<smem>>
    %610 = vector.broadcast %609 : f32 to vector<32x128xf32>
    %611 = arith.mulf %610, %17 : vector<32x128xf32>
    %612 = arith.addf %608, %611 : vector<32x128xf32>
    %c1_260 = arith.constant 1 : index
    %c15_261 = arith.constant 15 : index
    %613 = memref.load %arg9[%c1_260, %c15_261] : memref<6x32xf32, #tpu.memory_space<smem>>
    %614 = vector.broadcast %613 : f32 to vector<32x128xf32>
    %615 = arith.mulf %614, %20 : vector<32x128xf32>
    %616 = arith.addf %612, %615 : vector<32x128xf32>
    %c2_262 = arith.constant 2 : index
    %c15_263 = arith.constant 15 : index
    %617 = memref.load %arg9[%c2_262, %c15_263] : memref<6x32xf32, #tpu.memory_space<smem>>
    %618 = vector.broadcast %617 : f32 to vector<32x128xf32>
    %619 = arith.mulf %618, %23 : vector<32x128xf32>
    %620 = arith.addf %616, %619 : vector<32x128xf32>
    %c3_264 = arith.constant 3 : index
    %c15_265 = arith.constant 15 : index
    %621 = memref.load %arg9[%c3_264, %c15_265] : memref<6x32xf32, #tpu.memory_space<smem>>
    %622 = vector.broadcast %621 : f32 to vector<32x128xf32>
    %623 = arith.mulf %622, %26 : vector<32x128xf32>
    %624 = arith.addf %620, %623 : vector<32x128xf32>
    %c4_266 = arith.constant 4 : index
    %c15_267 = arith.constant 15 : index
    %625 = memref.load %arg9[%c4_266, %c15_267] : memref<6x32xf32, #tpu.memory_space<smem>>
    %626 = vector.broadcast %625 : f32 to vector<32x128xf32>
    %627 = arith.mulf %626, %29 : vector<32x128xf32>
    %628 = arith.addf %624, %627 : vector<32x128xf32>
    %c5_268 = arith.constant 5 : index
    %c15_269 = arith.constant 15 : index
    %629 = memref.load %arg9[%c5_268, %c15_269] : memref<6x32xf32, #tpu.memory_space<smem>>
    %630 = vector.broadcast %629 : f32 to vector<32x128xf32>
    %631 = arith.mulf %630, %32 : vector<32x128xf32>
    %632 = arith.addf %628, %631 : vector<32x128xf32>
    %cst_270 = arith.constant 0.000000e+00 : f32
    %633 = vector.broadcast %cst_270 : f32 to vector<32x128xf32>
    %634 = arith.cmpf ogt, %632, %633 : vector<32x128xf32>
    %cst_271 = arith.constant 2.000000e-01 : f32
    %635 = vector.broadcast %cst_271 : f32 to vector<32x128xf32>
    %636 = arith.mulf %635, %632 : vector<32x128xf32>
    %637 = arith.select %634, %632, %636 : vector<32x128xi1>, vector<32x128xf32>
    %c0_272 = arith.constant 0 : index
    %c15_273 = arith.constant 15 : index
    %638 = memref.load %arg10[%c0_272, %c15_273] : memref<2x16xf32, #tpu.memory_space<smem>>
    %639 = vector.broadcast %638 : f32 to vector<32x128xf32>
    %640 = arith.mulf %639, %637 : vector<32x128xf32>
    %641 = arith.addf %603, %640 : vector<32x128xf32>
    %cst_274 = arith.constant -1.000000e+30 : f32
    %642 = vector.broadcast %cst_274 : f32 to vector<32x128xf32>
    %643 = arith.select %14, %641, %642 : vector<32x128xi1>, vector<32x128xf32>
    %cst_275 = arith.constant dense<0xFF800000> : vector<32xf32>
    %644 = vector.multi_reduction <maximumf>, %643, %cst_275 [1] : vector<32x128xf32> to vector<32xf32>
    %645 = vector.shape_cast %644 : vector<32xf32> to vector<32x1xf32>
    %646 = vector.broadcast %645 : vector<32x1xf32> to vector<32x128xf32>
    %647 = arith.subf %643, %646 : vector<32x128xf32>
    %648 = math.exp %647 : vector<32x128xf32>
    %cst_276 = arith.constant 0.000000e+00 : f32
    %649 = vector.broadcast %cst_276 : f32 to vector<32x128xf32>
    %650 = arith.select %14, %648, %649 : vector<32x128xi1>, vector<32x128xf32>
    %cst_277 = arith.constant dense<0.000000e+00> : vector<32xf32>
    %651 = vector.multi_reduction <add>, %650, %cst_277 [1] : vector<32x128xf32> to vector<32xf32>
    %652 = vector.shape_cast %651 : vector<32xf32> to vector<32x1xf32>
    %cst_278 = arith.constant 9.99999968E-21 : f32
    %653 = vector.broadcast %cst_278 : f32 to vector<32x1xf32>
    %654 = arith.maximumf %652, %653 : vector<32x1xf32>
    %655 = tpu.reciprocal %654 {approx = true} : vector<32x1xf32> -> vector<32x1xf32>
    %656 = vector.broadcast %655 : vector<32x1xf32> to vector<32x128xf32>
    %657 = arith.mulf %650, %656 : vector<32x128xf32>
    %658 = vector.extract_strided_slice %5 {offsets = [0, 0], sizes = [16, 128], strides = [1, 1]} : vector<32x128xf32> to vector<16x128xf32>
    %659 = arith.truncf %657 : vector<32x128xf32> to vector<32x128xbf16>
    %660 = arith.truncf %658 : vector<16x128xf32> to vector<16x128xbf16>
    %cst_279 = arith.constant dense<0.000000e+00> : vector<32x16xf32>
    %661 = tpu.matmul %659, %660, %cst_279 {dimension_numbers = #tpu.dot_dimension_numbers<[1], [1], [0], [0], [0, 0, 1, 0], [], []>} : vector<32x128xbf16>, vector<16x128xbf16>, vector<32x16xf32> -> vector<32x16xf32>
    %cst_280 = arith.constant 0.000000e+00 : f32
    %662 = vector.broadcast %cst_280 : f32 to vector<32x128xf32>
    %663 = vector.extract_strided_slice %11 {offsets = [0, 16], sizes = [32, 1], strides = [1, 1]} : vector<32x32xf32> to vector<32x1xf32>
    %664 = vector.extract_strided_slice %5 {offsets = [16, 0], sizes = [1, 128], strides = [1, 1]} : vector<32x128xf32> to vector<1x128xf32>
    %665 = vector.broadcast %663 : vector<32x1xf32> to vector<32x128xf32>
    %666 = vector.broadcast %664 : vector<1x128xf32> to vector<32x128xf32>
    %667 = arith.addf %665, %666 : vector<32x128xf32>
    %c0_281 = arith.constant 0 : index
    %c16 = arith.constant 16 : index
    %668 = memref.load %arg9[%c0_281, %c16] : memref<6x32xf32, #tpu.memory_space<smem>>
    %669 = vector.broadcast %668 : f32 to vector<32x128xf32>
    %670 = arith.mulf %669, %17 : vector<32x128xf32>
    %671 = arith.addf %667, %670 : vector<32x128xf32>
    %c1_282 = arith.constant 1 : index
    %c16_283 = arith.constant 16 : index
    %672 = memref.load %arg9[%c1_282, %c16_283] : memref<6x32xf32, #tpu.memory_space<smem>>
    %673 = vector.broadcast %672 : f32 to vector<32x128xf32>
    %674 = arith.mulf %673, %20 : vector<32x128xf32>
    %675 = arith.addf %671, %674 : vector<32x128xf32>
    %c2_284 = arith.constant 2 : index
    %c16_285 = arith.constant 16 : index
    %676 = memref.load %arg9[%c2_284, %c16_285] : memref<6x32xf32, #tpu.memory_space<smem>>
    %677 = vector.broadcast %676 : f32 to vector<32x128xf32>
    %678 = arith.mulf %677, %23 : vector<32x128xf32>
    %679 = arith.addf %675, %678 : vector<32x128xf32>
    %c3_286 = arith.constant 3 : index
    %c16_287 = arith.constant 16 : index
    %680 = memref.load %arg9[%c3_286, %c16_287] : memref<6x32xf32, #tpu.memory_space<smem>>
    %681 = vector.broadcast %680 : f32 to vector<32x128xf32>
    %682 = arith.mulf %681, %26 : vector<32x128xf32>
    %683 = arith.addf %679, %682 : vector<32x128xf32>
    %c4_288 = arith.constant 4 : index
    %c16_289 = arith.constant 16 : index
    %684 = memref.load %arg9[%c4_288, %c16_289] : memref<6x32xf32, #tpu.memory_space<smem>>
    %685 = vector.broadcast %684 : f32 to vector<32x128xf32>
    %686 = arith.mulf %685, %29 : vector<32x128xf32>
    %687 = arith.addf %683, %686 : vector<32x128xf32>
    %c5_290 = arith.constant 5 : index
    %c16_291 = arith.constant 16 : index
    %688 = memref.load %arg9[%c5_290, %c16_291] : memref<6x32xf32, #tpu.memory_space<smem>>
    %689 = vector.broadcast %688 : f32 to vector<32x128xf32>
    %690 = arith.mulf %689, %32 : vector<32x128xf32>
    %691 = arith.addf %687, %690 : vector<32x128xf32>
    %cst_292 = arith.constant 0.000000e+00 : f32
    %692 = vector.broadcast %cst_292 : f32 to vector<32x128xf32>
    %693 = arith.cmpf ogt, %691, %692 : vector<32x128xf32>
    %cst_293 = arith.constant 2.000000e-01 : f32
    %694 = vector.broadcast %cst_293 : f32 to vector<32x128xf32>
    %695 = arith.mulf %694, %691 : vector<32x128xf32>
    %696 = arith.select %693, %691, %695 : vector<32x128xi1>, vector<32x128xf32>
    %c1_294 = arith.constant 1 : index
    %c0_295 = arith.constant 0 : index
    %697 = memref.load %arg10[%c1_294, %c0_295] : memref<2x16xf32, #tpu.memory_space<smem>>
    %698 = vector.broadcast %697 : f32 to vector<32x128xf32>
    %699 = arith.mulf %698, %696 : vector<32x128xf32>
    %700 = arith.addf %662, %699 : vector<32x128xf32>
    %701 = vector.extract_strided_slice %11 {offsets = [0, 17], sizes = [32, 1], strides = [1, 1]} : vector<32x32xf32> to vector<32x1xf32>
    %702 = vector.extract_strided_slice %5 {offsets = [17, 0], sizes = [1, 128], strides = [1, 1]} : vector<32x128xf32> to vector<1x128xf32>
    %703 = vector.broadcast %701 : vector<32x1xf32> to vector<32x128xf32>
    %704 = vector.broadcast %702 : vector<1x128xf32> to vector<32x128xf32>
    %705 = arith.addf %703, %704 : vector<32x128xf32>
    %c0_296 = arith.constant 0 : index
    %c17 = arith.constant 17 : index
    %706 = memref.load %arg9[%c0_296, %c17] : memref<6x32xf32, #tpu.memory_space<smem>>
    %707 = vector.broadcast %706 : f32 to vector<32x128xf32>
    %708 = arith.mulf %707, %17 : vector<32x128xf32>
    %709 = arith.addf %705, %708 : vector<32x128xf32>
    %c1_297 = arith.constant 1 : index
    %c17_298 = arith.constant 17 : index
    %710 = memref.load %arg9[%c1_297, %c17_298] : memref<6x32xf32, #tpu.memory_space<smem>>
    %711 = vector.broadcast %710 : f32 to vector<32x128xf32>
    %712 = arith.mulf %711, %20 : vector<32x128xf32>
    %713 = arith.addf %709, %712 : vector<32x128xf32>
    %c2_299 = arith.constant 2 : index
    %c17_300 = arith.constant 17 : index
    %714 = memref.load %arg9[%c2_299, %c17_300] : memref<6x32xf32, #tpu.memory_space<smem>>
    %715 = vector.broadcast %714 : f32 to vector<32x128xf32>
    %716 = arith.mulf %715, %23 : vector<32x128xf32>
    %717 = arith.addf %713, %716 : vector<32x128xf32>
    %c3_301 = arith.constant 3 : index
    %c17_302 = arith.constant 17 : index
    %718 = memref.load %arg9[%c3_301, %c17_302] : memref<6x32xf32, #tpu.memory_space<smem>>
    %719 = vector.broadcast %718 : f32 to vector<32x128xf32>
    %720 = arith.mulf %719, %26 : vector<32x128xf32>
    %721 = arith.addf %717, %720 : vector<32x128xf32>
    %c4_303 = arith.constant 4 : index
    %c17_304 = arith.constant 17 : index
    %722 = memref.load %arg9[%c4_303, %c17_304] : memref<6x32xf32, #tpu.memory_space<smem>>
    %723 = vector.broadcast %722 : f32 to vector<32x128xf32>
    %724 = arith.mulf %723, %29 : vector<32x128xf32>
    %725 = arith.addf %721, %724 : vector<32x128xf32>
    %c5_305 = arith.constant 5 : index
    %c17_306 = arith.constant 17 : index
    %726 = memref.load %arg9[%c5_305, %c17_306] : memref<6x32xf32, #tpu.memory_space<smem>>
    %727 = vector.broadcast %726 : f32 to vector<32x128xf32>
    %728 = arith.mulf %727, %32 : vector<32x128xf32>
    %729 = arith.addf %725, %728 : vector<32x128xf32>
    %cst_307 = arith.constant 0.000000e+00 : f32
    %730 = vector.broadcast %cst_307 : f32 to vector<32x128xf32>
    %731 = arith.cmpf ogt, %729, %730 : vector<32x128xf32>
    %cst_308 = arith.constant 2.000000e-01 : f32
    %732 = vector.broadcast %cst_308 : f32 to vector<32x128xf32>
    %733 = arith.mulf %732, %729 : vector<32x128xf32>
    %734 = arith.select %731, %729, %733 : vector<32x128xi1>, vector<32x128xf32>
    %c1_309 = arith.constant 1 : index
    %c1_310 = arith.constant 1 : index
    %735 = memref.load %arg10[%c1_309, %c1_310] : memref<2x16xf32, #tpu.memory_space<smem>>
    %736 = vector.broadcast %735 : f32 to vector<32x128xf32>
    %737 = arith.mulf %736, %734 : vector<32x128xf32>
    %738 = arith.addf %700, %737 : vector<32x128xf32>
    %739 = vector.extract_strided_slice %11 {offsets = [0, 18], sizes = [32, 1], strides = [1, 1]} : vector<32x32xf32> to vector<32x1xf32>
    %740 = vector.extract_strided_slice %5 {offsets = [18, 0], sizes = [1, 128], strides = [1, 1]} : vector<32x128xf32> to vector<1x128xf32>
    %741 = vector.broadcast %739 : vector<32x1xf32> to vector<32x128xf32>
    %742 = vector.broadcast %740 : vector<1x128xf32> to vector<32x128xf32>
    %743 = arith.addf %741, %742 : vector<32x128xf32>
    %c0_311 = arith.constant 0 : index
    %c18 = arith.constant 18 : index
    %744 = memref.load %arg9[%c0_311, %c18] : memref<6x32xf32, #tpu.memory_space<smem>>
    %745 = vector.broadcast %744 : f32 to vector<32x128xf32>
    %746 = arith.mulf %745, %17 : vector<32x128xf32>
    %747 = arith.addf %743, %746 : vector<32x128xf32>
    %c1_312 = arith.constant 1 : index
    %c18_313 = arith.constant 18 : index
    %748 = memref.load %arg9[%c1_312, %c18_313] : memref<6x32xf32, #tpu.memory_space<smem>>
    %749 = vector.broadcast %748 : f32 to vector<32x128xf32>
    %750 = arith.mulf %749, %20 : vector<32x128xf32>
    %751 = arith.addf %747, %750 : vector<32x128xf32>
    %c2_314 = arith.constant 2 : index
    %c18_315 = arith.constant 18 : index
    %752 = memref.load %arg9[%c2_314, %c18_315] : memref<6x32xf32, #tpu.memory_space<smem>>
    %753 = vector.broadcast %752 : f32 to vector<32x128xf32>
    %754 = arith.mulf %753, %23 : vector<32x128xf32>
    %755 = arith.addf %751, %754 : vector<32x128xf32>
    %c3_316 = arith.constant 3 : index
    %c18_317 = arith.constant 18 : index
    %756 = memref.load %arg9[%c3_316, %c18_317] : memref<6x32xf32, #tpu.memory_space<smem>>
    %757 = vector.broadcast %756 : f32 to vector<32x128xf32>
    %758 = arith.mulf %757, %26 : vector<32x128xf32>
    %759 = arith.addf %755, %758 : vector<32x128xf32>
    %c4_318 = arith.constant 4 : index
    %c18_319 = arith.constant 18 : index
    %760 = memref.load %arg9[%c4_318, %c18_319] : memref<6x32xf32, #tpu.memory_space<smem>>
    %761 = vector.broadcast %760 : f32 to vector<32x128xf32>
    %762 = arith.mulf %761, %29 : vector<32x128xf32>
    %763 = arith.addf %759, %762 : vector<32x128xf32>
    %c5_320 = arith.constant 5 : index
    %c18_321 = arith.constant 18 : index
    %764 = memref.load %arg9[%c5_320, %c18_321] : memref<6x32xf32, #tpu.memory_space<smem>>
    %765 = vector.broadcast %764 : f32 to vector<32x128xf32>
    %766 = arith.mulf %765, %32 : vector<32x128xf32>
    %767 = arith.addf %763, %766 : vector<32x128xf32>
    %cst_322 = arith.constant 0.000000e+00 : f32
    %768 = vector.broadcast %cst_322 : f32 to vector<32x128xf32>
    %769 = arith.cmpf ogt, %767, %768 : vector<32x128xf32>
    %cst_323 = arith.constant 2.000000e-01 : f32
    %770 = vector.broadcast %cst_323 : f32 to vector<32x128xf32>
    %771 = arith.mulf %770, %767 : vector<32x128xf32>
    %772 = arith.select %769, %767, %771 : vector<32x128xi1>, vector<32x128xf32>
    %c1_324 = arith.constant 1 : index
    %c2_325 = arith.constant 2 : index
    %773 = memref.load %arg10[%c1_324, %c2_325] : memref<2x16xf32, #tpu.memory_space<smem>>
    %774 = vector.broadcast %773 : f32 to vector<32x128xf32>
    %775 = arith.mulf %774, %772 : vector<32x128xf32>
    %776 = arith.addf %738, %775 : vector<32x128xf32>
    %777 = vector.extract_strided_slice %11 {offsets = [0, 19], sizes = [32, 1], strides = [1, 1]} : vector<32x32xf32> to vector<32x1xf32>
    %778 = vector.extract_strided_slice %5 {offsets = [19, 0], sizes = [1, 128], strides = [1, 1]} : vector<32x128xf32> to vector<1x128xf32>
    %779 = vector.broadcast %777 : vector<32x1xf32> to vector<32x128xf32>
    %780 = vector.broadcast %778 : vector<1x128xf32> to vector<32x128xf32>
    %781 = arith.addf %779, %780 : vector<32x128xf32>
    %c0_326 = arith.constant 0 : index
    %c19 = arith.constant 19 : index
    %782 = memref.load %arg9[%c0_326, %c19] : memref<6x32xf32, #tpu.memory_space<smem>>
    %783 = vector.broadcast %782 : f32 to vector<32x128xf32>
    %784 = arith.mulf %783, %17 : vector<32x128xf32>
    %785 = arith.addf %781, %784 : vector<32x128xf32>
    %c1_327 = arith.constant 1 : index
    %c19_328 = arith.constant 19 : index
    %786 = memref.load %arg9[%c1_327, %c19_328] : memref<6x32xf32, #tpu.memory_space<smem>>
    %787 = vector.broadcast %786 : f32 to vector<32x128xf32>
    %788 = arith.mulf %787, %20 : vector<32x128xf32>
    %789 = arith.addf %785, %788 : vector<32x128xf32>
    %c2_329 = arith.constant 2 : index
    %c19_330 = arith.constant 19 : index
    %790 = memref.load %arg9[%c2_329, %c19_330] : memref<6x32xf32, #tpu.memory_space<smem>>
    %791 = vector.broadcast %790 : f32 to vector<32x128xf32>
    %792 = arith.mulf %791, %23 : vector<32x128xf32>
    %793 = arith.addf %789, %792 : vector<32x128xf32>
    %c3_331 = arith.constant 3 : index
    %c19_332 = arith.constant 19 : index
    %794 = memref.load %arg9[%c3_331, %c19_332] : memref<6x32xf32, #tpu.memory_space<smem>>
    %795 = vector.broadcast %794 : f32 to vector<32x128xf32>
    %796 = arith.mulf %795, %26 : vector<32x128xf32>
    %797 = arith.addf %793, %796 : vector<32x128xf32>
    %c4_333 = arith.constant 4 : index
    %c19_334 = arith.constant 19 : index
    %798 = memref.load %arg9[%c4_333, %c19_334] : memref<6x32xf32, #tpu.memory_space<smem>>
    %799 = vector.broadcast %798 : f32 to vector<32x128xf32>
    %800 = arith.mulf %799, %29 : vector<32x128xf32>
    %801 = arith.addf %797, %800 : vector<32x128xf32>
    %c5_335 = arith.constant 5 : index
    %c19_336 = arith.constant 19 : index
    %802 = memref.load %arg9[%c5_335, %c19_336] : memref<6x32xf32, #tpu.memory_space<smem>>
    %803 = vector.broadcast %802 : f32 to vector<32x128xf32>
    %804 = arith.mulf %803, %32 : vector<32x128xf32>
    %805 = arith.addf %801, %804 : vector<32x128xf32>
    %cst_337 = arith.constant 0.000000e+00 : f32
    %806 = vector.broadcast %cst_337 : f32 to vector<32x128xf32>
    %807 = arith.cmpf ogt, %805, %806 : vector<32x128xf32>
    %cst_338 = arith.constant 2.000000e-01 : f32
    %808 = vector.broadcast %cst_338 : f32 to vector<32x128xf32>
    %809 = arith.mulf %808, %805 : vector<32x128xf32>
    %810 = arith.select %807, %805, %809 : vector<32x128xi1>, vector<32x128xf32>
    %c1_339 = arith.constant 1 : index
    %c3_340 = arith.constant 3 : index
    %811 = memref.load %arg10[%c1_339, %c3_340] : memref<2x16xf32, #tpu.memory_space<smem>>
    %812 = vector.broadcast %811 : f32 to vector<32x128xf32>
    %813 = arith.mulf %812, %810 : vector<32x128xf32>
    %814 = arith.addf %776, %813 : vector<32x128xf32>
    %815 = vector.extract_strided_slice %11 {offsets = [0, 20], sizes = [32, 1], strides = [1, 1]} : vector<32x32xf32> to vector<32x1xf32>
    %816 = vector.extract_strided_slice %5 {offsets = [20, 0], sizes = [1, 128], strides = [1, 1]} : vector<32x128xf32> to vector<1x128xf32>
    %817 = vector.broadcast %815 : vector<32x1xf32> to vector<32x128xf32>
    %818 = vector.broadcast %816 : vector<1x128xf32> to vector<32x128xf32>
    %819 = arith.addf %817, %818 : vector<32x128xf32>
    %c0_341 = arith.constant 0 : index
    %c20 = arith.constant 20 : index
    %820 = memref.load %arg9[%c0_341, %c20] : memref<6x32xf32, #tpu.memory_space<smem>>
    %821 = vector.broadcast %820 : f32 to vector<32x128xf32>
    %822 = arith.mulf %821, %17 : vector<32x128xf32>
    %823 = arith.addf %819, %822 : vector<32x128xf32>
    %c1_342 = arith.constant 1 : index
    %c20_343 = arith.constant 20 : index
    %824 = memref.load %arg9[%c1_342, %c20_343] : memref<6x32xf32, #tpu.memory_space<smem>>
    %825 = vector.broadcast %824 : f32 to vector<32x128xf32>
    %826 = arith.mulf %825, %20 : vector<32x128xf32>
    %827 = arith.addf %823, %826 : vector<32x128xf32>
    %c2_344 = arith.constant 2 : index
    %c20_345 = arith.constant 20 : index
    %828 = memref.load %arg9[%c2_344, %c20_345] : memref<6x32xf32, #tpu.memory_space<smem>>
    %829 = vector.broadcast %828 : f32 to vector<32x128xf32>
    %830 = arith.mulf %829, %23 : vector<32x128xf32>
    %831 = arith.addf %827, %830 : vector<32x128xf32>
    %c3_346 = arith.constant 3 : index
    %c20_347 = arith.constant 20 : index
    %832 = memref.load %arg9[%c3_346, %c20_347] : memref<6x32xf32, #tpu.memory_space<smem>>
    %833 = vector.broadcast %832 : f32 to vector<32x128xf32>
    %834 = arith.mulf %833, %26 : vector<32x128xf32>
    %835 = arith.addf %831, %834 : vector<32x128xf32>
    %c4_348 = arith.constant 4 : index
    %c20_349 = arith.constant 20 : index
    %836 = memref.load %arg9[%c4_348, %c20_349] : memref<6x32xf32, #tpu.memory_space<smem>>
    %837 = vector.broadcast %836 : f32 to vector<32x128xf32>
    %838 = arith.mulf %837, %29 : vector<32x128xf32>
    %839 = arith.addf %835, %838 : vector<32x128xf32>
    %c5_350 = arith.constant 5 : index
    %c20_351 = arith.constant 20 : index
    %840 = memref.load %arg9[%c5_350, %c20_351] : memref<6x32xf32, #tpu.memory_space<smem>>
    %841 = vector.broadcast %840 : f32 to vector<32x128xf32>
    %842 = arith.mulf %841, %32 : vector<32x128xf32>
    %843 = arith.addf %839, %842 : vector<32x128xf32>
    %cst_352 = arith.constant 0.000000e+00 : f32
    %844 = vector.broadcast %cst_352 : f32 to vector<32x128xf32>
    %845 = arith.cmpf ogt, %843, %844 : vector<32x128xf32>
    %cst_353 = arith.constant 2.000000e-01 : f32
    %846 = vector.broadcast %cst_353 : f32 to vector<32x128xf32>
    %847 = arith.mulf %846, %843 : vector<32x128xf32>
    %848 = arith.select %845, %843, %847 : vector<32x128xi1>, vector<32x128xf32>
    %c1_354 = arith.constant 1 : index
    %c4_355 = arith.constant 4 : index
    %849 = memref.load %arg10[%c1_354, %c4_355] : memref<2x16xf32, #tpu.memory_space<smem>>
    %850 = vector.broadcast %849 : f32 to vector<32x128xf32>
    %851 = arith.mulf %850, %848 : vector<32x128xf32>
    %852 = arith.addf %814, %851 : vector<32x128xf32>
    %853 = vector.extract_strided_slice %11 {offsets = [0, 21], sizes = [32, 1], strides = [1, 1]} : vector<32x32xf32> to vector<32x1xf32>
    %854 = vector.extract_strided_slice %5 {offsets = [21, 0], sizes = [1, 128], strides = [1, 1]} : vector<32x128xf32> to vector<1x128xf32>
    %855 = vector.broadcast %853 : vector<32x1xf32> to vector<32x128xf32>
    %856 = vector.broadcast %854 : vector<1x128xf32> to vector<32x128xf32>
    %857 = arith.addf %855, %856 : vector<32x128xf32>
    %c0_356 = arith.constant 0 : index
    %c21 = arith.constant 21 : index
    %858 = memref.load %arg9[%c0_356, %c21] : memref<6x32xf32, #tpu.memory_space<smem>>
    %859 = vector.broadcast %858 : f32 to vector<32x128xf32>
    %860 = arith.mulf %859, %17 : vector<32x128xf32>
    %861 = arith.addf %857, %860 : vector<32x128xf32>
    %c1_357 = arith.constant 1 : index
    %c21_358 = arith.constant 21 : index
    %862 = memref.load %arg9[%c1_357, %c21_358] : memref<6x32xf32, #tpu.memory_space<smem>>
    %863 = vector.broadcast %862 : f32 to vector<32x128xf32>
    %864 = arith.mulf %863, %20 : vector<32x128xf32>
    %865 = arith.addf %861, %864 : vector<32x128xf32>
    %c2_359 = arith.constant 2 : index
    %c21_360 = arith.constant 21 : index
    %866 = memref.load %arg9[%c2_359, %c21_360] : memref<6x32xf32, #tpu.memory_space<smem>>
    %867 = vector.broadcast %866 : f32 to vector<32x128xf32>
    %868 = arith.mulf %867, %23 : vector<32x128xf32>
    %869 = arith.addf %865, %868 : vector<32x128xf32>
    %c3_361 = arith.constant 3 : index
    %c21_362 = arith.constant 21 : index
    %870 = memref.load %arg9[%c3_361, %c21_362] : memref<6x32xf32, #tpu.memory_space<smem>>
    %871 = vector.broadcast %870 : f32 to vector<32x128xf32>
    %872 = arith.mulf %871, %26 : vector<32x128xf32>
    %873 = arith.addf %869, %872 : vector<32x128xf32>
    %c4_363 = arith.constant 4 : index
    %c21_364 = arith.constant 21 : index
    %874 = memref.load %arg9[%c4_363, %c21_364] : memref<6x32xf32, #tpu.memory_space<smem>>
    %875 = vector.broadcast %874 : f32 to vector<32x128xf32>
    %876 = arith.mulf %875, %29 : vector<32x128xf32>
    %877 = arith.addf %873, %876 : vector<32x128xf32>
    %c5_365 = arith.constant 5 : index
    %c21_366 = arith.constant 21 : index
    %878 = memref.load %arg9[%c5_365, %c21_366] : memref<6x32xf32, #tpu.memory_space<smem>>
    %879 = vector.broadcast %878 : f32 to vector<32x128xf32>
    %880 = arith.mulf %879, %32 : vector<32x128xf32>
    %881 = arith.addf %877, %880 : vector<32x128xf32>
    %cst_367 = arith.constant 0.000000e+00 : f32
    %882 = vector.broadcast %cst_367 : f32 to vector<32x128xf32>
    %883 = arith.cmpf ogt, %881, %882 : vector<32x128xf32>
    %cst_368 = arith.constant 2.000000e-01 : f32
    %884 = vector.broadcast %cst_368 : f32 to vector<32x128xf32>
    %885 = arith.mulf %884, %881 : vector<32x128xf32>
    %886 = arith.select %883, %881, %885 : vector<32x128xi1>, vector<32x128xf32>
    %c1_369 = arith.constant 1 : index
    %c5_370 = arith.constant 5 : index
    %887 = memref.load %arg10[%c1_369, %c5_370] : memref<2x16xf32, #tpu.memory_space<smem>>
    %888 = vector.broadcast %887 : f32 to vector<32x128xf32>
    %889 = arith.mulf %888, %886 : vector<32x128xf32>
    %890 = arith.addf %852, %889 : vector<32x128xf32>
    %891 = vector.extract_strided_slice %11 {offsets = [0, 22], sizes = [32, 1], strides = [1, 1]} : vector<32x32xf32> to vector<32x1xf32>
    %892 = vector.extract_strided_slice %5 {offsets = [22, 0], sizes = [1, 128], strides = [1, 1]} : vector<32x128xf32> to vector<1x128xf32>
    %893 = vector.broadcast %891 : vector<32x1xf32> to vector<32x128xf32>
    %894 = vector.broadcast %892 : vector<1x128xf32> to vector<32x128xf32>
    %895 = arith.addf %893, %894 : vector<32x128xf32>
    %c0_371 = arith.constant 0 : index
    %c22 = arith.constant 22 : index
    %896 = memref.load %arg9[%c0_371, %c22] : memref<6x32xf32, #tpu.memory_space<smem>>
    %897 = vector.broadcast %896 : f32 to vector<32x128xf32>
    %898 = arith.mulf %897, %17 : vector<32x128xf32>
    %899 = arith.addf %895, %898 : vector<32x128xf32>
    %c1_372 = arith.constant 1 : index
    %c22_373 = arith.constant 22 : index
    %900 = memref.load %arg9[%c1_372, %c22_373] : memref<6x32xf32, #tpu.memory_space<smem>>
    %901 = vector.broadcast %900 : f32 to vector<32x128xf32>
    %902 = arith.mulf %901, %20 : vector<32x128xf32>
    %903 = arith.addf %899, %902 : vector<32x128xf32>
    %c2_374 = arith.constant 2 : index
    %c22_375 = arith.constant 22 : index
    %904 = memref.load %arg9[%c2_374, %c22_375] : memref<6x32xf32, #tpu.memory_space<smem>>
    %905 = vector.broadcast %904 : f32 to vector<32x128xf32>
    %906 = arith.mulf %905, %23 : vector<32x128xf32>
    %907 = arith.addf %903, %906 : vector<32x128xf32>
    %c3_376 = arith.constant 3 : index
    %c22_377 = arith.constant 22 : index
    %908 = memref.load %arg9[%c3_376, %c22_377] : memref<6x32xf32, #tpu.memory_space<smem>>
    %909 = vector.broadcast %908 : f32 to vector<32x128xf32>
    %910 = arith.mulf %909, %26 : vector<32x128xf32>
    %911 = arith.addf %907, %910 : vector<32x128xf32>
    %c4_378 = arith.constant 4 : index
    %c22_379 = arith.constant 22 : index
    %912 = memref.load %arg9[%c4_378, %c22_379] : memref<6x32xf32, #tpu.memory_space<smem>>
    %913 = vector.broadcast %912 : f32 to vector<32x128xf32>
    %914 = arith.mulf %913, %29 : vector<32x128xf32>
    %915 = arith.addf %911, %914 : vector<32x128xf32>
    %c5_380 = arith.constant 5 : index
    %c22_381 = arith.constant 22 : index
    %916 = memref.load %arg9[%c5_380, %c22_381] : memref<6x32xf32, #tpu.memory_space<smem>>
    %917 = vector.broadcast %916 : f32 to vector<32x128xf32>
    %918 = arith.mulf %917, %32 : vector<32x128xf32>
    %919 = arith.addf %915, %918 : vector<32x128xf32>
    %cst_382 = arith.constant 0.000000e+00 : f32
    %920 = vector.broadcast %cst_382 : f32 to vector<32x128xf32>
    %921 = arith.cmpf ogt, %919, %920 : vector<32x128xf32>
    %cst_383 = arith.constant 2.000000e-01 : f32
    %922 = vector.broadcast %cst_383 : f32 to vector<32x128xf32>
    %923 = arith.mulf %922, %919 : vector<32x128xf32>
    %924 = arith.select %921, %919, %923 : vector<32x128xi1>, vector<32x128xf32>
    %c1_384 = arith.constant 1 : index
    %c6_385 = arith.constant 6 : index
    %925 = memref.load %arg10[%c1_384, %c6_385] : memref<2x16xf32, #tpu.memory_space<smem>>
    %926 = vector.broadcast %925 : f32 to vector<32x128xf32>
    %927 = arith.mulf %926, %924 : vector<32x128xf32>
    %928 = arith.addf %890, %927 : vector<32x128xf32>
    %929 = vector.extract_strided_slice %11 {offsets = [0, 23], sizes = [32, 1], strides = [1, 1]} : vector<32x32xf32> to vector<32x1xf32>
    %930 = vector.extract_strided_slice %5 {offsets = [23, 0], sizes = [1, 128], strides = [1, 1]} : vector<32x128xf32> to vector<1x128xf32>
    %931 = vector.broadcast %929 : vector<32x1xf32> to vector<32x128xf32>
    %932 = vector.broadcast %930 : vector<1x128xf32> to vector<32x128xf32>
    %933 = arith.addf %931, %932 : vector<32x128xf32>
    %c0_386 = arith.constant 0 : index
    %c23 = arith.constant 23 : index
    %934 = memref.load %arg9[%c0_386, %c23] : memref<6x32xf32, #tpu.memory_space<smem>>
    %935 = vector.broadcast %934 : f32 to vector<32x128xf32>
    %936 = arith.mulf %935, %17 : vector<32x128xf32>
    %937 = arith.addf %933, %936 : vector<32x128xf32>
    %c1_387 = arith.constant 1 : index
    %c23_388 = arith.constant 23 : index
    %938 = memref.load %arg9[%c1_387, %c23_388] : memref<6x32xf32, #tpu.memory_space<smem>>
    %939 = vector.broadcast %938 : f32 to vector<32x128xf32>
    %940 = arith.mulf %939, %20 : vector<32x128xf32>
    %941 = arith.addf %937, %940 : vector<32x128xf32>
    %c2_389 = arith.constant 2 : index
    %c23_390 = arith.constant 23 : index
    %942 = memref.load %arg9[%c2_389, %c23_390] : memref<6x32xf32, #tpu.memory_space<smem>>
    %943 = vector.broadcast %942 : f32 to vector<32x128xf32>
    %944 = arith.mulf %943, %23 : vector<32x128xf32>
    %945 = arith.addf %941, %944 : vector<32x128xf32>
    %c3_391 = arith.constant 3 : index
    %c23_392 = arith.constant 23 : index
    %946 = memref.load %arg9[%c3_391, %c23_392] : memref<6x32xf32, #tpu.memory_space<smem>>
    %947 = vector.broadcast %946 : f32 to vector<32x128xf32>
    %948 = arith.mulf %947, %26 : vector<32x128xf32>
    %949 = arith.addf %945, %948 : vector<32x128xf32>
    %c4_393 = arith.constant 4 : index
    %c23_394 = arith.constant 23 : index
    %950 = memref.load %arg9[%c4_393, %c23_394] : memref<6x32xf32, #tpu.memory_space<smem>>
    %951 = vector.broadcast %950 : f32 to vector<32x128xf32>
    %952 = arith.mulf %951, %29 : vector<32x128xf32>
    %953 = arith.addf %949, %952 : vector<32x128xf32>
    %c5_395 = arith.constant 5 : index
    %c23_396 = arith.constant 23 : index
    %954 = memref.load %arg9[%c5_395, %c23_396] : memref<6x32xf32, #tpu.memory_space<smem>>
    %955 = vector.broadcast %954 : f32 to vector<32x128xf32>
    %956 = arith.mulf %955, %32 : vector<32x128xf32>
    %957 = arith.addf %953, %956 : vector<32x128xf32>
    %cst_397 = arith.constant 0.000000e+00 : f32
    %958 = vector.broadcast %cst_397 : f32 to vector<32x128xf32>
    %959 = arith.cmpf ogt, %957, %958 : vector<32x128xf32>
    %cst_398 = arith.constant 2.000000e-01 : f32
    %960 = vector.broadcast %cst_398 : f32 to vector<32x128xf32>
    %961 = arith.mulf %960, %957 : vector<32x128xf32>
    %962 = arith.select %959, %957, %961 : vector<32x128xi1>, vector<32x128xf32>
    %c1_399 = arith.constant 1 : index
    %c7_400 = arith.constant 7 : index
    %963 = memref.load %arg10[%c1_399, %c7_400] : memref<2x16xf32, #tpu.memory_space<smem>>
    %964 = vector.broadcast %963 : f32 to vector<32x128xf32>
    %965 = arith.mulf %964, %962 : vector<32x128xf32>
    %966 = arith.addf %928, %965 : vector<32x128xf32>
    %967 = vector.extract_strided_slice %11 {offsets = [0, 24], sizes = [32, 1], strides = [1, 1]} : vector<32x32xf32> to vector<32x1xf32>
    %968 = vector.extract_strided_slice %5 {offsets = [24, 0], sizes = [1, 128], strides = [1, 1]} : vector<32x128xf32> to vector<1x128xf32>
    %969 = vector.broadcast %967 : vector<32x1xf32> to vector<32x128xf32>
    %970 = vector.broadcast %968 : vector<1x128xf32> to vector<32x128xf32>
    %971 = arith.addf %969, %970 : vector<32x128xf32>
    %c0_401 = arith.constant 0 : index
    %c24 = arith.constant 24 : index
    %972 = memref.load %arg9[%c0_401, %c24] : memref<6x32xf32, #tpu.memory_space<smem>>
    %973 = vector.broadcast %972 : f32 to vector<32x128xf32>
    %974 = arith.mulf %973, %17 : vector<32x128xf32>
    %975 = arith.addf %971, %974 : vector<32x128xf32>
    %c1_402 = arith.constant 1 : index
    %c24_403 = arith.constant 24 : index
    %976 = memref.load %arg9[%c1_402, %c24_403] : memref<6x32xf32, #tpu.memory_space<smem>>
    %977 = vector.broadcast %976 : f32 to vector<32x128xf32>
    %978 = arith.mulf %977, %20 : vector<32x128xf32>
    %979 = arith.addf %975, %978 : vector<32x128xf32>
    %c2_404 = arith.constant 2 : index
    %c24_405 = arith.constant 24 : index
    %980 = memref.load %arg9[%c2_404, %c24_405] : memref<6x32xf32, #tpu.memory_space<smem>>
    %981 = vector.broadcast %980 : f32 to vector<32x128xf32>
    %982 = arith.mulf %981, %23 : vector<32x128xf32>
    %983 = arith.addf %979, %982 : vector<32x128xf32>
    %c3_406 = arith.constant 3 : index
    %c24_407 = arith.constant 24 : index
    %984 = memref.load %arg9[%c3_406, %c24_407] : memref<6x32xf32, #tpu.memory_space<smem>>
    %985 = vector.broadcast %984 : f32 to vector<32x128xf32>
    %986 = arith.mulf %985, %26 : vector<32x128xf32>
    %987 = arith.addf %983, %986 : vector<32x128xf32>
    %c4_408 = arith.constant 4 : index
    %c24_409 = arith.constant 24 : index
    %988 = memref.load %arg9[%c4_408, %c24_409] : memref<6x32xf32, #tpu.memory_space<smem>>
    %989 = vector.broadcast %988 : f32 to vector<32x128xf32>
    %990 = arith.mulf %989, %29 : vector<32x128xf32>
    %991 = arith.addf %987, %990 : vector<32x128xf32>
    %c5_410 = arith.constant 5 : index
    %c24_411 = arith.constant 24 : index
    %992 = memref.load %arg9[%c5_410, %c24_411] : memref<6x32xf32, #tpu.memory_space<smem>>
    %993 = vector.broadcast %992 : f32 to vector<32x128xf32>
    %994 = arith.mulf %993, %32 : vector<32x128xf32>
    %995 = arith.addf %991, %994 : vector<32x128xf32>
    %cst_412 = arith.constant 0.000000e+00 : f32
    %996 = vector.broadcast %cst_412 : f32 to vector<32x128xf32>
    %997 = arith.cmpf ogt, %995, %996 : vector<32x128xf32>
    %cst_413 = arith.constant 2.000000e-01 : f32
    %998 = vector.broadcast %cst_413 : f32 to vector<32x128xf32>
    %999 = arith.mulf %998, %995 : vector<32x128xf32>
    %1000 = arith.select %997, %995, %999 : vector<32x128xi1>, vector<32x128xf32>
    %c1_414 = arith.constant 1 : index
    %c8_415 = arith.constant 8 : index
    %1001 = memref.load %arg10[%c1_414, %c8_415] : memref<2x16xf32, #tpu.memory_space<smem>>
    %1002 = vector.broadcast %1001 : f32 to vector<32x128xf32>
    %1003 = arith.mulf %1002, %1000 : vector<32x128xf32>
    %1004 = arith.addf %966, %1003 : vector<32x128xf32>
    %1005 = vector.extract_strided_slice %11 {offsets = [0, 25], sizes = [32, 1], strides = [1, 1]} : vector<32x32xf32> to vector<32x1xf32>
    %1006 = vector.extract_strided_slice %5 {offsets = [25, 0], sizes = [1, 128], strides = [1, 1]} : vector<32x128xf32> to vector<1x128xf32>
    %1007 = vector.broadcast %1005 : vector<32x1xf32> to vector<32x128xf32>
    %1008 = vector.broadcast %1006 : vector<1x128xf32> to vector<32x128xf32>
    %1009 = arith.addf %1007, %1008 : vector<32x128xf32>
    %c0_416 = arith.constant 0 : index
    %c25 = arith.constant 25 : index
    %1010 = memref.load %arg9[%c0_416, %c25] : memref<6x32xf32, #tpu.memory_space<smem>>
    %1011 = vector.broadcast %1010 : f32 to vector<32x128xf32>
    %1012 = arith.mulf %1011, %17 : vector<32x128xf32>
    %1013 = arith.addf %1009, %1012 : vector<32x128xf32>
    %c1_417 = arith.constant 1 : index
    %c25_418 = arith.constant 25 : index
    %1014 = memref.load %arg9[%c1_417, %c25_418] : memref<6x32xf32, #tpu.memory_space<smem>>
    %1015 = vector.broadcast %1014 : f32 to vector<32x128xf32>
    %1016 = arith.mulf %1015, %20 : vector<32x128xf32>
    %1017 = arith.addf %1013, %1016 : vector<32x128xf32>
    %c2_419 = arith.constant 2 : index
    %c25_420 = arith.constant 25 : index
    %1018 = memref.load %arg9[%c2_419, %c25_420] : memref<6x32xf32, #tpu.memory_space<smem>>
    %1019 = vector.broadcast %1018 : f32 to vector<32x128xf32>
    %1020 = arith.mulf %1019, %23 : vector<32x128xf32>
    %1021 = arith.addf %1017, %1020 : vector<32x128xf32>
    %c3_421 = arith.constant 3 : index
    %c25_422 = arith.constant 25 : index
    %1022 = memref.load %arg9[%c3_421, %c25_422] : memref<6x32xf32, #tpu.memory_space<smem>>
    %1023 = vector.broadcast %1022 : f32 to vector<32x128xf32>
    %1024 = arith.mulf %1023, %26 : vector<32x128xf32>
    %1025 = arith.addf %1021, %1024 : vector<32x128xf32>
    %c4_423 = arith.constant 4 : index
    %c25_424 = arith.constant 25 : index
    %1026 = memref.load %arg9[%c4_423, %c25_424] : memref<6x32xf32, #tpu.memory_space<smem>>
    %1027 = vector.broadcast %1026 : f32 to vector<32x128xf32>
    %1028 = arith.mulf %1027, %29 : vector<32x128xf32>
    %1029 = arith.addf %1025, %1028 : vector<32x128xf32>
    %c5_425 = arith.constant 5 : index
    %c25_426 = arith.constant 25 : index
    %1030 = memref.load %arg9[%c5_425, %c25_426] : memref<6x32xf32, #tpu.memory_space<smem>>
    %1031 = vector.broadcast %1030 : f32 to vector<32x128xf32>
    %1032 = arith.mulf %1031, %32 : vector<32x128xf32>
    %1033 = arith.addf %1029, %1032 : vector<32x128xf32>
    %cst_427 = arith.constant 0.000000e+00 : f32
    %1034 = vector.broadcast %cst_427 : f32 to vector<32x128xf32>
    %1035 = arith.cmpf ogt, %1033, %1034 : vector<32x128xf32>
    %cst_428 = arith.constant 2.000000e-01 : f32
    %1036 = vector.broadcast %cst_428 : f32 to vector<32x128xf32>
    %1037 = arith.mulf %1036, %1033 : vector<32x128xf32>
    %1038 = arith.select %1035, %1033, %1037 : vector<32x128xi1>, vector<32x128xf32>
    %c1_429 = arith.constant 1 : index
    %c9_430 = arith.constant 9 : index
    %1039 = memref.load %arg10[%c1_429, %c9_430] : memref<2x16xf32, #tpu.memory_space<smem>>
    %1040 = vector.broadcast %1039 : f32 to vector<32x128xf32>
    %1041 = arith.mulf %1040, %1038 : vector<32x128xf32>
    %1042 = arith.addf %1004, %1041 : vector<32x128xf32>
    %1043 = vector.extract_strided_slice %11 {offsets = [0, 26], sizes = [32, 1], strides = [1, 1]} : vector<32x32xf32> to vector<32x1xf32>
    %1044 = vector.extract_strided_slice %5 {offsets = [26, 0], sizes = [1, 128], strides = [1, 1]} : vector<32x128xf32> to vector<1x128xf32>
    %1045 = vector.broadcast %1043 : vector<32x1xf32> to vector<32x128xf32>
    %1046 = vector.broadcast %1044 : vector<1x128xf32> to vector<32x128xf32>
    %1047 = arith.addf %1045, %1046 : vector<32x128xf32>
    %c0_431 = arith.constant 0 : index
    %c26 = arith.constant 26 : index
    %1048 = memref.load %arg9[%c0_431, %c26] : memref<6x32xf32, #tpu.memory_space<smem>>
    %1049 = vector.broadcast %1048 : f32 to vector<32x128xf32>
    %1050 = arith.mulf %1049, %17 : vector<32x128xf32>
    %1051 = arith.addf %1047, %1050 : vector<32x128xf32>
    %c1_432 = arith.constant 1 : index
    %c26_433 = arith.constant 26 : index
    %1052 = memref.load %arg9[%c1_432, %c26_433] : memref<6x32xf32, #tpu.memory_space<smem>>
    %1053 = vector.broadcast %1052 : f32 to vector<32x128xf32>
    %1054 = arith.mulf %1053, %20 : vector<32x128xf32>
    %1055 = arith.addf %1051, %1054 : vector<32x128xf32>
    %c2_434 = arith.constant 2 : index
    %c26_435 = arith.constant 26 : index
    %1056 = memref.load %arg9[%c2_434, %c26_435] : memref<6x32xf32, #tpu.memory_space<smem>>
    %1057 = vector.broadcast %1056 : f32 to vector<32x128xf32>
    %1058 = arith.mulf %1057, %23 : vector<32x128xf32>
    %1059 = arith.addf %1055, %1058 : vector<32x128xf32>
    %c3_436 = arith.constant 3 : index
    %c26_437 = arith.constant 26 : index
    %1060 = memref.load %arg9[%c3_436, %c26_437] : memref<6x32xf32, #tpu.memory_space<smem>>
    %1061 = vector.broadcast %1060 : f32 to vector<32x128xf32>
    %1062 = arith.mulf %1061, %26 : vector<32x128xf32>
    %1063 = arith.addf %1059, %1062 : vector<32x128xf32>
    %c4_438 = arith.constant 4 : index
    %c26_439 = arith.constant 26 : index
    %1064 = memref.load %arg9[%c4_438, %c26_439] : memref<6x32xf32, #tpu.memory_space<smem>>
    %1065 = vector.broadcast %1064 : f32 to vector<32x128xf32>
    %1066 = arith.mulf %1065, %29 : vector<32x128xf32>
    %1067 = arith.addf %1063, %1066 : vector<32x128xf32>
    %c5_440 = arith.constant 5 : index
    %c26_441 = arith.constant 26 : index
    %1068 = memref.load %arg9[%c5_440, %c26_441] : memref<6x32xf32, #tpu.memory_space<smem>>
    %1069 = vector.broadcast %1068 : f32 to vector<32x128xf32>
    %1070 = arith.mulf %1069, %32 : vector<32x128xf32>
    %1071 = arith.addf %1067, %1070 : vector<32x128xf32>
    %cst_442 = arith.constant 0.000000e+00 : f32
    %1072 = vector.broadcast %cst_442 : f32 to vector<32x128xf32>
    %1073 = arith.cmpf ogt, %1071, %1072 : vector<32x128xf32>
    %cst_443 = arith.constant 2.000000e-01 : f32
    %1074 = vector.broadcast %cst_443 : f32 to vector<32x128xf32>
    %1075 = arith.mulf %1074, %1071 : vector<32x128xf32>
    %1076 = arith.select %1073, %1071, %1075 : vector<32x128xi1>, vector<32x128xf32>
    %c1_444 = arith.constant 1 : index
    %c10_445 = arith.constant 10 : index
    %1077 = memref.load %arg10[%c1_444, %c10_445] : memref<2x16xf32, #tpu.memory_space<smem>>
    %1078 = vector.broadcast %1077 : f32 to vector<32x128xf32>
    %1079 = arith.mulf %1078, %1076 : vector<32x128xf32>
    %1080 = arith.addf %1042, %1079 : vector<32x128xf32>
    %1081 = vector.extract_strided_slice %11 {offsets = [0, 27], sizes = [32, 1], strides = [1, 1]} : vector<32x32xf32> to vector<32x1xf32>
    %1082 = vector.extract_strided_slice %5 {offsets = [27, 0], sizes = [1, 128], strides = [1, 1]} : vector<32x128xf32> to vector<1x128xf32>
    %1083 = vector.broadcast %1081 : vector<32x1xf32> to vector<32x128xf32>
    %1084 = vector.broadcast %1082 : vector<1x128xf32> to vector<32x128xf32>
    %1085 = arith.addf %1083, %1084 : vector<32x128xf32>
    %c0_446 = arith.constant 0 : index
    %c27 = arith.constant 27 : index
    %1086 = memref.load %arg9[%c0_446, %c27] : memref<6x32xf32, #tpu.memory_space<smem>>
    %1087 = vector.broadcast %1086 : f32 to vector<32x128xf32>
    %1088 = arith.mulf %1087, %17 : vector<32x128xf32>
    %1089 = arith.addf %1085, %1088 : vector<32x128xf32>
    %c1_447 = arith.constant 1 : index
    %c27_448 = arith.constant 27 : index
    %1090 = memref.load %arg9[%c1_447, %c27_448] : memref<6x32xf32, #tpu.memory_space<smem>>
    %1091 = vector.broadcast %1090 : f32 to vector<32x128xf32>
    %1092 = arith.mulf %1091, %20 : vector<32x128xf32>
    %1093 = arith.addf %1089, %1092 : vector<32x128xf32>
    %c2_449 = arith.constant 2 : index
    %c27_450 = arith.constant 27 : index
    %1094 = memref.load %arg9[%c2_449, %c27_450] : memref<6x32xf32, #tpu.memory_space<smem>>
    %1095 = vector.broadcast %1094 : f32 to vector<32x128xf32>
    %1096 = arith.mulf %1095, %23 : vector<32x128xf32>
    %1097 = arith.addf %1093, %1096 : vector<32x128xf32>
    %c3_451 = arith.constant 3 : index
    %c27_452 = arith.constant 27 : index
    %1098 = memref.load %arg9[%c3_451, %c27_452] : memref<6x32xf32, #tpu.memory_space<smem>>
    %1099 = vector.broadcast %1098 : f32 to vector<32x128xf32>
    %1100 = arith.mulf %1099, %26 : vector<32x128xf32>
    %1101 = arith.addf %1097, %1100 : vector<32x128xf32>
    %c4_453 = arith.constant 4 : index
    %c27_454 = arith.constant 27 : index
    %1102 = memref.load %arg9[%c4_453, %c27_454] : memref<6x32xf32, #tpu.memory_space<smem>>
    %1103 = vector.broadcast %1102 : f32 to vector<32x128xf32>
    %1104 = arith.mulf %1103, %29 : vector<32x128xf32>
    %1105 = arith.addf %1101, %1104 : vector<32x128xf32>
    %c5_455 = arith.constant 5 : index
    %c27_456 = arith.constant 27 : index
    %1106 = memref.load %arg9[%c5_455, %c27_456] : memref<6x32xf32, #tpu.memory_space<smem>>
    %1107 = vector.broadcast %1106 : f32 to vector<32x128xf32>
    %1108 = arith.mulf %1107, %32 : vector<32x128xf32>
    %1109 = arith.addf %1105, %1108 : vector<32x128xf32>
    %cst_457 = arith.constant 0.000000e+00 : f32
    %1110 = vector.broadcast %cst_457 : f32 to vector<32x128xf32>
    %1111 = arith.cmpf ogt, %1109, %1110 : vector<32x128xf32>
    %cst_458 = arith.constant 2.000000e-01 : f32
    %1112 = vector.broadcast %cst_458 : f32 to vector<32x128xf32>
    %1113 = arith.mulf %1112, %1109 : vector<32x128xf32>
    %1114 = arith.select %1111, %1109, %1113 : vector<32x128xi1>, vector<32x128xf32>
    %c1_459 = arith.constant 1 : index
    %c11_460 = arith.constant 11 : index
    %1115 = memref.load %arg10[%c1_459, %c11_460] : memref<2x16xf32, #tpu.memory_space<smem>>
    %1116 = vector.broadcast %1115 : f32 to vector<32x128xf32>
    %1117 = arith.mulf %1116, %1114 : vector<32x128xf32>
    %1118 = arith.addf %1080, %1117 : vector<32x128xf32>
    %1119 = vector.extract_strided_slice %11 {offsets = [0, 28], sizes = [32, 1], strides = [1, 1]} : vector<32x32xf32> to vector<32x1xf32>
    %1120 = vector.extract_strided_slice %5 {offsets = [28, 0], sizes = [1, 128], strides = [1, 1]} : vector<32x128xf32> to vector<1x128xf32>
    %1121 = vector.broadcast %1119 : vector<32x1xf32> to vector<32x128xf32>
    %1122 = vector.broadcast %1120 : vector<1x128xf32> to vector<32x128xf32>
    %1123 = arith.addf %1121, %1122 : vector<32x128xf32>
    %c0_461 = arith.constant 0 : index
    %c28 = arith.constant 28 : index
    %1124 = memref.load %arg9[%c0_461, %c28] : memref<6x32xf32, #tpu.memory_space<smem>>
    %1125 = vector.broadcast %1124 : f32 to vector<32x128xf32>
    %1126 = arith.mulf %1125, %17 : vector<32x128xf32>
    %1127 = arith.addf %1123, %1126 : vector<32x128xf32>
    %c1_462 = arith.constant 1 : index
    %c28_463 = arith.constant 28 : index
    %1128 = memref.load %arg9[%c1_462, %c28_463] : memref<6x32xf32, #tpu.memory_space<smem>>
    %1129 = vector.broadcast %1128 : f32 to vector<32x128xf32>
    %1130 = arith.mulf %1129, %20 : vector<32x128xf32>
    %1131 = arith.addf %1127, %1130 : vector<32x128xf32>
    %c2_464 = arith.constant 2 : index
    %c28_465 = arith.constant 28 : index
    %1132 = memref.load %arg9[%c2_464, %c28_465] : memref<6x32xf32, #tpu.memory_space<smem>>
    %1133 = vector.broadcast %1132 : f32 to vector<32x128xf32>
    %1134 = arith.mulf %1133, %23 : vector<32x128xf32>
    %1135 = arith.addf %1131, %1134 : vector<32x128xf32>
    %c3_466 = arith.constant 3 : index
    %c28_467 = arith.constant 28 : index
    %1136 = memref.load %arg9[%c3_466, %c28_467] : memref<6x32xf32, #tpu.memory_space<smem>>
    %1137 = vector.broadcast %1136 : f32 to vector<32x128xf32>
    %1138 = arith.mulf %1137, %26 : vector<32x128xf32>
    %1139 = arith.addf %1135, %1138 : vector<32x128xf32>
    %c4_468 = arith.constant 4 : index
    %c28_469 = arith.constant 28 : index
    %1140 = memref.load %arg9[%c4_468, %c28_469] : memref<6x32xf32, #tpu.memory_space<smem>>
    %1141 = vector.broadcast %1140 : f32 to vector<32x128xf32>
    %1142 = arith.mulf %1141, %29 : vector<32x128xf32>
    %1143 = arith.addf %1139, %1142 : vector<32x128xf32>
    %c5_470 = arith.constant 5 : index
    %c28_471 = arith.constant 28 : index
    %1144 = memref.load %arg9[%c5_470, %c28_471] : memref<6x32xf32, #tpu.memory_space<smem>>
    %1145 = vector.broadcast %1144 : f32 to vector<32x128xf32>
    %1146 = arith.mulf %1145, %32 : vector<32x128xf32>
    %1147 = arith.addf %1143, %1146 : vector<32x128xf32>
    %cst_472 = arith.constant 0.000000e+00 : f32
    %1148 = vector.broadcast %cst_472 : f32 to vector<32x128xf32>
    %1149 = arith.cmpf ogt, %1147, %1148 : vector<32x128xf32>
    %cst_473 = arith.constant 2.000000e-01 : f32
    %1150 = vector.broadcast %cst_473 : f32 to vector<32x128xf32>
    %1151 = arith.mulf %1150, %1147 : vector<32x128xf32>
    %1152 = arith.select %1149, %1147, %1151 : vector<32x128xi1>, vector<32x128xf32>
    %c1_474 = arith.constant 1 : index
    %c12_475 = arith.constant 12 : index
    %1153 = memref.load %arg10[%c1_474, %c12_475] : memref<2x16xf32, #tpu.memory_space<smem>>
    %1154 = vector.broadcast %1153 : f32 to vector<32x128xf32>
    %1155 = arith.mulf %1154, %1152 : vector<32x128xf32>
    %1156 = arith.addf %1118, %1155 : vector<32x128xf32>
    %1157 = vector.extract_strided_slice %11 {offsets = [0, 29], sizes = [32, 1], strides = [1, 1]} : vector<32x32xf32> to vector<32x1xf32>
    %1158 = vector.extract_strided_slice %5 {offsets = [29, 0], sizes = [1, 128], strides = [1, 1]} : vector<32x128xf32> to vector<1x128xf32>
    %1159 = vector.broadcast %1157 : vector<32x1xf32> to vector<32x128xf32>
    %1160 = vector.broadcast %1158 : vector<1x128xf32> to vector<32x128xf32>
    %1161 = arith.addf %1159, %1160 : vector<32x128xf32>
    %c0_476 = arith.constant 0 : index
    %c29 = arith.constant 29 : index
    %1162 = memref.load %arg9[%c0_476, %c29] : memref<6x32xf32, #tpu.memory_space<smem>>
    %1163 = vector.broadcast %1162 : f32 to vector<32x128xf32>
    %1164 = arith.mulf %1163, %17 : vector<32x128xf32>
    %1165 = arith.addf %1161, %1164 : vector<32x128xf32>
    %c1_477 = arith.constant 1 : index
    %c29_478 = arith.constant 29 : index
    %1166 = memref.load %arg9[%c1_477, %c29_478] : memref<6x32xf32, #tpu.memory_space<smem>>
    %1167 = vector.broadcast %1166 : f32 to vector<32x128xf32>
    %1168 = arith.mulf %1167, %20 : vector<32x128xf32>
    %1169 = arith.addf %1165, %1168 : vector<32x128xf32>
    %c2_479 = arith.constant 2 : index
    %c29_480 = arith.constant 29 : index
    %1170 = memref.load %arg9[%c2_479, %c29_480] : memref<6x32xf32, #tpu.memory_space<smem>>
    %1171 = vector.broadcast %1170 : f32 to vector<32x128xf32>
    %1172 = arith.mulf %1171, %23 : vector<32x128xf32>
    %1173 = arith.addf %1169, %1172 : vector<32x128xf32>
    %c3_481 = arith.constant 3 : index
    %c29_482 = arith.constant 29 : index
    %1174 = memref.load %arg9[%c3_481, %c29_482] : memref<6x32xf32, #tpu.memory_space<smem>>
    %1175 = vector.broadcast %1174 : f32 to vector<32x128xf32>
    %1176 = arith.mulf %1175, %26 : vector<32x128xf32>
    %1177 = arith.addf %1173, %1176 : vector<32x128xf32>
    %c4_483 = arith.constant 4 : index
    %c29_484 = arith.constant 29 : index
    %1178 = memref.load %arg9[%c4_483, %c29_484] : memref<6x32xf32, #tpu.memory_space<smem>>
    %1179 = vector.broadcast %1178 : f32 to vector<32x128xf32>
    %1180 = arith.mulf %1179, %29 : vector<32x128xf32>
    %1181 = arith.addf %1177, %1180 : vector<32x128xf32>
    %c5_485 = arith.constant 5 : index
    %c29_486 = arith.constant 29 : index
    %1182 = memref.load %arg9[%c5_485, %c29_486] : memref<6x32xf32, #tpu.memory_space<smem>>
    %1183 = vector.broadcast %1182 : f32 to vector<32x128xf32>
    %1184 = arith.mulf %1183, %32 : vector<32x128xf32>
    %1185 = arith.addf %1181, %1184 : vector<32x128xf32>
    %cst_487 = arith.constant 0.000000e+00 : f32
    %1186 = vector.broadcast %cst_487 : f32 to vector<32x128xf32>
    %1187 = arith.cmpf ogt, %1185, %1186 : vector<32x128xf32>
    %cst_488 = arith.constant 2.000000e-01 : f32
    %1188 = vector.broadcast %cst_488 : f32 to vector<32x128xf32>
    %1189 = arith.mulf %1188, %1185 : vector<32x128xf32>
    %1190 = arith.select %1187, %1185, %1189 : vector<32x128xi1>, vector<32x128xf32>
    %c1_489 = arith.constant 1 : index
    %c13_490 = arith.constant 13 : index
    %1191 = memref.load %arg10[%c1_489, %c13_490] : memref<2x16xf32, #tpu.memory_space<smem>>
    %1192 = vector.broadcast %1191 : f32 to vector<32x128xf32>
    %1193 = arith.mulf %1192, %1190 : vector<32x128xf32>
    %1194 = arith.addf %1156, %1193 : vector<32x128xf32>
    %1195 = vector.extract_strided_slice %11 {offsets = [0, 30], sizes = [32, 1], strides = [1, 1]} : vector<32x32xf32> to vector<32x1xf32>
    %1196 = vector.extract_strided_slice %5 {offsets = [30, 0], sizes = [1, 128], strides = [1, 1]} : vector<32x128xf32> to vector<1x128xf32>
    %1197 = vector.broadcast %1195 : vector<32x1xf32> to vector<32x128xf32>
    %1198 = vector.broadcast %1196 : vector<1x128xf32> to vector<32x128xf32>
    %1199 = arith.addf %1197, %1198 : vector<32x128xf32>
    %c0_491 = arith.constant 0 : index
    %c30 = arith.constant 30 : index
    %1200 = memref.load %arg9[%c0_491, %c30] : memref<6x32xf32, #tpu.memory_space<smem>>
    %1201 = vector.broadcast %1200 : f32 to vector<32x128xf32>
    %1202 = arith.mulf %1201, %17 : vector<32x128xf32>
    %1203 = arith.addf %1199, %1202 : vector<32x128xf32>
    %c1_492 = arith.constant 1 : index
    %c30_493 = arith.constant 30 : index
    %1204 = memref.load %arg9[%c1_492, %c30_493] : memref<6x32xf32, #tpu.memory_space<smem>>
    %1205 = vector.broadcast %1204 : f32 to vector<32x128xf32>
    %1206 = arith.mulf %1205, %20 : vector<32x128xf32>
    %1207 = arith.addf %1203, %1206 : vector<32x128xf32>
    %c2_494 = arith.constant 2 : index
    %c30_495 = arith.constant 30 : index
    %1208 = memref.load %arg9[%c2_494, %c30_495] : memref<6x32xf32, #tpu.memory_space<smem>>
    %1209 = vector.broadcast %1208 : f32 to vector<32x128xf32>
    %1210 = arith.mulf %1209, %23 : vector<32x128xf32>
    %1211 = arith.addf %1207, %1210 : vector<32x128xf32>
    %c3_496 = arith.constant 3 : index
    %c30_497 = arith.constant 30 : index
    %1212 = memref.load %arg9[%c3_496, %c30_497] : memref<6x32xf32, #tpu.memory_space<smem>>
    %1213 = vector.broadcast %1212 : f32 to vector<32x128xf32>
    %1214 = arith.mulf %1213, %26 : vector<32x128xf32>
    %1215 = arith.addf %1211, %1214 : vector<32x128xf32>
    %c4_498 = arith.constant 4 : index
    %c30_499 = arith.constant 30 : index
    %1216 = memref.load %arg9[%c4_498, %c30_499] : memref<6x32xf32, #tpu.memory_space<smem>>
    %1217 = vector.broadcast %1216 : f32 to vector<32x128xf32>
    %1218 = arith.mulf %1217, %29 : vector<32x128xf32>
    %1219 = arith.addf %1215, %1218 : vector<32x128xf32>
    %c5_500 = arith.constant 5 : index
    %c30_501 = arith.constant 30 : index
    %1220 = memref.load %arg9[%c5_500, %c30_501] : memref<6x32xf32, #tpu.memory_space<smem>>
    %1221 = vector.broadcast %1220 : f32 to vector<32x128xf32>
    %1222 = arith.mulf %1221, %32 : vector<32x128xf32>
    %1223 = arith.addf %1219, %1222 : vector<32x128xf32>
    %cst_502 = arith.constant 0.000000e+00 : f32
    %1224 = vector.broadcast %cst_502 : f32 to vector<32x128xf32>
    %1225 = arith.cmpf ogt, %1223, %1224 : vector<32x128xf32>
    %cst_503 = arith.constant 2.000000e-01 : f32
    %1226 = vector.broadcast %cst_503 : f32 to vector<32x128xf32>
    %1227 = arith.mulf %1226, %1223 : vector<32x128xf32>
    %1228 = arith.select %1225, %1223, %1227 : vector<32x128xi1>, vector<32x128xf32>
    %c1_504 = arith.constant 1 : index
    %c14_505 = arith.constant 14 : index
    %1229 = memref.load %arg10[%c1_504, %c14_505] : memref<2x16xf32, #tpu.memory_space<smem>>
    %1230 = vector.broadcast %1229 : f32 to vector<32x128xf32>
    %1231 = arith.mulf %1230, %1228 : vector<32x128xf32>
    %1232 = arith.addf %1194, %1231 : vector<32x128xf32>
    %1233 = vector.extract_strided_slice %11 {offsets = [0, 31], sizes = [32, 1], strides = [1, 1]} : vector<32x32xf32> to vector<32x1xf32>
    %1234 = vector.extract_strided_slice %5 {offsets = [31, 0], sizes = [1, 128], strides = [1, 1]} : vector<32x128xf32> to vector<1x128xf32>
    %1235 = vector.broadcast %1233 : vector<32x1xf32> to vector<32x128xf32>
    %1236 = vector.broadcast %1234 : vector<1x128xf32> to vector<32x128xf32>
    %1237 = arith.addf %1235, %1236 : vector<32x128xf32>
    %c0_506 = arith.constant 0 : index
    %c31 = arith.constant 31 : index
    %1238 = memref.load %arg9[%c0_506, %c31] : memref<6x32xf32, #tpu.memory_space<smem>>
    %1239 = vector.broadcast %1238 : f32 to vector<32x128xf32>
    %1240 = arith.mulf %1239, %17 : vector<32x128xf32>
    %1241 = arith.addf %1237, %1240 : vector<32x128xf32>
    %c1_507 = arith.constant 1 : index
    %c31_508 = arith.constant 31 : index
    %1242 = memref.load %arg9[%c1_507, %c31_508] : memref<6x32xf32, #tpu.memory_space<smem>>
    %1243 = vector.broadcast %1242 : f32 to vector<32x128xf32>
    %1244 = arith.mulf %1243, %20 : vector<32x128xf32>
    %1245 = arith.addf %1241, %1244 : vector<32x128xf32>
    %c2_509 = arith.constant 2 : index
    %c31_510 = arith.constant 31 : index
    %1246 = memref.load %arg9[%c2_509, %c31_510] : memref<6x32xf32, #tpu.memory_space<smem>>
    %1247 = vector.broadcast %1246 : f32 to vector<32x128xf32>
    %1248 = arith.mulf %1247, %23 : vector<32x128xf32>
    %1249 = arith.addf %1245, %1248 : vector<32x128xf32>
    %c3_511 = arith.constant 3 : index
    %c31_512 = arith.constant 31 : index
    %1250 = memref.load %arg9[%c3_511, %c31_512] : memref<6x32xf32, #tpu.memory_space<smem>>
    %1251 = vector.broadcast %1250 : f32 to vector<32x128xf32>
    %1252 = arith.mulf %1251, %26 : vector<32x128xf32>
    %1253 = arith.addf %1249, %1252 : vector<32x128xf32>
    %c4_513 = arith.constant 4 : index
    %c31_514 = arith.constant 31 : index
    %1254 = memref.load %arg9[%c4_513, %c31_514] : memref<6x32xf32, #tpu.memory_space<smem>>
    %1255 = vector.broadcast %1254 : f32 to vector<32x128xf32>
    %1256 = arith.mulf %1255, %29 : vector<32x128xf32>
    %1257 = arith.addf %1253, %1256 : vector<32x128xf32>
    %c5_515 = arith.constant 5 : index
    %c31_516 = arith.constant 31 : index
    %1258 = memref.load %arg9[%c5_515, %c31_516] : memref<6x32xf32, #tpu.memory_space<smem>>
    %1259 = vector.broadcast %1258 : f32 to vector<32x128xf32>
    %1260 = arith.mulf %1259, %32 : vector<32x128xf32>
    %1261 = arith.addf %1257, %1260 : vector<32x128xf32>
    %cst_517 = arith.constant 0.000000e+00 : f32
    %1262 = vector.broadcast %cst_517 : f32 to vector<32x128xf32>
    %1263 = arith.cmpf ogt, %1261, %1262 : vector<32x128xf32>
    %cst_518 = arith.constant 2.000000e-01 : f32
    %1264 = vector.broadcast %cst_518 : f32 to vector<32x128xf32>
    %1265 = arith.mulf %1264, %1261 : vector<32x128xf32>
    %1266 = arith.select %1263, %1261, %1265 : vector<32x128xi1>, vector<32x128xf32>
    %c1_519 = arith.constant 1 : index
    %c15_520 = arith.constant 15 : index
    %1267 = memref.load %arg10[%c1_519, %c15_520] : memref<2x16xf32, #tpu.memory_space<smem>>
    %1268 = vector.broadcast %1267 : f32 to vector<32x128xf32>
    %1269 = arith.mulf %1268, %1266 : vector<32x128xf32>
    %1270 = arith.addf %1232, %1269 : vector<32x128xf32>
    %cst_521 = arith.constant -1.000000e+30 : f32
    %1271 = vector.broadcast %cst_521 : f32 to vector<32x128xf32>
    %1272 = arith.select %14, %1270, %1271 : vector<32x128xi1>, vector<32x128xf32>
    %cst_522 = arith.constant dense<0xFF800000> : vector<32xf32>
    %1273 = vector.multi_reduction <maximumf>, %1272, %cst_522 [1] : vector<32x128xf32> to vector<32xf32>
    %1274 = vector.shape_cast %1273 : vector<32xf32> to vector<32x1xf32>
    %1275 = vector.broadcast %1274 : vector<32x1xf32> to vector<32x128xf32>
    %1276 = arith.subf %1272, %1275 : vector<32x128xf32>
    %1277 = math.exp %1276 : vector<32x128xf32>
    %cst_523 = arith.constant 0.000000e+00 : f32
    %1278 = vector.broadcast %cst_523 : f32 to vector<32x128xf32>
    %1279 = arith.select %14, %1277, %1278 : vector<32x128xi1>, vector<32x128xf32>
    %cst_524 = arith.constant dense<0.000000e+00> : vector<32xf32>
    %1280 = vector.multi_reduction <add>, %1279, %cst_524 [1] : vector<32x128xf32> to vector<32xf32>
    %1281 = vector.shape_cast %1280 : vector<32xf32> to vector<32x1xf32>
    %cst_525 = arith.constant 9.99999968E-21 : f32
    %1282 = vector.broadcast %cst_525 : f32 to vector<32x1xf32>
    %1283 = arith.maximumf %1281, %1282 : vector<32x1xf32>
    %1284 = tpu.reciprocal %1283 {approx = true} : vector<32x1xf32> -> vector<32x1xf32>
    %1285 = vector.broadcast %1284 : vector<32x1xf32> to vector<32x128xf32>
    %1286 = arith.mulf %1279, %1285 : vector<32x128xf32>
    %1287 = vector.extract_strided_slice %5 {offsets = [16, 0], sizes = [16, 128], strides = [1, 1]} : vector<32x128xf32> to vector<16x128xf32>
    %1288 = arith.truncf %1286 : vector<32x128xf32> to vector<32x128xbf16>
    %1289 = arith.truncf %1287 : vector<16x128xf32> to vector<16x128xbf16>
    %cst_526 = arith.constant dense<0.000000e+00> : vector<32x16xf32>
    %1290 = tpu.matmul %1288, %1289, %cst_526 {dimension_numbers = #tpu.dot_dimension_numbers<[1], [1], [0], [0], [0, 0, 1, 0], [], []>} : vector<32x128xbf16>, vector<16x128xbf16>, vector<32x16xf32> -> vector<32x16xf32>
    %1291 = tpu.concatenate %661, %1290 in 1 : vector<32x16xf32>, vector<32x16xf32> -> vector<32x32xf32>
    %cst_527 = arith.constant 0.000000e+00 : f32
    %1292 = vector.broadcast %cst_527 : f32 to vector<32x96xf32>
    %1293 = tpu.concatenate %1291, %1292 in 1 : vector<32x32xf32>, vector<32x96xf32> -> vector<32x128xf32>
    %c0_528 = arith.constant 0 : index
    %c0_529 = arith.constant 0 : index
    %1294 = vector.load %arg11[%c0_528, %c0_529] : memref<1x128xf32, #tpu.memory_space<vmem>>, vector<1x128xf32>
    %1295 = vector.broadcast %1294 : vector<1x128xf32> to vector<32x128xf32>
    %1296 = arith.addf %1293, %1295 : vector<32x128xf32>
    %cst_530 = arith.constant 0.000000e+00 : f32
    %1297 = vector.broadcast %cst_530 : f32 to vector<32x128xf32>
    %1298 = arith.cmpf ogt, %1296, %1297 : vector<32x128xf32>
    %cst_531 = arith.constant 0.000000e+00 : f32
    %1299 = vector.broadcast %cst_531 : f32 to vector<32x128xf32>
    %1300 = arith.minimumf %1296, %1299 : vector<32x128xf32>
    %1301 = math.exp %1300 : vector<32x128xf32>
    %cst_532 = arith.constant 1.000000e+00 : f32
    %1302 = vector.broadcast %cst_532 : f32 to vector<32x128xf32>
    %1303 = arith.subf %1301, %1302 : vector<32x128xf32>
    %1304 = arith.select %1298, %1296, %1303 : vector<32x128xi1>, vector<32x128xf32>
    %c0_533 = arith.constant 0 : index
    %c0_534 = arith.constant 0 : index
    %1305 = vector.load %arg12[%c0_533, %c0_534] : memref<32x128xf32, #tpu.memory_space<vmem>>, vector<32x128xf32>
    tpu.vector_store %arg12[%c0_533, %c0_534], %1304 {strides = array<i32>} : memref<32x128xf32, #tpu.memory_space<vmem>>, vector<32x128xf32>,
    return
  }
  func.func @transform_0(%arg0: i32) -> (i32, i32) {
    %c0_i32 = arith.constant 0 : i32
    %c0_i32_0 = arith.constant 0 : i32
    return %arg0, %c0_i32 : i32, i32
  }
  func.func @transform_1(%arg0: i32) -> (i32, i32) {
    %c0_i32 = arith.constant 0 : i32
    %c0_i32_0 = arith.constant 0 : i32
    %c0_i32_1 = arith.constant 0 : i32
    return %c0_i32, %c0_i32_0 : i32, i32
  }
  func.func @transform_2(%arg0: i32) -> (i32, i32) {
    %c0_i32 = arith.constant 0 : i32
    %c0_i32_0 = arith.constant 0 : i32
    return %arg0, %c0_i32 : i32, i32
  }
  func.func @transform_3(%arg0: i32) -> (i32, i32, i32) {
    %c0_i32 = arith.constant 0 : i32
    %c0_i32_0 = arith.constant 0 : i32
    %c0_i32_1 = arith.constant 0 : i32
    return %c0_i32, %arg0, %c0_i32_0 : i32, i32, i32
  }
  func.func @transform_4(%arg0: i32) -> (i32, i32) {
    %c0_i32 = arith.constant 0 : i32
    %c0_i32_0 = arith.constant 0 : i32
    %c0_i32_1 = arith.constant 0 : i32
    return %c0_i32, %c0_i32_0 : i32, i32
  }
  func.func @transform_5(%arg0: i32) -> (i32, i32) {
    %c0_i32 = arith.constant 0 : i32
    %c0_i32_0 = arith.constant 0 : i32
    %c0_i32_1 = arith.constant 0 : i32
    return %c0_i32, %c0_i32_0 : i32, i32
  }
  func.func @transform_6(%arg0: i32) -> (i32, i32) {
    %c0_i32 = arith.constant 0 : i32
    %c0_i32_0 = arith.constant 0 : i32
    %c0_i32_1 = arith.constant 0 : i32
    return %c0_i32, %c0_i32_0 : i32, i32
  }
  func.func @transform_7(%arg0: i32) -> (i32, i32) {
    %c0_i32 = arith.constant 0 : i32
    %c0_i32_0 = arith.constant 0 : i32
    %c0_i32_1 = arith.constant 0 : i32
    return %c0_i32, %c0_i32_0 : i32, i32
  }
  func.func @transform_8(%arg0: i32) -> (i32, i32) {
    %c0_i32 = arith.constant 0 : i32
    %c0_i32_0 = arith.constant 0 : i32
    %c0_i32_1 = arith.constant 0 : i32
    return %c0_i32, %c0_i32_0 : i32, i32
  }
  func.func @transform_9(%arg0: i32) -> (i32, i32) {
    %c0_i32 = arith.constant 0 : i32
    %c0_i32_0 = arith.constant 0 : i32
    %c0_i32_1 = arith.constant 0 : i32
    return %c0_i32, %c0_i32_0 : i32, i32
  }
  func.func @transform_10(%arg0: i32) -> (i32, i32) {
    %c0_i32 = arith.constant 0 : i32
    %c0_i32_0 = arith.constant 0 : i32
    %c0_i32_1 = arith.constant 0 : i32
    return %c0_i32, %c0_i32_0 : i32, i32
  }
  func.func @transform_11(%arg0: i32) -> (i32, i32) {
    %c0_i32 = arith.constant 0 : i32
    %c0_i32_0 = arith.constant 0 : i32
    return %arg0, %c0_i32 : i32, i32
  }
}

</mosaic_0001>

<bundles_post_ra>
// kernel: tpu_custom_call.1
= control target key start
LH: loop header
LB: loop body
LE: loop exit
PB: predicated region body
PF: predicated region fallthrough
CT: control target
= control target key end

     0   :  { %s10758_s0 = inlined_call_operand.vmem [shape: bf16[128,8], index: 0, kind: input, shape index: {}]   ;;  %s10759_s1 = inlined_call_operand.vmem [shape: bf16[8,128], index: 1, kind: input, shape index: {}]   ;;  %s10760_s2 = inlined_call_operand.vmem [shape: s8[128,128], index: 2, kind: input, shape index: {}]   ;;  %s10761_s3 = inlined_call_operand.hbm [shape: bf16[6,128,128], index: 3, kind: input, shape index: {}]   ;;  %s10762_s4 = inlined_call_operand.vmem [shape: bf16[32,8], index: 4, kind: input, shape index: {}]   ;;  %s10763_s5 = inlined_call_operand.vmem [shape: f32[32,1], index: 5, kind: input, shape index: {}]   ;;  %s10764_s6 = inlined_call_operand.vmem [shape: bf16[8,32], index: 6, kind: input, shape index: {}]   ;;  %s10765_s7 = inlined_call_operand.vmem [shape: f32[1,32], index: 7, kind: input, shape index: {}]   ;;  %s10766_s8 = inlined_call_operand.vmem [shape: f32[6,32], index: 8, kind: input, shape index: {}]   ;;  %s10767_s9 = inlined_call_operand.vmem [shape: f32[2,16], index: 9, kind: input, shape index: {}]   ;;  %s10768_s10 = inlined_call_operand.vmem [shape: f32[1,128], index: 10, kind: input, shape index: {}]   ;;  %s10769_s11 = inlined_call_operand.hbm [shape: f32[128,128], index: 11, kind: output, shape index: {}]  }
   0x1   :  { %11509 = sst [smem:[#allocation495_spill]] %s10758_s0 }
   0x2   :  { %11510 = sst [smem:[#allocation496_spill]] %s10759_s1 }
   0x3   :  { %11511 = sst [smem:[#allocation497_spill]] %s10761_s3 }
   0x4   :  { %11512 = sst [smem:[#allocation498_spill]] %s10762_s4 }
   0x5   :  { %11513 = sst [smem:[#allocation499_spill]] %s10763_s5 }
   0x6   :  { %11514 = sst [smem:[#allocation500_spill]] %s10766_s8 }
   0x7   :  { %11515 = sst [smem:[#allocation501_spill]] %s10767_s9 }
   0x8   :  { %16 = vsyncpa [#allocation3], 0 }
   0x9   :  { %18 = vsyncpa [#allocation3 + $0x1], 0 }
   0xa   :  { %19 = vsyncpa [#allocation5], 0 }
   0xb   :  { %20 = vsyncpa [#allocation8], 0 }
   0xc   :  { %21 = vsyncpa [#allocation4], 0 }
   0xd   :  { %23 = vsyncpa [#allocation4 + $0x1], 0  ;;  %s5413_s17 = smov 0   ;;  %s5415_s18 = smov 0  }
   0xe   :  { %s5417_s19 = smov 0   ;;  %s5419_s20 = smov 0  }
   0xf LB: > { %11516 = sst [smem:[#allocation17_spill]] %s5296_s17  ;;  %s5434_s21 = sadd.s32 4294967295, %s5308_s20   ;;  %s5308_s20 = sphi %s5419_s20, %s13193_s20   ;;  %s5304_s19 = sphi %s5417_s19, %s13195_s19   ;;  %s5300_s18 = sphi %s5415_s18, %s13197_s18   ;;  %s5296_s17 = sphi %s5413_s17, %s13196_s17  }
  0x10   : > { %11517 = sst [smem:[#allocation18_spill]] %s5304_s19  ;;  %s4558_s22 = sadd.s32 4294967294, %s5308_s20  }
  0x11   : > { %s5438_s23 = sadd.s32 1, %s5308_s20   ;;  %s109_s24 = sadd.s32 1, %s5304_s19 }
  0x12   : > { %11518 = sst [smem:[#allocation19_spill]] %s5438_s23  ;;  %s106_s25 = ssub.s32 %s5308_s20, %s5438_s23 }
  0x13   : > { %p116_p0 = scmp.ne.s32.totalorder %s5304_s19, %s5300_s18  ;;  %p107_p1 = scmp.eq.s32.totalorder %s106_s25, 0 }
  0x14   : > { %p117_p2 = scmp.eq.s32.totalorder %s5308_s20, 0  ;;  %p122_p3 = scmp.ne.s32.totalorder %s5300_s18, %s5296_s17 }
  0x15   : > { %p10771_p4 = scmp.eq.s32.totalorder %s5434_s21, 0  ;;  %p293_p7 = scmp.eq.s32.totalorder %s5434_s21, 3 }
  0x16   : > { %s5450_s26 = scalar_select %p107_p1, %s5304_s19, %s109_s24  }
  0x17   : > { %p5452_p5 = por %p117_p2, %p116_p0  ;;  %p5458_p6 = por %p10771_p4, %p122_p3 }
  0x18   : > { %11519 = sst [smem:[#allocation20_spill]] %s5450_s26  ;;  %p299_p8 = scmp.eq.s32.totalorder %s4558_s22, 3 }
  0x19   : > { %s11520_s27 = scalar_select %p5452_p5, 1, 0 }
  0x1a   : > { %s11521_s28 = scalar_select %p5458_p6, 1, 0 }
  0x1b   : > { %p4559_p9 = scmp.ge.s32.totalorder %s5308_s20, 1  ;;  %p306_p10 = scmp.lt.s32.totalorder %s5308_s20, 5 }
  0x1c   : > { %p5465_p11 = por %p293_p7, %p116_p0  ;;  %p5469_p12 = por %p299_p8, %p122_p3 }
  0x1d   : > { %p5473_p13 = pnand %p4559_p9, %p306_p10  ;;  %s11526_s8 = sld [smem:[#allocation500_spill]] }
  0x1e   : > { %s11522_s29 = scalar_select %p5465_p11, 1, 0 }
  0x1f   : > { %s11523_s30 = scalar_select %p5469_p12, 1, 0 }
  0x20   : > { %s11525_s12 = scalar_select %p5473_p13, 1, 0 }
  0x21   : > { %11524 = sst [smem:[#allocation21_spill]] %s11523_s30  ;;  %p4955_p1 = pneg %p5473_p13 }
  0x22   : > { %s11527_s9 = sld [smem:[#allocation501_spill]] }
  0x23   : > { %s334_s15 = sshll.u32 %s11526_s8, 4  ;;  %p5487_p0 = pnand %p4955_p1, %p10771_p4  ;;  %s335_s15 = int_to_ptr.vmem [resolvable:$true] %s334_s15 }
  0x24   : > { %s5204_s26 = scalar_lea.vmem %s335_s15, 128  ;;  %p5212_p9 = scmp.lt.s32.totalorder %s335_s15, %s335_s15 }
  0x25   : > { %p5205_p2 = scmp.ne.s32.totalorder %s335_s15, %s5204_s26  ;;  %p5206_p3 = pneg %p5487_p0 }
  0x26   : > { %p5213_p10 = scmp.lt.s32.totalorder %s5204_s26, %s5204_s26 }
  0x27   : > { %p5207_p7 = pnand %p5206_p3, %p5205_p2 }
  0x28   : > { %s345_s24 = sshll.u32 %s11527_s9, 4  ;;  %p5214_p12 = por %p5213_p10, %p5212_p9  ;;  %s346_s24 = int_to_ptr.vmem [resolvable:$true] %s345_s24 }
  0x29   : > { %p5208_p8 = pneg %p5207_p7 }
  0x2b   : > { %p5215_p11 = pnand %p5214_p12, %p5208_p8 }
  0x2d   : > { %5218 = shalt.err (!%p5215_p11)
}
  0x2e   : > { %s5310_s13 = smov [#allocation6]   ;;  %s5219_s14 = scalar_lea.vmem %s346_s24, 32 }
  0x2f   : > { %4958 = dma.vmem_to_smem (!%p5487_p0), %s335_s15, 128, %s5310_s13, [#allocation5]  }
  0x30   : > { %p5220_p1 = scmp.ne.s32.totalorder %s346_s24, %s5219_s14  ;;  %p5227_p13 = scmp.lt.s32.totalorder %s346_s24, %s346_s24 }
  0x31   : > { %p5228_p5 = scmp.lt.s32.totalorder %s5219_s14, %s5219_s14 }
  0x32   : > { %p5222_p4 = pnand %p5220_p1, %p5206_p3 }
  0x33   : > { %p5229_p2 = por %p5228_p5, %p5227_p13 }
  0x34   : > { %p5223_p6 = pneg %p5222_p4 }
  0x36   : > { %p5230_p7 = pnand %p5229_p2, %p5223_p6 }
  0x38   : > { %5233 = shalt.err (!%p5230_p7)
}
  0x39   : > { %s5311_s16 = smov [#allocation7]   ;;  %p4562_p12 = scmp.ge.s32.totalorder %s5308_s20, 4 }
  0x3a   : > { %4961 = dma.vmem_to_smem (!%p5487_p0), %s346_s24, 32, %s5311_s16, [#allocation8]  }
  0x3b   : > { %355 = sbr.rel (%p4562_p12) target bundleno = 82 (0x52), region = 48 }
  0x42   : > { %s375_s26 = sand.u32 1, %s5304_s19   ;;  %s4835_s22 = sshll.u32 %s5308_s20, 8 }
  0x43   : > { %s4934_s15 = smul.u32 96, %s375_s26  ;;  %s5312_s13 = smov 1024  }
  0x44   : > { %p11529_p4 = scmp.ne.s32.totalorder %s11520_s27, 0  ;;  %s5313_s8 = smov 256  }
  0x45   : > { %s379_s14 = scalar_lea.vmem [#allocation2], %s4934_s15  ;;  %s5314_s9 = smov 4  }
  0x46   : > { %4941 = sst [smem:[#allocation11]] (%p11529_p4), %s5312_s13  ;;  %s398_s16 = sshll.u32 %s379_s14, 4  ;;  %s399_s16 = int_to_ptr.vmem [resolvable:$true] %s398_s16 }
  0x47   : > { %s4940_s24 = scalar_select %p11529_p4, [#allocation0], [#allocation12] }
  0x48   : > { %4942 = sst [smem:[#allocation11 + $0x1]] (%p11529_p4), %s5313_s8  ;;  %s11530_s3 = sld [smem:[#allocation497_spill]] }
  0x49   : > { %s390_s25 = sld [smem:[%s4940_s24]]   ;;  %s5315_s17 = smov 64  }
  0x4a   : > { %4943 = sst [smem:[#allocation11 + $0x2]] (%p11529_p4), %s5314_s9  ;;  %s376_s24 = scalar_lea.sflag [#allocation3], %s375_s26 }
  0x4b   : > { %4944 = sst [smem:[#allocation11 + $0x3]] (%p11529_p4), %s5315_s17  ;;  %s5316_s14 = smov [#allocation10]  }
  0x4c   : > { %4945 = sst [smem:[#allocation11 + $0x4]] (%p11529_p4), %s5315_s17 }
  0x4d   : > { %4946 = sst [smem:[#allocation11 + $0x5]] (%p11529_p4), %s5314_s9 }
  0x4e   : > { %s385_s30 = scalar_lea.hbm %s11530_s3, %s4835_s22 }
  0x4f   : > { %s4565_s15 = sshll.u32 %s390_s25, 26 }
  0x50   : > { %s4566_s13 = sadd.s32 134217728, %s4565_s15 }
  0x51   : > { %4947 = dma.general (%p11529_p4), %s385_s30, 1536, %s399_s16, %s376_s24, %s5316_s14, [#allocation11], %s4566_s13, 0  }
  0x52 PF: > { %p11531_p5 = scmp.ne.s32.totalorder %s11525_s12, 0 }
  0x54   : > { %423 = sbr.rel (%p11531_p5) target bundleno = 1697 (0x6a1), region = 64 }
  0x5b   : > { %s5522_s8 = sand.u32 1, %s5300_s18   ;;  %p11532_p6 = scmp.ne.s32.totalorder %s11521_s28, 0 }
  0x5c   : > { %s4935_s19 = smul.u32 96, %s5522_s8  ;;  %s426_s17 = scalar_lea.sflag [#allocation3], %s5522_s8 }
  0x5e   : > { %s5526_s23 = scalar_lea.vmem [#allocation2], %s4935_s19 }
  0x5f   : > { %5279 = dma.done.wait (%p11532_p6), %s426_s17, 1536  }
  0x60   : > { %5281 = vsyncadd (%p11532_p6), %s426_s17, 4294965760  ;;  %p11533_p11 = scmp.eq.s32.totalorder %s5434_s21, 0 }
  0x62   : > { %5283 = dma.done.wait (%p11533_p11), [#allocation5], 128   ;;  %p11534_p13 = pmov %p11533_p11 }
  0x63   : > { %p11535_p0 = pmov %p11533_p11 }
  0x64   : > { %5285 = vsyncadd (%p11534_p13), [#allocation5], 4294967168 }
  0x65   : > { %5287 = dma.done.wait (%p11535_p0), [#allocation8], 32   ;;  %p11536_p3 = pmov %p11535_p0 }
  0x67   : > { %5289 = vsyncadd (%p11536_p3), [#allocation8], 4294967264 }
  0x68   : > { %442 = sfence }
  0x69   : > { %vm547_vm0 = vcmask 1043456   ;;  %v604_v0 = vld [vmem:[%s10764_s6] sm:$0xf]  ;;  %s4571_s28 = sshll.u32 %s5434_s21, 2  ;;  %vm540_vm1 = vcmask 64512   ;;  %s11537_s4 = sld [smem:[#allocation498_spill]]  ;;  %v755_v27 = vlaneseq }
  0x6a   : > { %4933 = vmatprep.subr.msk.bf16.mxu1 %vm547_vm0, %v604_v0  ;;  %v629_v2 = vsel %vm547_vm0, %v604_v0, 0  ;;  %p487_p8 = scmp.lt.s32.totalorder %s4571_s28, 15  ;;  %s11538_s1 = sld [smem:[#allocation496_spill]]  ;;  %v10782_v7 = vmov 0   ;;  %v10790_v13 = vmov 16   ;;  %v10780_v33 = vmov 17  }
  0x6b   : > { %4915 = vmatpush3.bf16.msra.mxu1 %v629_v2  ;;  %s11539_s5 = sld [smem:[#allocation499_spill]]  ;;  %5046 = vset.pattern.permute.xlu1 %v10782_v7  ;;  %s11540_s0 = sld [smem:[#allocation495_spill]]  ;;  %v4578_v19 = vld [vmem:[%s10765_s7] ss:$0 sm:$0xff]  ;;  %v5594_v32 = vshrl.u32 %v755_v27, 7  ;;  %v10786_v38 = vmov 1  }
  0x6c   : > { %s13199_s28 = smov (!%p487_p8, %s4571_s28), 15  ;;  %5045 = vset.pattern.permute.xlu0 %v10782_v7  ;;  %s5599_s16 = sld [smem:[#allocation6 + $0x10]]  ;;  %v10788_v41 = vmov 18   ;;  %v5633_v43 = vld [vmem:[%s5526_s23 + $0x8] sm:$0xff]   ;;  %v5636_v44 = vld [vmem:[%s5526_s23 + $0x18] sm:$0xff]   ;;  %v4838_v57 = vld [vmem:[%s5526_s23] sm:$0xff]  }
  0x6d   : > { %s4572_s19 = sshll.u32 %s13199_s28, 2  ;;  %s5601_s15 = sld [smem:[#allocation6 + $0x90]]  ;;  %v5608_v34 = vsub.s32 0, %v5594_v32  ;;  %v5613_v35 = vsub.s32 1, %v5594_v32  ;;  %v5616_v36 = vsub.s32 2, %v5594_v32  ;;  %v5619_v37 = vsub.s32 3, %v5594_v32 }
  0x6e   : > { %s5603_s13 = sld [smem:[#allocation6]]  ;;  %v5625_v39 = vsub.s32 4, %v5594_v32  ;;  %v5628_v40 = vsub.s32 5, %v5594_v32  ;;  %v5641_v45 = vsub.s32 6, %v5594_v32  ;;  %v5647_v47 = vld [vmem:[%s5526_s23 + $0x28] sm:$0xff]   ;;  %v5654_v48 = vld [vmem:[%s5526_s23 + $0x38] sm:$0xff]   ;;  %v5678_v54 = vunpack.c.l.bf16 %v5633_v43 }
  0x6f   : > { %v5156_v1 = vld [vmem:[%s11537_s4] sm:$0xff]   ;;  %v5157_v5 = vld [vmem:[%s11537_s4 + $0x8] sm:$0xff]   ;;  %s5605_s24 = sld [smem:[#allocation6 + $0x80]]  ;;  %11544 = vst [vmem:[#allocation25_spill] sm:$0xff] %v5608_v34  ;;  %11545 = vst [vmem:[#allocation26_spill] sm:$0xff] %v5613_v35  ;;  %v5681_v55 = vunpack.c.l.bf16 %v5636_v44  ;;  %v5699_v60 = vunpack.c.l.bf16 %v5647_v47  ;;  %v10784_v0 = vmov 19  }
  0x70   : > { %v505_v3 = vld [vmem:[%s11538_s1] sm:$0xf]  ;;  %4910 = vmatprep.mubr.msk.bf16.mxu0 %vm540_vm1, %v5156_v1  ;;  %s5610_s14 = sld [smem:[#allocation6 + $0x110]]  ;;  %11546 = vst [vmem:[#allocation27_spill] sm:$0xff] %v5616_v36  ;;  %11547 = vst [vmem:[#allocation28_spill] sm:$0xff] %v5619_v37  ;;  %v5657_v49 = vld [vmem:[%s5526_s23 + $0x48] sm:$0xff]   ;;  %v5718_v1 = vunpack.c.l.bf16 %v5654_v48 }
  0x71   : > { %4932 = vmatprep.subr.msk.bf16.mxu0 %vm547_vm0, %v505_v3  ;;  %v549_v4 = vsel %vm547_vm0, %v505_v3, 0  ;;  %v508_v6 = vld [vmem:[%s11539_s5 + $0x10] sm:$0xff]  ;;  %v506_v8 = vld [vmem:[%s11539_s5] sm:$0xff]  ;;  %s490_s27 = scalar_lea.vmem %s11540_s0, %s4572_s19  ;;  %v509_v9 = vld [vmem:[%s11539_s5 + $0x18] sm:$0xff]  ;;  %s5622_s19 = sld [smem:[#allocation6 + $0x190]]  ;;  %11548 = vst [vmem:[#allocation29_spill] sm:$0xff] %v5625_v39  ;;  %v5721_v2 = vunpack.c.l.bf16 %v5657_v49 }
  0x72   : > { %4909 = vmatpush3.bf16.msra.mxu0 %v549_v4  ;;  %522 = vperm.xlu1 %5046, %v508_v6   ;;  %v507_v10 = vld [vmem:[%s11539_s5 + $0x8] sm:$0xff]  ;;  %v5154_v11 = vld [vmem:[%s490_s27] sm:$0xff]   ;;  %11549 = vst [vmem:[#allocation30_spill] sm:$0xff] %v5628_v40  ;;  %s5638_s17 = sld [smem:[#allocation6 + $0x210]]  ;;  %11550 = vst [vmem:[#allocation31_spill] sm:$0xff] %v5641_v45  ;;  %v5702_v61 = vstv %s5599_s16  ;;  %s5729_s28 = sld [smem:[#allocation6 + $0x11]] }
  0x73   : > { %512 = vperm.xlu0 %5045, %v506_v8   ;;  %v5155_v12 = vld [vmem:[%s490_s27 + $0x8] sm:$0xff]   ;;  %4916 = vmatprep.mubr.msk.bf16.mxu1 %vm540_vm1, %v5154_v11  ;;  %s5649_s9 = sld [smem:[#allocation6 + $0x290]]  ;;  %11556 = vst [vmem:[#allocation37_spill] sm:$0xff] %v5678_v54  ;;  %11557 = vst [vmem:[#allocation38_spill] sm:$0xff] %v5681_v55  ;;  %v5684_v56 = vld [vmem:[%s5526_s23 + $0x58] sm:$0xff]   ;;  %v5705_v62 = vstv %s5601_s15  ;;  %s5731_s25 = sld [smem:[#allocation6 + $0x91]]  ;;  %v5740_v8 = vunpack.c.l.bf16 %v4838_v57  ;;  %v5750_v11 = vmul.f32 %v5678_v54, %v5702_v61 }
  0x74   : > { %4917 = vmatmul.mubr.msk.bf16.vlgmr.msra.gmra.mrb[0].mxu1 %vm540_vm1, %v5155_v12  ;;  %s5651_s27 = sld [smem:[#allocation6 + $0x100]]  ;;  %11560 = vst [vmem:[#allocation41_spill] sm:$0xff] %v5699_v60  ;;  %11561 = vst [vmem:[#allocation42_spill] sm:$0xff] %v5702_v61  ;;  %v5724_v3 = vstv %s5603_s13  ;;  %s5743_s16 = sld [smem:[#allocation6 + $0x111]]  ;;  %v5754_v12 = vmul.f32 %v5681_v55, %v5705_v62 }
  0x75   : > { %4911 = vmatmul.mubr.msk.bf16.vlgmr.msra.gmra.mrb[0].mxu0 %vm540_vm1, %v5157_v5  ;;  %s5663_s30 = sld [smem:[#allocation6 + $0x180]]  ;;  %11562 = vst [vmem:[#allocation43_spill] sm:$0xff] %v5705_v62  ;;  %11564 = vst [vmem:[#allocation45_spill] sm:$0xff] %v5718_v1  ;;  %v5727_v4 = vstv %s5605_s24  ;;  %v5735_v5 = vunpack.c.l.bf16 %v5684_v56  ;;  %s5763_s15 = sld [smem:[#allocation6 + $0x191]] }
  0x76   : > { %527 = vperm.xlu1 %5046, %v509_v9   ;;  %s5686_s12 = sld [smem:[#allocation6 + $0x200]]  ;;  %11565 = vst [vmem:[#allocation46_spill] sm:$0xff] %v5721_v2  ;;  %11566 = vst [vmem:[#allocation47_spill] sm:$0xff] %v5724_v3  ;;  %v5738_v6 = vstv %s5610_s14  ;;  %v4886_v9 = vld [vmem:[%s5526_s23 + $0x10] sm:$0xff]   ;;  %s5778_s13 = sld [smem:[#allocation6 + $0x211]] }
  0x77   : > { %517 = vperm.xlu0 %5045, %v507_v10   ;;  %s5707_s26 = sld [smem:[#allocation7 + $0x80]]  ;;  %11567 = vst [vmem:[#allocation48_spill] sm:$0xff] %v5727_v4  ;;  %11568 = vst [vmem:[#allocation49_spill] sm:$0xff] %v5735_v5  ;;  %v5746_v10 = vsub.s32 7, %v5594_v32  ;;  %s5780_s24 = sld [smem:[#allocation6 + $0x1]]  ;;  %v10792_v32 = vmov 20  }
  0x78   : > { %s5709_s22 = sld [smem:[#allocation6 + $0x280]]  ;;  %11569 = vst [vmem:[#allocation50_spill] sm:$0xff] %v5738_v6  ;;  %11570 = vst [vmem:[#allocation51_spill] sm:$0xff] %v5740_v8  ;;  %s5799_s14 = sld [smem:[#allocation6 + $0x81]] }
  0x79   : > { %11571 = vst [vmem:[#allocation52_spill] sm:$0xff] %v5746_v10  ;;  %11572 = vst [vmem:[#allocation53_spill] sm:$0xff] %v5750_v11  ;;  %s5858_s0 = sld [smem:[#allocation6 + $0x112]]  ;;  %s5864_s1 = sld [smem:[#allocation7]] }
  0x7a   : > { %5047 = vset.pattern.permute.xlu1 %v10790_v13  ;;  %11573 = vst [vmem:[#allocation54_spill] sm:$0xff] %v5754_v12  ;;  %v5795_v27 = vstv %s5651_s27  ;;  %s5838_s27 = sld [smem:[#allocation6 + $0x181]]  ;;  %s6513_s5 = sld [smem:[#allocation6 + $0x29a]] }
  0x7b   : > { %11582 = vst [vmem:[#allocation63_spill] sm:$0xff] %v5795_v27  ;;  %v5810_v57 = vstv %s5663_s30  ;;  %s5840_s30 = sld [smem:[#allocation6 + $0x92]]  ;;  %s5972_s3 = sld [smem:[#allocation7 + $0x81]] }
  0x7c   : > { %11585 = vst [vmem:[#allocation66_spill] sm:$0xff] %v5810_v57  ;;  %s6498_s4 = sld [smem:[#allocation6 + $0x19]]  ;;  %p492_p9 = scmp.lt.s32.totalorder %s5434_s21, 3 }
  0x7d   : > { %p13189_p1 = scmp.ne.s32.totalorder %s11522_s29, 0 }
  0x81   : > { %v6113_v11 = vstv %s5972_s3  ;;  %s6145_s3 = sld [smem:[#allocation6 + $0x195]] }
  0x82   : > { %11653 = vst [vmem:[#allocation133_spill] sm:$0xff] %v6113_v11 }
  0xf1   : > { %v523_v14 = vpop.permute.xlu1 %522 }
  0xf2   : > { %v513_v42 = vpop.permute.xlu0 %512 }
  0xf5   : > { %v528_v16 = vpop.permute.xlu1 %527 }
 0x147   : > { %v4918_v22 = vpop.f32.mrb[0].mxu1 }
 0x148   : > { %v4912_v15 = vpop.f32.mrb[0].mxu0  ;;  %v5582_v23 = vadd.f32 %v4918_v22, %v4578_v19  ;;  %v665_v24 = vpop.f32.mrb[1].mxu1  ;;  %v4890_v22 = vld [vmem:[%s5526_s23 + $0x30] sm:$0xff]  }
 0x149   : > { %v5575_v17 = vadd.f32 %v4912_v15, %v523_v14  ;;  %v585_v18 = vpop.f32.mrb[1].mxu0  ;;  %v4919_v26 = vpop.f32.mrb[2].mxu1  ;;  %v5592_v31 = vadd.f32 %v4578_v19, %v665_v24  ;;  %v5757_v14 = vstv %s5622_s19  ;;  %s5801_s19 = sld [smem:[#allocation6 + $0x12]]  ;;  %v5835_v13 = vunpack.c.l.bf16 %v4890_v22 }
 0x14a   : > { %v4913_v20 = vpop.f32.mrb[2].mxu0  ;;  %11541 = vst [vmem:[#allocation22_spill] sm:$0xff] %v5582_v23  ;;  %v5586_v28 = vadd.f32 %v4919_v26, %v4578_v19  ;;  %2573 = vperm.xlu1 %5047, %v5582_v23   ;;  %747 = vperm.xlu0 %5045, %v5582_v23   ;;  %v668_v29 = vpop.f32.mrb[3].mxu1  ;;  %v5644_v46 = vadd.f32 %v585_v18, %v513_v42  ;;  %11574 = vst [vmem:[#allocation55_spill] sm:$0xff] %v5757_v14  ;;  %v5792_v26 = vstv %s5649_s9  ;;  %s5819_s9 = sld [smem:[#allocation6 + $0x101]] }
 0x14b   : > { %v5580_v21 = vadd.f32 %v4913_v20, %v528_v16  ;;  %v5590_v30 = vadd.f32 %v4578_v19, %v668_v29  ;;  %11543 = vst [vmem:[#allocation24_spill] sm:$0xff] %v5592_v31  ;;  %v5661_v50 = vrot.slane %v5575_v17, %v5608_v34  ;;  %v5667_v51 = vrot.slane %v5575_v17, %v5613_v35  ;;  %v4888_v20 = vld [vmem:[%s5526_s23 + $0x20] sm:$0xff]  }
 0x14c   : > { %11551 = vst [vmem:[#allocation32_spill] sm:$0xff] %v5644_v46  ;;  %v5671_v52 = vrot.slane %v5575_v17, %v5616_v36  ;;  %v5675_v53 = vrot.slane %v5575_v17, %v5619_v37  ;;  %v5691_v58 = vrot.slane %v5575_v17, %v5625_v39  ;;  %v5695_v59 = vrot.slane %v5575_v17, %v5628_v40 }
 0x14d   : > { %v4310_v25 = vpack.c.bf16 %v5580_v21, %v5575_v17  ;;  %11542 = vst [vmem:[#allocation23_spill] sm:$0xff] %v5590_v30  ;;  %11552 = vst [vmem:[#allocation33_spill] sm:$0xff] %v5661_v50  ;;  %v5713_v63 = vrot.slane %v5575_v17, %v5641_v45  ;;  %v5761_v15 = vrot.slane %v5644_v46, %v5608_v34  ;;  %v5766_v16 = vstv %s5638_s17  ;;  %s5817_s17 = sld [smem:[#allocation6 + $0x291]] }
 0x14e   : > { %5048 = vset.pattern.permute.xlu1 %v10780_v33  ;;  %737 = vperm.xlu0 %5045, %v5592_v31   ;;  %11553 = vst [vmem:[#allocation34_spill] sm:$0xff] %v5667_v51  ;;  %11554 = vst [vmem:[#allocation35_spill] sm:$0xff] %v5671_v52  ;;  %v5770_v18 = vmul.f32 %v5678_v54, %v5724_v3  ;;  %v5774_v19 = vmul.f32 %v5681_v55, %v5727_v4  ;;  %v5797_v29 = vunpack.c.l.bf16 %v4886_v9 }
 0x14f   : > { %4926 = vmatprep.subr.bf16.mxu1 %v4310_v25  ;;  %2679 = vperm.xlu1 %5048, %v5582_v23   ;;  %11555 = vst [vmem:[#allocation36_spill] sm:$0xff] %v5675_v53  ;;  %11558 = vst [vmem:[#allocation39_spill] sm:$0xff] %v5691_v58  ;;  %v5784_v24 = vrot.slane %v5580_v21, %v5608_v34  ;;  %v5807_v42 = vmul.f32 %v5718_v1, %v5757_v14  ;;  %v5847_v34 = vstv %s5707_s26  ;;  %s5874_s26 = sld [smem:[#allocation6 + $0x192]] }
 0x150   : > { %4927 = vmatpush3.bf16.xpose.msra.mxu1 %v4310_v25  ;;  %11559 = vst [vmem:[#allocation40_spill] sm:$0xff] %v5695_v59  ;;  %11563 = vst [vmem:[#allocation44_spill] sm:$0xff] %v5713_v63  ;;  %v5789_v25 = vmul.f32 %v5699_v60, %v5738_v6  ;;  %v5815_v9 = vmul.f32 %v5740_v8, %v5724_v3  ;;  %v5823_v7 = vrot.slane %v5575_v17, %v5746_v10  ;;  %v11600_v59 = vmov 20  }
 0x151   : > { %11575 = vst [vmem:[#allocation56_spill] sm:$0xff] %v5761_v15  ;;  %11576 = vst [vmem:[#allocation57_spill] sm:$0xff] %v5766_v16  ;;  %v5844_v17 = vmul.f32 %v5735_v5, %v5792_v26  ;;  %v5851_v3 = vmul.f32 %v5699_v60, %v5795_v27  ;;  %v5862_v22 = vmul.f32 %v5718_v1, %v5810_v57  ;;  %v5872_v63 = vstv %s5731_s25  ;;  %s5911_s25 = sld [smem:[#allocation6 + $0x292]] }
 0x152   : > { %5068 = vset.pattern.permute.xlu0 %v10786_v38  ;;  %11577 = vst [vmem:[#allocation58_spill] sm:$0xff] %v5770_v18  ;;  %11578 = vst [vmem:[#allocation59_spill] sm:$0xff] %v5774_v19  ;;  %v5831_v38 = vstv %s5686_s12  ;;  %s5856_s12 = sld [smem:[#allocation6 + $0x201]]  ;;  %v5888_v53 = vstv %s5743_s16  ;;  %v5909_v52 = vstv %s5763_s15  ;;  %s5928_s16 = sld [smem:[#allocation6 + $0x13]] }
 0x153   : > { %5049 = vset.pattern.permute.xlu1 %v10788_v41  ;;  %846 = vperm.xlu0 %5068, %v5592_v31   ;;  %11579 = vst [vmem:[#allocation60_spill] sm:$0xff] %v5784_v24  ;;  %11580 = vst [vmem:[#allocation61_spill] sm:$0xff] %v5789_v25  ;;  %v5869_v24 = vstv %s5729_s28  ;;  %s5892_s28 = sld [smem:[#allocation6 + $0x212]]  ;;  %s5945_s15 = sld [smem:[#allocation6 + $0x93]]  ;;  %v6117_v15 = vmul.f32 %v5835_v13, %v5909_v52 }
 0x154   : > { %2785 = vperm.xlu1 %5049, %v5582_v23   ;;  %11581 = vst [vmem:[#allocation62_spill] sm:$0xff] %v5792_v26  ;;  %11583 = vst [vmem:[#allocation64_spill] sm:$0xff] %v5797_v29 }
 0x155   : > { %11584 = vst [vmem:[#allocation65_spill] sm:$0xff] %v5807_v42  ;;  %11586 = vst [vmem:[#allocation67_spill] sm:$0xff] %v5815_v9  ;;  %v6005_v9 = vstv %s5864_s1  ;;  %s6034_s1 = sld [smem:[#allocation6 + $0x293]] }
 0x156   : > { %11587 = vst [vmem:[#allocation68_spill] sm:$0xff] %v5823_v7  ;;  %11589 = vst [vmem:[#allocation70_spill] sm:$0xff] %v5831_v38 }
 0x157   : > { %5070 = vset.pattern.permute.xlu0 %v10780_v33  ;;  %v4892_v33 = vld [vmem:[%s5526_s23 + $0x40] sm:$0xff]   ;;  %11591 = vst [vmem:[#allocation72_spill] sm:$0xff] %v5835_v13  ;;  %11592 = vst [vmem:[#allocation73_spill] sm:$0xff] %v5844_v17  ;;  %v10807_v17 = vmov 21   ;;  %v6049_v12 = vstv %s5911_s25  ;;  %s6126_s25 = sld [smem:[#allocation6 + $0x294]] }
 0x158   : > { %5050 = vset.pattern.permute.xlu1 %v10784_v0  ;;  %2671 = vperm.xlu0 %5070, %v5592_v31   ;;  %v5828_v0 = vmul.f32 %v5721_v2, %v5766_v16  ;;  %11593 = vst [vmem:[#allocation74_spill] sm:$0xff] %v5847_v34  ;;  %11594 = vst [vmem:[#allocation75_spill] sm:$0xff] %v5851_v3  ;;  %v5866_v7 = vunpack.c.l.bf16 %v4892_v33  ;;  %v5879_v34 = vmul.f32 %v5721_v2, %v5831_v38 }
 0x159   : > { %2891 = vperm.xlu1 %5050, %v5582_v23   ;;  %11596 = vst [vmem:[#allocation77_spill] sm:$0xff] %v5862_v22  ;;  %11598 = vst [vmem:[#allocation79_spill] sm:$0xff] %v5869_v24  ;;  %v5885_v33 = vmul.f32 %v5797_v29, %v5727_v4  ;;  %v5982_v22 = vstv %s5801_s19  ;;  %v5993_v42 = vstv %s5856_s12  ;;  %s6001_s19 = sld [smem:[#allocation6 + $0x213]]  ;;  %v6016_v3 = vstv %s5874_s26  ;;  %s6073_s12 = sld [smem:[#allocation6 + $0x15]] }
 0x15a   : > { %11588 = vst [vmem:[#allocation69_spill] sm:$0xff] %v5828_v0  ;;  %11597 = vst [vmem:[#allocation78_spill] sm:$0xff] %v5866_v7  ;;  %v5940_v0 = vrot.slane %v5644_v46, %v5613_v35  ;;  %v6071_v18 = vstv %s5928_s16  ;;  %s6091_s26 = sld [smem:[#allocation6 + $0x214]]  ;;  %s6128_s16 = sld [smem:[#allocation6 + $0x16]] }
 0x15b   : > { %11599 = vst [vmem:[#allocation80_spill] sm:$0xff] %v5872_v63  ;;  %11601 = vst [vmem:[#allocation81_spill] sm:$0xff] %v5879_v34  ;;  %v5906_v34 = vmul.f32 %v5835_v13, %v5810_v57  ;;  %v5926_v57 = vstv %s5780_s24  ;;  %s5963_s24 = sld [smem:[#allocation6 + $0x193]]  ;;  %v6121_v50 = vmul.f32 %v5678_v54, %v6071_v18 }
 0x15c   : > { %5071 = vset.pattern.permute.xlu0 %v10788_v41  ;;  %v5833_v41 = vunpack.c.l.bf16 %v4888_v20  ;;  %v5854_v20 = vstv %s5709_s22  ;;  %11603 = vst [vmem:[#allocation83_spill] sm:$0xff] %v5885_v33  ;;  %11604 = vst [vmem:[#allocation84_spill] sm:$0xff] %v5888_v53  ;;  %s5890_s22 = sld [smem:[#allocation6 + $0x281]]  ;;  %v10818_v33 = vmov 22  }
 0x15d   : > { %5051 = vset.pattern.permute.xlu1 %v10792_v32  ;;  %2777 = vperm.xlu0 %5071, %v5592_v31   ;;  %v4894_v32 = vld [vmem:[%s5526_s23 + $0x50] sm:$0xff]   ;;  %11595 = vst [vmem:[#allocation76_spill] sm:$0xff] %v5854_v20  ;;  %11607 = vst [vmem:[#allocation87_spill] sm:$0xff] %v5906_v34  ;;  %v5932_v34 = vmul.f32 %v5866_v7, %v5831_v38 }
 0x15e   : > { %2997 = vperm.xlu1 %5051, %v5582_v23   ;;  %11590 = vst [vmem:[#allocation71_spill] sm:$0xff] %v5833_v41  ;;  %v5881_v58 = vunpack.c.l.bf16 %v4894_v32  ;;  %v5898_v32 = vmul.f32 %v5735_v5, %v5854_v20  ;;  %v5902_v4 = vmul.f32 %v5833_v41, %v5795_v27  ;;  %11608 = vst [vmem:[#allocation88_spill] sm:$0xff] %v5909_v52 }
 0x15f   : > { %v5920_v27 = vmul.f32 %v5681_v55, %v5872_v63  ;;  %11612 = vst [vmem:[#allocation92_spill] sm:$0xff] %v5926_v57  ;;  %11613 = vst [vmem:[#allocation93_spill] sm:$0xff] %v5932_v34  ;;  %v5955_v34 = vmul.f32 %v5718_v1, %v5909_v52  ;;  %v6139_v11 = vstv %s6001_s19  ;;  %s6233_s19 = sld [smem:[#allocation6 + $0x196]] }
 0x160   : > { %11602 = vst [vmem:[#allocation82_spill] sm:$0xff] %v5881_v58  ;;  %11605 = vst [vmem:[#allocation85_spill] sm:$0xff] %v5898_v32  ;;  %v5923_v32 = vstv %s5778_s13  ;;  %s5947_s13 = sld [smem:[#allocation6 + $0x113]]  ;;  %v5951_v38 = vmul.f32 %v5881_v58, %v5854_v20  ;;  %v6297_v30 = vmul.f32 %v5881_v58, %v6049_v12 }
 0x161   : > { %5073 = vset.pattern.permute.xlu0 %v11600_v59  ;;  %11606 = vst [vmem:[#allocation86_spill] sm:$0xff] %v5902_v4  ;;  %11610 = vst [vmem:[#allocation90_spill] sm:$0xff] %v5920_v27  ;;  %v5936_v4 = vmul.f32 %v5699_v60, %v5888_v53  ;;  %v5943_v27 = vstv %s5799_s14  ;;  %s5965_s14 = sld [smem:[#allocation6 + $0x14]]  ;;  %v5970_v20 = vmul.f32 %v5721_v2, %v5923_v32 }
 0x162   : > { %5052 = vset.pattern.permute.xlu1 %v10807_v17  ;;  %2989 = vperm.xlu0 %5073, %v5592_v31   ;;  %v5916_v17 = vmul.f32 %v5678_v54, %v5869_v24  ;;  %11611 = vst [vmem:[#allocation91_spill] sm:$0xff] %v5923_v32  ;;  %11615 = vst [vmem:[#allocation95_spill] sm:$0xff] %v5940_v0  ;;  %v5961_v0 = vstv %s5819_s9  ;;  %v6023_v51 = vstv %s5890_s22  ;;  %s6051_s9 = sld [smem:[#allocation6 + $0x114]]  ;;  %s6093_s22 = sld [smem:[#allocation6 + $0x95]] }
 0x163   : > { %3103 = vperm.xlu1 %5052, %v5582_v23   ;;  %11614 = vst [vmem:[#allocation94_spill] sm:$0xff] %v5936_v4  ;;  %11616 = vst [vmem:[#allocation96_spill] sm:$0xff] %v5943_v27  ;;  %v5958_v4 = vstv %s5817_s17  ;;  %s5984_s17 = sld [smem:[#allocation6 + $0x94]] }
 0x164   : > { %11609 = vst [vmem:[#allocation89_spill] sm:$0xff] %v5916_v17  ;;  %11617 = vst [vmem:[#allocation97_spill] sm:$0xff] %v5951_v38  ;;  %v5976_v38 = vmul.f32 %v5740_v8, %v5926_v57  ;;  %v5996_v17 = vstv %s5840_s30  ;;  %s6060_s30 = sld [smem:[#allocation7 + $0x82]]  ;;  %v6644_v57 = vstv %s6498_s4  ;;  %s6677_s4 = sld [smem:[#allocation6 + $0x19e]] }
 0x165   : > { %11618 = vst [vmem:[#allocation98_spill] sm:$0xff] %v5955_v34  ;;  %11619 = vst [vmem:[#allocation99_spill] sm:$0xff] %v5958_v4  ;;  %v5979_v34 = vstv %s5838_s27  ;;  %s6053_s27 = sld [smem:[#allocation6 + $0x194]] }
 0x166   : > { %11620 = vst [vmem:[#allocation100_spill] sm:$0xff] %v5961_v0  ;;  %5075 = vset.pattern.permute.xlu0 %v10818_v33  ;;  %11621 = vst [vmem:[#allocation101_spill] sm:$0xff] %v5970_v20  ;;  %v5990_v20 = vmul.f32 %v5797_v29, %v5943_v27  ;;  %v6020_v25 = vmul.f32 %v5835_v13, %v5979_v34  ;;  %v11746_v27 = vmov 28  }
 0x167   : > { %11622 = vst [vmem:[#allocation102_spill] sm:$0xff] %v5976_v38  ;;  %11623 = vst [vmem:[#allocation103_spill] sm:$0xff] %v5979_v34  ;;  %5053 = vset.pattern.permute.xlu1 %v10818_v33  ;;  %3201 = vperm.xlu0 %5075, %v5592_v31   ;;  %v5999_v38 = vstv %s5858_s0  ;;  %v6009_v33 = vmul.f32 %v5735_v5, %v5958_v4  ;;  %s6025_s0 = sld [smem:[#allocation7 + $0x1]] }
 0x168   : > { %11624 = vst [vmem:[#allocation104_spill] sm:$0xff] %v5982_v22  ;;  %11625 = vst [vmem:[#allocation105_spill] sm:$0xff] %v5990_v20  ;;  %3209 = vperm.xlu1 %5053, %v5582_v23   ;;  %v6013_v20 = vmul.f32 %v5833_v41, %v5961_v0  ;;  %v6046_v19 = vmul.f32 %v5699_v60, %v5999_v38 }
 0x169   : > { %11626 = vst [vmem:[#allocation106_spill] sm:$0xff] %v5993_v42  ;;  %11627 = vst [vmem:[#allocation107_spill] sm:$0xff] %v5996_v17 }
 0x16a   : > { %11628 = vst [vmem:[#allocation108_spill] sm:$0xff] %v5999_v38  ;;  %11629 = vst [vmem:[#allocation109_spill] sm:$0xff] %v6005_v9  ;;  %v6029_v9 = vmul.f32 %v5678_v54, %v5982_v22 }
 0x16b   : > { %11630 = vst [vmem:[#allocation110_spill] sm:$0xff] %v6009_v33  ;;  %11631 = vst [vmem:[#allocation111_spill] sm:$0xff] %v6013_v20  ;;  %v6032_v33 = vstv %s5892_s28  ;;  %v6038_v20 = vmul.f32 %v5866_v7, %v5993_v42  ;;  %s6110_s28 = sld [smem:[#allocation6 + $0x115]]  ;;  %v11706_v42 = vmov 26  }
 0x16c   : > { %11632 = vst [vmem:[#allocation112_spill] sm:$0xff] %v6016_v3  ;;  %11633 = vst [vmem:[#allocation113_spill] sm:$0xff] %v6020_v25  ;;  %v6042_v25 = vmul.f32 %v5681_v55, %v5996_v17 }
 0x16d   : > { %11634 = vst [vmem:[#allocation114_spill] sm:$0xff] %v6023_v51  ;;  %11635 = vst [vmem:[#allocation115_spill] sm:$0xff] %v6029_v9  ;;  %v10822_v9 = vmov 24  }
 0x16e   : > { %11636 = vst [vmem:[#allocation116_spill] sm:$0xff] %v6032_v33  ;;  %11637 = vst [vmem:[#allocation117_spill] sm:$0xff] %v6038_v20  ;;  %5077 = vset.pattern.permute.xlu0 %v10822_v9  ;;  %v6058_v20 = vmul.f32 %v5718_v1, %v6016_v3  ;;  %v10828_v9 = vmov 23  }
 0x16f   : > { %11638 = vst [vmem:[#allocation118_spill] sm:$0xff] %v6042_v25  ;;  %11639 = vst [vmem:[#allocation119_spill] sm:$0xff] %v6046_v19  ;;  %v6064_v19 = vmul.f32 %v5740_v8, %v5869_v24  ;;  %v6068_v25 = vmul.f32 %v5797_v29, %v5872_v63  ;;  %5054 = vset.pattern.permute.xlu1 %v10828_v9  ;;  %3413 = vperm.xlu0 %5077, %v5592_v31  }
 0x170   : > { %11640 = vst [vmem:[#allocation120_spill] sm:$0xff] %v6049_v12  ;;  %11641 = vst [vmem:[#allocation121_spill] sm:$0xff] %v6058_v20  ;;  %v6079_v24 = vmul.f32 %v5881_v58, %v6023_v51  ;;  %v6083_v63 = vmul.f32 %v5721_v2, %v6032_v33  ;;  %v6089_v20 = vstv %s5947_s13  ;;  %3315 = vperm.xlu1 %5054, %v5582_v23   ;;  %s6178_s13 = sld [smem:[#allocation6 + $0x215]] }
 0x171   : > { %11642 = vst [vmem:[#allocation122_spill] sm:$0xff] %v6064_v19  ;;  %11643 = vst [vmem:[#allocation123_spill] sm:$0xff] %v6068_v25  ;;  %v6086_v25 = vstv %s5945_s15  ;;  %v6098_v9 = vmul.f32 %v5735_v5, %v6049_v12  ;;  %v6108_v19 = vstv %s5965_s14  ;;  %v6136_v52 = vmul.f32 %v5699_v60, %v6089_v20  ;;  %s6164_s15 = sld [smem:[#allocation6 + $0x96]] }
 0x172   : > { %11644 = vst [vmem:[#allocation124_spill] sm:$0xff] %v6071_v18  ;;  %11645 = vst [vmem:[#allocation125_spill] sm:$0xff] %v6079_v24  ;;  %v6102_v24 = vmul.f32 %v5833_v41, %v5888_v53  ;;  %v6132_v53 = vmul.f32 %v5681_v55, %v6086_v25  ;;  %s6201_s14 = sld [smem:[#allocation6 + $0x116]]  ;;  %v6269_v18 = vstv %s6128_s16  ;;  %s6344_s16 = sld [smem:[#allocation6 + $0x117]] }
 0x173   : > { %11646 = vst [vmem:[#allocation126_spill] sm:$0xff] %v6083_v63  ;;  %11647 = vst [vmem:[#allocation127_spill] sm:$0xff] %v6086_v25  ;;  %v6105_v63 = vstv %s5963_s24  ;;  %s6193_s24 = sld [smem:[#allocation7 + $0x83]] }
 0x174   : > { %11648 = vst [vmem:[#allocation128_spill] sm:$0xff] %v6089_v20  ;;  %11649 = vst [vmem:[#allocation129_spill] sm:$0xff] %v6098_v9  ;;  %v6124_v9 = vstv %s5984_s17  ;;  %v6208_v20 = vmul.f32 %v5833_v41, %v5999_v38  ;;  %s6217_s17 = sld [smem:[#allocation6 + $0x295]] }
 0x175   : > { %11650 = vst [vmem:[#allocation130_spill] sm:$0xff] %v6102_v24  ;;  %11651 = vst [vmem:[#allocation131_spill] sm:$0xff] %v6105_v63  ;;  %v10837_v24 = vmov 26  }
 0x176   : > { %11652 = vst [vmem:[#allocation132_spill] sm:$0xff] %v6108_v19  ;;  %11654 = vst [vmem:[#allocation134_spill] sm:$0xff] %v6117_v15  ;;  %v6143_v15 = vmul.f32 %v5740_v8, %v5982_v22  ;;  %5079 = vset.pattern.permute.xlu0 %v10837_v24  ;;  %v11665_v24 = vmov 24  }
 0x177   : > { %11655 = vst [vmem:[#allocation135_spill] sm:$0xff] %v6121_v50  ;;  %11656 = vst [vmem:[#allocation136_spill] sm:$0xff] %v6124_v9  ;;  %v6150_v50 = vmul.f32 %v5866_v7, %v5923_v32  ;;  %5055 = vset.pattern.permute.xlu1 %v11665_v24  ;;  %3625 = vperm.xlu0 %5079, %v5592_v31   ;;  %v6169_v32 = vstv %s6025_s0  ;;  %s6244_s0 = sld [smem:[#allocation7 + $0x84]] }
 0x178   : > { %11657 = vst [vmem:[#allocation137_spill] sm:$0xff] %v6132_v53  ;;  %11658 = vst [vmem:[#allocation138_spill] sm:$0xff] %v6136_v52  ;;  %v6154_v53 = vmul.f32 %v5718_v1, %v6105_v63  ;;  %v6158_v52 = vmul.f32 %v5797_v29, %v5996_v17  ;;  %3421 = vperm.xlu1 %5055, %v5582_v23   ;;  %v6199_v63 = vstv %s6053_s27  ;;  %s6273_s27 = sld [smem:[#allocation6 + $0x17]] }
 0x179   : > { %11659 = vst [vmem:[#allocation139_spill] sm:$0xff] %v6139_v11  ;;  %11660 = vst [vmem:[#allocation140_spill] sm:$0xff] %v6143_v15  ;;  %v6162_v15 = vmul.f32 %v5678_v54, %v6108_v19  ;;  %v6318_v51 = vmul.f32 %v5835_v13, %v6199_v63 }
 0x17a   : > { %11661 = vst [vmem:[#allocation141_spill] sm:$0xff] %v6150_v50  ;;  %11662 = vst [vmem:[#allocation142_spill] sm:$0xff] %v6154_v53  ;;  %v6172_v50 = vstv %s6034_s1  ;;  %v6176_v53 = vmul.f32 %v5681_v55, %v6124_v9  ;;  %s6253_s1 = sld [smem:[#allocation6 + $0x18]] }
 0x17b   : > { %11663 = vst [vmem:[#allocation143_spill] sm:$0xff] %v6158_v52  ;;  %11664 = vst [vmem:[#allocation144_spill] sm:$0xff] %v6162_v15  ;;  %v6182_v52 = vrot.slane %v5580_v21, %v5616_v36  ;;  %v6187_v15 = vmul.f32 %v5881_v58, %v5958_v4  ;;  %v6212_v4 = vmul.f32 %v5740_v8, %v6108_v19 }
 0x17c   : > { %11666 = vst [vmem:[#allocation145_spill] sm:$0xff] %v6169_v32  ;;  %11667 = vst [vmem:[#allocation146_spill] sm:$0xff] %v6172_v50  ;;  %v6191_v32 = vmul.f32 %v5721_v2, %v6139_v11  ;;  %v6228_v11 = vstv %s6091_s26  ;;  %s6306_s26 = sld [smem:[#allocation6 + $0x97]] }
 0x17d   : > { %11668 = vst [vmem:[#allocation147_spill] sm:$0xff] %v6176_v53  ;;  %11669 = vst [vmem:[#allocation148_spill] sm:$0xff] %v6182_v52  ;;  %v6196_v53 = vstv %s6051_s9  ;;  %v6204_v52 = vstv %s6060_s30  ;;  %s6271_s9 = sld [smem:[#allocation6 + $0x216]] }
 0x17e   : > { %11670 = vst [vmem:[#allocation149_spill] sm:$0xff] %v6187_v15  ;;  %11671 = vst [vmem:[#allocation150_spill] sm:$0xff] %v6191_v32  ;;  %v6215_v15 = vstv %s6073_s12  ;;  %v6221_v32 = vmul.f32 %v5735_v5, %v6172_v50  ;;  %v6238_v25 = vmul.f32 %v5699_v60, %v6196_v53  ;;  %v6251_v50 = vstv %s6110_s28  ;;  %s6291_s30 = sld [smem:[#allocation6 + $0x296]]  ;;  %s6293_s12 = sld [smem:[#allocation6 + $0x98]] }
 0x17f   : > { %11672 = vst [vmem:[#allocation151_spill] sm:$0xff] %v6196_v53  ;;  %11673 = vst [vmem:[#allocation152_spill] sm:$0xff] %v6199_v63  ;;  %s6329_s28 = sld [smem:[#allocation6 + $0x118]] }
 0x180   : > { %11674 = vst [vmem:[#allocation153_spill] sm:$0xff] %v6204_v52  ;;  %11675 = vst [vmem:[#allocation154_spill] sm:$0xff] %v6208_v20  ;;  %v6225_v52 = vmul.f32 %v5835_v13, %v6016_v3  ;;  %v6231_v20 = vstv %s6093_s22  ;;  %s6323_s22 = sld [smem:[#allocation7 + $0x85]] }
 0x181   : > { %11676 = vst [vmem:[#allocation155_spill] sm:$0xff] %v6212_v4  ;;  %11677 = vst [vmem:[#allocation156_spill] sm:$0xff] %v6215_v15  ;;  %v10856_v4 = vmov 28  }
 0x182   : > { %11678 = vst [vmem:[#allocation157_spill] sm:$0xff] %v6221_v32  ;;  %11679 = vst [vmem:[#allocation158_spill] sm:$0xff] %v6225_v52  ;;  %5081 = vset.pattern.permute.xlu0 %v10856_v4  ;;  %v6242_v32 = vmul.f32 %v5718_v1, %v6199_v63  ;;  %v6248_v52 = vmul.f32 %v5797_v29, %v6124_v9  ;;  %v10860_v4 = vmov 25  }
 0x183   : > { %11680 = vst [vmem:[#allocation159_spill] sm:$0xff] %v6228_v11  ;;  %11681 = vst [vmem:[#allocation160_spill] sm:$0xff] %v6231_v20  ;;  %5056 = vset.pattern.permute.xlu1 %v10860_v4  ;;  %3837 = vperm.xlu0 %5081, %v5592_v31   ;;  %v6278_v4 = vmul.f32 %v5721_v2, %v6228_v11 }
 0x184   : > { %11682 = vst [vmem:[#allocation161_spill] sm:$0xff] %v6238_v25  ;;  %11683 = vst [vmem:[#allocation162_spill] sm:$0xff] %v6242_v32  ;;  %v6259_v32 = vmul.f32 %v5866_v7, %v6032_v33  ;;  %v6262_v25 = vstv %s6126_s25  ;;  %3527 = vperm.xlu1 %5056, %v5582_v23   ;;  %s6342_s25 = sld [smem:[#allocation6 + $0x198]]  ;;  %v6431_v34 = vstv %s6291_s30  ;;  %s6478_s30 = sld [smem:[#allocation6 + $0x21a]] }
 0x185   : > { %11684 = vst [vmem:[#allocation163_spill] sm:$0xff] %v6248_v52  ;;  %11685 = vst [vmem:[#allocation164_spill] sm:$0xff] %v6251_v50  ;;  %v6266_v52 = vmul.f32 %v5678_v54, %v6215_v15  ;;  %v6289_v15 = vstv %s6145_s3  ;;  %s6367_s3 = sld [smem:[#allocation6 + $0x197]] }
 0x186   : > { %11686 = vst [vmem:[#allocation165_spill] sm:$0xff] %v6259_v32  ;;  %11687 = vst [vmem:[#allocation166_spill] sm:$0xff] %v6262_v25  ;;  %v6282_v32 = vmul.f32 %v5833_v41, %v6196_v53  ;;  %v6519_v0 = vstv %s6323_s22  ;;  %s6543_s22 = sld [smem:[#allocation7 + $0x88]] }
 0x187   : > { %11688 = vst [vmem:[#allocation167_spill] sm:$0xff] %v6266_v52  ;;  %11689 = vst [vmem:[#allocation168_spill] sm:$0xff] %v6269_v18  ;;  %v6286_v52 = vmul.f32 %v5681_v55, %v6231_v20  ;;  %v6314_v20 = vmul.f32 %v5735_v5, %v6262_v25 }
 0x188   : > { %11690 = vst [vmem:[#allocation169_spill] sm:$0xff] %v6278_v4  ;;  %11691 = vst [vmem:[#allocation170_spill] sm:$0xff] %v6282_v32  ;;  %v6301_v4 = vmul.f32 %v5699_v60, %v6251_v50  ;;  %v6304_v32 = vstv %s6164_s15  ;;  %v6333_v50 = vstv %s6193_s24  ;;  %5057 = vset.pattern.permute.xlu1 %v11706_v42  ;;  %s6369_s15 = sld [smem:[#allocation6 + $0x1a]] }
 0x189   : > { %11692 = vst [vmem:[#allocation171_spill] sm:$0xff] %v6286_v52  ;;  %11693 = vst [vmem:[#allocation172_spill] sm:$0xff] %v6289_v15  ;;  %v6310_v52 = vrot.slane %v5580_v21, %v5625_v39  ;;  %3633 = vperm.xlu1 %5057, %v5582_v23   ;;  %s6382_s24 = sld [smem:[#allocation6 + $0x9a]] }
 0x18a   : > { %11694 = vst [vmem:[#allocation173_spill] sm:$0xff] %v6297_v30  ;;  %11695 = vst [vmem:[#allocation174_spill] sm:$0xff] %v6301_v4  ;;  %v6321_v30 = vstv %s6178_s13  ;;  %v6327_v4 = vmul.f32 %v5740_v8, %v6269_v18  ;;  %s6380_s13 = sld [smem:[#allocation6 + $0x218]] }
 0x18b   : > { %11696 = vst [vmem:[#allocation175_spill] sm:$0xff] %v6304_v32  ;;  %11697 = vst [vmem:[#allocation176_spill] sm:$0xff] %v6310_v52  ;;  %v10874_v52 = vmov 30  }
 0x18c   : > { %11698 = vst [vmem:[#allocation177_spill] sm:$0xff] %v6314_v20  ;;  %11699 = vst [vmem:[#allocation178_spill] sm:$0xff] %v6318_v51  ;;  %5083 = vset.pattern.permute.xlu0 %v10874_v52  ;;  %v6337_v20 = vmul.f32 %v5718_v1, %v6289_v15  ;;  %v6340_v51 = vstv %s6201_s14  ;;  %v6354_v52 = vmul.f32 %v5866_v7, %v6228_v11  ;;  %v6404_v15 = vstv %s6253_s1  ;;  %s6406_s14 = sld [smem:[#allocation6 + $0x217]]  ;;  %s6436_s1 = sld [smem:[#allocation6 + $0x298]] }
 0x18d   : > { %11700 = vst [vmem:[#allocation179_spill] sm:$0xff] %v6321_v30  ;;  %11701 = vst [vmem:[#allocation180_spill] sm:$0xff] %v6327_v4  ;;  %v6348_v4 = vrot.slane %v5580_v21, %v5613_v35  ;;  %4049 = vperm.xlu0 %5083, %v5592_v31   ;;  %v6365_v35 = vmul.f32 %v5678_v54, %v6269_v18 }
 0x18e   : > { %11702 = vst [vmem:[#allocation181_spill] sm:$0xff] %v6333_v50  ;;  %11703 = vst [vmem:[#allocation182_spill] sm:$0xff] %v6337_v20  ;;  %v6357_v50 = vstv %s6217_s17  ;;  %v6361_v20 = vmul.f32 %v5797_v29, %v6304_v32  ;;  %s6415_s17 = sld [smem:[#allocation7 + $0x86]] }
 0x18f   : > { %11704 = vst [vmem:[#allocation183_spill] sm:$0xff] %v6340_v51  ;;  %11705 = vst [vmem:[#allocation184_spill] sm:$0xff] %v6348_v4  ;;  %v6374_v4 = vmul.f32 %v5881_v58, %v6262_v25 }
 0x190   : > { %11707 = vst [vmem:[#allocation185_spill] sm:$0xff] %v6354_v52  ;;  %11708 = vst [vmem:[#allocation186_spill] sm:$0xff] %v6357_v50  ;;  %v6378_v52 = vmul.f32 %v5721_v2, %v6321_v30  ;;  %v6401_v30 = vmul.f32 %v5681_v55, %v6304_v32 }
 0x191   : > { %11709 = vst [vmem:[#allocation187_spill] sm:$0xff] %v6361_v20  ;;  %11710 = vst [vmem:[#allocation188_spill] sm:$0xff] %v6365_v35  ;;  %v6386_v35 = vrot.slane %v5580_v21, %v5641_v45  ;;  %v6390_v20 = vrot.slane %v5580_v21, %v5619_v37  ;;  %v6410_v45 = vmul.f32 %v5735_v5, %v6357_v50  ;;  %v6428_v37 = vstv %s6244_s0  ;;  %s6458_s0 = sld [smem:[#allocation6 + $0x19a]] }
 0x192   : > { %11711 = vst [vmem:[#allocation189_spill] sm:$0xff] %v6374_v4  ;;  %11712 = vst [vmem:[#allocation190_spill] sm:$0xff] %v6378_v52  ;;  %v6394_v4 = vmul.f32 %v5833_v41, %v6340_v51  ;;  %v6397_v52 = vstv %s6233_s19  ;;  %s6420_s19 = sld [smem:[#allocation6 + $0x11a]]  ;;  %v6442_v50 = vrot.slane %v5580_v21, %v5746_v10 }
 0x193   : > { %11713 = vst [vmem:[#allocation191_spill] sm:$0xff] %v6386_v35  ;;  %11714 = vst [vmem:[#allocation192_spill] sm:$0xff] %v6390_v20  ;;  %v6413_v20 = vstv %s6271_s9  ;;  %v6418_v35 = vstv %s6273_s27  ;;  %s6438_s9 = sld [smem:[#allocation6 + $0x297]]  ;;  %s6460_s27 = sld [smem:[#allocation6 + $0x1c]] }
 0x194   : > { %11715 = vst [vmem:[#allocation193_spill] sm:$0xff] %v6394_v4  ;;  %11716 = vst [vmem:[#allocation194_spill] sm:$0xff] %v6397_v52  ;;  %v6424_v4 = vrot.slane %v5580_v21, %v5628_v40  ;;  %v10899_v40 = vmov 27   ;;  %v6465_v21 = vmul.f32 %v5866_v7, %v6413_v20  ;;  %v6473_v10 = vmul.f32 %v5678_v54, %v6418_v35 }
 0x195   : > { %11717 = vst [vmem:[#allocation195_spill] sm:$0xff] %v6401_v30  ;;  %11718 = vst [vmem:[#allocation196_spill] sm:$0xff] %v6404_v15  ;;  %v10895_v30 = vmov 2   ;;  %5058 = vset.pattern.permute.xlu1 %v10899_v40  ;;  %v6469_v40 = vmul.f32 %v5718_v1, %v6397_v52 }
 0x196   : > { %11719 = vst [vmem:[#allocation197_spill] sm:$0xff] %v6410_v45  ;;  %11720 = vst [vmem:[#allocation198_spill] sm:$0xff] %v6413_v20  ;;  %5085 = vset.pattern.permute.xlu0 %v10895_v30  ;;  %v6434_v45 = vstv %s6293_s12  ;;  %v6448_v30 = vmul.f32 %v5835_v13, %v6397_v52  ;;  %3739 = vperm.xlu1 %5058, %v5582_v23   ;;  %s6480_s12 = sld [smem:[#allocation6 + $0x9c]]  ;;  %v6522_v52 = vstv %s6380_s13  ;;  %s6589_s13 = sld [smem:[#allocation6 + $0x219]] }
 0x197   : > { %11721 = vst [vmem:[#allocation199_spill] sm:$0xff] %v6418_v35  ;;  %11722 = vst [vmem:[#allocation200_spill] sm:$0xff] %v6424_v4  ;;  %952 = vperm.xlu0 %5085, %v5592_v31   ;;  %v6452_v4 = vmul.f32 %v5699_v60, %v6340_v51  ;;  %v6511_v35 = vstv %s6369_s15  ;;  %s6572_s15 = sld [smem:[#allocation6 + $0x199]] }
 0x198   : > { %11723 = vst [vmem:[#allocation201_spill] sm:$0xff] %v6428_v37  ;;  %11724 = vst [vmem:[#allocation202_spill] sm:$0xff] %v6431_v34  ;;  %v6456_v37 = vmul.f32 %v5740_v8, %v6404_v15 }
 0x199   : > { %11725 = vst [vmem:[#allocation203_spill] sm:$0xff] %v6434_v45  ;;  %11726 = vst [vmem:[#allocation204_spill] sm:$0xff] %v6442_v50  ;;  %v6476_v50 = vstv %s6306_s26  ;;  %s6496_s26 = sld [smem:[#allocation6 + $0x11c]] }
 0x19a   : > { %11727 = vst [vmem:[#allocation205_spill] sm:$0xff] %v6448_v30  ;;  %11728 = vst [vmem:[#allocation206_spill] sm:$0xff] %v6452_v4  ;;  %v6484_v4 = vmul.f32 %v5881_v58, %v6431_v34  ;;  %v6502_v30 = vmul.f32 %v5721_v2, %v6413_v20  ;;  %v6529_v20 = vstv %s6382_s24  ;;  %5059 = vset.pattern.permute.xlu1 %v11746_v27  ;;  %s6591_s24 = sld [smem:[#allocation6 + $0x1e]] }
 0x19b   : > { %11729 = vst [vmem:[#allocation207_spill] sm:$0xff] %v6456_v37  ;;  %11730 = vst [vmem:[#allocation208_spill] sm:$0xff] %v6465_v21  ;;  %v6488_v21 = vmul.f32 %v5797_v29, %v6434_v45  ;;  %v6505_v37 = vstv %s6342_s25  ;;  %s6531_s25 = sld [smem:[#allocation6 + $0x119]]  ;;  %3845 = vperm.xlu1 %5059, %v5582_v23  }
 0x19c   : > { %11731 = vst [vmem:[#allocation209_spill] sm:$0xff] %v6469_v40  ;;  %11732 = vst [vmem:[#allocation210_spill] sm:$0xff] %v6473_v10  ;;  %v6491_v40 = vstv %s6329_s28  ;;  %v6494_v10 = vstv %s6344_s16  ;;  %s6515_s28 = sld [smem:[#allocation6 + $0x99]]  ;;  %s6552_s16 = sld [smem:[#allocation6 + $0x19c]]  ;;  %v6667_v11 = vmul.f32 %v5718_v1, %v6505_v37 }
 0x19d   : > { %11733 = vst [vmem:[#allocation211_spill] sm:$0xff] %v6476_v50  ;;  %11734 = vst [vmem:[#allocation212_spill] sm:$0xff] %v6484_v4  ;;  %v6508_v4 = vstv %s6367_s3  ;;  %s6570_s3 = sld [smem:[#allocation6 + $0x21c]]  ;;  %v6656_v32 = vmul.f32 %v5699_v60, %v6491_v40 }
 0x19e   : > { %11735 = vst [vmem:[#allocation213_spill] sm:$0xff] %v6488_v21  ;;  %11736 = vst [vmem:[#allocation214_spill] sm:$0xff] %v6491_v40  ;;  %v10914_v21 = vmov 4  }
 0x19f   : > { %11737 = vst [vmem:[#allocation215_spill] sm:$0xff] %v6494_v10  ;;  %11738 = vst [vmem:[#allocation216_spill] sm:$0xff] %v6502_v30  ;;  %5087 = vset.pattern.permute.xlu0 %v10914_v21  ;;  %v6526_v30 = vmul.f32 %v5681_v55, %v6476_v50  ;;  %v6537_v21 = vmul.f32 %v5735_v5, %v6431_v34  ;;  %v6550_v50 = vstv %s6406_s14  ;;  %s6607_s14 = sld [smem:[#allocation6 + $0x29c]] }
 0x1a0   : > { %11739 = vst [vmem:[#allocation217_spill] sm:$0xff] %v6505_v37  ;;  %11740 = vst [vmem:[#allocation218_spill] sm:$0xff] %v6508_v4  ;;  %1164 = vperm.xlu0 %5087, %v5592_v31   ;;  %v6576_v34 = vmul.f32 %v5866_v7, %v6522_v52  ;;  %v6601_v31 = vstv %s6438_s9  ;;  %s6635_s9 = sld [smem:[#allocation7 + $0x87]] }
 0x1a1   : > { %11741 = vst [vmem:[#allocation219_spill] sm:$0xff] %v6511_v35  ;;  %11742 = vst [vmem:[#allocation220_spill] sm:$0xff] %v6519_v0  ;;  %v6541_v0 = vmul.f32 %v5833_v41, %v6491_v40  ;;  %v6649_v51 = vmul.f32 %v5735_v5, %v6601_v31 }
 0x1a2   : > { %11743 = vst [vmem:[#allocation221_spill] sm:$0xff] %v6522_v52  ;;  %11744 = vst [vmem:[#allocation222_spill] sm:$0xff] %v6526_v30  ;;  %v6547_v30 = vmul.f32 %v5699_v60, %v6494_v10  ;;  %v6565_v10 = vmul.f32 %v5740_v8, %v6511_v35 }
 0x1a3   : > { %11745 = vst [vmem:[#allocation223_spill] sm:$0xff] %v6529_v20  ;;  %11747 = vst [vmem:[#allocation224_spill] sm:$0xff] %v6537_v21  ;;  %v6557_v21 = vmul.f32 %v5835_v13, %v6505_v37  ;;  %v6744_v37 = vstv %s6589_s13  ;;  %s6804_s13 = sld [smem:[#allocation6 + $0x202]] }
 0x1a4   : > { %11748 = vst [vmem:[#allocation225_spill] sm:$0xff] %v6541_v0  ;;  %11749 = vst [vmem:[#allocation226_spill] sm:$0xff] %v6547_v30  ;;  %v6561_v0 = vmul.f32 %v5718_v1, %v6508_v4  ;;  %v6568_v30 = vstv %s6420_s19  ;;  %v6594_v4 = vstv %s6415_s17  ;;  %s6609_s19 = sld [smem:[#allocation6 + $0x9e]]  ;;  %s6625_s17 = sld [smem:[#allocation6 + $0x299]] }
 0x1a5   : > { %11750 = vst [vmem:[#allocation227_spill] sm:$0xff] %v6550_v50  ;;  %11751 = vst [vmem:[#allocation228_spill] sm:$0xff] %v6557_v21  ;;  %v6579_v21 = vstv %s6436_s1  ;;  %s6627_s1 = sld [smem:[#allocation6 + $0x11e]] }
 0x1a6   : > { %11752 = vst [vmem:[#allocation229_spill] sm:$0xff] %v6561_v0  ;;  %11753 = vst [vmem:[#allocation230_spill] sm:$0xff] %v6565_v10  ;;  %v6583_v0 = vmul.f32 %v5797_v29, %v6529_v20  ;;  %v6587_v10 = vmul.f32 %v5678_v54, %v6404_v15  ;;  %v6638_v15 = vstv %s6478_s30  ;;  %s6716_s30 = sld [smem:[#allocation6 + $0x102]]  ;;  %v6773_v53 = vstv %s6635_s9  ;;  %s6891_s9 = sld [smem:[#allocation6 + $0x204]] }
 0x1a7   : > { %11754 = vst [vmem:[#allocation231_spill] sm:$0xff] %v6568_v30  ;;  %11755 = vst [vmem:[#allocation232_spill] sm:$0xff] %v6576_v34  ;;  %v6598_v34 = vmul.f32 %v5721_v2, %v6550_v50  ;;  %v6620_v50 = vstv %s6460_s27  ;;  %s6699_s27 = sld [smem:[#allocation6 + $0x82]] }
 0x1a8   : > { %11756 = vst [vmem:[#allocation233_spill] sm:$0xff] %v6579_v21  ;;  %11757 = vst [vmem:[#allocation234_spill] sm:$0xff] %v6583_v0  ;;  %v6605_v0 = vmul.f32 %v5681_v55, %v6434_v45  ;;  %v6623_v45 = vstv %s6480_s12  ;;  %s6718_s12 = sld [smem:[#allocation6 + $0x1b]] }
 0x1a9   : > { %11758 = vst [vmem:[#allocation235_spill] sm:$0xff] %v6587_v10  ;;  %11759 = vst [vmem:[#allocation236_spill] sm:$0xff] %v6594_v4  ;;  %v11763_v10 = vmov 16   ;;  %v6614_v4 = vmul.f32 %v5833_v41, %v6568_v30 }
 0x1aa   : > { %11760 = vst [vmem:[#allocation237_spill] sm:$0xff] %v6598_v34  ;;  %11761 = vst [vmem:[#allocation238_spill] sm:$0xff] %v6601_v31  ;;  %5090 = vset.pattern.permute.xlu0 %v11763_v10  ;;  %v6617_v34 = vstv %s6458_s0  ;;  %v6641_v10 = vstv %s6496_s26  ;;  %v6675_v31 = vmul.f32 %v5797_v29, %v6623_v45  ;;  %s6697_s0 = sld [smem:[#allocation6 + $0x21e]]  ;;  %v6750_v40 = vstv %s6609_s19  ;;  %s6827_s19 = sld [smem:[#allocation6 + $0x104]] }
 0x1ab   : > { %11762 = vst [vmem:[#allocation239_spill] sm:$0xff] %v6605_v0  ;;  %11764 = vst [vmem:[#allocation240_spill] sm:$0xff] %v6614_v4  ;;  %v10938_v0 = vmov 29   ;;  %2577 = vperm.xlu0 %5090, %v5586_v28   ;;  %v6633_v4 = vmul.f32 %v5881_v58, %v6579_v21  ;;  %v6663_v25 = vmul.f32 %v5835_v13, %v6617_v34  ;;  %s6735_s26 = sld [smem:[#allocation6 + $0x29e]]  ;;  %v6763_v18 = vstv %s6625_s17  ;;  %s6843_s17 = sld [smem:[#allocation6 + $0x29b]] }
 0x1ac   : > { %11765 = vst [vmem:[#allocation241_spill] sm:$0xff] %v6617_v34  ;;  %11766 = vst [vmem:[#allocation242_spill] sm:$0xff] %v6620_v50  ;;  %5060 = vset.pattern.permute.xlu1 %v10938_v0  ;;  %v6652_v0 = vstv %s6513_s5  ;;  %s6679_s5 = sld [smem:[#allocation6 + $0x2]]  ;;  %v6766_v63 = vstv %s6627_s1  ;;  %s6845_s1 = sld [smem:[#allocation6 + $0x184]] }
 0x1ad   : > { %11767 = vst [vmem:[#allocation243_spill] sm:$0xff] %v6623_v45  ;;  %11768 = vst [vmem:[#allocation244_spill] sm:$0xff] %v6633_v4  ;;  %3951 = vperm.xlu1 %5060, %v5582_v23   ;;  %v6659_v4 = vstv %s6515_s28  ;;  %s6737_s28 = sld [smem:[#allocation6 + $0x9b]] }
 0x1ae   : > { %11769 = vst [vmem:[#allocation245_spill] sm:$0xff] %v6638_v15  ;;  %11770 = vst [vmem:[#allocation246_spill] sm:$0xff] %v6641_v10 }
 0x1af   : > { %11771 = vst [vmem:[#allocation247_spill] sm:$0xff] %v6644_v57  ;;  %11772 = vst [vmem:[#allocation248_spill] sm:$0xff] %v6649_v51  ;;  %v6671_v51 = vmul.f32 %v5740_v8, %v6620_v50 }
 0x1b0   : > { %11773 = vst [vmem:[#allocation249_spill] sm:$0xff] %v6652_v0  ;;  %11774 = vst [vmem:[#allocation250_spill] sm:$0xff] %v6656_v32  ;;  %v6691_v32 = vmul.f32 %v5833_v41, %v6641_v10 }
 0x1b1   : > { %11775 = vst [vmem:[#allocation251_spill] sm:$0xff] %v6659_v4  ;;  %11776 = vst [vmem:[#allocation252_spill] sm:$0xff] %v6663_v25  ;;  %v6683_v25 = vmul.f32 %v5866_v7, %v6638_v15 }
 0x1b2   : > { %11777 = vst [vmem:[#allocation253_spill] sm:$0xff] %v6667_v11  ;;  %11778 = vst [vmem:[#allocation254_spill] sm:$0xff] %v6671_v51  ;;  %v6687_v11 = vmul.f32 %v5721_v2, %v6522_v52  ;;  %v11784_v51 = vmov 18   ;;  %v6741_v52 = vstv %s6607_s14  ;;  %s6825_s14 = sld [smem:[#allocation6 + $0x282]] }
 0x1b3   : > { %11779 = vst [vmem:[#allocation255_spill] sm:$0xff] %v6675_v31  ;;  %11780 = vst [vmem:[#allocation256_spill] sm:$0xff] %v6683_v25  ;;  %v6695_v31 = vmul.f32 %v5678_v54, %v6644_v57  ;;  %5092 = vset.pattern.permute.xlu0 %v11784_v51  ;;  %v6704_v25 = vmul.f32 %v5881_v58, %v6652_v0  ;;  %v6714_v57 = vstv %s6531_s25  ;;  %v11789_v51 = vmov 30   ;;  %s6752_s25 = sld [smem:[#allocation6 + $0x182]] }
 0x1b4   : > { %11781 = vst [vmem:[#allocation257_spill] sm:$0xff] %v6687_v11  ;;  %11782 = vst [vmem:[#allocation258_spill] sm:$0xff] %v6691_v32  ;;  %v6707_v11 = vstv %s6552_s16  ;;  %v6711_v32 = vmul.f32 %v5681_v55, %v6659_v4  ;;  %5061 = vset.pattern.permute.xlu1 %v11789_v51  ;;  %2789 = vperm.xlu0 %5092, %v5586_v28   ;;  %v6730_v4 = vstv %s6570_s3  ;;  %s6770_s16 = sld [smem:[#allocation6 + $0x4]]  ;;  %s6783_s3 = sld [smem:[#allocation6 + $0x19b]] }
 0x1b5   : > { %11783 = vst [vmem:[#allocation259_spill] sm:$0xff] %v6695_v31  ;;  %11785 = vst [vmem:[#allocation260_spill] sm:$0xff] %v6704_v25  ;;  %v6723_v25 = vstv %s6543_s22  ;;  %v6727_v31 = vmul.f32 %v5735_v5, %v6579_v21  ;;  %4057 = vperm.xlu1 %5061, %v5582_v23   ;;  %v6760_v21 = vmul.f32 %v5699_v60, %v6714_v57  ;;  %s6768_s22 = sld [smem:[#allocation6 + $0x11b]] }
 0x1b6   : > { %11786 = vst [vmem:[#allocation261_spill] sm:$0xff] %v6707_v11  ;;  %11787 = vst [vmem:[#allocation262_spill] sm:$0xff] %v6711_v32  ;;  %v6733_v32 = vstv %s6572_s15  ;;  %v6777_v9 = vmul.f32 %v5866_v7, %v6730_v4  ;;  %s6785_s15 = sld [smem:[#allocation6 + $0x84]] }
 0x1b7   : > { %11788 = vst [vmem:[#allocation263_spill] sm:$0xff] %v6714_v57  ;;  %11790 = vst [vmem:[#allocation264_spill] sm:$0xff] %v6723_v25  ;;  %v6747_v25 = vstv %s6591_s24  ;;  %v6790_v57 = vmul.f32 %v5881_v58, %v6741_v52  ;;  %s6806_s24 = sld [smem:[#allocation6 + $0x21b]] }
 0x1b8   : > { %11791 = vst [vmem:[#allocation265_spill] sm:$0xff] %v6727_v31  ;;  %11792 = vst [vmem:[#allocation266_spill] sm:$0xff] %v6730_v4  ;;  %v6756_v31 = vmul.f32 %v5835_v13, %v6707_v11  ;;  %5094 = vset.pattern.permute.xlu0 %v11600_v59  ;;  %v10977_v59 = vmov 31  }
 0x1b9   : > { %11793 = vst [vmem:[#allocation267_spill] sm:$0xff] %v6733_v32  ;;  %11794 = vst [vmem:[#allocation268_spill] sm:$0xff] %v6741_v52  ;;  %5062 = vset.pattern.permute.xlu1 %v10977_v59  ;;  %3001 = vperm.xlu0 %5094, %v5586_v28   ;;  %v6831_v59 = vstv %s6697_s0  ;;  %s6952_s0 = sld [smem:[#allocation6 + $0x9d]] }
 0x1ba   : > { %11795 = vst [vmem:[#allocation269_spill] sm:$0xff] %v6744_v37  ;;  %11796 = vst [vmem:[#allocation270_spill] sm:$0xff] %v6747_v25  ;;  %4163 = vperm.xlu1 %5062, %v5582_v23  }
 0x1bb   : > { %11797 = vst [vmem:[#allocation271_spill] sm:$0xff] %v6750_v40  ;;  %11798 = vst [vmem:[#allocation272_spill] sm:$0xff] %v6756_v31  ;;  %v6781_v31 = vmul.f32 %v5718_v1, %v6733_v32  ;;  %v6802_v32 = vmul.f32 %v5797_v29, %v6750_v40 }
 0x1bc   : > { %11799 = vst [vmem:[#allocation273_spill] sm:$0xff] %v6760_v21  ;;  %11800 = vst [vmem:[#allocation274_spill] sm:$0xff] %v6763_v18 }
 0x1bd   : > { %11801 = vst [vmem:[#allocation275_spill] sm:$0xff] %v6766_v63  ;;  %11802 = vst [vmem:[#allocation276_spill] sm:$0xff] %v6773_v53  ;;  %v6794_v53 = vmul.f32 %v5721_v2, %v6744_v37  ;;  %v6812_v37 = vmul.f32 %v5735_v5, %v6763_v18  ;;  %v6835_v18 = vmul.f32 %v5681_v55, %v6529_v20  ;;  %v6866_v20 = vstv %s6735_s26  ;;  %s7006_s26 = sld [smem:[#allocation6 + $0x29d]] }
 0x1be   : > { %11803 = vst [vmem:[#allocation277_spill] sm:$0xff] %v6777_v9  ;;  %11804 = vst [vmem:[#allocation278_spill] sm:$0xff] %v6781_v31  ;;  %v6798_v9 = vmul.f32 %v5740_v8, %v6747_v25  ;;  %v6849_v31 = vmul.f32 %v5699_v60, %v6568_v30  ;;  %v6873_v30 = vstv %s6737_s28  ;;  %s7008_s28 = sld [smem:[#allocation7 + $0x2]] }
 0x1bf   : > { %11805 = vst [vmem:[#allocation279_spill] sm:$0xff] %v6790_v57  ;;  %11806 = vst [vmem:[#allocation280_spill] sm:$0xff] %v6794_v53  ;;  %v6816_v57 = vmul.f32 %v5833_v41, %v6766_v63  ;;  %v6819_v53 = vstv %s6677_s4  ;;  %s6907_s4 = sld [smem:[#allocation6 + $0x284]] }
 0x1c0   : > { %11807 = vst [vmem:[#allocation281_spill] sm:$0xff] %v6798_v9  ;;  %11808 = vst [vmem:[#allocation282_spill] sm:$0xff] %v6802_v32  ;;  %v6823_v32 = vmul.f32 %v5678_v54, %v6511_v35  ;;  %v6856_v9 = vstv %s6716_s30  ;;  %v6863_v21 = vmul.f32 %v5835_v13, %v6819_v53  ;;  %v6870_v35 = vmul.f32 %v5718_v1, %v6617_v34  ;;  %s6971_s30 = sld [smem:[#allocation6 + $0x19d]] }
 0x1c1   : > { %11809 = vst [vmem:[#allocation283_spill] sm:$0xff] %v6812_v37  ;;  %11810 = vst [vmem:[#allocation284_spill] sm:$0xff] %v6816_v57  ;;  %v6838_v37 = vstv %s6679_s5  ;;  %v6841_v57 = vstv %s6699_s27  ;;  %v6945_v34 = vstv %s6785_s15  ;;  %s6950_s5 = sld [smem:[#allocation6 + $0x1d]]  ;;  %s7102_s15 = sld [smem:[#allocation6 + $0x19f]] }
 0x1c2   : > { %11811 = vst [vmem:[#allocation285_spill] sm:$0xff] %v6819_v53  ;;  %11812 = vst [vmem:[#allocation286_spill] sm:$0xff] %v6823_v32  ;;  %v6853_v32 = vrot.slane %v5644_v46, %v5616_v36  ;;  %v6878_v36 = vmul.f32 %v5866_v7, %v6831_v59  ;;  %s6969_s27 = sld [smem:[#allocation6 + $0x11d]] }
 0x1c3   : > { %11813 = vst [vmem:[#allocation287_spill] sm:$0xff] %v6831_v59  ;;  %11814 = vst [vmem:[#allocation288_spill] sm:$0xff] %v6835_v18  ;;  %v6859_v18 = vstv %s6718_s12  ;;  %s6987_s12 = sld [smem:[#allocation6 + $0x21d]] }
 0x1c4   : > { %11815 = vst [vmem:[#allocation289_spill] sm:$0xff] %v6838_v37  ;;  %11816 = vst [vmem:[#allocation290_spill] sm:$0xff] %v6841_v57 }
 0x1c5   : > { %11817 = vst [vmem:[#allocation291_spill] sm:$0xff] %v6849_v31  ;;  %11818 = vst [vmem:[#allocation292_spill] sm:$0xff] %v6853_v32  ;;  %v11825_v31 = vmov 22   ;;  %v6882_v32 = vmul.f32 %v5740_v8, %v6838_v37 }
 0x1c6   : > { %11819 = vst [vmem:[#allocation293_spill] sm:$0xff] %v6856_v9  ;;  %11820 = vst [vmem:[#allocation294_spill] sm:$0xff] %v6859_v18  ;;  %5096 = vset.pattern.permute.xlu0 %v11825_v31  ;;  %v11830_v31 = vmov 1  }
 0x1c7   : > { %11821 = vst [vmem:[#allocation295_spill] sm:$0xff] %v6863_v21  ;;  %11822 = vst [vmem:[#allocation296_spill] sm:$0xff] %v6866_v20  ;;  %v6886_v21 = vmul.f32 %v5797_v29, %v6841_v57  ;;  %5063 = vset.pattern.permute.xlu1 %v11830_v31  ;;  %3213 = vperm.xlu0 %5096, %v5586_v28   ;;  %v6912_v31 = vmul.f32 %v5881_v58, %v6866_v20  ;;  %v6933_v20 = vstv %s6804_s13  ;;  %v11850_v57 = vmov 2   ;;  %s7119_s13 = sld [smem:[#allocation6 + $0x21f]] }
 0x1c8   : > { %11823 = vst [vmem:[#allocation297_spill] sm:$0xff] %v6870_v35  ;;  %11824 = vst [vmem:[#allocation298_spill] sm:$0xff] %v6873_v30  ;;  %v6889_v35 = vstv %s6752_s25  ;;  %854 = vperm.xlu1 %5063, %v5582_v23   ;;  %s7039_s25 = sld [smem:[#allocation7 + $0x4]] }
 0x1c9   : > { %11826 = vst [vmem:[#allocation299_spill] sm:$0xff] %v6878_v36  ;;  %11827 = vst [vmem:[#allocation300_spill] sm:$0xff] %v6882_v32  ;;  %v6897_v36 = vmul.f32 %v5721_v2, %v6638_v15  ;;  %v6905_v32 = vmul.f32 %v5678_v54, %v6859_v18  ;;  %v6919_v15 = vstv %s6768_s22  ;;  %v6926_v18 = vmul.f32 %v5735_v5, %v6652_v0  ;;  %s7068_s22 = sld [smem:[#allocation6 + $0x1f]] }
 0x1ca   : > { %11828 = vst [vmem:[#allocation301_spill] sm:$0xff] %v6886_v21  ;;  %11829 = vst [vmem:[#allocation302_spill] sm:$0xff] %v6889_v35  ;;  %v6901_v21 = vmul.f32 %v5833_v41, %v6856_v9  ;;  %v6948_v9 = vstv %s6827_s19  ;;  %v6964_v0 = vstv %s6843_s17  ;;  %s7265_s19 = sld [smem:[#allocation6 + $0x103]] }
 0x1cb   : > { %11831 = vst [vmem:[#allocation303_spill] sm:$0xff] %v6897_v36  ;;  %11833 = vst [vmem:[#allocation305_spill] sm:$0xff] %v6905_v32  ;;  %v6916_v36 = vmul.f32 %v5681_v55, %v6873_v30  ;;  %v6930_v32 = vmul.f32 %v5835_v13, %v6889_v35  ;;  %v6939_v30 = vstv %s6825_s14  ;;  %5098 = vset.pattern.permute.xlu0 %v11665_v24  ;;  %v6967_v35 = vstv %s6845_s1  ;;  %s7231_s14 = sld [smem:[#allocation6 + $0x83]] }
 0x1cc   : > { %11832 = vst [vmem:[#allocation304_spill] sm:$0xff] %v6901_v21  ;;  %11834 = vst [vmem:[#allocation306_spill] sm:$0xff] %v6912_v31  ;;  %v6922_v21 = vstv %s6783_s3  ;;  %v6936_v31 = vstv %s6770_s16  ;;  %5064 = vset.pattern.permute.xlu1 %v11850_v57  ;;  %3425 = vperm.xlu0 %5098, %v5586_v28   ;;  %s7085_s16 = sld [smem:[#allocation6 + $0x9f]]  ;;  %s7283_s17 = sld [smem:[#allocation6 + $0x183]] }
 0x1cd   : > { %11835 = vst [vmem:[#allocation307_spill] sm:$0xff] %v6916_v36  ;;  %11836 = vst [vmem:[#allocation308_spill] sm:$0xff] %v6919_v15  ;;  %v6942_v36 = vstv %s6806_s24  ;;  %v6985_v24 = vmul.f32 %v5740_v8, %v6936_v31  ;;  %960 = vperm.xlu1 %5064, %v5582_v23   ;;  %s7087_s3 = sld [smem:[#allocation6 + $0x11f]]  ;;  %s7212_s24 = sld [smem:[#allocation6 + $0x3]] }
 0x1ce   : > { %11837 = vst [vmem:[#allocation309_spill] sm:$0xff] %v6922_v21  ;;  %11838 = vst [vmem:[#allocation310_spill] sm:$0xff] %v6926_v18  ;;  %v6957_v18 = vmul.f32 %v5699_v60, %v6919_v15  ;;  %v6977_v15 = vmul.f32 %v5866_v7, %v6933_v20  ;;  %s7302_s1 = sld [smem:[#allocation6 + $0x203]] }
 0x1cf   : > { %11839 = vst [vmem:[#allocation311_spill] sm:$0xff] %v6930_v32  ;;  %11840 = vst [vmem:[#allocation312_spill] sm:$0xff] %v6933_v20  ;;  %v6961_v32 = vmul.f32 %v5718_v1, %v6922_v21  ;;  %v6981_v21 = vrot.slane %v5644_v46, %v5625_v39  ;;  %v7000_v39 = vmul.f32 %v5797_v29, %v6945_v34 }
 0x1d0   : > { %11841 = vst [vmem:[#allocation313_spill] sm:$0xff] %v6936_v31  ;;  %11842 = vst [vmem:[#allocation314_spill] sm:$0xff] %v6939_v30  ;;  %5100 = vset.pattern.permute.xlu0 %v11706_v42 }
 0x1d1   : > { %11843 = vst [vmem:[#allocation315_spill] sm:$0xff] %v6942_v36  ;;  %11844 = vst [vmem:[#allocation316_spill] sm:$0xff] %v6945_v34  ;;  %3637 = vperm.xlu0 %5100, %v5586_v28  }
 0x1d2   : > { %11845 = vst [vmem:[#allocation317_spill] sm:$0xff] %v6948_v9  ;;  %11846 = vst [vmem:[#allocation318_spill] sm:$0xff] %v6957_v18  ;;  %v6996_v18 = vmul.f32 %v5721_v2, %v6942_v36  ;;  %v7016_v36 = vmul.f32 %v5835_v13, %v6967_v35  ;;  %v11887_v13 = vmov 4  }
 0x1d3   : > { %11847 = vst [vmem:[#allocation319_spill] sm:$0xff] %v6961_v32  ;;  %11848 = vst [vmem:[#allocation320_spill] sm:$0xff] %v6964_v0  ;;  %v6992_v32 = vmul.f32 %v5881_v58, %v6939_v30 }
 0x1d4   : > { %11849 = vst [vmem:[#allocation321_spill] sm:$0xff] %v6967_v35  ;;  %11851 = vst [vmem:[#allocation322_spill] sm:$0xff] %v6977_v15  ;;  %v7004_v15 = vmul.f32 %v5833_v41, %v6948_v9 }
 0x1d5   : > { %11852 = vst [vmem:[#allocation323_spill] sm:$0xff] %v6981_v21  ;;  %11853 = vst [vmem:[#allocation324_spill] sm:$0xff] %v6985_v24  ;;  %v7012_v24 = vmul.f32 %v5735_v5, %v6964_v0  ;;  %v7033_v21 = vmul.f32 %v5681_v55, %v6623_v45  ;;  %v7036_v0 = vunpack.c.h.bf16 %v5636_v44  ;;  %v7053_v44 = vunpack.c.h.bf16 %v5654_v48  ;;  %5102 = vset.pattern.permute.xlu0 %v11746_v27 }
 0x1d6   : > { %11854 = vst [vmem:[#allocation325_spill] sm:$0xff] %v6992_v32  ;;  %11855 = vst [vmem:[#allocation326_spill] sm:$0xff] %v6996_v18  ;;  %v7019_v18 = vstv %s6891_s9  ;;  %v7022_v32 = vunpack.c.h.bf16 %v5633_v43  ;;  %v7043_v43 = vmul.f32 %v5699_v60, %v6641_v10  ;;  %3849 = vperm.xlu0 %5102, %v5586_v28   ;;  %v7140_v27 = vstv %s7008_s28  ;;  %s7331_s9 = sld [smem:[#allocation6 + $0x283]] }
 0x1d7   : > { %11856 = vst [vmem:[#allocation327_spill] sm:$0xff] %v7000_v39  ;;  %11857 = vst [vmem:[#allocation328_spill] sm:$0xff] %v7004_v15  ;;  %v7025_v39 = vstv %s6907_s4  ;;  %v7029_v15 = vmul.f32 %v5678_v54, %v6620_v50  ;;  %v7059_v42 = vmul.f32 %v5866_v7, %v7019_v18  ;;  %s7348_s4 = sld [smem:[#allocation6 + $0x5]] }
 0x1d8   : > { %11858 = vst [vmem:[#allocation329_spill] sm:$0xff] %v7012_v24  ;;  %11859 = vst [vmem:[#allocation330_spill] sm:$0xff] %v7016_v36  ;;  %v7047_v24 = vmul.f32 %v5718_v1, %v6707_v11  ;;  %v7050_v36 = vunpack.c.h.bf16 %v5647_v47  ;;  %v7066_v47 = vunpack.c.h.bf16 %v5657_v49  ;;  %v7073_v48 = vmul.f32 %v5881_v58, %v7025_v39  ;;  %s7601_s28 = scalar_select %p492_p9, %s5434_s21, 3 }
 0x1d9   : > { %11860 = vst [vmem:[#allocation331_spill] sm:$0xff] %v7019_v18  ;;  %11861 = vst [vmem:[#allocation332_spill] sm:$0xff] %v7022_v32  ;;  %v7090_v49 = vunpack.c.h.bf16 %v5684_v56  ;;  %v7114_v56 = vmul.f32 %v7053_v44, %v5757_v14 }
 0x1da   : > { %11862 = vst [vmem:[#allocation333_spill] sm:$0xff] %v7025_v39  ;;  %11863 = vst [vmem:[#allocation334_spill] sm:$0xff] %v7029_v15  ;;  %v7106_v15 = vmul.f32 %v5735_v5, %v6741_v52  ;;  %v7110_v58 = vmul.f32 %v7050_v36, %v5738_v6  ;;  %v7124_v7 = vmul.f32 %v7066_v47, %v5766_v16  ;;  %5104 = vset.pattern.permute.xlu0 %v11789_v51  ;;  %v11905_v51 = vld [vmem:[#allocation136_spill] sm:$0xff] }
 0x1db   : > { %11864 = vst [vmem:[#allocation335_spill] sm:$0xff] %v7033_v21  ;;  %11865 = vst [vmem:[#allocation336_spill] sm:$0xff] %v7036_v0  ;;  %v11019_v21 = vmov 3   ;;  %4061 = vperm.xlu0 %5104, %v5586_v28  }
 0x1dc   : > { %11866 = vst [vmem:[#allocation337_spill] sm:$0xff] %v7043_v43  ;;  %11867 = vst [vmem:[#allocation338_spill] sm:$0xff] %v7047_v24  ;;  %5065 = vset.pattern.permute.xlu1 %v11019_v21  ;;  %v7063_v24 = vmul.f32 %v5721_v2, %v6730_v4  ;;  %v7077_v21 = vmul.f32 %v7022_v32, %v5702_v61  ;;  %v7080_v43 = vstv %s6950_s5  ;;  %s7365_s5 = sld [smem:[#allocation6 + $0x85]] }
 0x1dd   : > { %11868 = vst [vmem:[#allocation339_spill] sm:$0xff] %v7050_v36  ;;  %11869 = vst [vmem:[#allocation340_spill] sm:$0xff] %v7053_v44  ;;  %1066 = vperm.xlu1 %5065, %v5582_v23  }
 0x1de   : > { %11870 = vst [vmem:[#allocation341_spill] sm:$0xff] %v7059_v42  ;;  %11871 = vst [vmem:[#allocation342_spill] sm:$0xff] %v7063_v24  ;;  %v7083_v42 = vstv %s6952_s0  ;;  %v7094_v24 = vmul.f32 %v7036_v0, %v5705_v62  ;;  %s7397_s0 = sld [smem:[#allocation6 + $0x105]] }
 0x1df   : > { %11872 = vst [vmem:[#allocation343_spill] sm:$0xff] %v7066_v47  ;;  %11873 = vst [vmem:[#allocation344_spill] sm:$0xff] %v7073_v48  ;;  %v7097_v48 = vstv %s6969_s27  ;;  %5107 = vset.pattern.permute.xlu0 %v11850_v57  ;;  %v11933_v57 = vmov 16   ;;  %s7415_s27 = sld [smem:[#allocation6 + $0x185]] }
 0x1e0   : > { %11874 = vst [vmem:[#allocation345_spill] sm:$0xff] %v7077_v21  ;;  %11875 = vst [vmem:[#allocation346_spill] sm:$0xff] %v7080_v43  ;;  %v7100_v21 = vstv %s6971_s30  ;;  %964 = vperm.xlu0 %5107, %v5586_v28   ;;  %s7432_s30 = sld [smem:[#allocation6 + $0x205]] }
 0x1e1   : > { %11876 = vst [vmem:[#allocation347_spill] sm:$0xff] %v7083_v42  ;;  %11877 = vst [vmem:[#allocation348_spill] sm:$0xff] %v7090_v49  ;;  %5066 = vset.pattern.permute.xlu1 %v11887_v13 }
 0x1e2   : > { %11878 = vst [vmem:[#allocation349_spill] sm:$0xff] %v7094_v24  ;;  %11879 = vst [vmem:[#allocation350_spill] sm:$0xff] %v7097_v48  ;;  %v7117_v24 = vstv %s6987_s12  ;;  %1172 = vperm.xlu1 %5066, %v5582_v23   ;;  %s7466_s12 = sld [smem:[#allocation6 + $0x285]] }
 0x1e3   : > { %11880 = vst [vmem:[#allocation351_spill] sm:$0xff] %v7100_v21  ;;  %11881 = vst [vmem:[#allocation352_spill] sm:$0xff] %v7106_v15  ;;  %v7128_v15 = vmul.f32 %v5678_v54, %v7080_v43  ;;  %v7148_v43 = vmul.f32 %v5718_v1, %v7100_v21  ;;  %v7165_v21 = vmul.f32 %v7036_v0, %v5996_v17 }
 0x1e4   : > { %11882 = vst [vmem:[#allocation353_spill] sm:$0xff] %v7110_v58  ;;  %11883 = vst [vmem:[#allocation354_spill] sm:$0xff] %v7114_v56  ;;  %v7132_v58 = vmul.f32 %v5681_v55, %v7083_v42  ;;  %v7135_v56 = vstv %s7006_s26  ;;  %v7152_v42 = vmul.f32 %v7022_v32, %v5982_v22  ;;  %v7169_v22 = vmul.f32 %v7050_v36, %v5999_v38  ;;  %s7567_s26 = sld [smem:[#allocation7 + $0x3]] }
 0x1e5   : > { %11884 = vst [vmem:[#allocation355_spill] sm:$0xff] %v7117_v24  ;;  %11885 = vst [vmem:[#allocation356_spill] sm:$0xff] %v7124_v7  ;;  %v7144_v7 = vmul.f32 %v5699_v60, %v7097_v48  ;;  %v7161_v48 = vmul.f32 %v5721_v2, %v7117_v24  ;;  %v7184_v24 = vmul.f32 %v5678_v54, %v6747_v25  ;;  %5109 = vset.pattern.permute.xlu0 %v11887_v13  ;;  %v11969_v13 = vld [vmem:[#allocation302_spill] sm:$0xff] }
 0x1e6   : > { %11886 = vst [vmem:[#allocation357_spill] sm:$0xff] %v7135_v56  ;;  %11888 = vst [vmem:[#allocation358_spill] sm:$0xff] %v7140_v27  ;;  %v7157_v27 = vmul.f32 %v7090_v49, %v5792_v26  ;;  %v7188_v17 = vmul.f32 %v5681_v55, %v6750_v40  ;;  %v7192_v38 = vmul.f32 %v5699_v60, %v6766_v63  ;;  %1176 = vperm.xlu0 %5109, %v5586_v28  }
 0x1e7   : > { %11889 = vst [vmem:[#allocation359_spill] sm:$0xff] %v7144_v7  ;;  %11890 = vst [vmem:[#allocation360_spill] sm:$0xff] %v7148_v43  ;;  %v7172_v43 = vstv %s7039_s25  ;;  %v7176_v7 = vmul.f32 %v5735_v5, %v7135_v56  ;;  %v7196_v56 = vmul.f32 %v5718_v1, %v6819_v53  ;;  %s4573_s25 = sshll.u32 %s7601_s28, 3  ;;  %s8962_s28 = sld [smem:[#allocation6 + $0x7]] }
 0x1e8   : > { %11891 = vst [vmem:[#allocation361_spill] sm:$0xff] %v7157_v27  ;;  %11892 = vst [vmem:[#allocation362_spill] sm:$0xff] %v7161_v48  ;;  %v7180_v27 = vmul.f32 %v7053_v44, %v6016_v3  ;;  %v7204_v3 = vmul.f32 %v7066_v47, %v6032_v33  ;;  %v7210_v48 = vstv %s7087_s3  ;;  %v7222_v33 = vmul.f32 %v7022_v32, %v6108_v19  ;;  %s495_s3 = scalar_lea.vmem %s10760_s2, %s4573_s25  ;;  %s8968_s25 = sld [smem:[#allocation6 + $0x87]] }
 0x1e9   : > { %11893 = vst [vmem:[#allocation363_spill] sm:$0xff] %v7172_v43  ;;  %11894 = vst [vmem:[#allocation364_spill] sm:$0xff] %v7176_v7  ;;  %v7199_v7 = vstv %s7068_s22  ;;  %v7207_v43 = vstv %s7085_s16  ;;  %s8973_s22 = sld [smem:[#allocation6 + $0x107]] }
 0x1ea   : > { %11895 = vst [vmem:[#allocation365_spill] sm:$0xff] %v7180_v27  ;;  %11896 = vst [vmem:[#allocation366_spill] sm:$0xff] %v7188_v17  ;;  %v7229_v17 = vstv %s7102_s15  ;;  %v7244_v19 = vmul.f32 %v5678_v54, %v7199_v7  ;;  %s8141_s15 = sld [smem:[#allocation7 + $0x5]]  ;;  %s8983_s16 = sld [smem:[#allocation6 + $0x187]] }
 0x1eb   : > { %11897 = vst [vmem:[#allocation367_spill] sm:$0xff] %v7192_v38  ;;  %11898 = vst [vmem:[#allocation368_spill] sm:$0xff] %v7196_v56  ;;  %v11048_v38 = vmov 5   ;;  %v7218_v56 = vmul.f32 %v7090_v49, %v6049_v12  ;;  %v11909_v12 = vld [vmem:[#allocation151_spill] sm:$0xff] }
 0x1ec   : > { %11899 = vst [vmem:[#allocation369_spill] sm:$0xff] %v7199_v7  ;;  %11900 = vst [vmem:[#allocation370_spill] sm:$0xff] %v7204_v3  ;;  %5067 = vset.pattern.permute.xlu1 %v11048_v38  ;;  %v7226_v3 = vmul.f32 %v7036_v0, %v11905_v51  ;;  %v7236_v38 = vmul.f32 %v5721_v2, %v6831_v59  ;;  %v7247_v51 = vstv %s7119_s13  ;;  %v11919_v7 = vld [vmem:[#allocation159_spill] sm:$0xff]  ;;  %s8297_s13 = sld [smem:[#allocation7 + $0x8a]] }
 0x1ed   : > { %11901 = vst [vmem:[#allocation371_spill] sm:$0xff] %v7207_v43  ;;  %11902 = vst [vmem:[#allocation372_spill] sm:$0xff] %v7210_v48  ;;  %1278 = vperm.xlu1 %5067, %v5582_v23   ;;  %v7255_v23 = vmul.f32 %v5681_v55, %v7207_v43  ;;  %v7277_v43 = vmul.f32 %v5718_v1, %v7229_v17 }
 0x1ee   : > { %11903 = vst [vmem:[#allocation373_spill] sm:$0xff] %v7218_v56  ;;  %11904 = vst [vmem:[#allocation374_spill] sm:$0xff] %v7222_v33  ;;  %v7240_v56 = vmul.f32 %v7050_v36, %v11909_v12  ;;  %v11917_v12 = vld [vmem:[#allocation168_spill] sm:$0xff] }
 0x1ef   : > { %11906 = vst [vmem:[#allocation375_spill] sm:$0xff] %v7226_v3  ;;  %11907 = vst [vmem:[#allocation376_spill] sm:$0xff] %v7229_v17  ;;  %v11913_v3 = vld [vmem:[#allocation152_spill] sm:$0xff] }
 0x1f0   : > { %11908 = vst [vmem:[#allocation377_spill] sm:$0xff] %v7236_v38  ;;  %11910 = vst [vmem:[#allocation378_spill] sm:$0xff] %v7240_v56  ;;  %v7251_v27 = vmul.f32 %v7053_v44, %v11913_v3  ;;  %v7259_v38 = vmul.f32 %v5699_v60, %v7210_v48  ;;  %v7263_v56 = vmul.f32 %v7022_v32, %v11917_v12  ;;  %v11921_v3 = vld [vmem:[#allocation166_spill] sm:$0xff]  ;;  %v11924_v48 = vld [vmem:[#allocation175_spill] sm:$0xff] }
 0x1f1   : > { %11911 = vst [vmem:[#allocation379_spill] sm:$0xff] %v7244_v19  ;;  %11912 = vst [vmem:[#allocation380_spill] sm:$0xff] %v7247_v51  ;;  %v7269_v19 = vmul.f32 %v7066_v47, %v11919_v7  ;;  %v7288_v7 = vmul.f32 %v5721_v2, %v7247_v51  ;;  %v11927_v12 = vld [vmem:[#allocation183_spill] sm:$0xff]  ;;  %5069 = vset.pattern.permute.xlu1 %v11933_v57  ;;  %v11934_v51 = vld [vmem:[#allocation194_spill] sm:$0xff] }
 0x1f2   : > { %11914 = vst [vmem:[#allocation381_spill] sm:$0xff] %v7251_v27  ;;  %11915 = vst [vmem:[#allocation382_spill] sm:$0xff] %v7255_v23  ;;  %v7273_v27 = vmul.f32 %v7090_v49, %v11921_v3  ;;  %v7292_v3 = vmul.f32 %v7050_v36, %v11927_v12  ;;  %v11936_v12 = vld [vmem:[#allocation100_spill] sm:$0xff] }
 0x1f3   : > { %11916 = vst [vmem:[#allocation383_spill] sm:$0xff] %v7259_v38  ;;  %11918 = vst [vmem:[#allocation384_spill] sm:$0xff] %v7263_v56  ;;  %v7281_v38 = vmul.f32 %v7036_v0, %v11924_v48  ;;  %v11968_v56 = vmov 19  }
 0x1f4   : > { %11920 = vst [vmem:[#allocation385_spill] sm:$0xff] %v7269_v19  ;;  %11922 = vst [vmem:[#allocation386_spill] sm:$0xff] %v7273_v27  ;;  %v11929_v27 = vld [vmem:[#allocation92_spill] sm:$0xff]  ;;  %5115 = vset.pattern.permute.xlu0 %v11968_v56 }
 0x1f5   : > { %11923 = vst [vmem:[#allocation387_spill] sm:$0xff] %v7277_v43  ;;  %11925 = vst [vmem:[#allocation388_spill] sm:$0xff] %v7281_v38  ;;  %v7296_v17 = vmul.f32 %v5678_v54, %v11929_v27  ;;  %v11931_v43 = vld [vmem:[#allocation96_spill] sm:$0xff]  ;;  %v7312_v27 = vmul.f32 %v5699_v60, %v11936_v12  ;;  %v11946_v12 = vld [vmem:[#allocation103_spill] sm:$0xff] }
 0x1f6   : > { %11926 = vst [vmem:[#allocation389_spill] sm:$0xff] %v7288_v7  ;;  %11928 = vst [vmem:[#allocation390_spill] sm:$0xff] %v7292_v3  ;;  %v7300_v48 = vmul.f32 %v5681_v55, %v11931_v43  ;;  %v7308_v7 = vmul.f32 %v7053_v44, %v11934_v51  ;;  %v11938_v19 = vld [vmem:[#allocation196_spill] sm:$0xff]  ;;  %v7329_v51 = vmul.f32 %v5678_v54, %v6838_v37 }
 0x1f7   : > { %11930 = vst [vmem:[#allocation391_spill] sm:$0xff] %v7296_v17  ;;  %11937 = vst [vmem:[#allocation394_spill] sm:$0xff] %v7312_v27  ;;  %v7316_v3 = vmul.f32 %v7022_v32, %v11938_v19  ;;  %v11940_v43 = vld [vmem:[#allocation24_spill] sm:$0xff]  ;;  %v11943_v17 = vld [vmem:[#allocation202_spill] sm:$0xff]  ;;  %v7335_v19 = vmul.f32 %v5718_v1, %v11946_v12 }
 0x1f8   : > { %11932 = vst [vmem:[#allocation392_spill] sm:$0xff] %v7300_v48  ;;  %11935 = vst [vmem:[#allocation393_spill] sm:$0xff] %v7308_v7  ;;  %2565 = vperm.xlu1 %5069, %v11940_v43   ;;  %v11941_v48 = vld [vmem:[#allocation198_spill] sm:$0xff]  ;;  %v7325_v38 = vmul.f32 %v7090_v49, %v11943_v17  ;;  %v7346_v17 = vstv %s7212_s24  ;;  %s8328_s24 = sld [smem:[#allocation7 + $0x8b]] }
 0x1f9   : > { %11939 = vst [vmem:[#allocation395_spill] sm:$0xff] %v7316_v3  ;;  %v7321_v57 = vmul.f32 %v7066_v47, %v11941_v48  ;;  %11945 = vst [vmem:[#allocation397_spill] sm:$0xff] %v7329_v51  ;;  %v11948_v3 = vld [vmem:[#allocation203_spill] sm:$0xff]  ;;  %v11950_v48 = vld [vmem:[#allocation290_spill] sm:$0xff] }
 0x1fa   : > { %11944 = vst [vmem:[#allocation396_spill] sm:$0xff] %v7325_v38  ;;  %11947 = vst [vmem:[#allocation398_spill] sm:$0xff] %v7335_v19  ;;  %v7339_v27 = vmul.f32 %v7036_v0, %v11948_v3  ;;  %v11953_v38 = vld [vmem:[#allocation106_spill] sm:$0xff]  ;;  %v11957_v19 = vld [vmem:[#allocation28_spill] sm:$0xff] }
 0x1fb   : > { %11942 = vst [vmem:[#allocation24_spill] sm:$0xff] %v7321_v57  ;;  %v7343_v57 = vmul.f32 %v5681_v55, %v11950_v48  ;;  %11952 = vst [vmem:[#allocation401_spill] sm:$0xff] %v7346_v17  ;;  %v7352_v51 = vmul.f32 %v5721_v2, %v11953_v38  ;;  %v11955_v7 = vld [vmem:[#allocation214_spill] sm:$0xff]  ;;  %v7360_v3 = vrot.slane %v5644_v46, %v11957_v19  ;;  %v11962_v38 = vld [vmem:[#allocation217_spill] sm:$0xff] }
 0x1fc   : > { %11949 = vst [vmem:[#allocation399_spill] sm:$0xff] %v7339_v27  ;;  %v7356_v12 = vmul.f32 %v7050_v36, %v11955_v7  ;;  %v7363_v27 = vstv %s7231_s14  ;;  %v11964_v7 = vld [vmem:[#allocation293_spill] sm:$0xff]  ;;  %v11966_v19 = vld [vmem:[#allocation219_spill] sm:$0xff]  ;;  %5072 = vset.pattern.permute.xlu1 %v11968_v56  ;;  %s8753_s14 = sld [smem:[#allocation7 + $0x8c]] }
 0x1fd   : > { %11951 = vst [vmem:[#allocation400_spill] sm:$0xff] %v7343_v57  ;;  %11954 = vst [vmem:[#allocation402_spill] sm:$0xff] %v7352_v51  ;;  %v11960_v57 = vld [vmem:[#allocation114_spill] sm:$0xff]  ;;  %v7374_v51 = vmul.f32 %v7053_v44, %v11962_v38  ;;  %v7392_v38 = vmul.f32 %v5678_v54, %v7346_v17  ;;  %2883 = vperm.xlu1 %5072, %v11940_v43   ;;  %v7413_v17 = vstv %s7283_s17  ;;  %s8771_s17 = sld [smem:[#allocation6 + $0x29f]] }
 0x1fe   : > { %11956 = vst [vmem:[#allocation403_spill] sm:$0xff] %v7356_v12  ;;  %11958 = vst [vmem:[#allocation404_spill] sm:$0xff] %v7360_v3  ;;  %v7370_v23 = vmul.f32 %v5735_v5, %v11960_v57  ;;  %v7378_v12 = vmul.f32 %v5699_v60, %v11964_v7  ;;  %v7382_v3 = vmul.f32 %v7022_v32, %v11966_v19  ;;  %v11973_v19 = vld [vmem:[#allocation221_spill] sm:$0xff] }
 0x1ff   : > { %11959 = vst [vmem:[#allocation405_spill] sm:$0xff] %v7363_v27  ;;  %11963 = vst [vmem:[#allocation407_spill] sm:$0xff] %v7374_v51  ;;  %v7388_v57 = vmul.f32 %v5718_v1, %v11969_v13  ;;  %v7395_v51 = vstv %s7265_s19  ;;  %s8760_s19 = sld [smem:[#allocation7 + $0x8d]] }
 0x200   : > { %11961 = vst [vmem:[#allocation406_spill] sm:$0xff] %v7370_v23  ;;  %11965 = vst [vmem:[#allocation408_spill] sm:$0xff] %v7378_v12  ;;  %v7402_v23 = vmul.f32 %v7066_v47, %v11973_v19  ;;  %v11975_v12 = vld [vmem:[#allocation223_spill] sm:$0xff]  ;;  %v7423_v19 = vmul.f32 %v5721_v2, %v6933_v20 }
 0x201   : > { %11967 = vst [vmem:[#allocation409_spill] sm:$0xff] %v7382_v3  ;;  %11970 = vst [vmem:[#allocation410_spill] sm:$0xff] %v7388_v57  ;;  %v7406_v3 = vmul.f32 %v7036_v0, %v11975_v12  ;;  %v7410_v57 = vmul.f32 %v5681_v55, %v7363_v27  ;;  %v7436_v27 = vmul.f32 %v5735_v5, %v6939_v30 }
 0x202   : > { %11971 = vst [vmem:[#allocation411_spill] sm:$0xff] %v7392_v38  ;;  %11972 = vst [vmem:[#allocation412_spill] sm:$0xff] %v7395_v51  ;;  %v11979_v38 = vld [vmem:[#allocation233_spill] sm:$0xff] }
 0x203   : > { %11974 = vst [vmem:[#allocation413_spill] sm:$0xff] %v7402_v23  ;;  %11976 = vst [vmem:[#allocation414_spill] sm:$0xff] %v7406_v3  ;;  %v7419_v33 = vmul.f32 %v7090_v49, %v11979_v38  ;;  %v11982_v23 = vld [vmem:[#allocation231_spill] sm:$0xff]  ;;  %v7430_v3 = vstv %s7302_s1  ;;  %s8781_s1 = sld [smem:[#allocation7 + $0x8e]] }
 0x204   : > { %11977 = vst [vmem:[#allocation415_spill] sm:$0xff] %v7410_v57  ;;  %11978 = vst [vmem:[#allocation416_spill] sm:$0xff] %v7413_v17  ;;  %v7427_v12 = vmul.f32 %v7050_v36, %v11982_v23  ;;  %v11986_v57 = vld [vmem:[#allocation241_spill] sm:$0xff]  ;;  %v7448_v23 = vmul.f32 %v7022_v32, %v6620_v50  ;;  %v11994_v50 = vmov 21  }
 0x205   : > { %11980 = vst [vmem:[#allocation417_spill] sm:$0xff] %v7419_v33  ;;  %11981 = vst [vmem:[#allocation418_spill] sm:$0xff] %v7423_v19  ;;  %v7440_v38 = vmul.f32 %v7053_v44, %v11986_v57  ;;  %v7444_v33 = vmul.f32 %v5699_v60, %v7395_v51  ;;  %v7453_v19 = vmul.f32 %v5718_v1, %v7413_v17  ;;  %5074 = vset.pattern.permute.xlu1 %v11994_v50 }
 0x206   : > { %11983 = vst [vmem:[#allocation419_spill] sm:$0xff] %v7427_v12  ;;  %11984 = vst [vmem:[#allocation420_spill] sm:$0xff] %v7430_v3  ;;  %v7460_v57 = vmul.f32 %v7036_v0, %v6623_v45  ;;  %v7464_v51 = vmul.f32 %v5678_v54, %v6936_v31  ;;  %v7480_v45 = vmul.f32 %v5681_v55, %v6945_v34  ;;  %3095 = vperm.xlu1 %5074, %v11940_v43  }
 0x207   : > { %11985 = vst [vmem:[#allocation421_spill] sm:$0xff] %v7436_v27  ;;  %11987 = vst [vmem:[#allocation422_spill] sm:$0xff] %v7440_v38  ;;  %v7456_v27 = vstv %s7331_s9  ;;  %v11995_v38 = vld [vmem:[#allocation23_spill] sm:$0xff]  ;;  %v7507_v12 = vmul.f32 %v7053_v44, %v6707_v11  ;;  %s8787_s9 = sld [smem:[#allocation6 + $0x6]] }
 0x208   : > { %11988 = vst [vmem:[#allocation423_spill] sm:$0xff] %v7444_v33  ;;  %11989 = vst [vmem:[#allocation424_spill] sm:$0xff] %v7448_v23  ;;  %2887 = vperm.xlu0 %5115, %v11995_v38   ;;  %v11996_v23 = vld [vmem:[#allocation245_spill] sm:$0xff] }
 0x209   : > { %11990 = vst [vmem:[#allocation425_spill] sm:$0xff] %v7453_v19  ;;  %11991 = vst [vmem:[#allocation426_spill] sm:$0xff] %v7456_v27  ;;  %v7472_v17 = vmul.f32 %v7066_v47, %v11996_v23  ;;  %v7476_v19 = vmul.f32 %v5721_v2, %v7430_v3  ;;  %v7492_v23 = vmul.f32 %v7050_v36, %v6641_v10 }
 0x20a   : > { %11992 = vst [vmem:[#allocation427_spill] sm:$0xff] %v7460_v57  ;;  %11993 = vst [vmem:[#allocation428_spill] sm:$0xff] %v7464_v51  ;;  %v7483_v51 = vstv %s7348_s4  ;;  %v12001_v57 = vld [vmem:[#allocation249_spill] sm:$0xff]  ;;  %v7515_v10 = vmul.f32 %v7022_v32, %v6747_v25  ;;  %v7536_v25 = vmul.f32 %v7066_v47, %v6730_v4  ;;  %v7564_v4 = vstv %s7432_s30  ;;  %s8796_s4 = sld [smem:[#allocation6 + $0x86]]  ;;  %s8821_s30 = sld [smem:[#allocation7 + $0x8f]] }
 0x20b   : > { %11997 = vst [vmem:[#allocation429_spill] sm:$0xff] %v7472_v17  ;;  %11998 = vst [vmem:[#allocation430_spill] sm:$0xff] %v7476_v19  ;;  %v7488_v33 = vmul.f32 %v7090_v49, %v12001_v57  ;;  %v12004_v17 = vld [vmem:[#allocation30_spill] sm:$0xff]  ;;  %v7499_v19 = vstv %s7365_s5  ;;  %v7511_v57 = vmul.f32 %v5699_v60, %v6948_v9  ;;  %v7527_v11 = vmul.f32 %v5678_v54, %v7483_v51  ;;  %s8806_s5 = sld [smem:[#allocation6 + $0x106]] }
 0x20c   : > { %11999 = vst [vmem:[#allocation431_spill] sm:$0xff] %v7480_v45  ;;  %12000 = vst [vmem:[#allocation432_spill] sm:$0xff] %v7483_v51  ;;  %v7496_v3 = vrot.slane %v5644_v46, %v12004_v17  ;;  %v7503_v45 = vmul.f32 %v5735_v5, %v7456_v27  ;;  %v7519_v17 = vmul.f32 %v5718_v1, %v6967_v35  ;;  %5117 = vset.pattern.permute.xlu0 %v11994_v50  ;;  %v12019_v54 = vmov 23  }
 0x20d   : > { %12002 = vst [vmem:[#allocation433_spill] sm:$0xff] %v7488_v33  ;;  %12003 = vst [vmem:[#allocation434_spill] sm:$0xff] %v7492_v23  ;;  %v7523_v27 = vmul.f32 %v7036_v0, %v6750_v40  ;;  %v7530_v33 = vstv %s7397_s0  ;;  %v7544_v40 = vmul.f32 %v5681_v55, %v7499_v19  ;;  %5076 = vset.pattern.permute.xlu1 %v12019_v54  ;;  %3099 = vperm.xlu0 %5117, %v11995_v38   ;;  %s8808_s0 = sld [smem:[#allocation6 + $0x186]] }
 0x20e   : > { %12005 = vst [vmem:[#allocation435_spill] sm:$0xff] %v7496_v3  ;;  %12006 = vst [vmem:[#allocation436_spill] sm:$0xff] %v7499_v19  ;;  %v7553_v51 = vmul.f32 %v5721_v2, %v7019_v18  ;;  %v7561_v55 = vmul.f32 %v7050_v36, %v6766_v63  ;;  %3307 = vperm.xlu1 %5076, %v11940_v43   ;;  %v518_v19 = vpop.permute.xlu0 %517  ;;  %v7583_v63 = vmul.f32 %v5740_v8, %v5702_v61  ;;  %v12182_v3 = vld [vmem:[#allocation157_spill] sm:$0xff] }
 0x20f   : > { %12007 = vst [vmem:[#allocation437_spill] sm:$0xff] %v7503_v45  ;;  %12008 = vst [vmem:[#allocation438_spill] sm:$0xff] %v7507_v12  ;;  %v7609_v61 = vmul.f32 %v5721_v2, %v7564_v4  ;;  %v7630_v2 = vmul.f32 %v7022_v32, %v6936_v31  ;;  %v12181_v12 = vld [vmem:[#allocation141_spill] sm:$0xff]  ;;  %v12225_v45 = vld [vmem:[#allocation208_spill] sm:$0xff] }
 0x210   : > { %12009 = vst [vmem:[#allocation439_spill] sm:$0xff] %v7511_v57  ;;  %12010 = vst [vmem:[#allocation440_spill] sm:$0xff] %v7515_v10  ;;  %v7540_v10 = vmul.f32 %v7090_v49, %v6741_v52  ;;  %v7557_v52 = vmul.f32 %v5735_v5, %v7025_v39  ;;  %v12184_v57 = vld [vmem:[#allocation162_spill] sm:$0xff] }
 0x211   : > { %12011 = vst [vmem:[#allocation441_spill] sm:$0xff] %v7519_v17  ;;  %12012 = vst [vmem:[#allocation442_spill] sm:$0xff] %v7523_v27  ;;  %v7547_v27 = vstv %s7415_s27  ;;  %5119 = vset.pattern.permute.xlu0 %v12019_v54  ;;  %s8812_s27 = sld [smem:[#allocation6 + $0x206]] }
 0x212   : > { %12013 = vst [vmem:[#allocation443_spill] sm:$0xff] %v7527_v11  ;;  %12014 = vst [vmem:[#allocation444_spill] sm:$0xff] %v7530_v33  ;;  %3311 = vperm.xlu0 %5119, %v11995_v38   ;;  %v12130_v11 = vld [vmem:[#allocation105_spill] sm:$0xff] }
 0x213   : > { %12015 = vst [vmem:[#allocation445_spill] sm:$0xff] %v7536_v25  ;;  %12016 = vst [vmem:[#allocation446_spill] sm:$0xff] %v7540_v10  ;;  %v7571_v10 = vmul.f32 %v7053_v44, %v6819_v53  ;;  %v7575_v25 = vmul.f32 %v5699_v60, %v7530_v33  ;;  %v7590_v53 = vstv %s7466_s12  ;;  %v7594_v60 = vmul.f32 %v7036_v0, %v11950_v48  ;;  %s8823_s12 = sld [smem:[#allocation6 + $0x286]] }
 0x214   : > { %12017 = vst [vmem:[#allocation447_spill] sm:$0xff] %v7544_v40  ;;  %12018 = vst [vmem:[#allocation448_spill] sm:$0xff] %v7547_v27  ;;  %v7587_v40 = vmul.f32 %v5718_v1, %v7547_v27  ;;  %v7613_v1 = vmul.f32 %v7050_v36, %v11964_v7  ;;  %v7617_v48 = vmul.f32 %v5797_v29, %v5705_v62  ;;  %v5198_v7 = vld [vmem:[%s5526_s23] sm:$0xff]   ;;  %v12041_v62 = vmov 25   ;;  %v12044_v27 = vld [vmem:[#allocation124_spill] sm:$0xff] }
 0x215   : > { %12020 = vst [vmem:[#allocation449_spill] sm:$0xff] %v7553_v51  ;;  %12021 = vst [vmem:[#allocation450_spill] sm:$0xff] %v7557_v52  ;;  %v7579_v52 = vmul.f32 %v7022_v32, %v6838_v37  ;;  %v7605_v37 = vmul.f32 %v7066_v47, %v6831_v59  ;;  %v7626_v59 = vmul.f32 %v5833_v41, %v5738_v6  ;;  %5078 = vset.pattern.permute.xlu1 %v12041_v62  ;;  %v12047_v32 = vld [vmem:[#allocation72_spill] sm:$0xff]  ;;  %v12117_v51 = vmov 31  }
 0x216   : > { %12022 = vst [vmem:[#allocation451_spill] sm:$0xff] %v7561_v55  ;;  %12023 = vst [vmem:[#allocation452_spill] sm:$0xff] %v7564_v4  ;;  %v588_v55 = vpop.f32.mrb[3].mxu0  ;;  %v7633_v4 = vunpack.c.h.bf16 %v5198_v7  ;;  %v7643_v6 = vmul.f32 %v7053_v44, %v11969_v13  ;;  %v7647_v31 = vmul.f32 %v5740_v8, %v12044_v27  ;;  %3519 = vperm.xlu1 %5078, %v11940_v43   ;;  %5121 = vset.pattern.permute.xlu0 %v12041_v62 }
 0x217   : > { %12024 = vst [vmem:[#allocation453_spill] sm:$0xff] %v7571_v10  ;;  %12025 = vst [vmem:[#allocation454_spill] sm:$0xff] %v7575_v25  ;;  %v7596_v33 = vadd.f32 %v588_v55, %v518_v19  ;;  %v12036_v55 = vld [vmem:[#allocation296_spill] sm:$0xff]  ;;  %v7652_v7 = vmul.f32 %v7066_v47, %v6933_v20  ;;  %v7671_v20 = vmul.f32 %v7050_v36, %v6948_v9  ;;  %v5200_v9 = vld [vmem:[%s5526_s23 + $0x20] sm:$0xff]   ;;  %3523 = vperm.xlu0 %5121, %v11995_v38  }
 0x218   : > { %12026 = vst [vmem:[#allocation455_spill] sm:$0xff] %v7579_v52  ;;  %12027 = vst [vmem:[#allocation456_spill] sm:$0xff] %v7583_v63  ;;  %v7622_v19 = vmul.f32 %v7090_v49, %v12036_v55  ;;  %v7639_v55 = vmul.f32 %v5735_v5, %v7590_v53  ;;  %v7660_v5 = vmul.f32 %v7036_v0, %v6945_v34  ;;  %v5199_v10 = vld [vmem:[%s5526_s23 + $0x10] sm:$0xff]   ;;  %v2574_v0 = vpop.permute.xlu1 %2573  ;;  %v7689_v36 = vunpack.c.h.bf16 %v5200_v9 }
 0x219   : > { %12028 = vst [vmem:[#allocation457_spill] sm:$0xff] %v7587_v40  ;;  %12029 = vst [vmem:[#allocation458_spill] sm:$0xff] %v7590_v53  ;;  %v2514_v13 = vpack.c.bf16 %v7596_v33, %v5644_v46  ;;  %v12050_v53 = vld [vmem:[#allocation78_spill] sm:$0xff]  ;;  %v7678_v34 = vunpack.c.h.bf16 %v5199_v10  ;;  %v12061_v10 = vld [vmem:[#allocation33_spill] sm:$0xff]  ;;  %v12066_v9 = vmov 27   ;;  %v12095_v40 = vmov 29  }
 0x21a   : > { %12030 = vst [vmem:[#allocation459_spill] sm:$0xff] %v7594_v60  ;;  %12031 = vst [vmem:[#allocation460_spill] sm:$0xff] %v7596_v33  ;;  %v7682_v33 = vmul.f32 %v7090_v49, %v6939_v30  ;;  %v7699_v30 = vstv %s7567_s26  ;;  %5080 = vset.pattern.permute.xlu1 %v12066_v9  ;;  %v12107_v60 = vld [vmem:[#allocation179_spill] sm:$0xff]  ;;  %s8939_s26 = sld [smem:[#allocation7 + $0x6]] }
 0x21b   : > { %12032 = vst [vmem:[#allocation461_spill] sm:$0xff] %v7605_v37  ;;  %12033 = vst [vmem:[#allocation462_spill] sm:$0xff] %v7609_v61  ;;  %v7667_v37 = vmul.f32 %v12050_v53, %v5766_v16  ;;  %v12057_v16 = vld [vmem:[#allocation128_spill] sm:$0xff]  ;;  %4920 = vmatprep.subr.bf16.mxu0 %v2514_v13  ;;  %3731 = vperm.xlu1 %5080, %v11940_v43  }
 0x21c   : > { %12034 = vst [vmem:[#allocation463_spill] sm:$0xff] %v7613_v1  ;;  %12035 = vst [vmem:[#allocation464_spill] sm:$0xff] %v7617_v48  ;;  %v7686_v46 = vmul.f32 %v5833_v41, %v12057_v16  ;;  %4921 = vmatpush3.bf16.xpose.msra.mxu0 %v2514_v13  ;;  %v12071_v13 = vld [vmem:[#allocation156_spill] sm:$0xff]  ;;  %5123 = vset.pattern.permute.xlu0 %v12066_v9 }
 0x21d   : > { %12037 = vst [vmem:[#allocation465_spill] sm:$0xff] %v7622_v19  ;;  %12038 = vst [vmem:[#allocation466_spill] sm:$0xff] %v7626_v59  ;;  %v7656_v19 = vmul.f32 %v12047_v32, %v5757_v14  ;;  %3735 = vperm.xlu0 %5123, %v11995_v38   ;;  %v12098_v48 = vld [vmem:[#allocation172_spill] sm:$0xff] }
 0x21e   : > { %12039 = vst [vmem:[#allocation467_spill] sm:$0xff] %v7630_v2  ;;  %12040 = vst [vmem:[#allocation468_spill] sm:$0xff] %v7633_v4  ;;  %v12106_v2 = vld [vmem:[#allocation95_spill] sm:$0xff] }
 0x21f   : > { %12042 = vst [vmem:[#allocation469_spill] sm:$0xff] %v7639_v55  ;;  %12043 = vst [vmem:[#allocation470_spill] sm:$0xff] %v7643_v6  ;;  %v12053_v55 = vld [vmem:[#allocation127_spill] sm:$0xff]  ;;  %5082 = vset.pattern.permute.xlu1 %v12095_v40 }
 0x220   : > { %12045 = vst [vmem:[#allocation471_spill] sm:$0xff] %v7647_v31  ;;  %12046 = vst [vmem:[#allocation472_spill] sm:$0xff] %v7652_v7  ;;  %v7675_v14 = vmul.f32 %v5797_v29, %v12053_v55  ;;  %v12062_v7 = vld [vmem:[#allocation56_spill] sm:$0xff]  ;;  %3943 = vperm.xlu1 %5082, %v11940_v43  }
 0x221   : > { %12048 = vst [vmem:[#allocation473_spill] sm:$0xff] %v7656_v19  ;;  %12049 = vst [vmem:[#allocation474_spill] sm:$0xff] %v7660_v5  ;;  %v748_v19 = vpop.permute.xlu0 %747  ;;  %5125 = vset.pattern.permute.xlu0 %v12095_v40 }
 0x222   : > { %12051 = vst [vmem:[#allocation475_spill] sm:$0xff] %v7667_v37  ;;  %12052 = vst [vmem:[#allocation476_spill] sm:$0xff] %v7671_v20  ;;  %v7693_v37 = vmul.f32 %v7633_v4, %v12044_v27  ;;  %v761_v61 = vadd.f32 %v12062_v7, %v748_v19  ;;  %v12068_v19 = vld [vmem:[#allocation131_spill] sm:$0xff]  ;;  %v12074_v20 = vld [vmem:[#allocation58_spill] sm:$0xff]  ;;  %3947 = vperm.xlu0 %5125, %v11995_v38  }
 0x223   : > { %12054 = vst [vmem:[#allocation477_spill] sm:$0xff] %v7675_v14  ;;  %12055 = vst [vmem:[#allocation478_spill] sm:$0xff] %v7678_v34  ;;  %v2586_v14 = vadd.f32 %v12061_v10, %v2574_v0  ;;  %v7712_v0 = vmul.f32 %v7053_v44, %v6967_v35  ;;  %v7716_v27 = vmul.f32 %v12047_v32, %v12068_v19 }
 0x224   : > { %12056 = vst [vmem:[#allocation479_spill] sm:$0xff] %v7682_v33  ;;  %12058 = vst [vmem:[#allocation480_spill] sm:$0xff] %v7686_v46  ;;  %v12064_v33 = vld [vmem:[#allocation82_spill] sm:$0xff]  ;;  %v771_v59 = vadd.f32 %v12074_v20, %v761_v61  ;;  %v7730_v35 = vmul.f32 %v7066_v47, %v7019_v18  ;;  %v7734_v44 = vmul.f32 %v7678_v34, %v12053_v55  ;;  %5084 = vset.pattern.permute.xlu1 %v12117_v51 }
 0x225   : > { %12059 = vst [vmem:[#allocation481_spill] sm:$0xff] %v7689_v36  ;;  %12060 = vst [vmem:[#allocation482_spill] sm:$0xff] %v7693_v37  ;;  %v7703_v46 = vmul.f32 %v12064_v33, %v5792_v26  ;;  %v5201_v37 = vld [vmem:[%s5526_s23 + $0x30] sm:$0xff]   ;;  %v7746_v61 = vmul.f32 %v7689_v36, %v12057_v16  ;;  %v680_v18 = vld [vmem:[%s495_s3] sm:$0xff]  ;;  %4155 = vperm.xlu1 %5084, %v11940_v43   ;;  %s8992_s3 = sld [smem:[#allocation6 + $0x207]] }
 0x226   : > { %12063 = vst [vmem:[#allocation483_spill] sm:$0xff] %v7699_v30  ;;  %12067 = vst [vmem:[#allocation485_spill] sm:$0xff] %v7712_v0  ;;  %v7719_v26 = vunpack.c.h.bf16 %v5201_v37  ;;  %v12073_v30 = vld [vmem:[#allocation53_spill] sm:$0xff]  ;;  %v738_v37 = vpop.permute.xlu0 %737  ;;  %v12083_v55 = vld [vmem:[#allocation54_spill] sm:$0xff]  ;;  %vm681_vm2 = vnez %v680_v18  ;;  %5127 = vset.pattern.permute.xlu0 %v12117_v51 }
 0x227   : > { %12065 = vst [vmem:[#allocation484_spill] sm:$0xff] %v7703_v46  ;;  %12069 = vst [vmem:[#allocation486_spill] sm:$0xff] %v7716_v27  ;;  %v7723_v46 = vmul.f32 %v5740_v8, %v12071_v13  ;;  %v2596_v31 = vadd.f32 %v12073_v30, %v2586_v14  ;;  %v7738_v27 = vmul.f32 %v7090_v49, %v7025_v39  ;;  %v12081_v14 = vld [vmem:[#allocation160_spill] sm:$0xff]  ;;  %v2680_v49 = vpop.permute.xlu1 %2679  ;;  %v12087_v16 = vld [vmem:[#allocation146_spill] sm:$0xff]  ;;  %4159 = vperm.xlu0 %5127, %v11995_v38  }
 0x228   : > { %12070 = vst [vmem:[#allocation487_spill] sm:$0xff] %v7719_v26  ;;  %12075 = vst [vmem:[#allocation53_spill] sm:$0xff] %v7730_v35  ;;  %v7750_v20 = vmul.f32 %v5797_v29, %v12081_v14  ;;  %v12084_v35 = vld [vmem:[#allocation59_spill] sm:$0xff]  ;;  %v759_v39 = vadd.f32 %v12062_v7, %v738_v37 }
 0x229   : > { %12072 = vst [vmem:[#allocation488_spill] sm:$0xff] %v7723_v46  ;;  %12076 = vst [vmem:[#allocation58_spill] sm:$0xff] %v7734_v44  ;;  %v12078_v46 = vld [vmem:[#allocation139_spill] sm:$0xff]  ;;  %v2606_v47 = vadd.f32 %v12083_v55, %v2596_v31  ;;  %v781_v44 = vadd.f32 %v12084_v35, %v771_v59  ;;  %v7766_v31 = vmul.f32 %v7719_v26, %v12068_v19  ;;  %v12090_v35 = vld [vmem:[#allocation164_spill] sm:$0xff] }
 0x22a   : > { %12077 = vst [vmem:[#allocation489_spill] sm:$0xff] %v7738_v27  ;;  %v7742_v30 = vmul.f32 %v12050_v53, %v12078_v46  ;;  %12080 = vst [vmem:[#allocation491_spill] sm:$0xff] %v7746_v61  ;;  %v5202_v27 = vld [vmem:[%s5526_s23 + $0x40] sm:$0xff]   ;;  %v7762_v61 = vmul.f32 %v12064_v33, %v12087_v16  ;;  %v7770_v59 = vmul.f32 %v5833_v41, %v12090_v35  ;;  %v12092_v55 = vld [vmem:[#allocation61_spill] sm:$0xff] }
 0x22b   : > { %12082 = vst [vmem:[#allocation492_spill] sm:$0xff] %v7750_v20  ;;  %v7756_v0 = vunpack.c.h.bf16 %v5202_v27  ;;  %12089 = vst [vmem:[#allocation493_spill] sm:$0xff] %v7766_v31  ;;  %v2616_v37 = vadd.f32 %v12092_v55, %v2606_v47  ;;  %v12093_v27 = vld [vmem:[#allocation75_spill] sm:$0xff]  ;;  %v5203_v19 = vld [vmem:[%s5526_s23 + $0x50] sm:$0xff]   ;;  %s7960_s23 = sld [smem:[#allocation7 + $0x89]] }
 0x22c   : > { %12079 = vst [vmem:[#allocation490_spill] sm:$0xff] %v7742_v30  ;;  %v12086_v30 = vld [vmem:[#allocation34_spill] sm:$0xff]  ;;  %12088 = vst [vmem:[#allocation59_spill] sm:$0xff] %v7762_v61  ;;  %v791_v7 = vadd.f32 %v12093_v27, %v781_v44  ;;  %v12094_v20 = vld [vmem:[#allocation67_spill] sm:$0xff]  ;;  %v7780_v31 = vunpack.c.h.bf16 %v5203_v19  ;;  %v7788_v44 = vmul.f32 %v7633_v4, %v12071_v13  ;;  %v7801_v13 = vmul.f32 %v12050_v53, %v12107_v60 }
 0x22d   : > { %12085 = vst [vmem:[#allocation54_spill] sm:$0xff] %v7756_v0  ;;  %v2692_v6 = vadd.f32 %v12086_v30, %v2680_v49  ;;  %12091 = vst [vmem:[#allocation494_spill] sm:$0xff] %v7770_v59  ;;  %v769_v49 = vadd.f32 %v12094_v20, %v759_v39  ;;  %v12096_v61 = vld [vmem:[#allocation89_spill] sm:$0xff]  ;;  %v7784_v59 = vmul.f32 %v12047_v32, %v12098_v48  ;;  %v12103_v27 = vld [vmem:[#allocation83_spill] sm:$0xff] }
 0x22e   : > { %12097 = vst [vmem:[#allocation61_spill] sm:$0xff] %v7780_v31  ;;  %12100 = vst [vmem:[#allocation67_spill] sm:$0xff] %v7788_v44  ;;  %v12101_v39 = vld [vmem:[#allocation65_spill] sm:$0xff]  ;;  %v12105_v19 = vld [vmem:[#allocation90_spill] sm:$0xff] }
 0x22f   : > { %v2702_v5 = vadd.f32 %v12096_v61, %v2692_v6  ;;  %12099 = vst [vmem:[#allocation75_spill] sm:$0xff] %v7784_v59  ;;  %v2626_v47 = vadd.f32 %v12101_v39, %v2616_v37  ;;  %v12102_v20 = vld [vmem:[#allocation77_spill] sm:$0xff]  ;;  %v779_v1 = vadd.f32 %v12103_v27, %v769_v49  ;;  %v847_v6 = vpop.permute.xlu0 %846  ;;  %v7795_v61 = vmul.f32 %v7756_v0, %v12078_v46  ;;  %v2786_v59 = vpop.permute.xlu1 %2785  ;;  %v12111_v39 = vld [vmem:[#allocation86_spill] sm:$0xff]  ;;  %v12112_v27 = vld [vmem:[#allocation35_spill] sm:$0xff] }
 0x230   : > { %v801_v55 = vadd.f32 %v12102_v20, %v791_v7  ;;  %v865_v63 = vadd.f32 %v12106_v2, %v847_v6  ;;  %12108 = vst [vmem:[#allocation65_spill] sm:$0xff] %v7801_v13  ;;  %v7805_v37 = vmul.f32 %v7678_v34, %v12081_v14  ;;  %v12110_v7 = vld [vmem:[#allocation69_spill] sm:$0xff]  ;;  %v2798_v46 = vadd.f32 %v12112_v27, %v2786_v59  ;;  %v12118_v14 = vld [vmem:[#allocation211_spill] sm:$0xff] }
 0x231   : > { %12104 = vst [vmem:[#allocation89_spill] sm:$0xff] %v7795_v61  ;;  %v2712_v25 = vadd.f32 %v12105_v19, %v2702_v5  ;;  %v2636_v49 = vadd.f32 %v12110_v7, %v2626_v47  ;;  %v789_v20 = vadd.f32 %v12111_v39, %v779_v1  ;;  %v12113_v5 = vld [vmem:[#allocation199_spill] sm:$0xff]  ;;  %v12115_v19 = vld [vmem:[#allocation94_spill] sm:$0xff]  ;;  %v7821_v47 = vmul.f32 %v5797_v29, %v12118_v14  ;;  %v12122_v7 = vld [vmem:[#allocation81_spill] sm:$0xff] }
 0x232   : > { %12109 = vst [vmem:[#allocation77_spill] sm:$0xff] %v7805_v37  ;;  %v7813_v6 = vmul.f32 %v5740_v8, %v12113_v5  ;;  %v12116_v61 = vld [vmem:[#allocation102_spill] sm:$0xff]  ;;  %v12120_v1 = vmov 0   ;;  %v811_v39 = vadd.f32 %v12122_v7, %v801_v55  ;;  %v12123_v8 = vld [vmem:[#allocation115_spill] sm:$0xff] }
 0x233   : > { %v2722_v44 = vadd.f32 %v12115_v19, %v2712_v25  ;;  %v875_v13 = vadd.f32 %v12116_v61, %v865_v63  ;;  %12119 = vst [vmem:[#allocation90_spill] sm:$0xff] %v7821_v47  ;;  %v7825_v59 = vsel %vm681_vm2, 16843009, %v12120_v1  ;;  %v2808_v37 = vadd.f32 %v12123_v8, %v2798_v46  ;;  %v12125_v25 = vld [vmem:[#allocation186_spill] sm:$0xff]  ;;  %v12127_v19 = vld [vmem:[#allocation73_spill] sm:$0xff]  ;;  %v12128_v47 = vld [vmem:[#allocation87_spill] sm:$0xff]  ;;  %v2672_v7 = vpop.permute.xlu0 %2671  ;;  %v2892_v46 = vpop.permute.xlu1 %2891 }
 0x234   : > { %12114 = vst [vmem:[#allocation83_spill] sm:$0xff] %v7813_v6  ;;  %12121 = vst [vmem:[#allocation69_spill] sm:$0xff] %v7825_v59  ;;  %v7832_v63 = vmul.f32 %v7780_v31, %v12087_v16  ;;  %v7836_v61 = vmul.f32 %v12064_v33, %v12125_v25  ;;  %v2646_v29 = vadd.f32 %v12127_v19, %v2636_v49  ;;  %v12129_v6 = vld [vmem:[#allocation98_spill] sm:$0xff]  ;;  %v12237_v59 = vld [vmem:[#allocation224_spill] sm:$0xff] }
 0x235   : > { %v799_v18 = vadd.f32 %v12128_v47, %v789_v20  ;;  %v2732_v52 = vadd.f32 %v12129_v6, %v2722_v44  ;;  %v885_v55 = vadd.f32 %v12130_v11, %v875_v13  ;;  %v7844_v8 = vmul.f32 %v7689_v36, %v12090_v35  ;;  %v12135_v49 = vld [vmem:[#allocation218_spill] sm:$0xff]  ;;  %v12137_v44 = vld [vmem:[#allocation101_spill] sm:$0xff]  ;;  %v12138_v13 = vld [vmem:[#allocation111_spill] sm:$0xff] }
 0x236   : > { %12124 = vst [vmem:[#allocation86_spill] sm:$0xff] %v7832_v63  ;;  %12126 = vst [vmem:[#allocation94_spill] sm:$0xff] %v7836_v61  ;;  %v7848_v16 = vmul.f32 %v7719_v26, %v12098_v48  ;;  %v12133_v63 = vld [vmem:[#allocation215_spill] sm:$0xff]  ;;  %v7856_v20 = vmul.f32 %v12047_v32, %v12135_v49  ;;  %v12139_v47 = vld [vmem:[#allocation118_spill] sm:$0xff]  ;;  %v7864_v48 = vmul.f32 %v7633_v4, %v12113_v5  ;;  %v12143_v49 = vmov 3  }
 0x237   : > { %12131 = vst [vmem:[#allocation102_spill] sm:$0xff] %v7844_v8  ;;  %v7852_v61 = vmul.f32 %v5833_v41, %v12133_v63  ;;  %v2742_v11 = vadd.f32 %v12137_v44, %v2732_v52  ;;  %v895_v6 = vadd.f32 %v12138_v13, %v885_v55  ;;  %v2818_v19 = vadd.f32 %v12139_v47, %v2808_v37  ;;  %v12141_v35 = vld [vmem:[#allocation85_spill] sm:$0xff]  ;;  %v12146_v13 = vld [vmem:[#allocation110_spill] sm:$0xff]  ;;  %v12148_v5 = vld [vmem:[#allocation119_spill] sm:$0xff] }
 0x238   : > { %12132 = vst [vmem:[#allocation81_spill] sm:$0xff] %v7848_v16  ;;  %12136 = vst [vmem:[#allocation73_spill] sm:$0xff] %v7856_v20  ;;  %v7867_v26 = vadd.f32 %v12141_v35, %v811_v39  ;;  %v2690_v41 = vadd.f32 %v12086_v30, %v2672_v7  ;;  %v12142_v16 = vld [vmem:[#allocation36_spill] sm:$0xff]  ;;  %5086 = vset.pattern.permute.xlu1 %v12143_v49  ;;  %v7874_v52 = vmul.f32 %v7756_v0, %v12107_v60  ;;  %v12145_v55 = vld [vmem:[#allocation93_spill] sm:$0xff]  ;;  %v2778_v60 = vpop.permute.xlu0 %2777 }
 0x239   : > { %12134 = vst [vmem:[#allocation115_spill] sm:$0xff] %v7852_v61  ;;  %12140 = vst [vmem:[#allocation87_spill] sm:$0xff] %v7864_v48  ;;  %v2904_v32 = vadd.f32 %v12142_v16, %v2892_v46  ;;  %vm2650_vm3 = vcmp.gt.f32.partialorder %v2646_v29, 0.0  ;;  %v2654_v37 = vmul.f32 0.2, %v2646_v29  ;;  %v809_v44 = vadd.f32 %v12145_v55, %v799_v18  ;;  %v12147_v35 = vld [vmem:[#allocation113_spill] sm:$0xff]  ;;  %1058 = vperm.xlu1 %5086, %v11940_v43  }
 0x23a   : > { %12144 = vst [vmem:[#allocation98_spill] sm:$0xff] %v7874_v52  ;;  %v2752_v47 = vadd.f32 %v12146_v13, %v2742_v11  ;;  %v905_v39 = vadd.f32 %v12147_v35, %v895_v6  ;;  %v2828_v7 = vadd.f32 %v12148_v5, %v2818_v19  ;;  %v12149_v30 = vld [vmem:[#allocation122_spill] sm:$0xff]  ;;  %v12150_v4 = vld [vmem:[#allocation135_spill] sm:$0xff]  ;;  %v2998_v52 = vpop.permute.xlu1 %2997  ;;  %v7886_v18 = vmul.f32 %v7780_v31, %v12125_v25  ;;  %v12158_v13 = vld [vmem:[#allocation137_spill] sm:$0xff] }
 0x23b   : > { %v2700_v46 = vadd.f32 %v12149_v30, %v2690_v41  ;;  %v2914_v48 = vadd.f32 %v12150_v4, %v2904_v32  ;;  %v12152_v11 = vld [vmem:[#allocation227_spill] sm:$0xff]  ;;  %v7894_v5 = vmul.f32 %v7678_v34, %v12118_v14  ;;  %v12155_v41 = vld [vmem:[#allocation117_spill] sm:$0xff]  ;;  %v2658_v20 = vsel %vm2650_vm3, %v2646_v29, %v2654_v37  ;;  %v12165_v29 = vld [vmem:[#allocation138_spill] sm:$0xff] }
 0x23c   : > { %v2760_v0 = vmul.f32 0.2, %v2752_v47  ;;  %12151 = vst [vmem:[#allocation105_spill] sm:$0xff] %v7886_v18  ;;  %v7890_v55 = vmul.f32 %v12050_v53, %v12152_v11  ;;  %v915_v30 = vadd.f32 %v12155_v41, %v905_v39  ;;  %v12156_v4 = vld [vmem:[#allocation121_spill] sm:$0xff]  ;;  %v12157_v6 = vld [vmem:[#allocation123_spill] sm:$0xff]  ;;  %vm2756_vm4 = vcmp.gt.f32.partialorder %v2752_v47, 0.0  ;;  %v2990_v18 = vpop.permute.xlu0 %2989 }
 0x23d   : > { %12154 = vst [vmem:[#allocation111_spill] sm:$0xff] %v7894_v5  ;;  %v2838_v32 = vadd.f32 %v12156_v4, %v2828_v7  ;;  %v2710_v19 = vadd.f32 %v12157_v6, %v2700_v46  ;;  %v2924_v35 = vadd.f32 %v12158_v13, %v2914_v48  ;;  %v2796_v25 = vadd.f32 %v12112_v27, %v2778_v60  ;;  %v12159_v31 = vld [vmem:[#allocation39_spill] sm:$0xff]  ;;  %v12161_v39 = vld [vmem:[#allocation97_spill] sm:$0xff]  ;;  %v12162_v7 = vld [vmem:[#allocation126_spill] sm:$0xff] }
 0x23e   : > { %12153 = vst [vmem:[#allocation101_spill] sm:$0xff] %v7890_v55  ;;  %v3010_v53 = vadd.f32 %v12159_v31, %v2998_v52  ;;  %v12160_v11 = vmov 1   ;;  %vm825_vm5 = vcmp.gt.f32.partialorder %v7867_v26, 0.0  ;;  %v829_v14 = vmul.f32 0.2, %v7867_v26  ;;  %v12164_v48 = vld [vmem:[#allocation130_spill] sm:$0xff] }
 0x23f   : > { %5128 = vset.pattern.permute.xlu0 %v12160_v11  ;;  %v819_v41 = vadd.f32 %v12161_v39, %v809_v44  ;;  %v2848_v4 = vadd.f32 %v12162_v7, %v2838_v32  ;;  %v12163_v46 = vmov 5   ;;  %v2720_v6 = vadd.f32 %v12164_v48, %v2710_v19  ;;  %v12166_v13 = vld [vmem:[#allocation140_spill] sm:$0xff]  ;;  %v12168_v5 = vld [vmem:[#allocation74_spill] sm:$0xff]  ;;  %v12169_v44 = vld [vmem:[#allocation125_spill] sm:$0xff]  ;;  %v3104_v19 = vpop.permute.xlu1 %3103 }
 0x240   : > { %5088 = vset.pattern.permute.xlu1 %v12163_v46  ;;  %v2934_v37 = vadd.f32 %v12165_v29, %v2924_v35  ;;  %v2806_v60 = vadd.f32 %v12166_v13, %v2796_v25  ;;  %v12167_v34 = vld [vmem:[#allocation144_spill] sm:$0xff]  ;;  %850 = vperm.xlu0 %5128, %v11995_v38   ;;  %v2664_v55 = vmul.f32 %v12168_v5, %v2658_v20  ;;  %v12170_v32 = vld [vmem:[#allocation129_spill] sm:$0xff]  ;;  %v12171_v48 = vld [vmem:[#allocation134_spill] sm:$0xff] }
 0x241   : > { %v3020_v52 = vadd.f32 %v12167_v34, %v3010_v53  ;;  %v2764_v61 = vsel %vm2756_vm4, %v2752_v47, %v2760_v0  ;;  %v925_v39 = vadd.f32 %v12169_v44, %v915_v30  ;;  %v2858_v7 = vadd.f32 %v12170_v32, %v2848_v4  ;;  %1270 = vperm.xlu1 %5088, %v11940_v43   ;;  %v12172_v29 = vld [vmem:[#allocation142_spill] sm:$0xff]  ;;  %v12173_v13 = vld [vmem:[#allocation143_spill] sm:$0xff]  ;;  %v12175_v30 = vld [vmem:[#allocation133_spill] sm:$0xff] }
 0x242   : > { %v2730_v35 = vadd.f32 %v12171_v48, %v2720_v6  ;;  %v2944_v25 = vadd.f32 %v12172_v29, %v2934_v37  ;;  %v2816_v34 = vadd.f32 %v12173_v13, %v2806_v60  ;;  %v12174_v53 = vld [vmem:[#allocation147_spill] sm:$0xff]  ;;  %vm823_vm6 = vcmp.gt.f32.partialorder %v819_v41, 0.0  ;;  %v12176_v4 = vld [vmem:[#allocation150_spill] sm:$0xff]  ;;  %v12178_v6 = vld [vmem:[#allocation161_spill] sm:$0xff]  ;;  %v3202_v13 = vpop.permute.xlu0 %3201 }
 0x243   : > { %v3030_v8 = vadd.f32 %v12174_v53, %v3020_v52  ;;  %vm2862_vm7 = vcmp.gt.f32.partialorder %v2858_v7, 0.0  ;;  %v2866_v20 = vmul.f32 0.2, %v2858_v7  ;;  %v3008_v0 = vadd.f32 %v12159_v31, %v2990_v18  ;;  %v12177_v16 = vld [vmem:[#allocation154_spill] sm:$0xff]  ;;  %v12179_v60 = vld [vmem:[#allocation155_spill] sm:$0xff]  ;;  %v12180_v52 = vld [vmem:[#allocation40_spill] sm:$0xff] }
 0x244   : > { %v827_v47 = vmul.f32 0.2, %v819_v41  ;;  %v2770_v44 = vmul.f32 %v12175_v30, %v2764_v61  ;;  %v2954_v32 = vadd.f32 %v12176_v4, %v2944_v25  ;;  %v2826_v17 = vadd.f32 %v12177_v16, %v2816_v34  ;;  %5130 = vset.pattern.permute.xlu0 %v12143_v49  ;;  %v3210_v16 = vpop.permute.xlu1 %3209  ;;  %v12183_v34 = vld [vmem:[#allocation158_spill] sm:$0xff] }
 0x245   : > { %vm929_vm8 = vcmp.gt.f32.partialorder %v925_v39, 0.0  ;;  %v3040_v37 = vadd.f32 %v12178_v6, %v3030_v8  ;;  %v3018_v48 = vadd.f32 %v12179_v60, %v3008_v0  ;;  %v3116_v29 = vadd.f32 %v12180_v52, %v3104_v19  ;;  %5089 = vset.pattern.permute.xlu1 %v12120_v1  ;;  %1062 = vperm.xlu0 %5130, %v11995_v38   ;;  %v12185_v6 = vld [vmem:[#allocation163_spill] sm:$0xff] }
 0x246   : > { %v933_v18 = vmul.f32 0.2, %v925_v39  ;;  %v2870_v53 = vsel %vm2862_vm7, %v2858_v7, %v2866_v20  ;;  %v2740_v61 = vadd.f32 %v12181_v12, %v2730_v35  ;;  %v2964_v25 = vadd.f32 %v12182_v3, %v2954_v32  ;;  %v12186_v60 = vld [vmem:[#allocation167_spill] sm:$0xff]  ;;  %752 = vperm.xlu1 %5089, %v5586_v28   ;;  %v12187_v3 = vld [vmem:[#allocation238_spill] sm:$0xff]  ;;  %v12190_v20 = vld [vmem:[#allocation153_spill] sm:$0xff] }
 0x247   : > { %v2836_v4 = vadd.f32 %v12183_v34, %v2826_v17  ;;  %v3050_v8 = vadd.f32 %v12184_v57, %v3040_v37  ;;  %v3028_v0 = vadd.f32 %v12185_v6, %v3018_v48  ;;  %v3126_v19 = vadd.f32 %v12186_v60, %v3116_v29  ;;  %v12191_v37 = vld [vmem:[#allocation169_spill] sm:$0xff]  ;;  %v12192_v29 = vld [vmem:[#allocation170_spill] sm:$0xff]  ;;  %v12195_v60 = vld [vmem:[#allocation44_spill] sm:$0xff] }
 0x248   : > { %v833_v7 = vsel %vm825_vm5, %v7867_v26, %v829_v14  ;;  %v831_v12 = vsel %vm823_vm6, %v819_v41, %v827_v47  ;;  %v7946_v35 = vmul.f32 %v12064_v33, %v12187_v3  ;;  %v7950_v17 = vmul.f32 %v7689_v36, %v12133_v63  ;;  %v12193_v26 = vld [vmem:[#allocation149_spill] sm:$0xff]  ;;  %v12194_v41 = vld [vmem:[#allocation171_spill] sm:$0xff]  ;;  %v3414_v3 = vpop.permute.xlu0 %3413 }
 0x249   : > { %v2774_v57 = vadd.f32 %v2770_v44, %v2664_v55  ;;  %v2876_v32 = vmul.f32 %v12190_v20, %v2870_v53  ;;  %v3060_v48 = vadd.f32 %v12191_v37, %v3050_v8  ;;  %v3038_v34 = vadd.f32 %v12192_v29, %v3028_v0  ;;  %5132 = vset.pattern.permute.xlu0 %v12163_v46  ;;  %v12196_v44 = vld [vmem:[#allocation165_spill] sm:$0xff]  ;;  %v12199_v37 = vld [vmem:[#allocation178_spill] sm:$0xff] }
 0x24a   : > { %12188 = vst [vmem:[#allocation118_spill] sm:$0xff] %v7946_v35  ;;  %12189 = vst [vmem:[#allocation85_spill] sm:$0xff] %v7950_v17  ;;  %v937_v6 = vsel %vm929_vm8, %v925_v39, %v933_v18  ;;  %v2750_v14 = vadd.f32 %v12193_v26, %v2740_v61  ;;  %v3136_v47 = vadd.f32 %v12194_v41, %v3126_v19  ;;  %vm2968_vm9 = vcmp.gt.f32.partialorder %v2964_v25, 0.0  ;;  %v3316_v39 = vpop.permute.xlu1 %3315  ;;  %v12198_v18 = vld [vmem:[#allocation177_spill] sm:$0xff]  ;;  %v12200_v29 = vld [vmem:[#allocation174_spill] sm:$0xff] }
 0x24b   : > { %v3220_v33 = vadd.f32 %v12195_v60, %v3202_v13  ;;  %v2972_v55 = vmul.f32 0.2, %v2964_v25  ;;  %v2846_v53 = vadd.f32 %v12196_v44, %v2836_v4  ;;  %v3222_v8 = vadd.f32 %v12195_v60, %v3210_v16  ;;  %v12201_v26 = vld [vmem:[#allocation180_spill] sm:$0xff]  ;;  %1274 = vperm.xlu0 %5132, %v11995_v38   ;;  %v12202_v63 = vld [vmem:[#allocation109_spill] sm:$0xff] }
 0x24c   : > { %v12197_v0 = vmov 17   ;;  %v3070_v61 = vadd.f32 %v12198_v18, %v3060_v48  ;;  %v3048_v19 = vadd.f32 %v12199_v37, %v3038_v34  ;;  %v3146_v13 = vadd.f32 %v12200_v29, %v3136_v47  ;;  %v12204_v16 = vld [vmem:[#allocation145_spill] sm:$0xff]  ;;  %v12205_v34 = vld [vmem:[#allocation182_spill] sm:$0xff]  ;;  %v12206_v18 = vld [vmem:[#allocation187_spill] sm:$0xff] }
 0x24d   : > { %5091 = vset.pattern.permute.xlu1 %v12197_v0  ;;  %v3230_v41 = vadd.f32 %v12201_v26, %v3220_v33  ;;  %v7971_v36 = vmul.f32 %v12202_v63, %v833_v7  ;;  %v7974_v4 = vmul.f32 %v12202_v63, %v831_v12  ;;  %v7977_v44 = vmul.f32 %v12204_v16, %v937_v6  ;;  %v12207_v29 = vld [vmem:[#allocation173_spill] sm:$0xff]  ;;  %v12208_v26 = vld [vmem:[#allocation188_spill] sm:$0xff]  ;;  %v3626_v6 = vpop.permute.xlu0 %3625 }
 0x24e   : > { %v2880_v17 = vadd.f32 %v2876_v32, %v2774_v57  ;;  %2683 = vperm.xlu1 %5091, %v5586_v28   ;;  %vm2754_vm10 = vcmp.gt.f32.partialorder %v2750_v14, 0.0  ;;  %v2758_v48 = vmul.f32 0.2, %v2750_v14  ;;  %v3156_v47 = vadd.f32 %v12205_v34, %v3146_v13  ;;  %v12209_v63 = vld [vmem:[#allocation60_spill] sm:$0xff]  ;;  %v12210_v32 = vld [vmem:[#allocation185_spill] sm:$0xff] }
 0x24f   : > { %12203 = vst [vmem:[#allocation93_spill] sm:$0xff] %v7971_v36  ;;  %v3240_v33 = vadd.f32 %v12206_v18, %v3230_v41  ;;  %v2976_v37 = vsel %vm2968_vm9, %v2964_v25, %v2972_v55  ;;  %v7984_v7 = vadd.f32 %v12207_v29, %v2846_v53  ;;  %v3232_v12 = vadd.f32 %v12208_v26, %v3222_v8  ;;  %v12211_v36 = vld [vmem:[#allocation190_spill] sm:$0xff]  ;;  %v3422_v41 = vpop.permute.xlu1 %3421  ;;  %v12212_v25 = vld [vmem:[#allocation193_spill] sm:$0xff]  ;;  %v12213_v53 = vld [vmem:[#allocation195_spill] sm:$0xff] }
 0x250   : > { %v3432_v35 = vadd.f32 %v12209_v63, %v3414_v3  ;;  %vm3074_vm11 = vcmp.gt.f32.partialorder %v3070_v61, 0.0  ;;  %v3078_v57 = vmul.f32 0.2, %v3070_v61  ;;  %v3058_v52 = vadd.f32 %v12210_v32, %v3048_v19  ;;  %v12214_v18 = vld [vmem:[#allocation207_spill] sm:$0xff]  ;;  %v12215_v29 = vld [vmem:[#allocation68_spill] sm:$0xff]  ;;  %v12216_v19 = vld [vmem:[#allocation181_spill] sm:$0xff] }
 0x251   : > { %v3166_v23 = vadd.f32 %v12211_v36, %v3156_v47  ;;  %v11189_v13 = vmov 6   ;;  %v3250_v55 = vadd.f32 %v12212_v25, %v3240_v33  ;;  %v3242_v34 = vadd.f32 %v12213_v53, %v3232_v12  ;;  %v12217_v36 = vld [vmem:[#allocation197_spill] sm:$0xff] }
 0x252   : > { %5133 = vset.pattern.permute.xlu0 %v11189_v13  ;;  %v3442_v8 = vadd.f32 %v12214_v18, %v3432_v35  ;;  %v3328_v3 = vadd.f32 %v12215_v29, %v3316_v39  ;;  %5093 = vset.pattern.permute.xlu1 %v11968_v56  ;;  %v7997_v26 = vsel %vm2754_vm10, %v2750_v14, %v2758_v48  ;;  %v8004_v33 = vstv %s7960_s23  ;;  %v12219_v12 = vld [vmem:[#allocation205_spill] sm:$0xff]  ;;  %v12220_v35 = vld [vmem:[#allocation206_spill] sm:$0xff]  ;;  %s9000_s23 = sld [smem:[#allocation6 + $0x287]] }
 0x253   : > { %v2982_v32 = vmul.f32 %v12216_v19, %v2976_v37  ;;  %v3176_v47 = vadd.f32 %v12217_v36, %v3166_v23  ;;  %1376 = vperm.xlu0 %5133, %v11940_v43   ;;  %2895 = vperm.xlu1 %5093, %v5586_v28   ;;  %12218 = vst [vmem:[#allocation110_spill] sm:$0xff] %v8004_v33  ;;  %v12221_v39 = vld [vmem:[#allocation213_spill] sm:$0xff]  ;;  %v12222_v56 = vld [vmem:[#allocation210_spill] sm:$0xff]  ;;  %vm2860_vm12 = vcmp.gt.f32.partialorder %v7984_v7, 0.0  ;;  %v12224_v37 = vld [vmem:[#allocation148_spill] sm:$0xff]  ;;  %v3838_v19 = vpop.permute.xlu0 %3837 }
 0x254   : > { %v3260_v25 = vadd.f32 %v12219_v12, %v3250_v55  ;;  %v3252_v53 = vadd.f32 %v12220_v35, %v3242_v34  ;;  %v3452_v18 = vadd.f32 %v12221_v39, %v3442_v8  ;;  %v3338_v13 = vadd.f32 %v12222_v56, %v3328_v3  ;;  %v12223_v48 = vld [vmem:[#allocation189_spill] sm:$0xff]  ;;  %v3528_v35 = vpop.permute.xlu1 %3527  ;;  %v12228_v8 = vld [vmem:[#allocation222_spill] sm:$0xff] }
 0x255   : > { %v3082_v14 = vsel %vm3074_vm11, %v3070_v61, %v3078_v57  ;;  %v3068_v23 = vadd.f32 %v12223_v48, %v3058_v52  ;;  %v3644_v36 = vadd.f32 %v12224_v37, %v3626_v6  ;;  %v3184_v29 = vmul.f32 0.2, %v3176_v47  ;;  %v12226_v16 = vld [vmem:[#allocation209_spill] sm:$0xff]  ;;  %v12229_v39 = vld [vmem:[#allocation230_spill] sm:$0xff]  ;;  %v12230_v57 = vld [vmem:[#allocation216_spill] sm:$0xff] }
 0x256   : > { %v3270_v33 = vadd.f32 %v12225_v45, %v3260_v25  ;;  %v3262_v55 = vadd.f32 %v12226_v16, %v3252_v53  ;;  %v12227_v12 = vld [vmem:[#allocation225_spill] sm:$0xff]  ;;  %vm3180_vm13 = vcmp.gt.f32.partialorder %v3176_v47, 0.0  ;;  %v3348_v3 = vadd.f32 %v12228_v8, %v3338_v13  ;;  %v12231_v45 = vld [vmem:[#allocation228_spill] sm:$0xff]  ;;  %v12234_v13 = vld [vmem:[#allocation235_spill] sm:$0xff] }
 0x257   : > { %v3462_v34 = vadd.f32 %v12227_v12, %v3452_v18  ;;  %v3654_v56 = vadd.f32 %v12229_v39, %v3644_v36  ;;  %v3434_v61 = vadd.f32 %v12209_v63, %v3422_v41  ;;  %1388 = vperm.xlu0 %5133, %v5586_v28   ;;  %v2986_v52 = vadd.f32 %v2982_v32, %v2880_v17  ;;  %v12232_v16 = vld [vmem:[#allocation212_spill] sm:$0xff]  ;;  %v12233_v18 = vld [vmem:[#allocation226_spill] sm:$0xff]  ;;  %v12236_v39 = vld [vmem:[#allocation201_spill] sm:$0xff] }
 0x258   : > { %v2864_v6 = vmul.f32 0.2, %v7984_v7  ;;  %v3272_v48 = vadd.f32 %v12230_v57, %v3262_v55  ;;  %5095 = vset.pattern.permute.xlu1 %v11994_v50  ;;  %v3280_v53 = vadd.f32 %v12232_v16, %v3270_v33  ;;  %v3358_v12 = vadd.f32 %v12233_v18, %v3348_v3  ;;  %v12235_v41 = vld [vmem:[#allocation176_spill] sm:$0xff]  ;;  %v12238_v57 = vld [vmem:[#allocation234_spill] sm:$0xff]  ;;  %v12239_v33 = vld [vmem:[#allocation229_spill] sm:$0xff] }
 0x259   : > { %v3472_v25 = vadd.f32 %v12231_v45, %v3462_v34  ;;  %v3444_v8 = vadd.f32 %v12234_v13, %v3434_v61  ;;  %3107 = vperm.xlu1 %5095, %v5586_v28   ;;  %v3856_v36 = vadd.f32 %v12235_v41, %v3838_v19  ;;  %v3088_v17 = vmul.f32 %v12236_v39, %v3082_v14  ;;  %v4050_v45 = vpop.permute.xlu0 %4049  ;;  %v12240_v3 = vld [vmem:[#allocation239_spill] sm:$0xff]  ;;  %v3634_v13 = vpop.permute.xlu1 %3633  ;;  %v12241_v14 = vld [vmem:[#allocation232_spill] sm:$0xff] }
 0x25a   : > { %v3188_v32 = vsel %vm3180_vm13, %v3176_v47, %v3184_v29  ;;  %v3282_v55 = vadd.f32 %v12237_v59, %v3272_v48  ;;  %v3664_v34 = vadd.f32 %v12238_v57, %v3654_v56  ;;  %vm3072_vm14 = vcmp.gt.f32.partialorder %v3068_v23, 0.0  ;;  %v12242_v29 = vld [vmem:[#allocation254_spill] sm:$0xff]  ;;  %v12243_v56 = vld [vmem:[#allocation220_spill] sm:$0xff] }
 0x25b   : > { %v3076_v50 = vmul.f32 0.2, %v3068_v23  ;;  %v3368_v16 = vadd.f32 %v12239_v33, %v3358_v12  ;;  %v3454_v18 = vadd.f32 %v12240_v3, %v3444_v8  ;;  %v11192_v61 = vmov 7   ;;  %v12244_v8 = vld [vmem:[#allocation237_spill] sm:$0xff]  ;;  %v12245_v33 = vld [vmem:[#allocation240_spill] sm:$0xff] }
 0x25c   : > { %5136 = vset.pattern.permute.xlu0 %v11192_v61  ;;  %vm3286_vm15 = vcmp.gt.f32.partialorder %v3282_v55, 0.0  ;;  %v3290_v19 = vmul.f32 0.2, %v3282_v55  ;;  %v3482_v0 = vadd.f32 %v12241_v14, %v3472_v25  ;;  %v3866_v47 = vadd.f32 %v12242_v29, %v3856_v36  ;;  %v12246_v61 = vld [vmem:[#allocation250_spill] sm:$0xff]  ;;  %v12247_v14 = vld [vmem:[#allocation184_spill] sm:$0xff] }
 0x25d   : > { %1486 = vperm.xlu0 %5136, %v11995_v38   ;;  %v2868_v59 = vsel %vm2860_vm12, %v7984_v7, %v2864_v6  ;;  %v3194_v48 = vmul.f32 %v12243_v56, %v3188_v32  ;;  %v3288_v12 = vmul.f32 0.2, %v3280_v53  ;;  %v3378_v57 = vadd.f32 %v12244_v8, %v3368_v16  ;;  %5097 = vset.pattern.permute.xlu1 %v12019_v54  ;;  %v953_v16 = vpop.permute.xlu0 %952  ;;  %v12248_v54 = vld [vmem:[#allocation244_spill] sm:$0xff]  ;;  %v12249_v56 = vld [vmem:[#allocation253_spill] sm:$0xff]  ;;  %v3740_v1 = vpop.permute.xlu1 %3739 }
 0x25e   : > { %vm3284_vm0 = vcmp.gt.f32.partialorder %v3280_v53, 0.0  ;;  %v3674_v3 = vadd.f32 %v12245_v33, %v3664_v34  ;;  %v3464_v25 = vadd.f32 %v12246_v61, %v3454_v18  ;;  %v3540_v36 = vadd.f32 %v12247_v14, %v3528_v35  ;;  %3319 = vperm.xlu1 %5097, %v5586_v28   ;;  %v12250_v33 = vld [vmem:[#allocation255_spill] sm:$0xff] }
 0x25f   : > { %v8052_v29 = vadd.f32 %v7977_v44, %v7974_v4  ;;  %v3092_v7 = vadd.f32 %v3088_v17, %v2986_v52  ;;  %v3080_v6 = vsel %vm3072_vm14, %v3068_v23, %v3076_v50  ;;  %v3294_v32 = vsel %vm3286_vm15, %v3282_v55, %v3290_v19  ;;  %v12251_v61 = vld [vmem:[#allocation259_spill] sm:$0xff]  ;;  %v12255_v50 = vld [vmem:[#allocation236_spill] sm:$0xff] }
 0x260   : > { %v3492_v8 = vadd.f32 %v12248_v54, %v3482_v0  ;;  %v3474_v34 = vadd.f32 %v12249_v56, %v3464_v25  ;;  %v3876_v18 = vadd.f32 %v12250_v33, %v3866_v47  ;;  %v3550_v35 = vadd.f32 %v12251_v61, %v3540_v36  ;;  %v12253_v0 = vld [vmem:[#allocation248_spill] sm:$0xff]  ;;  %v12259_v54 = vld [vmem:[#allocation191_spill] sm:$0xff] }
 0x261   : > { %v11194_v14 = vmov 8   ;;  %v8063_v4 = vmul.f32 %v12175_v30, %v7997_v26  ;;  %v8066_v44 = vmul.f32 %v12190_v20, %v2868_v59  ;;  %v3292_v23 = vsel %vm3284_vm0, %v3280_v53, %v3288_v12  ;;  %v12256_v47 = vld [vmem:[#allocation252_spill] sm:$0xff]  ;;  %v12257_v26 = vld [vmem:[#allocation257_spill] sm:$0xff]  ;;  %v12258_v59 = vld [vmem:[#allocation262_spill] sm:$0xff] }
 0x262   : > { %5137 = vset.pattern.permute.xlu0 %v11194_v14  ;;  %v3388_v52 = vadd.f32 %v12253_v0, %v3378_v57  ;;  %v8072_v17 = vmul.f32 %v12236_v39, %v3080_v6  ;;  %v3198_v55 = vadd.f32 %v3194_v48, %v3092_v7  ;;  %v3300_v19 = vmul.f32 %v12255_v50, %v3294_v32  ;;  %v12261_v7 = vld [vmem:[#allocation258_spill] sm:$0xff] }
 0x263   : > { %12252 = vst [vmem:[#allocation113_spill] sm:$0xff] %v8066_v44  ;;  %1588 = vperm.xlu0 %5137, %v11940_v43   ;;  %v3684_v56 = vadd.f32 %v12256_v47, %v3674_v3  ;;  %5099 = vset.pattern.permute.xlu1 %v12041_v62  ;;  %v3484_v25 = vadd.f32 %v12257_v26, %v3474_v34  ;;  %vm3496_vm1 = vcmp.gt.f32.partialorder %v3492_v8, 0.0  ;;  %v3500_v48 = vmul.f32 0.2, %v3492_v8  ;;  %v1165_v3 = vpop.permute.xlu0 %1164  ;;  %v12262_v62 = vld [vmem:[#allocation273_spill] sm:$0xff] }
 0x264   : > { %12254 = vst [vmem:[#allocation119_spill] sm:$0xff] %v8072_v17  ;;  %v3560_v36 = vadd.f32 %v12258_v59, %v3550_v35  ;;  %v4068_v53 = vadd.f32 %v12259_v54, %v4050_v45  ;;  %v3646_v12 = vadd.f32 %v12224_v37, %v3634_v13  ;;  %3531 = vperm.xlu1 %5099, %v5586_v28   ;;  %v3396_v32 = vmul.f32 0.2, %v3388_v52  ;;  %v12263_v34 = vld [vmem:[#allocation281_spill] sm:$0xff]  ;;  %v12264_v35 = vld [vmem:[#allocation286_spill] sm:$0xff]  ;;  %v3846_v45 = vpop.permute.xlu1 %3845  ;;  %v12265_v13 = vld [vmem:[#allocation256_spill] sm:$0xff] }
 0x265   : > { %v8083_v57 = vmul.f32 %v12255_v50, %v3292_v23  ;;  %v3886_v6 = vadd.f32 %v12261_v7, %v3876_v18  ;;  %vm3392_vm2 = vcmp.gt.f32.partialorder %v3388_v52, 0.0  ;;  %v3694_v47 = vadd.f32 %v12265_v13, %v3684_v56  ;;  %v12266_v23 = vld [vmem:[#allocation292_spill] sm:$0xff]  ;;  %v12269_v18 = vld [vmem:[#allocation265_spill] sm:$0xff] }
 0x266   : > { %v3570_v33 = vadd.f32 %v12262_v62, %v3560_v36  ;;  %v4078_v61 = vadd.f32 %v12263_v34, %v4068_v53  ;;  %v3656_v0 = vadd.f32 %v12264_v35, %v3646_v12  ;;  %v971_v26 = vadd.f32 %v12266_v23, %v953_v16  ;;  %v12267_v59 = vld [vmem:[#allocation192_spill] sm:$0xff]  ;;  %v12271_v62 = vld [vmem:[#allocation282_spill] sm:$0xff]  ;;  %v12274_v44 = vld [vmem:[#allocation305_spill] sm:$0xff] }
 0x267   : > { %12260 = vst [vmem:[#allocation122_spill] sm:$0xff] %v8083_v57  ;;  %1600 = vperm.xlu0 %5137, %v5586_v28   ;;  %v3752_v14 = vadd.f32 %v12267_v59, %v3740_v1  ;;  %v8093_v30 = vadd.f32 %v3300_v19, %v3198_v55  ;;  %v3494_v7 = vadd.f32 %v12269_v18, %v3484_v25  ;;  %v12270_v57 = vld [vmem:[#allocation278_spill] sm:$0xff]  ;;  %v12272_v12 = vld [vmem:[#allocation288_spill] sm:$0xff]  ;;  %v12275_v16 = vld [vmem:[#allocation323_spill] sm:$0xff] }
 0x268   : > { %v3580_v36 = vadd.f32 %v12270_v57, %v3570_v33  ;;  %v4088_v53 = vadd.f32 %v12271_v62, %v4078_v61  ;;  %5101 = vset.pattern.permute.xlu1 %v12066_v9  ;;  %v3666_v34 = vadd.f32 %v12272_v12, %v3656_v0  ;;  %v12273_v35 = vld [vmem:[#allocation300_spill] sm:$0xff]  ;;  %v1183_v1 = vadd.f32 %v12275_v16, %v1165_v3  ;;  %v2578_v9 = vpop.permute.xlu0 %2577  ;;  %v12282_v3 = vld [vmem:[#allocation283_spill] sm:$0xff] }
 0x269   : > { %12268 = vst [vmem:[#allocation135_spill] sm:$0xff] %v8093_v30  ;;  %v981_v17 = vadd.f32 %v12273_v35, %v971_v26  ;;  %v3762_v56 = vadd.f32 %v12274_v44, %v3752_v14  ;;  %3743 = vperm.xlu1 %5101, %v5586_v28   ;;  %v3504_v55 = vsel %vm3496_vm1, %v3492_v8, %v3500_v48  ;;  %v12276_v25 = vld [vmem:[#allocation272_spill] sm:$0xff]  ;;  %v11196_v61 = vmov 9   ;;  %v12279_v26 = vld [vmem:[#allocation301_spill] sm:$0xff]  ;;  %v12280_v14 = vld [vmem:[#allocation307_spill] sm:$0xff]  ;;  %v3952_v8 = vpop.permute.xlu1 %3951 }
 0x26a   : > { %v3400_v19 = vsel %vm3392_vm2, %v3388_v52, %v3396_v32  ;;  %v3896_v13 = vadd.f32 %v12276_v25, %v3886_v6  ;;  %v12277_v57 = vld [vmem:[#allocation280_spill] sm:$0xff]  ;;  %vm3498_vm3 = vcmp.gt.f32.partialorder %v3494_v7, 0.0  ;;  %v3502_v52 = vmul.f32 0.2, %v3494_v7 }
 0x26b   : > { %v3590_v33 = vadd.f32 %v12277_v57, %v3580_v36  ;;  %5140 = vset.pattern.permute.xlu0 %v11196_v61  ;;  %v12278_v0 = vld [vmem:[#allocation284_spill] sm:$0xff]  ;;  %v991_v62 = vadd.f32 %v12279_v26, %v981_v17  ;;  %v3772_v44 = vadd.f32 %v12280_v14, %v3762_v56  ;;  %v3858_v48 = vadd.f32 %v12235_v41, %v3846_v45  ;;  %v12283_v36 = vld [vmem:[#allocation291_spill] sm:$0xff]  ;;  %v12290_v61 = vld [vmem:[#allocation334_spill] sm:$0xff] }
 0x26c   : > { %v4098_v18 = vadd.f32 %v12278_v0, %v4088_v53  ;;  %v12281_v12 = vld [vmem:[#allocation324_spill] sm:$0xff]  ;;  %1698 = vperm.xlu0 %5140, %v11995_v38   ;;  %v2587_v6 = vadd.f32 %v12061_v10, %v2578_v9  ;;  %v3676_v25 = vadd.f32 %v12283_v36, %v3666_v34  ;;  %v12285_v17 = vld [vmem:[#allocation327_spill] sm:$0xff]  ;;  %v12293_v36 = vld [vmem:[#allocation318_spill] sm:$0xff] }
 0x26d   : > { %v1193_v35 = vadd.f32 %v12281_v12, %v1183_v1  ;;  %v3600_v32 = vadd.f32 %v12282_v3, %v3590_v33  ;;  %v12284_v53 = vld [vmem:[#allocation304_spill] sm:$0xff]  ;;  %5103 = vset.pattern.permute.xlu1 %v12095_v40  ;;  %v12289_v12 = vld [vmem:[#allocation277_spill] sm:$0xff]  ;;  %v3868_v9 = vadd.f32 %v12290_v61, %v3858_v48  ;;  %v12291_v33 = vld [vmem:[#allocation295_spill] sm:$0xff] }
 0x26e   : > { %v1001_v57 = vadd.f32 %v12284_v53, %v991_v62  ;;  %v12286_v56 = vld [vmem:[#allocation264_spill] sm:$0xff]  ;;  %v3906_v45 = vadd.f32 %v12289_v12, %v3896_v13  ;;  %3955 = vperm.xlu1 %5103, %v5586_v28   ;;  %v4108_v34 = vadd.f32 %v12291_v33, %v4098_v18  ;;  %v12292_v3 = vld [vmem:[#allocation311_spill] sm:$0xff]  ;;  %v3506_v13 = vsel %vm3498_vm3, %v3494_v7, %v3502_v52  ;;  %v12298_v12 = vld [vmem:[#allocation345_spill] sm:$0xff]  ;;  %v4058_v18 = vpop.permute.xlu1 %4057 }
 0x26f   : > { %v1203_v0 = vadd.f32 %v12285_v17, %v1193_v35  ;;  %v8121_v1 = vmul.f32 %v12286_v56, %v3504_v55  ;;  %v12288_v26 = vld [vmem:[#allocation260_spill] sm:$0xff]  ;;  %v3782_v35 = vadd.f32 %v12293_v36, %v3772_v44  ;;  %v11197_v17 = vmov 10   ;;  %v2790_v55 = vpop.permute.xlu0 %2789  ;;  %v12297_v61 = vld [vmem:[#allocation335_spill] sm:$0xff]  ;;  %v12300_v33 = vld [vmem:[#allocation322_spill] sm:$0xff] }
 0x270   : > { %v8124_v14 = vadd.f32 %v12288_v26, %v3694_v47  ;;  %v1011_v62 = vadd.f32 %v12292_v3, %v1001_v57  ;;  %v12294_v53 = vld [vmem:[#allocation328_spill] sm:$0xff]  ;;  %5141 = vset.pattern.permute.xlu0 %v11197_v17  ;;  %v3878_v48 = vadd.f32 %v12297_v61, %v3868_v9  ;;  %v2597_v30 = vadd.f32 %v12298_v12, %v2587_v6  ;;  %v12299_v57 = vld [vmem:[#allocation297_spill] sm:$0xff]  ;;  %v12301_v36 = vld [vmem:[#allocation330_spill] sm:$0xff] }
 0x271   : > { %12287 = vst [vmem:[#allocation117_spill] sm:$0xff] %v8121_v1  ;;  %v1213_v40 = vadd.f32 %v12294_v53, %v1203_v0  ;;  %v12295_v47 = vld [vmem:[#allocation276_spill] sm:$0xff]  ;;  %1800 = vperm.xlu0 %5141, %v11940_v43   ;;  %v3608_v44 = vmul.f32 0.2, %v3600_v32  ;;  %v3686_v0 = vadd.f32 %v12299_v57, %v3676_v25  ;;  %vm3604_vm4 = vcmp.gt.f32.partialorder %v3600_v32, 0.0  ;;  %v12304_v9 = vld [vmem:[#allocation279_spill] sm:$0xff] }
 0x272   : > { %v8135_v26 = vmul.f32 %v12295_v47, %v3400_v19  ;;  %v1021_v3 = vadd.f32 %v12300_v33, %v1011_v62  ;;  %v12302_v19 = vld [vmem:[#allocation349_spill] sm:$0xff]  ;;  %v12303_v7 = vld [vmem:[#allocation200_spill] sm:$0xff]  ;;  %5105 = vset.pattern.permute.xlu1 %v12117_v51  ;;  %v2799_v6 = vadd.f32 %v12112_v27, %v2790_v55  ;;  %v8151_v61 = vadd.f32 %v12304_v9, %v3906_v45  ;;  %v12305_v12 = vld [vmem:[#allocation299_spill] sm:$0xff] }
 0x273   : > { %v1223_v53 = vadd.f32 %v12301_v36, %v1213_v40  ;;  %v2607_v17 = vadd.f32 %v12302_v19, %v2597_v30  ;;  %v3964_v52 = vadd.f32 %v12303_v7, %v3952_v8  ;;  %v12306_v1 = vld [vmem:[#allocation325_spill] sm:$0xff]  ;;  %v12307_v57 = vld [vmem:[#allocation319_spill] sm:$0xff]  ;;  %4167 = vperm.xlu1 %5105, %v5586_v28   ;;  %v3002_v45 = vpop.permute.xlu0 %3001  ;;  %v8163_v55 = vmul.f32 %v12286_v56, %v3506_v13  ;;  %v12314_v9 = vld [vmem:[#allocation344_spill] sm:$0xff] }
 0x274   : > { %12296 = vst [vmem:[#allocation121_spill] sm:$0xff] %v8135_v26  ;;  %v4118_v26 = vadd.f32 %v12305_v12, %v4108_v34  ;;  %v1031_v25 = vadd.f32 %v12306_v1, %v1021_v3  ;;  %v3792_v62 = vadd.f32 %v12307_v57, %v3782_v35  ;;  %v12308_v40 = vld [vmem:[#allocation341_spill] sm:$0xff]  ;;  %v8166_v1 = vsel %vm3604_vm4, %v3600_v32, %v3608_v44  ;;  %v12313_v34 = vld [vmem:[#allocation303_spill] sm:$0xff]  ;;  %v12315_v12 = vld [vmem:[#allocation354_spill] sm:$0xff] }
 0x275   : > { %v1233_v33 = vadd.f32 %v12308_v40, %v1223_v53  ;;  %v12309_v30 = vld [vmem:[#allocation337_spill] sm:$0xff]  ;;  %v3974_v7 = vadd.f32 %v7128_v15, %v3964_v52  ;;  %1812 = vperm.xlu0 %5141, %v5586_v28   ;;  %12311 = vst [vmem:[#allocation123_spill] sm:$0xff] %v8163_v55  ;;  %12312 = vst [vmem:[#allocation137_spill] sm:$0xff] %v8166_v1  ;;  %v3696_v35 = vadd.f32 %v12313_v34, %v3686_v0  ;;  %v4164_v53 = vpop.permute.xlu1 %4163  ;;  %v12316_v44 = vld [vmem:[#allocation306_spill] sm:$0xff] }
 0x276   : > { %v3888_v36 = vadd.f32 %v12309_v30, %v3878_v48  ;;  %v12310_v8 = vld [vmem:[#allocation353_spill] sm:$0xff]  ;;  %v2809_v3 = vadd.f32 %v7152_v42, %v2799_v6  ;;  %v1039_v48 = vmul.f32 0.2, %v1031_v25  ;;  %vm1035_vm5 = vcmp.gt.f32.partialorder %v1031_v25, 0.0  ;;  %v12318_v0 = vld [vmem:[#allocation326_spill] sm:$0xff]  ;;  %v12324_v34 = vld [vmem:[#allocation204_spill] sm:$0xff] }
 0x277   : > { %v2617_v19 = vadd.f32 %v12310_v8, %v2607_v17  ;;  %v1243_v17 = vadd.f32 %v12314_v9, %v1233_v33  ;;  %v3984_v52 = vadd.f32 %v7132_v58, %v3974_v7  ;;  %v4070_v57 = vadd.f32 %v12259_v54, %v4058_v18  ;;  %5106 = vset.pattern.permute.xlu1 %v12160_v11  ;;  %v12319_v40 = vld [vmem:[#allocation338_spill] sm:$0xff]  ;;  %v12322_v7 = vld [vmem:[#allocation359_spill] sm:$0xff]  ;;  %v12379_v1 = vld [vmem:[#allocation396_spill] sm:$0xff] }
 0x278   : > { %v2819_v13 = vadd.f32 %v7165_v21, %v2809_v3  ;;  %v3011_v32 = vadd.f32 %v12159_v31, %v3002_v45  ;;  %v8178_v42 = vadd.f32 %v12316_v44, %v4118_v26  ;;  %v3802_v6 = vadd.f32 %v12318_v0, %v3792_v62  ;;  %858 = vperm.xlu1 %5106, %v5586_v28   ;;  %v12321_v21 = vld [vmem:[#allocation356_spill] sm:$0xff]  ;;  %v3214_v62 = vpop.permute.xlu0 %3213  ;;  %v12325_v44 = vld [vmem:[#allocation361_spill] sm:$0xff] }
 0x279   : > { %v2627_v15 = vadd.f32 %v12315_v12, %v2617_v19  ;;  %v3898_v33 = vadd.f32 %v12319_v40, %v3888_v36  ;;  %v11198_v30 = vmov 11   ;;  %v8185_v58 = vstv %s8141_s15  ;;  %v12323_v19 = vld [vmem:[#allocation374_spill] sm:$0xff]  ;;  %v855_v9 = vpop.permute.xlu1 %854  ;;  %v12326_v0 = vld [vmem:[#allocation360_spill] sm:$0xff]  ;;  %v12327_v40 = vld [vmem:[#allocation365_spill] sm:$0xff]  ;;  %s9026_s15 = sld [smem:[#allocation6 + $0x8]] }
 0x27a   : > { %12317 = vst [vmem:[#allocation97_spill] sm:$0xff] %v8178_v42  ;;  %5144 = vset.pattern.permute.xlu0 %v11198_v30  ;;  %12320 = vst [vmem:[#allocation126_spill] sm:$0xff] %v8185_v58  ;;  %v3994_v11 = vadd.f32 %v12322_v7, %v3984_v52  ;;  %v2829_v8 = vadd.f32 %v7169_v22, %v2819_v13  ;;  %v4080_v26 = vadd.f32 %v7184_v24, %v4070_v57  ;;  %v12328_v13 = vld [vmem:[#allocation366_spill] sm:$0xff]  ;;  %v12329_v57 = vld [vmem:[#allocation375_spill] sm:$0xff] }
 0x27b   : > { %v2637_v18 = vadd.f32 %v12321_v21, %v2627_v15  ;;  %1910 = vperm.xlu0 %5144, %v11995_v38   ;;  %v1043_v36 = vsel %vm1035_vm5, %v1031_v25, %v1039_v48  ;;  %vm1247_vm6 = vcmp.gt.f32.partialorder %v1243_v17, 0.0  ;;  %v3021_v45 = vadd.f32 %v12323_v19, %v3011_v32  ;;  %v12330_v7 = vld [vmem:[#allocation379_spill] sm:$0xff]  ;;  %v12332_v48 = vld [vmem:[#allocation310_spill] sm:$0xff]  ;;  %v12359_v31 = vld [vmem:[#allocation393_spill] sm:$0xff] }
 0x27c   : > { %v4176_v3 = vadd.f32 %v12324_v34, %v4164_v53  ;;  %v1251_v12 = vmul.f32 0.2, %v1243_v17  ;;  %v4004_v52 = vadd.f32 %v12326_v0, %v3994_v11  ;;  %v2839_v22 = vadd.f32 %v12327_v40, %v2829_v8  ;;  %5108 = vset.pattern.permute.xlu1 %v12143_v49  ;;  %v12335_v19 = vld [vmem:[#allocation342_spill] sm:$0xff]  ;;  %v12338_v0 = vld [vmem:[#allocation384_spill] sm:$0xff] }
 0x27d   : > { %v2647_v15 = vadd.f32 %v12325_v44, %v2637_v18  ;;  %v4090_v24 = vadd.f32 %v12328_v13, %v4080_v26  ;;  %v3031_v21 = vadd.f32 %v12329_v57, %v3021_v45  ;;  %v3223_v25 = vadd.f32 %v12195_v60, %v3214_v62  ;;  %v12334_v18 = vld [vmem:[#allocation358_spill] sm:$0xff]  ;;  %1070 = vperm.xlu1 %5108, %v5586_v28  }
 0x27e   : > { %v4186_v30 = vadd.f32 %v12330_v7, %v4176_v3  ;;  %v8204_v53 = vmul.f32 0.2, %v8124_v14  ;;  %v8207_v32 = vadd.f32 %v12332_v48, %v3696_v35  ;;  %v1049_v11 = vmul.f32 %v12334_v18, %v1043_v36  ;;  %v12336_v3 = vld [vmem:[#allocation362_spill] sm:$0xff]  ;;  %v3426_v35 = vpop.permute.xlu0 %3425  ;;  %v961_v7 = vpop.permute.xlu1 %960  ;;  %v12340_v48 = vld [vmem:[#allocation329_spill] sm:$0xff] }
 0x27f   : > { %v3908_v8 = vadd.f32 %v12335_v19, %v3898_v33  ;;  %v11199_v26 = vmov 12   ;;  %v2655_v45 = vmul.f32 0.2, %v2647_v15  ;;  %v4014_v49 = vadd.f32 %v12336_v3, %v4004_v52  ;;  %v12337_v44 = vld [vmem:[#allocation378_spill] sm:$0xff]  ;;  %v12343_v3 = vld [vmem:[#allocation381_spill] sm:$0xff] }
 0x280   : > { %12331 = vst [vmem:[#allocation130_spill] sm:$0xff] %v8204_v53  ;;  %12333 = vst [vmem:[#allocation138_spill] sm:$0xff] %v8207_v32  ;;  %5145 = vset.pattern.permute.xlu0 %v11199_v26  ;;  %v3041_v62 = vadd.f32 %v12337_v44, %v3031_v21  ;;  %v3233_v40 = vadd.f32 %v12338_v0, %v3223_v25  ;;  %v1255_v13 = vsel %vm1247_vm6, %v1243_v17, %v1251_v12  ;;  %v12339_v36 = vld [vmem:[#allocation370_spill] sm:$0xff]  ;;  %v12342_v26 = vld [vmem:[#allocation367_spill] sm:$0xff] }
 0x281   : > { %2012 = vperm.xlu0 %5145, %v11940_v43   ;;  %vm2651_vm7 = vcmp.gt.f32.partialorder %v2647_v15, 0.0  ;;  %v2849_v33 = vadd.f32 %v12339_v36, %v2839_v22  ;;  %v867_v57 = vadd.f32 %v12106_v2, %v855_v9  ;;  %v8221_v19 = vadd.f32 %v12340_v48, %v3802_v6  ;;  %v12344_v44 = vld [vmem:[#allocation382_spill] sm:$0xff]  ;;  %v12345_v0 = vld [vmem:[#allocation352_spill] sm:$0xff]  ;;  %v12348_v36 = vld [vmem:[#allocation391_spill] sm:$0xff]  ;;  %5110 = vset.pattern.permute.xlu1 %v12163_v46 }
 0x282   : > { %v4100_v52 = vadd.f32 %v12342_v26, %v4090_v24  ;;  %v3051_v21 = vadd.f32 %v12343_v3, %v3041_v62  ;;  %v4196_v60 = vadd.f32 %v12344_v44, %v4186_v30  ;;  %v8227_v25 = vadd.f32 %v1049_v11, %v8052_v29  ;;  %v12347_v12 = vld [vmem:[#allocation388_spill] sm:$0xff]  ;;  %v12350_v24 = vld [vmem:[#allocation363_spill] sm:$0xff]  ;;  %1282 = vperm.xlu1 %5110, %v5586_v28   ;;  %v12353_v29 = vld [vmem:[#allocation373_spill] sm:$0xff]  ;;  %v3638_v44 = vpop.permute.xlu0 %3637 }
 0x283   : > { %12341 = vst [vmem:[#allocation140_spill] sm:$0xff] %v8221_v19  ;;  %v8230_v17 = vadd.f32 %v12345_v0, %v3908_v8  ;;  %v3243_v22 = vadd.f32 %v12347_v12, %v3233_v40  ;;  %v877_v9 = vadd.f32 %v12348_v36, %v867_v57  ;;  %v8236_v6 = vmul.f32 0.2, %v8151_v61  ;;  %v12351_v30 = vld [vmem:[#allocation364_spill] sm:$0xff]  ;;  %v12354_v8 = vld [vmem:[#allocation390_spill] sm:$0xff]  ;;  %v12357_v12 = vld [vmem:[#allocation385_spill] sm:$0xff] }
 0x284   : > { %v8239_v26 = vmul.f32 %v12350_v24, %v1255_v13  ;;  %v2659_v62 = vsel %vm2651_vm7, %v2647_v15, %v2655_v45  ;;  %v8242_v48 = vadd.f32 %v12351_v30, %v4014_v49  ;;  %v2859_v11 = vadd.f32 %v12353_v29, %v2849_v33  ;;  %v12355_v57 = vld [vmem:[#allocation392_spill] sm:$0xff]  ;;  %v12358_v45 = vld [vmem:[#allocation383_spill] sm:$0xff]  ;;  %v1067_v30 = vpop.permute.xlu1 %1066 }
 0x285   : > { %12346 = vst [vmem:[#allocation144_spill] sm:$0xff] %v8230_v17  ;;  %12349 = vst [vmem:[#allocation125_spill] sm:$0xff] %v8236_v6  ;;  %2024 = vperm.xlu0 %5145, %v5586_v28   ;;  %v3253_v40 = vadd.f32 %v12354_v8, %v3243_v22  ;;  %v887_v46 = vadd.f32 %v12355_v57, %v877_v9  ;;  %v3435_v3 = vadd.f32 %v12209_v63, %v3426_v35  ;;  %v12356_v0 = vld [vmem:[#allocation368_spill] sm:$0xff]  ;;  %v12361_v29 = vld [vmem:[#allocation395_spill] sm:$0xff] }
 0x286   : > { %12352 = vst [vmem:[#allocation129_spill] sm:$0xff] %v8242_v48  ;;  %v4110_v13 = vadd.f32 %v12356_v0, %v4100_v52  ;;  %v3061_v15 = vadd.f32 %v12357_v12, %v3051_v21  ;;  %v4206_v49 = vadd.f32 %v12358_v45, %v4196_v60  ;;  %v973_v36 = vadd.f32 %v12266_v23, %v961_v7  ;;  %v12360_v48 = vld [vmem:[#allocation394_spill] sm:$0xff]  ;;  %v12364_v21 = vld [vmem:[#allocation397_spill] sm:$0xff]  ;;  %v12367_v57 = vld [vmem:[#allocation24_spill] sm:$0xff] }
 0x287   : > { %v3263_v27 = vadd.f32 %v12359_v31, %v3253_v40  ;;  %v897_v33 = vadd.f32 %v12360_v48, %v887_v46  ;;  %v3445_v22 = vadd.f32 %v12361_v29, %v3435_v3  ;;  %v3647_v9 = vadd.f32 %v12224_v37, %v3638_v44  ;;  %v12366_v31 = vld [vmem:[#allocation404_spill] sm:$0xff]  ;;  %v12368_v3 = vld [vmem:[#allocation398_spill] sm:$0xff]  ;;  %v12369_v0 = vld [vmem:[#allocation399_spill] sm:$0xff] }
 0x288   : > { %v8259_v35 = vmul.f32 0.2, %v8207_v32  ;;  %v8262_v52 = vmul.f32 %v12168_v5, %v2659_v62  ;;  %v983_v8 = vadd.f32 %v12364_v21, %v973_v36  ;;  %v12365_v60 = vmov 0   ;;  %v12370_v62 = vld [vmem:[#allocation386_spill] sm:$0xff]  ;;  %v12371_v36 = vld [vmem:[#allocation400_spill] sm:$0xff]  ;;  %v12372_v21 = vld [vmem:[#allocation409_spill] sm:$0xff]  ;;  %v1173_v55 = vpop.permute.xlu1 %1172 }
 0x289   : > { %5111 = vset.pattern.permute.xlu1 %v12365_v60  ;;  %v11205_v7 = vmov 13   ;;  %v1079_v40 = vadd.f32 %v12366_v31, %v1067_v30  ;;  %v2867_v48 = vmul.f32 0.2, %v2859_v11  ;;  %v3273_v46 = vadd.f32 %v12367_v57, %v3263_v27  ;;  %v3850_v30 = vpop.permute.xlu0 %3849  ;;  %v12376_v27 = vld [vmem:[#allocation387_spill] sm:$0xff]  ;;  %v12377_v57 = vld [vmem:[#allocation402_spill] sm:$0xff]  ;;  %v12572_v53 = vld [vmem:[#allocation416_spill] sm:$0xff] }
 0x28a   : > { %12362 = vst [vmem:[#allocation134_spill] sm:$0xff] %v8259_v35  ;;  %12363 = vst [vmem:[#allocation142_spill] sm:$0xff] %v8262_v52  ;;  %5148 = vset.pattern.permute.xlu0 %v11205_v7  ;;  %v907_v44 = vadd.f32 %v12368_v3, %v897_v33  ;;  %v3455_v12 = vadd.f32 %v12369_v0, %v3445_v22  ;;  %742 = vperm.xlu1 %5111, %v11995_v38   ;;  %v12373_v7 = vld [vmem:[#allocation411_spill] sm:$0xff]  ;;  %v12374_v52 = vld [vmem:[#allocation377_spill] sm:$0xff]  ;;  %vm2863_vm8 = vcmp.gt.f32.partialorder %v2859_v11, 0.0 }
 0x28b   : > { %2122 = vperm.xlu0 %5148, %v11995_v38   ;;  %v3071_v45 = vadd.f32 %v12370_v62, %v3061_v15  ;;  %v993_v29 = vadd.f32 %v12371_v36, %v983_v8  ;;  %v3657_v37 = vadd.f32 %v12372_v21, %v3647_v9  ;;  %v1089_v63 = vadd.f32 %v12373_v7, %v1079_v40  ;;  %v12378_v3 = vld [vmem:[#allocation403_spill] sm:$0xff]  ;;  %v12380_v15 = vld [vmem:[#allocation408_spill] sm:$0xff]  ;;  %v12381_v8 = vld [vmem:[#allocation414_spill] sm:$0xff] }
 0x28c   : > { %v8278_v17 = vadd.f32 %v12374_v52, %v4110_v13  ;;  %v4216_v33 = vadd.f32 %v12376_v27, %v4206_v49  ;;  %v917_v22 = vadd.f32 %v12377_v57, %v907_v44  ;;  %v3465_v0 = vadd.f32 %v12378_v3, %v3455_v12  ;;  %v12382_v9 = vld [vmem:[#allocation415_spill] sm:$0xff]  ;;  %v12383_v7 = vld [vmem:[#allocation406_spill] sm:$0xff] }
 0x28d   : > { %v3283_v35 = vadd.f32 %v12379_v1, %v3273_v46  ;;  %v1003_v62 = vadd.f32 %v12380_v15, %v993_v29  ;;  %v3667_v36 = vadd.f32 %v12381_v8, %v3657_v37  ;;  %v1099_v21 = vadd.f32 %v12382_v9, %v1089_v63  ;;  %v12384_v13 = vld [vmem:[#allocation407_spill] sm:$0xff]  ;;  %v12386_v1 = vld [vmem:[#allocation410_spill] sm:$0xff]  ;;  %v4062_v3 = vpop.permute.xlu0 %4061  ;;  %v12391_v8 = vld [vmem:[#allocation425_spill] sm:$0xff]  ;;  %v1279_v9 = vpop.permute.xlu1 %1278 }
 0x28e   : > { %12375 = vst [vmem:[#allocation143_spill] sm:$0xff] %v8278_v17  ;;  %v927_v40 = vadd.f32 %v12383_v7, %v917_v22  ;;  %v3475_v52 = vadd.f32 %v12384_v13, %v3465_v0  ;;  %v12385_v17 = vmov 16   ;;  %v11208_v49 = vmov 14   ;;  %v12387_v29 = vld [vmem:[#allocation419_spill] sm:$0xff]  ;;  %v12390_v15 = vld [vmem:[#allocation418_spill] sm:$0xff]  ;;  %v12393_v13 = vld [vmem:[#allocation424_spill] sm:$0xff] }
 0x28f   : > { %5112 = vset.pattern.permute.xlu1 %v12385_v17  ;;  %5149 = vset.pattern.permute.xlu0 %v11208_v49  ;;  %v3859_v44 = vadd.f32 %v12235_v41, %v3850_v30  ;;  %v3079_v12 = vmul.f32 0.2, %v3071_v45  ;;  %v1013_v46 = vadd.f32 %v12386_v1, %v1003_v62  ;;  %v3677_v27 = vadd.f32 %v12387_v29, %v3667_v36  ;;  %v12388_v37 = vld [vmem:[#allocation423_spill] sm:$0xff]  ;;  %v12389_v17 = vld [vmem:[#allocation413_spill] sm:$0xff]  ;;  %v12394_v41 = vld [vmem:[#allocation422_spill] sm:$0xff] }
 0x290   : > { %v1109_v57 = vadd.f32 %v12388_v37, %v1099_v21  ;;  %2569 = vperm.xlu1 %5112, %v11995_v38   ;;  %2224 = vperm.xlu0 %5149, %v11940_v43   ;;  %vm3075_vm9 = vcmp.gt.f32.partialorder %v3071_v45, 0.0  ;;  %vm931_vm10 = vcmp.gt.f32.partialorder %v927_v40, 0.0  ;;  %v935_v63 = vmul.f32 0.2, %v927_v40  ;;  %v12392_v21 = vld [vmem:[#allocation417_spill] sm:$0xff] }
 0x291   : > { %v3485_v22 = vadd.f32 %v12389_v17, %v3475_v52  ;;  %v2871_v30 = vsel %vm2863_vm8, %v2859_v11, %v2867_v48  ;;  %v3291_v0 = vmul.f32 0.2, %v3283_v35  ;;  %v1023_v62 = vadd.f32 %v12390_v15, %v1013_v46  ;;  %v12395_v17 = vld [vmem:[#allocation430_spill] sm:$0xff]  ;;  %v12398_v46 = vld [vmem:[#allocation421_spill] sm:$0xff]  ;;  %v12399_v15 = vld [vmem:[#allocation427_spill] sm:$0xff] }
 0x292   : > { %v1119_v36 = vadd.f32 %v12391_v8, %v1109_v57  ;;  %vm3287_vm11 = vcmp.gt.f32.partialorder %v3283_v35, 0.0  ;;  %v3869_v1 = vadd.f32 %v12393_v13, %v3859_v44  ;;  %v1185_v29 = vadd.f32 %v12275_v16, %v1173_v55  ;;  %v12402_v55 = vld [vmem:[#allocation389_spill] sm:$0xff]  ;;  %v965_v44 = vpop.permute.xlu0 %964 }
 0x293   : > { %v3495_v7 = vadd.f32 %v12392_v21, %v3485_v22  ;;  %v3083_v37 = vsel %vm3075_vm9, %v3071_v45, %v3079_v12  ;;  %v939_v49 = vsel %vm931_vm10, %v927_v40, %v935_v63  ;;  %v3687_v52 = vadd.f32 %v12394_v41, %v3677_v27  ;;  %v12400_v22 = vld [vmem:[#allocation428_spill] sm:$0xff]  ;;  %v12404_v12 = vld [vmem:[#allocation69_spill] sm:$0xff] }
 0x294   : > { %v1129_v32 = vadd.f32 %v12395_v17, %v1119_v36  ;;  %v12396_v11 = vmov 17   ;;  %v8310_v48 = vmul.f32 0.2, %v8221_v19  ;;  %v1033_v57 = vadd.f32 %v12398_v46, %v1023_v62  ;;  %2236 = vperm.xlu0 %5149, %v5586_v28   ;;  %v12405_v63 = vld [vmem:[#allocation145_spill] sm:$0xff]  ;;  %v12533_v19 = vld [vmem:[#allocation478_spill] sm:$0xff] }
 0x295   : > { %5113 = vset.pattern.permute.xlu1 %v12396_v11  ;;  %v3879_v8 = vadd.f32 %v12399_v15, %v3869_v1  ;;  %v1195_v21 = vadd.f32 %v12400_v22, %v1185_v29  ;;  %v8318_v41 = vmul.f32 %v12190_v20, %v2871_v30  ;;  %v8321_v45 = vadd.f32 %v12402_v55, %v4216_v33  ;;  %v12406_v13 = vld [vmem:[#allocation437_spill] sm:$0xff]  ;;  %v12407_v29 = vld [vmem:[#allocation431_spill] sm:$0xff]  ;;  %v2566_v11 = vpop.permute.xlu1 %2565  ;;  %v12409_v33 = vld [vmem:[#allocation434_spill] sm:$0xff] }
 0x296   : > { %12397 = vst [vmem:[#allocation147_spill] sm:$0xff] %v8310_v48  ;;  %2675 = vperm.xlu1 %5113, %v11995_v38   ;;  %v3295_v40 = vsel %vm3287_vm11, %v3283_v35, %v3291_v0  ;;  %v945_v62 = vmul.f32 %v12405_v63, %v939_v49  ;;  %v3503_v36 = vmul.f32 0.2, %v3495_v7  ;;  %v1139_v1 = vadd.f32 %v12406_v13, %v1129_v32  ;;  %v12412_v15 = vld [vmem:[#allocation429_spill] sm:$0xff] }
 0x297   : > { %12401 = vst [vmem:[#allocation150_spill] sm:$0xff] %v8318_v41  ;;  %12403 = vst [vmem:[#allocation154_spill] sm:$0xff] %v8321_v45  ;;  %v1205_v17 = vadd.f32 %v12407_v29, %v1195_v21  ;;  %v8331_v30 = vmul.f32 %v12236_v39, %v3083_v37  ;;  %vm3499_vm12 = vcmp.gt.f32.partialorder %v3495_v7, 0.0  ;;  %v3889_v46 = vadd.f32 %v12409_v33, %v3879_v8  ;;  %v12414_v37 = vld [vmem:[#allocation439_spill] sm:$0xff]  ;;  %v12418_v39 = vld [vmem:[#allocation441_spill] sm:$0xff] }
 0x298   : > { %v8335_v35 = vstv %s8297_s13  ;;  %v8338_v0 = vmul.f32 %v12255_v50, %v3295_v40  ;;  %vm1037_vm13 = vcmp.gt.f32.partialorder %v1033_v57, 0.0  ;;  %v1041_v49 = vmul.f32 0.2, %v1033_v57  ;;  %v12415_v8 = vld [vmem:[#allocation435_spill] sm:$0xff]  ;;  %v12416_v40 = vld [vmem:[#allocation93_spill] sm:$0xff]  ;;  %v12530_v45 = vld [vmem:[#allocation78_spill] sm:$0xff] }
 0x299   : > { %12408 = vst [vmem:[#allocation161_spill] sm:$0xff] %v8331_v30  ;;  %12410 = vst [vmem:[#allocation155_spill] sm:$0xff] %v8335_v35  ;;  %v3697_v32 = vadd.f32 %v12412_v15, %v3687_v52  ;;  %v11212_v22 = vmov 15   ;;  %v12413_v21 = vmov 18   ;;  %v1147_v55 = vmul.f32 0.2, %v1139_v1 }
 0x29a   : > { %12411 = vst [vmem:[#allocation141_spill] sm:$0xff] %v8338_v0  ;;  %5152 = vset.pattern.permute.xlu0 %v11212_v22  ;;  %5114 = vset.pattern.permute.xlu1 %v12413_v21  ;;  %v1215_v13 = vadd.f32 %v12414_v37, %v1205_v17  ;;  %v4071_v29 = vadd.f32 %v12259_v54, %v4062_v3  ;;  %vm1143_vm14 = vcmp.gt.f32.partialorder %v1139_v1, 0.0  ;;  %v1177_v22 = vpop.permute.xlu0 %1176  ;;  %v12417_v21 = vld [vmem:[#allocation438_spill] sm:$0xff]  ;;  %v12419_v37 = vld [vmem:[#allocation440_spill] sm:$0xff]  ;;  %v12420_v54 = vld [vmem:[#allocation443_spill] sm:$0xff]  ;;  %s9043_s13 = sld [smem:[#allocation6 + $0x88]] }
 0x29b   : > { %v1291_v33 = vadd.f32 %v12415_v8, %v1279_v9  ;;  %2334 = vperm.xlu0 %5152, %v11995_v38   ;;  %2781 = vperm.xlu1 %5114, %v11995_v38   ;;  %v949_v27 = vadd.f32 %v945_v62, %v12416_v40  ;;  %v3507_v52 = vsel %vm3499_vm12, %v3495_v7, %v3503_v36  ;;  %v12421_v0 = vld [vmem:[#allocation455_spill] sm:$0xff]  ;;  %v2884_v36 = vpop.permute.xlu1 %2883  ;;  %v12422_v40 = vld [vmem:[#allocation449_spill] sm:$0xff] }
 0x29c   : > { %v974_v15 = vadd.f32 %v12266_v23, %v965_v44  ;;  %v3899_v50 = vadd.f32 %v12417_v21, %v3889_v46  ;;  %v1225_v17 = vadd.f32 %v12418_v39, %v1215_v13  ;;  %v4081_v3 = vadd.f32 %v12419_v37, %v4071_v29  ;;  %v12423_v46 = vld [vmem:[#allocation442_spill] sm:$0xff]  ;;  %v12424_v39 = vld [vmem:[#allocation447_spill] sm:$0xff] }
 0x29d   : > { %v1301_v9 = vadd.f32 %v12420_v54, %v1291_v33  ;;  %v1045_v20 = vsel %vm1037_vm13, %v1033_v57, %v1041_v49  ;;  %v2584_v62 = vadd.f32 %v12061_v10, %v2566_v11  ;;  %v1186_v7 = vadd.f32 %v12275_v16, %v1177_v22  ;;  %v12426_v37 = vld [vmem:[#allocation459_spill] sm:$0xff]  ;;  %v12427_v33 = vld [vmem:[#allocation456_spill] sm:$0xff] }
 0x29e   : > { %v984_v30 = vadd.f32 %v12421_v0, %v974_v15  ;;  %v1151_v44 = vsel %vm1143_vm14, %v1139_v1, %v1147_v55  ;;  %v1235_v23 = vadd.f32 %v12422_v40, %v1225_v17  ;;  %v4091_v21 = vadd.f32 %v12423_v46, %v4081_v3  ;;  %v12428_v0 = vld [vmem:[#allocation467_spill] sm:$0xff]  ;;  %v12430_v1 = vld [vmem:[#allocation445_spill] sm:$0xff]  ;;  %v12431_v55 = vld [vmem:[#allocation450_spill] sm:$0xff]  ;;  %v2888_v46 = vpop.permute.xlu0 %2887 }
 0x29f   : > { %v1311_v13 = vadd.f32 %v12424_v39, %v1301_v9  ;;  %v12425_v29 = vmov 20   ;;  %v2594_v57 = vadd.f32 %v12427_v33, %v2584_v62  ;;  %v1196_v11 = vadd.f32 %v12428_v0, %v1186_v7  ;;  %5153 = vset.pattern.permute.xlu0 %v12117_v51  ;;  %v12432_v17 = vld [vmem:[#allocation454_spill] sm:$0xff]  ;;  %v12433_v9 = vld [vmem:[#allocation36_spill] sm:$0xff]  ;;  %v12437_v51 = vld [vmem:[#allocation433_spill] sm:$0xff] }
 0x2a0   : > { %5116 = vset.pattern.permute.xlu1 %v12425_v29  ;;  %v994_v54 = vadd.f32 %v12426_v37, %v984_v30  ;;  %v8368_v49 = vstv %s8328_s24  ;;  %v3909_v22 = vadd.f32 %v12430_v1, %v3899_v50  ;;  %v1245_v15 = vadd.f32 %v12431_v55, %v1235_v23  ;;  %v12434_v30 = vld [vmem:[#allocation463_spill] sm:$0xff]  ;;  %v12435_v62 = vld [vmem:[#allocation464_spill] sm:$0xff]  ;;  %v12436_v37 = vld [vmem:[#allocation474_spill] sm:$0xff]  ;;  %s9055_s24 = sld [smem:[#allocation6 + $0x108]] }
 0x2a1   : > { %2993 = vperm.xlu1 %5116, %v11995_v38   ;;  %12429 = vst [vmem:[#allocation157_spill] sm:$0xff] %v8368_v49  ;;  %v1321_v3 = vadd.f32 %v12432_v17, %v1311_v13  ;;  %v2902_v40 = vadd.f32 %v12433_v9, %v2884_v36  ;;  %v2604_v29 = vadd.f32 %v12435_v62, %v2594_v57  ;;  %v12439_v50 = vld [vmem:[#allocation451_spill] sm:$0xff]  ;;  %v12440_v1 = vld [vmem:[#allocation457_spill] sm:$0xff]  ;;  %v12441_v55 = vld [vmem:[#allocation470_spill] sm:$0xff]  ;;  %v12536_v49 = vmov 4  }
 0x2a2   : > { %v1004_v39 = vadd.f32 %v12434_v30, %v994_v54  ;;  %v1206_v33 = vadd.f32 %v12436_v37, %v1196_v11  ;;  %v2903_v7 = vadd.f32 %v12433_v9, %v2888_v46  ;;  %v1051_v0 = vmul.f32 %v12334_v18, %v1045_v20  ;;  %v12442_v17 = vld [vmem:[#allocation466_spill] sm:$0xff]  ;;  %v12443_v54 = vld [vmem:[#allocation476_spill] sm:$0xff]  ;;  %v12444_v57 = vld [vmem:[#allocation471_spill] sm:$0xff] }
 0x2a3   : > { %v8381_v16 = vadd.f32 %v12437_v51, %v3697_v32  ;;  %v4101_v23 = vadd.f32 %v12439_v50, %v4091_v21  ;;  %v1331_v13 = vadd.f32 %v12440_v1, %v1321_v3  ;;  %v2614_v10 = vadd.f32 %v12442_v17, %v2604_v29  ;;  %v12447_v20 = vld [vmem:[#allocation483_spill] sm:$0xff]  ;;  %v12448_v37 = vld [vmem:[#allocation462_spill] sm:$0xff]  ;;  %v12454_v17 = vld [vmem:[#allocation485_spill] sm:$0xff] }
 0x2a4   : > { %v1014_v36 = vadd.f32 %v12441_v55, %v1004_v39  ;;  %v1216_v30 = vadd.f32 %v12443_v54, %v1206_v33  ;;  %v2912_v62 = vadd.f32 %v12444_v57, %v2902_v40  ;;  %v12445_v11 = vmov 22   ;;  %v12449_v21 = vld [vmem:[#allocation482_spill] sm:$0xff]  ;;  %v12452_v33 = vld [vmem:[#allocation472_spill] sm:$0xff]  ;;  %v12453_v40 = vld [vmem:[#allocation473_spill] sm:$0xff] }
 0x2a5   : > { %12438 = vst [vmem:[#allocation158_spill] sm:$0xff] %v8381_v16  ;;  %5118 = vset.pattern.permute.xlu1 %v12445_v11  ;;  %v8391_v46 = vmul.f32 %v12286_v56, %v3507_v52  ;;  %v1157_v32 = vmul.f32 %v12447_v20, %v1151_v44  ;;  %v1341_v51 = vadd.f32 %v12448_v37, %v1331_v13  ;;  %v12450_v39 = vld [vmem:[#allocation446_spill] sm:$0xff]  ;;  %v1253_v29 = vmul.f32 0.2, %v1245_v15  ;;  %v12455_v54 = vld [vmem:[#allocation477_spill] sm:$0xff]  ;;  %v3096_v13 = vpop.permute.xlu1 %3095 }
 0x2a6   : > { %3205 = vperm.xlu1 %5118, %v11995_v38   ;;  %v2913_v3 = vadd.f32 %v12449_v21, %v2903_v7  ;;  %v8398_v50 = vadd.f32 %v12450_v39, %v3909_v22  ;;  %v1024_v1 = vadd.f32 %v12452_v33, %v1014_v36  ;;  %v2624_v55 = vadd.f32 %v12453_v40, %v2614_v10  ;;  %v12456_v44 = vld [vmem:[#allocation58_spill] sm:$0xff]  ;;  %v12457_v56 = vld [vmem:[#allocation453_spill] sm:$0xff]  ;;  %v12459_v22 = vld [vmem:[#allocation475_spill] sm:$0xff] }
 0x2a7   : > { %12446 = vst [vmem:[#allocation162_spill] sm:$0xff] %v8391_v46  ;;  %vm1249_vm15 = vcmp.gt.f32.partialorder %v1245_v15, 0.0  ;;  %v1226_v52 = vadd.f32 %v12454_v17, %v1216_v30  ;;  %v2922_v57 = vadd.f32 %v12455_v54, %v2912_v62  ;;  %v1055_v37 = vadd.f32 %v1051_v0, %v949_v27  ;;  %v12458_v7 = vld [vmem:[#allocation469_spill] sm:$0xff]  ;;  %v12461_v36 = vld [vmem:[#allocation479_spill] sm:$0xff]  ;;  %v12462_v33 = vld [vmem:[#allocation480_spill] sm:$0xff] }
 0x2a8   : > { %12451 = vst [vmem:[#allocation163_spill] sm:$0xff] %v8398_v50  ;;  %v2923_v11 = vadd.f32 %v12456_v44, %v2913_v3  ;;  %v4111_v46 = vadd.f32 %v12457_v56, %v4101_v23  ;;  %v1351_v21 = vadd.f32 %v12458_v7, %v1341_v51  ;;  %v2634_v39 = vadd.f32 %v12459_v22, %v2624_v55  ;;  %v12463_v30 = vld [vmem:[#allocation491_spill] sm:$0xff]  ;;  %v12466_v0 = vld [vmem:[#allocation484_spill] sm:$0xff]  ;;  %v12467_v51 = vld [vmem:[#allocation53_spill] sm:$0xff] }
 0x2a9   : > { %v8409_v41 = vmul.f32 0.2, %v8381_v16  ;;  %v1034_v10 = vadd.f32 %v12461_v36, %v1024_v1  ;;  %v2932_v40 = vadd.f32 %v12462_v33, %v2922_v57  ;;  %v12464_v62 = vmov 24   ;;  %v12468_v54 = vld [vmem:[#allocation486_spill] sm:$0xff]  ;;  %v12469_v44 = vld [vmem:[#allocation493_spill] sm:$0xff]  ;;  %v12470_v7 = vld [vmem:[#allocation40_spill] sm:$0xff]  ;;  %v3100_v33 = vpop.permute.xlu0 %3099 }
 0x2aa   : > { %v2933_v17 = vadd.f32 %v12463_v30, %v2923_v11  ;;  %5120 = vset.pattern.permute.xlu1 %v12464_v62  ;;  %v1161_v3 = vadd.f32 %v1157_v32, %v1055_v37  ;;  %v8416_v27 = vmul.f32 0.2, %v8398_v50  ;;  %v1257_v56 = vsel %vm1249_vm15, %v1245_v15, %v1253_v29  ;;  %v12471_v22 = vld [vmem:[#allocation461_spill] sm:$0xff]  ;;  %v12472_v29 = vld [vmem:[#allocation490_spill] sm:$0xff]  ;;  %v3308_v30 = vpop.permute.xlu1 %3307 }
 0x2ab   : > { %12460 = vst [vmem:[#allocation167_spill] sm:$0xff] %v8409_v41  ;;  %v2644_v23 = vadd.f32 %v12466_v0, %v2634_v39  ;;  %3417 = vperm.xlu1 %5120, %v11995_v38   ;;  %v1236_v55 = vadd.f32 %v12467_v51, %v1226_v52  ;;  %v2942_v1 = vadd.f32 %v12468_v54, %v2932_v40  ;;  %v1359_v32 = vmul.f32 0.2, %v1351_v21  ;;  %v12473_v40 = vld [vmem:[#allocation89_spill] sm:$0xff]  ;;  %v12515_v41 = vld [vmem:[#allocation227_spill] sm:$0xff]  ;;  %v12516_v16 = vld [vmem:[#allocation54_spill] sm:$0xff] }
 0x2ac   : > { %12465 = vst [vmem:[#allocation169_spill] sm:$0xff] %v8416_v27  ;;  %v2943_v57 = vadd.f32 %v12469_v44, %v2933_v17  ;;  %v3114_v11 = vadd.f32 %v12470_v7, %v3096_v13  ;;  %v4121_v36 = vadd.f32 %v12471_v22, %v4111_v46  ;;  %v1263_v15 = vmul.f32 %v12350_v24, %v1257_v56  ;;  %v12474_v17 = vld [vmem:[#allocation488_spill] sm:$0xff]  ;;  %v12476_v54 = vld [vmem:[#allocation489_spill] sm:$0xff]  ;;  %v12477_v22 = vld [vmem:[#allocation59_spill] sm:$0xff] }
 0x2ad   : > { %vm2648_vm0 = vcmp.gt.f32.partialorder %v2644_v23, 0.0  ;;  %v2652_v37 = vmul.f32 0.2, %v2644_v23  ;;  %vm1355_vm1 = vcmp.gt.f32.partialorder %v1351_v21, 0.0  ;;  %vm1038_vm2 = vcmp.gt.f32.partialorder %v1034_v10, 0.0 }
 0x2ae   : > { %v2952_v39 = vadd.f32 %v12472_v29, %v2942_v1  ;;  %v1042_v52 = vmul.f32 0.2, %v1034_v10  ;;  %v2953_v0 = vadd.f32 %v12473_v40, %v2943_v57  ;;  %v3124_v51 = vadd.f32 %v12474_v17, %v3114_v11  ;;  %v12478_v29 = vld [vmem:[#allocation86_spill] sm:$0xff]  ;;  %v12480_v57 = vld [vmem:[#allocation68_spill] sm:$0xff] }
 0x2af   : > { %v2656_v62 = vsel %vm2648_vm0, %v2644_v23, %v2652_v37  ;;  %v12475_v13 = vmov 26   ;;  %v1246_v44 = vadd.f32 %v12476_v54, %v1236_v55  ;;  %v3115_v56 = vadd.f32 %v12470_v7, %v3100_v33  ;;  %v12479_v23 = vld [vmem:[#allocation492_spill] sm:$0xff]  ;;  %v12482_v54 = vld [vmem:[#allocation465_spill] sm:$0xff]  ;;  %v12484_v33 = vld [vmem:[#allocation494_spill] sm:$0xff] }
 0x2b0   : > { %5122 = vset.pattern.permute.xlu1 %v12475_v13  ;;  %v2662_v46 = vmul.f32 %v12168_v5, %v2656_v62  ;;  %v2962_v27 = vadd.f32 %v12477_v22, %v2952_v39  ;;  %v1363_v1 = vsel %vm1355_vm1, %v1351_v21, %v1359_v32  ;;  %v2963_v50 = vadd.f32 %v12478_v29, %v2953_v0  ;;  %v12481_v62 = vld [vmem:[#allocation67_spill] sm:$0xff]  ;;  %v12486_v29 = vld [vmem:[#allocation77_spill] sm:$0xff] }
 0x2b1   : > { %3629 = vperm.xlu1 %5122, %v11995_v38   ;;  %v3134_v37 = vadd.f32 %v12479_v23, %v3124_v51  ;;  %v3326_v40 = vadd.f32 %v12480_v57, %v3308_v30  ;;  %v3125_v13 = vadd.f32 %v12481_v62, %v3115_v56  ;;  %v1267_v55 = vadd.f32 %v1263_v15, %v1161_v3  ;;  %v12485_v5 = vld [vmem:[#allocation83_spill] sm:$0xff]  ;;  %v3312_v23 = vpop.permute.xlu0 %3311 }
 0x2b2   : > { %v2772_v11 = vadd.f32 %v8063_v4, %v2662_v46  ;;  %vm2966_vm3 = vcmp.gt.f32.partialorder %v2962_v27, 0.0  ;;  %v2970_v17 = vmul.f32 0.2, %v2962_v27  ;;  %v8442_v39 = vadd.f32 %v12482_v54, %v4121_v36  ;;  %v12488_v3 = vld [vmem:[#allocation75_spill] sm:$0xff]  ;;  %v12489_v36 = vld [vmem:[#allocation90_spill] sm:$0xff] }
 0x2b3   : > { %v3144_v22 = vadd.f32 %v12484_v33, %v3134_v37  ;;  %v3336_v21 = vadd.f32 %v12485_v5, %v3326_v40  ;;  %v1369_v32 = vmul.f32 %v8185_v58, %v1363_v1  ;;  %v1254_v0 = vmul.f32 0.2, %v1246_v44  ;;  %v12490_v37 = vld [vmem:[#allocation113_spill] sm:$0xff]  ;;  %v12494_v33 = vld [vmem:[#allocation115_spill] sm:$0xff] }
 0x2b4   : > { %12483 = vst [vmem:[#allocation170_spill] sm:$0xff] %v8442_v39  ;;  %v2974_v51 = vsel %vm2966_vm3, %v2962_v27, %v2970_v17  ;;  %v3135_v30 = vadd.f32 %v12486_v29, %v3125_v13  ;;  %v12487_v4 = vmov 28   ;;  %v1046_v46 = vsel %vm1038_vm2, %v1034_v10, %v1042_v52  ;;  %v12491_v40 = vld [vmem:[#allocation181_spill] sm:$0xff]  ;;  %v12492_v27 = vld [vmem:[#allocation102_spill] sm:$0xff] }
 0x2b5   : > { %5124 = vset.pattern.permute.xlu1 %v12487_v4  ;;  %vm1250_vm4 = vcmp.gt.f32.partialorder %v1246_v44, 0.0  ;;  %v3154_v15 = vadd.f32 %v12488_v3, %v3144_v22  ;;  %v3346_v56 = vadd.f32 %v12489_v36, %v3336_v21  ;;  %v2878_v5 = vadd.f32 %v12490_v37, %v2772_v11  ;;  %v12493_v13 = vld [vmem:[#allocation65_spill] sm:$0xff]  ;;  %v12498_v3 = vld [vmem:[#allocation94_spill] sm:$0xff] }
 0x2b6   : > { %3841 = vperm.xlu1 %5124, %v11995_v38   ;;  %v2980_v1 = vmul.f32 %v12491_v40, %v2974_v51  ;;  %v2971_v62 = vmul.f32 0.2, %v2963_v50  ;;  %v3145_v17 = vadd.f32 %v12492_v27, %v3135_v30  ;;  %vm2967_vm5 = vcmp.gt.f32.partialorder %v2963_v50, 0.0  ;;  %v12497_v4 = vld [vmem:[#allocation81_spill] sm:$0xff]  ;;  %v12500_v30 = vld [vmem:[#allocation218_spill] sm:$0xff]  ;;  %v12501_v27 = vld [vmem:[#allocation487_spill] sm:$0xff] }
 0x2b7   : > { %v3164_v54 = vadd.f32 %v12493_v13, %v3154_v15  ;;  %v3356_v29 = vadd.f32 %v12494_v33, %v3346_v56  ;;  %v3327_v10 = vadd.f32 %v12480_v57, %v3312_v23  ;;  %v8459_v52 = vadd.f32 %v1369_v32, %v1267_v55  ;;  %v12499_v36 = vld [vmem:[#allocation73_spill] sm:$0xff]  ;;  %v12502_v15 = vld [vmem:[#allocation87_spill] sm:$0xff]  ;;  %v3520_v56 = vpop.permute.xlu1 %3519  ;;  %v12504_v23 = vld [vmem:[#allocation98_spill] sm:$0xff] }
 0x2b8   : > { %v8462_v22 = vmul.f32 %v12334_v18, %v1046_v46  ;;  %v1258_v21 = vsel %vm1250_vm4, %v1246_v44, %v1254_v0  ;;  %v3155_v11 = vadd.f32 %v12497_v4, %v3145_v17  ;;  %v3363_v39 = vmul.f32 %v12501_v27, %v12500_v30  ;;  %v12506_v44 = vld [vmem:[#allocation51_spill] sm:$0xff]  ;;  %v12517_v30 = vld [vmem:[#allocation85_spill] sm:$0xff] }
 0x2b9   : > { %12495 = vst [vmem:[#allocation149_spill] sm:$0xff] %v8459_v52  ;;  %v3174_v51 = vadd.f32 %v12498_v3, %v3164_v54  ;;  %v3366_v37 = vadd.f32 %v12499_v36, %v3356_v29  ;;  %v3337_v13 = vadd.f32 %v12502_v15, %v3327_v10  ;;  %v12503_v33 = vmov 30   ;;  %v12505_v52 = vld [vmem:[#allocation247_spill] sm:$0xff]  ;;  %v12507_v54 = vld [vmem:[#allocation101_spill] sm:$0xff] }
 0x2ba   : > { %12496 = vst [vmem:[#allocation171_spill] sm:$0xff] %v8462_v22  ;;  %5126 = vset.pattern.permute.xlu1 %v12503_v33  ;;  %v2984_v55 = vadd.f32 %v2980_v1, %v2878_v5  ;;  %v2975_v32 = vsel %vm2967_vm5, %v2963_v50, %v2971_v62  ;;  %v3165_v46 = vadd.f32 %v12504_v23, %v3155_v11  ;;  %v12508_v4 = vld [vmem:[#allocation111_spill] sm:$0xff]  ;;  %v12510_v36 = vld [vmem:[#allocation105_spill] sm:$0xff]  ;;  %v12512_v50 = vld [vmem:[#allocation64_spill] sm:$0xff]  ;;  %v12523_v57 = vmov 2  }
 0x2bb   : > { %v3544_v0 = vmul.f32 %v12506_v44, %v12505_v52  ;;  %4053 = vperm.xlu1 %5126, %v11995_v38   ;;  %vm3178_vm6 = vcmp.gt.f32.partialorder %v3174_v51, 0.0  ;;  %v3182_v17 = vmul.f32 0.2, %v3174_v51  ;;  %v3376_v29 = vadd.f32 %v12507_v54, %v3366_v37  ;;  %v12511_v5 = vld [vmem:[#allocation251_spill] sm:$0xff]  ;;  %v12513_v62 = vld [vmem:[#allocation184_spill] sm:$0xff]  ;;  %v12514_v23 = vld [vmem:[#allocation118_spill] sm:$0xff]  ;;  %v3732_v42 = vpop.permute.xlu1 %3731 }
 0x2bc   : > { %v3347_v3 = vadd.f32 %v12508_v4, %v3337_v13  ;;  %v8478_v10 = vmul.f32 %v12350_v24, %v1258_v21  ;;  %v3175_v15 = vadd.f32 %v12510_v36, %v3165_v46  ;;  %v3554_v1 = vmul.f32 %v12512_v50, %v12511_v5  ;;  %v12519_v21 = vld [vmem:[#allocation238_spill] sm:$0xff]  ;;  %v12520_v54 = vld [vmem:[#allocation61_spill] sm:$0xff]  ;;  %v12521_v46 = vld [vmem:[#allocation263_spill] sm:$0xff] }
 0x2bd   : > { %v3538_v11 = vadd.f32 %v12513_v62, %v3520_v56  ;;  %v3186_v33 = vsel %vm3178_vm6, %v3174_v51, %v3182_v17  ;;  %v3386_v18 = vadd.f32 %v12514_v23, %v3376_v29  ;;  %v3373_v22 = vmul.f32 %v12516_v16, %v12515_v41  ;;  %v12522_v36 = vld [vmem:[#allocation71_spill] sm:$0xff]  ;;  %v12526_v41 = vld [vmem:[#allocation72_spill] sm:$0xff] }
 0x2be   : > { %12509 = vst [vmem:[#allocation165_spill] sm:$0xff] %v8478_v10  ;;  %v3357_v37 = vadd.f32 %v12517_v30, %v3347_v3  ;;  %v8489_v13 = vmul.f32 %v12491_v40, %v2975_v32  ;;  %v3383_v4 = vmul.f32 %v12520_v54, %v12519_v21  ;;  %v3564_v24 = vmul.f32 %v12522_v36, %v12521_v46  ;;  %v12524_v51 = vld [vmem:[#allocation119_spill] sm:$0xff]  ;;  %v3524_v30 = vpop.permute.xlu0 %3523  ;;  %v12527_v32 = vld [vmem:[#allocation220_spill] sm:$0xff] }
 0x2bf   : > { %v3548_v10 = vadd.f32 %v3544_v0, %v3538_v11  ;;  %5129 = vset.pattern.permute.xlu1 %v12523_v57  ;;  %v3090_v56 = vadd.f32 %v12524_v51, %v2984_v55  ;;  %v3183_v17 = vmul.f32 0.2, %v3175_v15  ;;  %v12525_v23 = vld [vmem:[#allocation267_spill] sm:$0xff]  ;;  %v3192_v3 = vmul.f32 %v12527_v32, %v3186_v33  ;;  %v12528_v21 = vld [vmem:[#allocation468_spill] sm:$0xff]  ;;  %v12529_v57 = vld [vmem:[#allocation269_spill] sm:$0xff] }
 0x2c0   : > { %12518 = vst [vmem:[#allocation177_spill] sm:$0xff] %v8489_v13  ;;  %v3367_v29 = vadd.f32 %v3363_v39, %v3357_v37  ;;  %v3574_v7 = vmul.f32 %v12526_v41, %v12525_v23  ;;  %956 = vperm.xlu1 %5129, %v11995_v38   ;;  %vm3179_vm7 = vcmp.gt.f32.partialorder %v3175_v15, 0.0  ;;  %v3545_v40 = vmul.f32 %v12528_v21, %v12505_v52  ;;  %v12531_v51 = vld [vmem:[#allocation274_spill] sm:$0xff]  ;;  %v12534_v52 = vld [vmem:[#allocation481_spill] sm:$0xff] }
 0x2c1   : > { %v3558_v13 = vadd.f32 %v3554_v1, %v3548_v10  ;;  %v3394_v0 = vmul.f32 0.2, %v3386_v18  ;;  %v3584_v55 = vmul.f32 %v12530_v45, %v12529_v57  ;;  %v12532_v39 = vld [vmem:[#allocation82_spill] sm:$0xff]  ;;  %vm3390_vm8 = vcmp.gt.f32.partialorder %v3386_v18, 0.0 }
 0x2c2   : > { %v3377_v11 = vadd.f32 %v3373_v22, %v3367_v29  ;;  %v3594_v37 = vmul.f32 %v12532_v39, %v12531_v51  ;;  %v3555_v9 = vmul.f32 %v12533_v19, %v12511_v5  ;;  %v3539_v33 = vadd.f32 %v12513_v62, %v3524_v30  ;;  %v12535_v22 = vld [vmem:[#allocation294_spill] sm:$0xff] }
 0x2c3   : > { %v3568_v48 = vadd.f32 %v3564_v24, %v3558_v13  ;;  %v3187_v10 = vsel %vm3179_vm7, %v3175_v15, %v3183_v17  ;;  %v3565_v6 = vmul.f32 %v12534_v52, %v12521_v46  ;;  %v3756_v29 = vmul.f32 %v12506_v44, %v12535_v22 }
 0x2c4   : > { %v3387_v1 = vadd.f32 %v3383_v4, %v3377_v11  ;;  %5131 = vset.pattern.permute.xlu1 %v12536_v49  ;;  %v8515_v35 = vadd.f32 %v3192_v3, %v3090_v56  ;;  %v3575_v24 = vmul.f32 %v12501_v27, %v12525_v23  ;;  %v3549_v13 = vadd.f32 %v3545_v40, %v3539_v33  ;;  %v12538_v4 = vld [vmem:[#allocation298_spill] sm:$0xff]  ;;  %v3736_v40 = vpop.permute.xlu0 %3735  ;;  %v12544_v23 = vld [vmem:[#allocation315_spill] sm:$0xff] }
 0x2c5   : > { %v3578_v60 = vadd.f32 %v3574_v7, %v3568_v48  ;;  %1168 = vperm.xlu1 %5131, %v11995_v38   ;;  %v3398_v30 = vsel %vm3390_vm8, %v3386_v18, %v3394_v0  ;;  %v3585_v15 = vmul.f32 %v12516_v16, %v12529_v57  ;;  %v3766_v17 = vmul.f32 %v12512_v50, %v12538_v4  ;;  %v12540_v7 = vld [vmem:[#allocation308_spill] sm:$0xff] }
 0x2c6   : > { %12537 = vst [vmem:[#allocation178_spill] sm:$0xff] %v8515_v35  ;;  %v3750_v11 = vadd.f32 %v12267_v59, %v3732_v42  ;;  %v8526_v49 = vmul.f32 %v12527_v32, %v3187_v10  ;;  %v3395_v56 = vmul.f32 0.2, %v3387_v1  ;;  %v3559_v48 = vadd.f32 %v3555_v9, %v3549_v13  ;;  %v12591_v35 = vld [vmem:[#allocation336_spill] sm:$0xff] }
 0x2c7   : > { %v3776_v3 = vmul.f32 %v12522_v36, %v12540_v7  ;;  %vm3391_vm9 = vcmp.gt.f32.partialorder %v3387_v1, 0.0  ;;  %v3588_v33 = vadd.f32 %v3584_v55, %v3578_v60  ;;  %v3757_v0 = vmul.f32 %v12528_v21, %v12535_v22  ;;  %v12546_v22 = vld [vmem:[#allocation346_spill] sm:$0xff] }
 0x2c8   : > { %12539 = vst [vmem:[#allocation174_spill] sm:$0xff] %v8526_v49  ;;  %v3760_v18 = vadd.f32 %v3756_v29, %v3750_v11  ;;  %v8533_v57 = vmul.f32 %v12295_v47, %v3398_v30  ;;  %v3595_v42 = vmul.f32 %v12520_v54, %v12531_v51  ;;  %v3569_v10 = vadd.f32 %v3565_v6, %v3559_v48  ;;  %v12542_v49 = vld [vmem:[#allocation309_spill] sm:$0xff]  ;;  %v3944_v30 = vpop.permute.xlu1 %3943  ;;  %v12545_v6 = vld [vmem:[#allocation320_spill] sm:$0xff] }
 0x2c9   : > { %v3786_v9 = vmul.f32 %v12526_v41, %v12542_v49  ;;  %v12543_v13 = vmov 6   ;;  %v3796_v46 = vmul.f32 %v12530_v45, %v12544_v23  ;;  %v3767_v55 = vmul.f32 %v12533_v19, %v12538_v4 }
 0x2ca   : > { %12541 = vst [vmem:[#allocation180_spill] sm:$0xff] %v8533_v57  ;;  %5134 = vset.pattern.permute.xlu1 %v12543_v13  ;;  %v3770_v60 = vadd.f32 %v3766_v17, %v3760_v18  ;;  %v3751_v29 = vadd.f32 %v12267_v59, %v3736_v40  ;;  %v3399_v11 = vsel %vm3391_vm9, %v3387_v1, %v3395_v56  ;;  %v12547_v59 = vld [vmem:[#allocation347_spill] sm:$0xff]  ;;  %vm3708_vm13 = vcmp.gt.f32.partialorder %v8124_v14, 0.0 }
 0x2cb   : > { %1380 = vperm.xlu1 %5134, %v11995_v38   ;;  %v3579_v51 = vadd.f32 %v3575_v24, %v3569_v10  ;;  %v3806_v48 = vmul.f32 %v12532_v39, %v12545_v6  ;;  %v3968_v13 = vmul.f32 %v12506_v44, %v12546_v22  ;;  %v3598_v62 = vadd.f32 %v3594_v37, %v3588_v33  ;;  %v12548_v24 = vld [vmem:[#allocation200_spill] sm:$0xff]  ;;  %v3948_v33 = vpop.permute.xlu0 %3947 }
 0x2cc   : > { %v3780_v5 = vadd.f32 %v3776_v3, %v3770_v60  ;;  %v3777_v17 = vmul.f32 %v12534_v52, %v12540_v7  ;;  %v3761_v18 = vadd.f32 %v3757_v0, %v3751_v29  ;;  %v3787_v40 = vmul.f32 %v12501_v27, %v12542_v49  ;;  %v12550_v60 = vld [vmem:[#allocation22_spill] sm:$0xff] }
 0x2cd   : > { %v3589_v4 = vadd.f32 %v3585_v15, %v3579_v51  ;;  %v3978_v1 = vmul.f32 %v12512_v50, %v12547_v59  ;;  %v3962_v56 = vadd.f32 %v12548_v24, %v3944_v30  ;;  %v8558_v10 = vmul.f32 %v12295_v47, %v3399_v11  ;;  %v12551_v15 = vld [vmem:[#allocation350_spill] sm:$0xff]  ;;  %v12552_v11 = vld [vmem:[#allocation351_spill] sm:$0xff] }
 0x2ce   : > { %v3790_v32 = vadd.f32 %v3786_v9, %v3780_v5  ;;  %v3797_v37 = vmul.f32 %v12516_v16, %v12544_v23  ;;  %v3771_v3 = vadd.f32 %v3767_v55, %v3761_v18  ;;  %v3988_v0 = vmul.f32 %v12522_v36, %v12551_v15 }
 0x2cf   : > { %12549 = vst [vmem:[#allocation182_spill] sm:$0xff] %v8558_v10  ;;  %1384 = vperm.xlu1 %5134, %v12550_v60   ;;  %v3599_v51 = vadd.f32 %v3595_v42, %v3589_v4  ;;  %v3972_v29 = vadd.f32 %v3968_v13, %v3962_v56  ;;  %v3969_v49 = vmul.f32 %v12528_v21, %v12546_v22  ;;  %vm3602_vm10 = vcmp.gt.f32.partialorder %v3598_v62, 0.0  ;;  %v12553_v56 = vld [vmem:[#allocation355_spill] sm:$0xff] }
 0x2d0   : > { %v3800_v30 = vadd.f32 %v3796_v46, %v3790_v32  ;;  %v3807_v5 = vmul.f32 %v12520_v54, %v12545_v6  ;;  %v3781_v9 = vadd.f32 %v3777_v17, %v3771_v3  ;;  %v3998_v55 = vmul.f32 %v12526_v41, %v12552_v11  ;;  %v4156_v32 = vpop.permute.xlu1 %4155 }
 0x2d1   : > { %v3982_v18 = vadd.f32 %v3978_v1, %v3972_v29  ;;  %v3979_v4 = vmul.f32 %v12533_v19, %v12547_v59  ;;  %v3963_v42 = vadd.f32 %v12548_v24, %v3948_v33  ;;  %v3606_v10 = vmul.f32 0.2, %v3598_v62  ;;  %v12555_v1 = vld [vmem:[#allocation369_spill] sm:$0xff]  ;;  %v12557_v59 = vld [vmem:[#allocation371_spill] sm:$0xff] }
 0x2d2   : > { %v3791_v13 = vadd.f32 %v3787_v40, %v3781_v9  ;;  %v4008_v22 = vmul.f32 %v12530_v45, %v12553_v56  ;;  %v3989_v46 = vmul.f32 %v12534_v52, %v12551_v15  ;;  %v12554_v6 = vmov 7  }
 0x2d3   : > { %5135 = vset.pattern.permute.xlu1 %v12554_v6  ;;  %v3607_v17 = vmul.f32 0.2, %v3599_v51  ;;  %v3992_v3 = vadd.f32 %v3988_v0, %v3982_v18  ;;  %v3973_v23 = vadd.f32 %v3969_v49, %v3963_v42  ;;  %v4180_v29 = vmul.f32 %v12506_v44, %v12555_v1  ;;  %v4160_v49 = vpop.permute.xlu0 %4159  ;;  %v12559_v42 = vld [vmem:[#allocation357_spill] sm:$0xff] }
 0x2d4   : > { %1482 = vperm.xlu1 %5135, %v11940_v43   ;;  %vm3603_vm11 = vcmp.gt.f32.partialorder %v3599_v51, 0.0  ;;  %v8582_v33 = vadd.f32 %v3806_v48, %v3800_v30  ;;  %v3801_v40 = vadd.f32 %v3797_v37, %v3791_v13  ;;  %v3999_v9 = vmul.f32 %v12501_v27, %v12552_v11  ;;  %v12563_v13 = vld [vmem:[#allocation372_spill] sm:$0xff] }
 0x2d5   : > { %v4002_v24 = vadd.f32 %v3998_v55, %v3992_v3  ;;  %v3983_v15 = vadd.f32 %v3979_v4, %v3973_v23  ;;  %v4190_v6 = vmul.f32 %v12512_v50, %v12557_v59  ;;  %v4174_v0 = vadd.f32 %v12324_v34, %v4156_v32  ;;  %v12571_v11 = vld [vmem:[#allocation412_spill] sm:$0xff] }
 0x2d6   : > { %12556 = vst [vmem:[#allocation187_spill] sm:$0xff] %v8582_v33  ;;  %v8590_v18 = vsel %vm3602_vm10, %v3598_v62, %v3606_v10  ;;  %v4018_v47 = vmul.f32 %v12532_v39, %v12559_v42  ;;  %v4009_v48 = vmul.f32 %v12516_v16, %v12553_v56  ;;  %v4181_v37 = vmul.f32 %v12528_v21, %v12555_v1  ;;  %v1059_v1 = vpop.permute.xlu1 %1058  ;;  %v12564_v56 = vld [vmem:[#allocation401_spill] sm:$0xff] }
 0x2d7   : > { %12558 = vst [vmem:[#allocation173_spill] sm:$0xff] %v8590_v18  ;;  %v8598_v30 = vsel %vm3603_vm11, %v3599_v51, %v3607_v17  ;;  %v4019_v23 = vmul.f32 %v12520_v54, %v12559_v42  ;;  %v3993_v55 = vadd.f32 %v3989_v46, %v3983_v15  ;;  %v4184_v4 = vadd.f32 %v4180_v29, %v4174_v0  ;;  %v12565_v46 = vld [vmem:[#allocation376_spill] sm:$0xff] }
 0x2d8   : > { %12560 = vst [vmem:[#allocation188_spill] sm:$0xff] %v8598_v30  ;;  %1490 = vperm.xlu1 %5135, %v12550_v60   ;;  %v8604_v62 = vmul.f32 0.2, %v8582_v33  ;;  %v8606_v10 = vadd.f32 %v3807_v5, %v3801_v40  ;;  %v4200_v32 = vmul.f32 %v12522_v36, %v12563_v13  ;;  %v4175_v3 = vadd.f32 %v12324_v34, %v4160_v49  ;;  %v12566_v0 = vld [vmem:[#allocation380_spill] sm:$0xff] }
 0x2d9   : > { %v4012_v51 = vadd.f32 %v4008_v22, %v4002_v24  ;;  %v4003_v17 = vadd.f32 %v3999_v9, %v3993_v55  ;;  %v4194_v30 = vadd.f32 %v4190_v6, %v4184_v4  ;;  %v1083_v15 = vmul.f32 %v12506_v44, %v12564_v56  ;;  %v12567_v24 = vld [vmem:[#allocation405_spill] sm:$0xff]  ;;  %v851_v55 = vpop.permute.xlu0 %850  ;;  %v12574_v18 = vld [vmem:[#allocation420_spill] sm:$0xff] }
 0x2da   : > { %12561 = vst [vmem:[#allocation185_spill] sm:$0xff] %v8604_v62  ;;  %12562 = vst [vmem:[#allocation190_spill] sm:$0xff] %v8606_v10  ;;  %v4210_v29 = vmul.f32 %v12526_v41, %v12565_v46  ;;  %v8617_v42 = vmul.f32 %v12530_v45, %v12566_v0  ;;  %v4191_v5 = vmul.f32 %v12533_v19, %v12557_v59  ;;  %v8632_v4 = vmul.f32 0.2, %v8606_v10 }
 0x2db   : > { %v4185_v40 = vadd.f32 %v4181_v37, %v4175_v3  ;;  %v4201_v49 = vmul.f32 %v12534_v52, %v12563_v13  ;;  %v8625_v22 = vmul.f32 %v12501_v27, %v12565_v46  ;;  %v1093_v9 = vmul.f32 %v12512_v50, %v12567_v24  ;;  %v12569_v3 = vld [vmem:[#allocation92_spill] sm:$0xff] }
 0x2dc   : > { %v1077_v6 = vadd.f32 %v12366_v31, %v1059_v1  ;;  %1494 = vperm.xlu1 %5135, %v5586_v28   ;;  %12568 = vst [vmem:[#allocation193_spill] sm:$0xff] %v8632_v4  ;;  %v4013_v59 = vadd.f32 %v4009_v48, %v4003_v17  ;;  %v8636_v37 = vmul.f32 %v12516_v16, %v12566_v0  ;;  %v12573_v4 = vld [vmem:[#allocation96_spill] sm:$0xff]  ;;  %v1271_v0 = vpop.permute.xlu1 %1270  ;;  %vm3920_vm0 = vcmp.gt.f32.partialorder %v8151_v61, 0.0 }
 0x2dd   : > { %v872_v46 = vmul.f32 %v12528_v21, %v12569_v3  ;;  %v8640_v13 = vadd.f32 %v4018_v47, %v4012_v51  ;;  %v4204_v34 = vadd.f32 %v4200_v32, %v4194_v30  ;;  %v1103_v1 = vmul.f32 %v12522_v36, %v12571_v11  ;;  %v12575_v47 = vld [vmem:[#allocation426_spill] sm:$0xff]  ;;  %v12576_v51 = vld [vmem:[#allocation432_spill] sm:$0xff] }
 0x2de   : > { %v1087_v7 = vadd.f32 %v1083_v15, %v1077_v6  ;;  %v4195_v62 = vadd.f32 %v4191_v5, %v4185_v40  ;;  %v1113_v10 = vmul.f32 %v12526_v41, %v12572_v53  ;;  %v882_v48 = vmul.f32 %v12533_v19, %v12573_v4  ;;  %v12579_v6 = vld [vmem:[#allocation100_spill] sm:$0xff] }
 0x2df   : > { %12570 = vst [vmem:[#allocation195_spill] sm:$0xff] %v8640_v13  ;;  %v866_v17 = vadd.f32 %v12106_v2, %v851_v55  ;;  %v1123_v3 = vmul.f32 %v12530_v45, %v12574_v18  ;;  %v1133_v30 = vmul.f32 %v12532_v39, %v12575_v47  ;;  %v1295_v15 = vmul.f32 %v12506_v44, %v12576_v51  ;;  %v12580_v13 = vld [vmem:[#allocation103_spill] sm:$0xff] }
 0x2e0   : > { %v1097_v32 = vadd.f32 %v1093_v9, %v1087_v7  ;;  %v12577_v5 = vmov 8   ;;  %v8656_v40 = vadd.f32 %v4019_v23, %v4013_v59  ;;  %v892_v4 = vmul.f32 %v12534_v52, %v12579_v6  ;;  %v12581_v7 = vld [vmem:[#allocation436_spill] sm:$0xff]  ;;  %v12582_v23 = vld [vmem:[#allocation106_spill] sm:$0xff] }
 0x2e1   : > { %5138 = vset.pattern.permute.xlu1 %v12577_v5  ;;  %v902_v55 = vmul.f32 %v12501_v27, %v12580_v13  ;;  %v876_v2 = vadd.f32 %v872_v46, %v866_v17  ;;  %v8663_v57 = vadd.f32 %v4210_v29, %v4204_v34  ;;  %v1305_v9 = vmul.f32 %v12512_v50, %v12581_v7  ;;  %v1063_v5 = vpop.permute.xlu0 %1062  ;;  %v12583_v17 = vld [vmem:[#allocation114_spill] sm:$0xff]  ;;  %v12584_v29 = vld [vmem:[#allocation444_spill] sm:$0xff] }
 0x2e2   : > { %12578 = vst [vmem:[#allocation207_spill] sm:$0xff] %v8656_v40  ;;  %1592 = vperm.xlu1 %5138, %v11995_v38   ;;  %v1107_v33 = vadd.f32 %v1103_v1, %v1097_v32  ;;  %v1289_v44 = vadd.f32 %v12415_v8, %v1271_v0  ;;  %v4205_v59 = vadd.f32 %v4201_v49, %v4195_v62  ;;  %v12585_v38 = vld [vmem:[#allocation448_spill] sm:$0xff]  ;;  %v753_v49 = vpop.permute.xlu1 %752 }
 0x2e3   : > { %v912_v40 = vmul.f32 %v12516_v16, %v12582_v23  ;;  %v886_v6 = vadd.f32 %v882_v48, %v876_v2  ;;  %v1084_v13 = vmul.f32 %v12528_v21, %v12564_v56  ;;  %v922_v34 = vmul.f32 %v12520_v54, %v12583_v17  ;;  %v12587_v17 = vld [vmem:[#allocation47_spill] sm:$0xff]  ;;  %v12588_v23 = vld [vmem:[#allocation332_spill] sm:$0xff] }
 0x2e4   : > { %v1117_v46 = vadd.f32 %v1113_v10, %v1107_v33  ;;  %v1315_v1 = vmul.f32 %v12522_v36, %v12584_v29  ;;  %v1299_v32 = vadd.f32 %v1295_v15, %v1289_v44  ;;  %v1325_v0 = vmul.f32 %v12526_v41, %v12585_v38  ;;  %v12586_v10 = vld [vmem:[#allocation452_spill] sm:$0xff]  ;;  %v12589_v15 = vld [vmem:[#allocation458_spill] sm:$0xff] }
 0x2e5   : > { %v896_v50 = vadd.f32 %v892_v4, %v886_v6  ;;  %v1094_v62 = vmul.f32 %v12533_v19, %v12567_v24  ;;  %v1078_v2 = vadd.f32 %v12366_v31, %v1063_v5  ;;  %v1335_v48 = vmul.f32 %v12530_v45, %v12586_v10  ;;  %v12590_v36 = vld [vmem:[#allocation48_spill] sm:$0xff] }
 0x2e6   : > { %1596 = vperm.xlu1 %5138, %v12550_v60   ;;  %v1127_v33 = vadd.f32 %v1123_v3, %v1117_v46  ;;  %v1309_v56 = vadd.f32 %v1305_v9, %v1299_v32  ;;  %v768_v44 = vmul.f32 %v12588_v23, %v12587_v17  ;;  %v1345_v6 = vmul.f32 %v12532_v39, %v12589_v15  ;;  %v12592_v46 = vld [vmem:[#allocation56_spill] sm:$0xff] }
 0x2e7   : > { %v906_v4 = vadd.f32 %v902_v55, %v896_v50  ;;  %v1104_v24 = vmul.f32 %v12534_v52, %v12571_v11  ;;  %v1088_v41 = vadd.f32 %v1084_v13, %v1078_v2  ;;  %v778_v3 = vmul.f32 %v12591_v35, %v12590_v36  ;;  %v12593_v50 = vld [vmem:[#allocation63_spill] sm:$0xff] }
 0x2e8   : > { %v1137_v5 = vadd.f32 %v1133_v30, %v1127_v33  ;;  %v1319_v31 = vadd.f32 %v1315_v1, %v1309_v56  ;;  %v762_v58 = vadd.f32 %v12592_v46, %v753_v49  ;;  %v1114_v9 = vmul.f32 %v12501_v27, %v12572_v53  ;;  %v12594_v55 = vld [vmem:[#allocation339_spill] sm:$0xff]  ;;  %v1275_v49 = vpop.permute.xlu0 %1274  ;;  %v12596_v33 = vld [vmem:[#allocation66_spill] sm:$0xff]  ;;  %v12661_v53 = vld [vmem:[#allocation128_spill] sm:$0xff] }
 0x2e9   : > { %v916_v45 = vadd.f32 %v912_v40, %v906_v4  ;;  %v1098_v32 = vadd.f32 %v1094_v62, %v1088_v41  ;;  %v788_v17 = vmul.f32 %v12594_v55, %v12593_v50  ;;  %v12595_v39 = vmov 9   ;;  %v12597_v4 = vld [vmem:[#allocation340_spill] sm:$0xff] }
 0x2ea   : > { %5139 = vset.pattern.permute.xlu1 %v12595_v39  ;;  %vm1141_vm12 = vcmp.gt.f32.partialorder %v1137_v5, 0.0  ;;  %v1145_v11 = vmul.f32 0.2, %v1137_v5  ;;  %v1329_v13 = vadd.f32 %v1325_v0, %v1319_v31  ;;  %v772_v30 = vadd.f32 %v768_v44, %v762_v58 }
 0x2eb   : > { %1694 = vperm.xlu1 %5139, %v11940_v43   ;;  %v4215_v56 = vadd.f32 %v8625_v22, %v4205_v59  ;;  %v926_v1 = vadd.f32 %v922_v34, %v916_v45  ;;  %v1124_v40 = vmul.f32 %v12516_v16, %v12574_v18  ;;  %v1108_v2 = vadd.f32 %v1104_v24, %v1098_v32  ;;  %v12660_v18 = vld [vmem:[#allocation127_spill] sm:$0xff] }
 0x2ec   : > { %v1149_v41 = vsel %vm1141_vm12, %v1137_v5, %v1145_v11  ;;  %v1339_v62 = vadd.f32 %v1335_v48, %v1329_v13  ;;  %v798_v50 = vmul.f32 %v12597_v4, %v12596_v33  ;;  %v782_v39 = vadd.f32 %v778_v3, %v772_v30  ;;  %v12598_v5 = vld [vmem:[#allocation70_spill] sm:$0xff]  ;;  %v12599_v3 = vld [vmem:[#allocation343_spill] sm:$0xff]  ;;  %v2684_v13 = vpop.permute.xlu1 %2683 }
 0x2ed   : > { %v1155_v46 = vmul.f32 %v12447_v20, %v1149_v41  ;;  %v1134_v58 = vmul.f32 %v12520_v54, %v12575_v47  ;;  %v1118_v31 = vadd.f32 %v1114_v9, %v1108_v2  ;;  %v1296_v45 = vmul.f32 %v12528_v21, %v12576_v51  ;;  %v12601_v2 = vld [vmem:[#allocation76_spill] sm:$0xff] }
 0x2ee   : > { %v934_v22 = vmul.f32 0.2, %v926_v1  ;;  %v1349_v59 = vadd.f32 %v1345_v6, %v1339_v62  ;;  %v792_v34 = vadd.f32 %v788_v17, %v782_v39  ;;  %v1290_v24 = vadd.f32 %v12415_v8, %v1275_v49  ;;  %v12602_v49 = vld [vmem:[#allocation348_spill] sm:$0xff]  ;;  %v12603_v62 = vld [vmem:[#allocation79_spill] sm:$0xff] }
 0x2ef   : > { %1702 = vperm.xlu1 %5139, %v12550_v60   ;;  %v1159_v11 = vadd.f32 %v1155_v46, %v8227_v25  ;;  %vm930_vm14 = vcmp.gt.f32.partialorder %v926_v1, 0.0  ;;  %v1128_v0 = vadd.f32 %v1124_v40, %v1118_v31  ;;  %v1306_v48 = vmul.f32 %v12533_v19, %v12581_v7  ;;  %v12658_v7 = vld [vmem:[#allocation78_spill] sm:$0xff] }
 0x2f0   : > { %vm1353_vm15 = vcmp.gt.f32.partialorder %v1349_v59, 0.0  ;;  %v1357_v44 = vmul.f32 0.2, %v1349_v59  ;;  %v808_v9 = vmul.f32 %v12599_v3, %v12598_v5  ;;  %v802_v6 = vadd.f32 %v798_v50, %v792_v34  ;;  %v2896_v8 = vpop.permute.xlu1 %2895 }
 0x2f1   : > { %v8719_v17 = vadd.f32 %v8617_v42, %v8663_v57  ;;  %v1265_v32 = vadd.f32 %v8239_v26, %v1159_v11  ;;  %v1316_v25 = vmul.f32 %v12534_v52, %v12584_v29  ;;  %v1300_v46 = vadd.f32 %v1296_v45, %v1290_v24  ;;  %v12605_v45 = vld [vmem:[#allocation34_spill] sm:$0xff] }
 0x2f2   : > { %v8725_v30 = vadd.f32 %v8636_v37, %v4215_v56  ;;  %v938_v40 = vsel %vm930_vm14, %v926_v1, %v934_v22  ;;  %v818_v41 = vmul.f32 %v12602_v49, %v12601_v2  ;;  %v2699_v50 = vmul.f32 %v12588_v23, %v12603_v62  ;;  %v12604_v56 = vld [vmem:[#allocation80_spill] sm:$0xff]  ;;  %v12626_v2 = vld [vmem:[#allocation117_spill] sm:$0xff] }
 0x2f3   : > { %1706 = vperm.xlu1 %5139, %v5586_v28   ;;  %v1361_v57 = vsel %vm1353_vm15, %v1349_v59, %v1357_v44  ;;  %v1138_v42 = vadd.f32 %v1134_v58, %v1128_v0  ;;  %v1326_v26 = vmul.f32 %v12501_v27, %v12585_v38  ;;  %v1310_v39 = vadd.f32 %v1306_v48, %v1300_v46  ;;  %v12608_v0 = vld [vmem:[#allocation126_spill] sm:$0xff]  ;;  %v12609_v44 = vld [vmem:[#allocation84_spill] sm:$0xff] }
 0x2f4   : > { %12600 = vst [vmem:[#allocation197_spill] sm:$0xff] %v8725_v30  ;;  %v812_v31 = vadd.f32 %v808_v9, %v802_v6  ;;  %v1336_v37 = vmul.f32 %v12516_v16, %v12586_v10  ;;  %v2709_v1 = vmul.f32 %v12591_v35, %v12604_v56  ;;  %v2693_v22 = vadd.f32 %v12605_v45, %v2684_v13  ;;  %v12610_v6 = vld [vmem:[#allocation88_spill] sm:$0xff]  ;;  %v12613_v56 = vld [vmem:[#allocation122_spill] sm:$0xff] }
 0x2f5   : > { %v8741_v34 = vmul.f32 %v12405_v63, %v938_v40  ;;  %v1346_v58 = vmul.f32 %v12520_v54, %v12589_v15  ;;  %v1320_v59 = vadd.f32 %v1316_v25, %v1310_v39  ;;  %v12607_v24 = vunpack.c.0.s8 %v12404_v12  ;;  %v12612_v39 = vld [vmem:[#allocation178_spill] sm:$0xff]  ;;  %v12659_v63 = vld [vmem:[#allocation124_spill] sm:$0xff]  ;;  %v12663_v54 = vld [vmem:[#allocation135_spill] sm:$0xff] }
 0x2f6   : > { %v1367_v48 = vmul.f32 %v12608_v0, %v1361_v57  ;;  %v2719_v9 = vmul.f32 %v12594_v55, %v12609_v44  ;;  %v2729_v46 = vmul.f32 %v12597_v4, %v12610_v6  ;;  %v2703_v13 = vadd.f32 %v2699_v50, %v2693_v22  ;;  %v12615_v44 = vld [vmem:[#allocation187_spill] sm:$0xff] }
 0x2f7   : > { %12606 = vst [vmem:[#allocation205_spill] sm:$0xff] %v8741_v34  ;;  %v2440_v11 = vpack.c.b16 %v12607_v24, %v12607_v24  ;;  %v12611_v40 = vmov 10   ;;  %v1146_v30 = vmul.f32 0.2, %v1138_v42  ;;  %v1330_v45 = vadd.f32 %v1326_v26, %v1320_v59  ;;  %v12614_v24 = vld [vmem:[#allocation23_spill] sm:$0xff]  ;;  %v12619_v26 = vld [vmem:[#allocation180_spill] sm:$0xff] }
 0x2f8   : > { %5142 = vset.pattern.permute.xlu1 %v12611_v40  ;;  %v3302_v62 = vadd.f32 %v12613_v56, %v12612_v39  ;;  %vm1142_vm1 = vcmp.gt.f32.partialorder %v1138_v42, 0.0  ;;  %v822_v57 = vadd.f32 %v818_v41, %v812_v31  ;;  %v2713_v34 = vadd.f32 %v2709_v1, %v2703_v13  ;;  %v12616_v50 = vld [vmem:[#allocation91_spill] sm:$0xff]  ;;  %v12621_v56 = vld [vmem:[#allocation110_spill] sm:$0xff] }
 0x2f9   : > { %v2441_v25 = vpack.c.b8 %v2440_v11, %v2440_v11  ;;  %1804 = vperm.xlu1 %5142, %v12614_v24   ;;  %vm3814_vm2 = vcmp.gt.f32.partialorder %v12615_v44, 0.0  ;;  %v2739_v22 = vmul.f32 %v12599_v3, %v12616_v50  ;;  %v12620_v11 = vld [vmem:[#allocation173_spill] sm:$0xff]  ;;  %v12622_v41 = vld [vmem:[#allocation99_spill] sm:$0xff]  ;;  %v12623_v13 = vld [vmem:[#allocation130_spill] sm:$0xff]  ;;  %v8863_v33 = vstv %s8796_s4  ;;  %s9161_s4 = sld [smem:[#allocation6 + $0x9]] }
 0x2fa   : > { %v3408_v59 = vadd.f32 %v12619_v26, %v3302_v62  ;;  %v3616_v39 = vmul.f32 %v12621_v56, %v12620_v11  ;;  %v2749_v31 = vmul.f32 %v12602_v49, %v12622_v41  ;;  %v2723_v1 = vadd.f32 %v2719_v9, %v2713_v34  ;;  %12649 = vst [vmem:[#allocation216_spill] sm:$0xff] %v8863_v33 }
 0x2fb   : > { %vm8764_vm3 = vnez %v2441_v25  ;;  %v3716_v50 = vsel %vm3708_vm13, %v8124_v14, %v12623_v13  ;;  %v12624_v25 = vld [vmem:[#allocation185_spill] sm:$0xff]  ;;  %v8783_v62 = vadd.f32 %v1367_v48, %v1265_v32  ;;  %v1150_v26 = vsel %vm1142_vm1, %v1138_v42, %v1146_v30  ;;  %v12628_v32 = vld [vmem:[#allocation155_spill] sm:$0xff] }
 0x2fc   : > { %v3822_v6 = vsel %vm3814_vm2, %v12615_v44, %v12624_v25  ;;  %v1340_v11 = vadd.f32 %v1336_v37, %v1330_v45  ;;  %v3514_v5 = vadd.f32 %v12626_v2, %v3408_v59  ;;  %vm826_vm4 = vcmp.gt.f32.partialorder %v822_v57, 0.0  ;;  %v12629_v25 = vld [vmem:[#allocation157_spill] sm:$0xff]  ;;  %v12630_v42 = vld [vmem:[#allocation195_spill] sm:$0xff] }
 0x2fd   : > { %12625 = vst [vmem:[#allocation206_spill] sm:$0xff] %v8783_v62  ;;  %1808 = vperm.xlu1 %5142, %v12550_v60   ;;  %v830_v34 = vmul.f32 0.2, %v822_v57  ;;  %v2733_v14 = vadd.f32 %v2729_v46, %v2723_v1  ;;  %v12627_v9 = vmov 0   ;;  %v3722_v48 = vmul.f32 %v12628_v32, %v3716_v50  ;;  %v12631_v37 = vld [vmem:[#allocation125_spill] sm:$0xff] }
 0x2fe   : > { %v2452_v44 = vsel %vm8764_vm3, 16843009, %v12627_v9  ;;  %v3620_v13 = vadd.f32 %v3616_v39, %v3514_v5  ;;  %v3828_v30 = vmul.f32 %v12629_v25, %v3822_v6  ;;  %vm4026_vm5 = vcmp.gt.f32.partialorder %v12630_v42, 0.0  ;;  %v12633_v50 = vld [vmem:[#allocation97_spill] sm:$0xff] }
 0x2ff   : > { %v2743_v2 = vadd.f32 %v2739_v22, %v2733_v14  ;;  %v3928_v45 = vsel %vm3920_vm0, %v8151_v61, %v12631_v37  ;;  %v8803_v46 = vstv %s8753_s14  ;;  %v4030_v40 = vmul.f32 0.2, %v12630_v42  ;;  %v12640_v37 = vld [vmem:[#allocation82_spill] sm:$0xff]  ;;  %s9070_s14 = sld [smem:[#allocation6 + $0x188]] }
 0x300   : > { %12632 = vst [vmem:[#allocation213_spill] sm:$0xff] %v8803_v46  ;;  %v1350_v5 = vadd.f32 %v1346_v58, %v1340_v11  ;;  %v3726_v6 = vadd.f32 %v3722_v48, %v3620_v13  ;;  %vm4132_vm6 = vcmp.gt.f32.partialorder %v12633_v50, 0.0  ;;  %v4136_v22 = vmul.f32 0.2, %v12633_v50 }
 0x301   : > { %v12634_v59 = vmov 11   ;;  %v2753_v61 = vadd.f32 %v2749_v31, %v2743_v2  ;;  %v2456_v39 = vunpack.c.0.s8 %v2452_v44  ;;  %v4034_v1 = vsel %vm4026_vm5, %v12630_v42, %v4030_v40  ;;  %v12637_v44 = vld [vmem:[#allocation138_spill] sm:$0xff] }
 0x302   : > { %5143 = vset.pattern.permute.xlu1 %v12634_v59  ;;  %v8819_v14 = vstv %s8760_s19  ;;  %v3832_v58 = vadd.f32 %v3828_v30, %v3726_v6  ;;  %v3934_v11 = vmul.f32 %v8803_v46, %v3928_v45  ;;  %v8829_v31 = vstv %s8771_s17  ;;  %s9072_s19 = sld [smem:[#allocation6 + $0x208]]  ;;  %s9083_s17 = sld [smem:[#allocation7 + $0x7]] }
 0x303   : > { %12635 = vst [vmem:[#allocation210_spill] sm:$0xff] %v8819_v14  ;;  %1906 = vperm.xlu1 %5143, %v11940_v43   ;;  %v4040_v13 = vmul.f32 %v8819_v14, %v4034_v1  ;;  %12636 = vst [vmem:[#allocation189_spill] sm:$0xff] %v8829_v31  ;;  %vm3710_vm7 = vcmp.gt.f32.partialorder %v12637_v44, 0.0  ;;  %v8833_v48 = vmul.f32 %v12447_v20, %v1150_v26  ;;  %v8839_v2 = vstv %s8781_s1  ;;  %v12645_v1 = vld [vmem:[#allocation31_spill] sm:$0xff]  ;;  %s9085_s1 = sld [smem:[#allocation6 + $0x288]] }
 0x304   : > { %v4140_v42 = vsel %vm4132_vm6, %v12633_v50, %v4136_v22  ;;  %12639 = vst [vmem:[#allocation209_spill] sm:$0xff] %v8839_v2  ;;  %v4230_v30 = vmul.f32 %v12640_v37, %v8829_v31  ;;  %v8844_v45 = vsel %vm826_vm4, %v822_v57, %v830_v34  ;;  %vm1354_vm8 = vcmp.gt.f32.partialorder %v1350_v5, 0.0 }
 0x305   : > { %12638 = vst [vmem:[#allocation208_spill] sm:$0xff] %v8833_v48  ;;  %v3938_v40 = vadd.f32 %v3934_v11, %v3832_v58  ;;  %v8847_v6 = vstv %s8787_s9  ;;  %v1358_v26 = vmul.f32 0.2, %v1350_v5  ;;  %vm2757_vm9 = vcmp.gt.f32.partialorder %v2753_v61, 0.0  ;;  %v12646_v58 = vld [vmem:[#allocation32_spill] sm:$0xff]  ;;  %s9103_s9 = sld [smem:[#allocation7 + $0x8]] }
 0x306   : > { %12641 = vst [vmem:[#allocation225_spill] sm:$0xff] %v8847_v6  ;;  %vm8849_vm10 = vcmp.ne.s32.totalorder %v2456_v39, 0  ;;  %v12642_v50 = vmov 0  ;;  %v4234_v22 = vadd.f32 %v4230_v30, %v8719_v17  ;;  %v2761_v57 = vmul.f32 0.2, %v2753_v61  ;;  %v12648_v39 = vld [vmem:[#allocation51_spill] sm:$0xff]  ;;  %v1377_v17 = vpop.permute.xlu0 %1376 }
 0x307   : > { %v12643_v50 = vsel %vm8849_vm10, 4294967295, %v12642_v50  ;;  %1914 = vperm.xlu1 %5143, %v12550_v60   ;;  %v4044_v34 = vadd.f32 %v4040_v13, %v3938_v40  ;;  %v4146_v59 = vmul.f32 %v8839_v2, %v4140_v42  ;;  %v8858_v11 = vrot.slane %v12646_v58, %v12645_v1 }
 0x308   : > { %12644 = vst [vmem:[#allocation222_spill] sm:$0xff] %v12643_v50  ;;  %vm4238_vm11 = vcmp.gt.f32.partialorder %v4234_v22, 0.0  ;;  %v4242_v48 = vmul.f32 0.2, %v4234_v22  ;;  %v1401_v41 = vmul.f32 %v12648_v39, %v8847_v6  ;;  %v8866_v36 = vstv %s8806_s5  ;;  %s9172_s5 = sld [smem:[#allocation6 + $0x89]] }
 0x309   : > { %12647 = vst [vmem:[#allocation230_spill] sm:$0xff] %v8858_v11  ;;  %v4150_v30 = vadd.f32 %v4146_v59, %v4044_v34  ;;  %12650 = vst [vmem:[#allocation228_spill] sm:$0xff] %v8866_v36  ;;  %v8869_v20 = vstv %s8808_s0  ;;  %v8872_v13 = vstv %s8812_s27  ;;  %v8875_v42 = vsel %vm1354_vm8, %v1350_v5, %v1358_v26  ;;  %v12655_v59 = vld [vmem:[#allocation64_spill] sm:$0xff]  ;;  %v12656_v5 = vld [vmem:[#allocation71_spill] sm:$0xff]  ;;  %s9178_s0 = sld [smem:[#allocation6 + $0x109]] }
 0x30a   : > { %12651 = vst [vmem:[#allocation212_spill] sm:$0xff] %v8869_v20  ;;  %12652 = vst [vmem:[#allocation226_spill] sm:$0xff] %v8872_v13  ;;  %v4246_v40 = vsel %vm4238_vm11, %v4234_v22, %v4242_v48  ;;  %v8878_v1 = vstv %s8821_s30  ;;  %v8881_v15 = vstv %s8823_s12  ;;  %v2765_v10 = vsel %vm2757_vm9, %v2753_v61, %v2761_v57  ;;  %v12657_v48 = vld [vmem:[#allocation72_spill] sm:$0xff]  ;;  %s9189_s27 = sld [smem:[#allocation6 + $0x189]] }
 0x30b   : > { %12653 = vst [vmem:[#allocation235_spill] sm:$0xff] %v8878_v1  ;;  %12654 = vst [vmem:[#allocation224_spill] sm:$0xff] %v8881_v15  ;;  %1918 = vperm.xlu1 %5143, %v5586_v28   ;;  %v4252_v34 = vmul.f32 %v8878_v1, %v4246_v40  ;;  %v1411_v38 = vmul.f32 %v12655_v59, %v8863_v33  ;;  %v1395_v29 = vadd.f32 %v8858_v11, %v1377_v17  ;;  %v12662_v59 = vld [vmem:[#allocation36_spill] sm:$0xff]  ;;  %v12665_v62 = vmov 12   ;;  %s9191_s30 = sld [smem:[#allocation6 + $0x209]] }
 0x30c   : > { %v1421_v26 = vmul.f32 %v12656_v5, %v8866_v36  ;;  %v1431_v22 = vmul.f32 %v12657_v48, %v8869_v20  ;;  %v1441_v51 = vmul.f32 %v12658_v7, %v8872_v13  ;;  %v2911_v61 = vmul.f32 %v12588_v23, %v12659_v63  ;;  %v12664_v7 = vld [vmem:[#allocation121_spill] sm:$0xff]  ;;  %s9204_s12 = sld [smem:[#allocation6 + $0x289]] }
 0x30d   : > { %v4256_v57 = vadd.f32 %v4252_v34, %v4150_v30  ;;  %v1451_v40 = vmul.f32 %v12640_v37, %v8881_v15  ;;  %v1405_v47 = vadd.f32 %v1401_v41, %v1395_v29  ;;  %v2921_v17 = vmul.f32 %v12591_v35, %v12660_v18  ;;  %v12667_v41 = vld [vmem:[#allocation134_spill] sm:$0xff]  ;;  %v12670_v30 = vld [vmem:[#allocation137_spill] sm:$0xff] }
 0x30e   : > { %v2931_v5 = vmul.f32 %v12594_v55, %v12661_v53  ;;  %v2905_v39 = vadd.f32 %v12662_v59, %v2896_v8  ;;  %v2438_v48 = vunpack.c.2.s8 %v12404_v12  ;;  %v3410_v16 = vadd.f32 %v12664_v7, %v12663_v54  ;;  %v12668_v53 = vld [vmem:[#allocation140_spill] sm:$0xff]  ;;  %v12669_v8 = vld [vmem:[#allocation131_spill] sm:$0xff] }
 0x30f   : > { %5146 = vset.pattern.permute.xlu1 %v12665_v62  ;;  %v8910_v63 = vsel %vm8849_vm10, %v4256_v57, -1e+30  ;;  %v1415_v29 = vadd.f32 %v1411_v38, %v1405_v47  ;;  %v3718_v18 = vsel %vm3710_vm7, %v12637_v44, %v12667_v41  ;;  %vm3816_vm12 = vcmp.gt.f32.partialorder %v12668_v53, 0.0  ;;  %v12671_v47 = vld [vmem:[#allocation123_spill] sm:$0xff]  ;;  %v12672_v57 = vld [vmem:[#allocation144_spill] sm:$0xff] }
 0x310   : > { %12666 = vst [vmem:[#allocation234_spill] sm:$0xff] %v8910_v63  ;;  %2016 = vperm.xlu1 %5146, %v12614_v24   ;;  %4264 = vmax.xlane.f32.xlu0 %v8910_v63  ;;  %v2941_v54 = vmul.f32 %v12597_v4, %v12669_v8  ;;  %v2915_v7 = vadd.f32 %v2911_v61, %v2905_v39  ;;  %vm3922_vm13 = vcmp.gt.f32.partialorder %v12672_v57, 0.0  ;;  %v3926_v44 = vmul.f32 0.2, %v12672_v57  ;;  %v12673_v63 = vld [vmem:[#allocation147_spill] sm:$0xff] }
 0x311   : > { %v2444_v62 = vpack.c.b16 %v2438_v48, %v2438_v48  ;;  %v3618_v34 = vmul.f32 %v12621_v56, %v12670_v30  ;;  %v1425_v38 = vadd.f32 %v1421_v26, %v1415_v29  ;;  %v3516_v59 = vadd.f32 %v12671_v47, %v3410_v16  ;;  %v12674_v39 = vld [vmem:[#allocation139_spill] sm:$0xff]  ;;  %v12675_v26 = vld [vmem:[#allocation129_spill] sm:$0xff] }
 0x312   : > { %v2925_v41 = vadd.f32 %v2921_v17, %v2915_v7  ;;  %v3724_v12 = vmul.f32 %v12628_v32, %v3718_v18  ;;  %v3824_v37 = vsel %vm3816_vm12, %v12668_v53, %v12673_v63  ;;  %v2951_v48 = vmul.f32 %v12599_v3, %v12674_v39  ;;  %v12676_v17 = vld [vmem:[#allocation133_spill] sm:$0xff] }
 0x313   : > { %v2445_v50 = vpack.c.b8 %v2444_v62, %v2444_v62  ;;  %v1435_v8 = vadd.f32 %v1431_v22, %v1425_v38  ;;  %v3930_v61 = vsel %vm3922_vm13, %v12672_v57, %v3926_v44  ;;  %v4032_v29 = vmul.f32 0.2, %v12675_v26  ;;  %v12677_v22 = vld [vmem:[#allocation296_spill] sm:$0xff]  ;;  %v12678_v53 = vld [vmem:[#allocation49_spill] sm:$0xff]  ;;  %v12679_v38 = vld [vmem:[#allocation146_spill] sm:$0xff] }
 0x314   : > { %2020 = vperm.xlu1 %5146, %v12550_v60   ;;  %v2935_v16 = vadd.f32 %v2931_v5, %v2925_v41  ;;  %v3622_v30 = vadd.f32 %v3618_v34, %v3516_v59  ;;  %vm4028_vm15 = vcmp.gt.f32.partialorder %v12675_v26, 0.0  ;;  %v2771_v18 = vmul.f32 %v12676_v17, %v2765_v10  ;;  %v12680_v10 = vld [vmem:[#allocation143_spill] sm:$0xff]  ;;  %v3108_v59 = vpop.permute.xlu1 %3107 }
 0x315   : > { %vm2450_vm14 = vnez %v2445_v50  ;;  %v1445_v7 = vadd.f32 %v1441_v51, %v1435_v8  ;;  %v3830_v63 = vmul.f32 %v12629_v25, %v3824_v37  ;;  %v4126_v62 = vmul.f32 %v12678_v53, %v12677_v22  ;;  %v12682_v8 = vld [vmem:[#allocation109_spill] sm:$0xff] }
 0x316   : > { %v2961_v47 = vmul.f32 %v12602_v49, %v12679_v38  ;;  %v2945_v57 = vadd.f32 %v2941_v54, %v2935_v16  ;;  %v3728_v44 = vadd.f32 %v3724_v12, %v3622_v30  ;;  %v3936_v50 = vmul.f32 %v8803_v46, %v3930_v61 }
 0x317   : > { %v2454_v5 = vsel %vm2450_vm14, 16843009, %v12627_v9  ;;  %v4036_v34 = vsel %vm4028_vm15, %v12675_v26, %v4032_v29  ;;  %v4130_v51 = vadd.f32 %v4126_v62, %v12680_v10  ;;  %v4232_v37 = vmul.f32 %v12678_v53, %v8829_v31  ;;  %v12684_v26 = vld [vmem:[#allocation142_spill] sm:$0xff]  ;;  %v1389_v53 = vpop.permute.xlu0 %1388 }
 0x318   : > { %v12681_v41 = vmov 13   ;;  %v8952_v39 = vmul.f32 %v12682_v8, %v8844_v45  ;;  %v8956_v12 = vmul.f32 %v12608_v0, %v8875_v42  ;;  %v1455_v54 = vadd.f32 %v1451_v40, %v1445_v7 }
 0x319   : > { %5147 = vset.pattern.permute.xlu1 %v12681_v41  ;;  %v2955_v61 = vadd.f32 %v2951_v48, %v2945_v57  ;;  %v2775_v29 = vadd.f32 %v2771_v18, %v12684_v26  ;;  %v3834_v16 = vadd.f32 %v3830_v63, %v3728_v44  ;;  %vm4134_vm0 = vcmp.gt.f32.partialorder %v4130_v51, 0.0  ;;  %v12685_v41 = vld [vmem:[#allocation154_spill] sm:$0xff] }
 0x31a   : > { %12683 = vst [vmem:[#allocation229_spill] sm:$0xff] %v8956_v12  ;;  %2118 = vperm.xlu1 %5147, %v11940_v43   ;;  %v4138_v30 = vmul.f32 0.2, %v4130_v51  ;;  %v2458_v38 = vunpack.c.0.s8 %v2454_v5  ;;  %v4042_v10 = vmul.f32 %v8819_v14, %v4036_v34  ;;  %v4236_v45 = vadd.f32 %v4232_v37, %v12685_v41  ;;  %v12687_v34 = vld [vmem:[#allocation150_spill] sm:$0xff]  ;;  %v12688_v41 = vld [vmem:[#allocation156_spill] sm:$0xff] }
 0x31b   : > { %v2965_v62 = vadd.f32 %v2961_v47, %v2955_v61  ;;  %v3940_v42 = vadd.f32 %v3936_v50, %v3834_v16  ;;  %v1404_v48 = vmul.f32 %v12588_v23, %v8847_v6  ;;  %v1414_v18 = vmul.f32 %v12591_v35, %v8863_v33  ;;  %v8975_v50 = vpop.permute.xlu1 %3319 }
 0x31c   : > { %v4142_v40 = vsel %vm4134_vm0, %v4130_v51, %v4138_v30  ;;  %v1463_v7 = vmul.f32 0.2, %v1455_v54  ;;  %vm1459_vm2 = vcmp.gt.f32.partialorder %v1455_v54, 0.0  ;;  %vm4240_vm3 = vcmp.gt.f32.partialorder %v4236_v45, 0.0 }
 0x31d   : > { %vm2969_vm1 = vcmp.gt.f32.partialorder %v2965_v62, 0.0  ;;  %v2973_v63 = vmul.f32 0.2, %v2965_v62  ;;  %v4148_v47 = vmul.f32 %v8839_v2, %v4142_v40  ;;  %v4244_v57 = vmul.f32 0.2, %v4236_v45 }
 0x31e   : > { %2126 = vperm.xlu1 %5147, %v12550_v60   ;;  %v1398_v44 = vadd.f32 %v8858_v11, %v1389_v53  ;;  %v8978_v5 = vstv %s8939_s26  ;;  %v2881_v51 = vadd.f32 %v12687_v34, %v2775_v29  ;;  %v4046_v37 = vadd.f32 %v4042_v10, %v3940_v42  ;;  %v12696_v34 = vld [vmem:[#allocation164_spill] sm:$0xff]  ;;  %s9217_s26 = sld [smem:[#allocation6 + $0xa]] }
 0x31f   : > { %12686 = vst [vmem:[#allocation239_spill] sm:$0xff] %v8978_v5  ;;  %v1424_v61 = vmul.f32 %v12594_v55, %v8866_v36  ;;  %v2977_v26 = vsel %vm2969_vm1, %v2965_v62, %v2973_v63  ;;  %v4248_v16 = vsel %vm4240_vm3, %v4236_v45, %v4244_v57  ;;  %v3123_v53 = vmul.f32 %v12588_v23, %v12688_v41  ;;  %v12692_v45 = vld [vmem:[#allocation160_spill] sm:$0xff] }
 0x320   : > { %v1408_v30 = vadd.f32 %v1404_v48, %v1398_v44  ;;  %v1467_v40 = vsel %vm1459_vm2, %v1455_v54, %v1463_v7  ;;  %vm8987_vm4 = vcmp.ne.s32.totalorder %v2458_v38, 0  ;;  %v12689_v12 = vmov 0  ;;  %v12693_v54 = vld [vmem:[#allocation40_spill] sm:$0xff]  ;;  %v12694_v48 = vld [vmem:[#allocation181_spill] sm:$0xff] }
 0x321   : > { %v12690_v12 = vsel %vm8987_vm4, 4294967295, %v12689_v12  ;;  %v4152_v11 = vadd.f32 %v4148_v47, %v4046_v37  ;;  %v4254_v29 = vmul.f32 %v8878_v1, %v4248_v16  ;;  %v1434_v62 = vmul.f32 %v12597_v4, %v8869_v20  ;;  %v12699_v41 = vld [vmem:[#allocation52_spill] sm:$0xff]  ;;  %v12739_v1 = vld [vmem:[#allocation78_spill] sm:$0xff] }
 0x322   : > { %12691 = vst [vmem:[#allocation232_spill] sm:$0xff] %v12690_v12  ;;  %2130 = vperm.xlu1 %5147, %v5586_v28   ;;  %v1418_v10 = vadd.f32 %v1414_v18, %v1408_v30  ;;  %v3133_v42 = vmul.f32 %v12591_v35, %v12692_v45  ;;  %v3117_v38 = vadd.f32 %v12693_v54, %v3108_v59  ;;  %v9006_v57 = vstv %s8962_s28  ;;  %v1487_v59 = vpop.permute.xlu0 %1486  ;;  %v9013_v30 = vpop.permute.xlu1 %3531  ;;  %v12729_v20 = vld [vmem:[#allocation64_spill] sm:$0xff]  ;;  %s9232_s28 = sld [smem:[#allocation6 + $0x8a]] }
 0x323   : > { %v2983_v7 = vmul.f32 %v12694_v48, %v2977_v26  ;;  %v4258_v63 = vadd.f32 %v4254_v29, %v4152_v11  ;;  %v1444_v47 = vmul.f32 %v12599_v3, %v8872_v13  ;;  %12695 = vst [vmem:[#allocation254_spill] sm:$0xff] %v9006_v57  ;;  %v3143_v18 = vmul.f32 %v12594_v55, %v12696_v34 }
 0x324   : > { %v1428_v44 = vadd.f32 %v1424_v61, %v1418_v10  ;;  %v3127_v37 = vadd.f32 %v3123_v53, %v3117_v38  ;;  %v9011_v16 = vstv %s8968_s25  ;;  %v1473_v26 = vmul.f32 %v8978_v5, %v1467_v40  ;;  %v12702_v40 = vld [vmem:[#allocation172_spill] sm:$0xff]  ;;  %s9243_s25 = sld [smem:[#allocation6 + $0x10a]] }
 0x325   : > { %12697 = vst [vmem:[#allocation237_spill] sm:$0xff] %v9011_v16  ;;  %v9018_v11 = vsel %vm8987_vm4, %v4258_v63, -1e+30  ;;  %v9022_v61 = vrot.slane %v12646_v58, %v12699_v41  ;;  %v1508_v29 = vmul.f32 %v12528_v21, %v9006_v57  ;;  %v12701_v53 = vmov 14  }
 0x326   : > { %12698 = vst [vmem:[#allocation240_spill] sm:$0xff] %v9018_v11  ;;  %5150 = vset.pattern.permute.xlu1 %v12701_v53  ;;  %4268 = vmax.xlane.f32.xlu0 %v9018_v11  ;;  %v1438_v10 = vadd.f32 %v1434_v62, %v1428_v44  ;;  %v3153_v45 = vmul.f32 %v12597_v4, %v12702_v40  ;;  %v9033_v38 = vstv %s8973_s22  ;;  %v9040_v63 = vstv %s8983_s16  ;;  %s9263_s22 = sld [smem:[#allocation6 + $0x18a]] }
 0x327   : > { %12700 = vst [vmem:[#allocation250_spill] sm:$0xff] %v9022_v61  ;;  %v3137_v54 = vadd.f32 %v3133_v42, %v3127_v37  ;;  %12703 = vst [vmem:[#allocation244_spill] sm:$0xff] %v9033_v38  ;;  %v1454_v58 = vmul.f32 %v12602_v49, %v8881_v15  ;;  %v1518_v48 = vmul.f32 %v12533_v19, %v9011_v16  ;;  %2228 = vperm.xlu1 %5150, %v12614_v24   ;;  %v12705_v42 = vld [vmem:[#allocation179_spill] sm:$0xff]  ;;  %s9271_s16 = sld [smem:[#allocation6 + $0x20a]] }
 0x328   : > { %12704 = vst [vmem:[#allocation253_spill] sm:$0xff] %v9040_v63  ;;  %v1502_v34 = vadd.f32 %v9022_v61, %v1487_v59  ;;  %v2987_v62 = vadd.f32 %v2983_v7, %v2881_v51  ;;  %v1448_v44 = vadd.f32 %v1444_v47, %v1438_v10  ;;  %v3163_v37 = vmul.f32 %v12599_v3, %v12705_v42  ;;  %v12707_v16 = vld [vmem:[#allocation199_spill] sm:$0xff]  ;;  %v12708_v59 = vld [vmem:[#allocation186_spill] sm:$0xff] }
 0x329   : > { %v3147_v53 = vadd.f32 %v3143_v18, %v3137_v54  ;;  %v1528_v40 = vmul.f32 %v12534_v52, %v9033_v38  ;;  %v9051_v12 = vstv %s8992_s3  ;;  %v3335_v57 = vmul.f32 %v12588_v23, %v12707_v16  ;;  %v9064_v18 = vpop.permute.xlu1 %3743  ;;  %v12711_v16 = vld [vmem:[#allocation68_spill] sm:$0xff]  ;;  %s9273_s3 = sld [smem:[#allocation6 + $0x28a]] }
 0x32a   : > { %12706 = vst [vmem:[#allocation255_spill] sm:$0xff] %v9051_v12  ;;  %v1512_v11 = vadd.f32 %v1508_v29, %v1502_v34  ;;  %v3173_v24 = vmul.f32 %v12602_v49, %v12708_v59  ;;  %v1538_v7 = vmul.f32 %v12501_v27, %v9040_v63  ;;  %v9062_v47 = vstv %s9000_s23  ;;  %v12710_v29 = vld [vmem:[#allocation211_spill] sm:$0xff]  ;;  %v12714_v59 = vld [vmem:[#allocation161_spill] sm:$0xff]  ;;  %s9325_s23 = sld [smem:[#allocation6 + $0xb]] }
 0x32b   : > { %v3157_v51 = vadd.f32 %v3153_v45, %v3147_v53  ;;  %12709 = vst [vmem:[#allocation259_spill] sm:$0xff] %v9062_v47  ;;  %v1458_v10 = vadd.f32 %v1454_v58, %v1448_v44  ;;  %v3345_v34 = vmul.f32 %v12591_v35, %v12710_v29  ;;  %v3329_v42 = vadd.f32 %v12711_v16, %v8975_v50  ;;  %v12712_v45 = vld [vmem:[#allocation206_spill] sm:$0xff]  ;;  %v12716_v44 = vld [vmem:[#allocation215_spill] sm:$0xff] }
 0x32c   : > { %v1522_v54 = vadd.f32 %v1518_v48, %v1512_v11  ;;  %2232 = vperm.xlu1 %5150, %v12550_v60   ;;  %v9076_v53 = vadd.f32 %v1473_v26, %v12712_v45  ;;  %v9079_v63 = vadd.f32 %v12714_v59, %v2987_v62  ;;  %v12715_v58 = vld [vmem:[#allocation54_spill] sm:$0xff]  ;;  %v3355_v29 = vmul.f32 %v12594_v55, %v12716_v44  ;;  %v12718_v62 = vld [vmem:[#allocation61_spill] sm:$0xff] }
 0x32d   : > { %v3167_v11 = vadd.f32 %v3163_v37, %v3157_v51  ;;  %v1548_v48 = vmul.f32 %v12715_v58, %v9051_v12  ;;  %v3339_v16 = vadd.f32 %v3335_v57, %v3329_v42  ;;  %v9090_v61 = vstv %s9026_s15  ;;  %v12719_v59 = vld [vmem:[#allocation218_spill] sm:$0xff]  ;;  %v12720_v51 = vld [vmem:[#allocation25_spill] sm:$0xff]  ;;  %v1589_v57 = vpop.permute.xlu0 %1588  ;;  %s9339_s15 = sld [smem:[#allocation6 + $0x8b]] }
 0x32e   : > { %12713 = vst [vmem:[#allocation248_spill] sm:$0xff] %v9076_v53  ;;  %v1532_v50 = vadd.f32 %v1528_v40, %v1522_v54  ;;  %12717 = vst [vmem:[#allocation252_spill] sm:$0xff] %v9090_v61  ;;  %v1558_v45 = vmul.f32 %v12718_v62, %v9062_v47  ;;  %v3365_v37 = vmul.f32 %v12597_v4, %v12719_v59  ;;  %v12721_v53 = vld [vmem:[#allocation460_spill] sm:$0xff]  ;;  %v1466_v38 = vmul.f32 0.2, %v1458_v10  ;;  %v9108_v59 = vpop.permute.xlu1 %3955  ;;  %v12728_v47 = vld [vmem:[#allocation238_spill] sm:$0xff] }
 0x32f   : > { %v3177_v26 = vadd.f32 %v3173_v24, %v3167_v11  ;;  %v9098_v12 = vrot.slane %v12721_v53, %v12720_v51  ;;  %v3349_v54 = vadd.f32 %v3345_v34, %v3339_v16  ;;  %v9101_v15 = vstv %s9043_s13  ;;  %v12725_v11 = vld [vmem:[#allocation51_spill] sm:$0xff]  ;;  %s9354_s13 = sld [smem:[#allocation6 + $0x10b]] }
 0x330   : > { %v1542_v40 = vadd.f32 %v1538_v7, %v1532_v50  ;;  %12723 = vst [vmem:[#allocation262_spill] sm:$0xff] %v9101_v15  ;;  %v12724_v24 = vmov 15   ;;  %vm1462_vm5 = vcmp.gt.f32.partialorder %v1458_v10, 0.0  ;;  %v1613_v44 = vmul.f32 %v12725_v11, %v9090_v61  ;;  %v12726_v34 = vld [vmem:[#allocation227_spill] sm:$0xff] }
 0x331   : > { %12722 = vst [vmem:[#allocation257_spill] sm:$0xff] %v9098_v12  ;;  %5151 = vset.pattern.permute.xlu1 %v12724_v24  ;;  %vm3181_vm6 = vcmp.gt.f32.partialorder %v3177_v26, 0.0  ;;  %v3185_v42 = vmul.f32 0.2, %v3177_v26  ;;  %v3375_v50 = vmul.f32 %v12599_v3, %v12726_v34  ;;  %v3359_v16 = vadd.f32 %v3355_v29, %v3349_v54  ;;  %v12733_v29 = vld [vmem:[#allocation71_spill] sm:$0xff]  ;;  %v12735_v54 = vld [vmem:[#allocation220_spill] sm:$0xff] }
 0x332   : > { %2330 = vperm.xlu1 %5151, %v11940_v43   ;;  %v1552_v7 = vadd.f32 %v1548_v48, %v1542_v40  ;;  %v9114_v51 = vstv %s9055_s24  ;;  %v3385_v13 = vmul.f32 %v12602_v49, %v12728_v47  ;;  %v1623_v36 = vmul.f32 %v12729_v20, %v9101_v15  ;;  %s9356_s24 = sld [smem:[#allocation6 + $0x18b]] }
 0x333   : > { %12727 = vst [vmem:[#allocation258_spill] sm:$0xff] %v9114_v51  ;;  %v3189_v24 = vsel %vm3181_vm6, %v3177_v26, %v3185_v42  ;;  %v1607_v33 = vadd.f32 %v9098_v12, %v1589_v57  ;;  %v1470_v6 = vsel %vm1462_vm5, %v1458_v10, %v1466_v38  ;;  %v3369_v22 = vadd.f32 %v3365_v37, %v3359_v16  ;;  %v12736_v10 = vld [vmem:[#allocation247_spill] sm:$0xff]  ;;  %v12738_v16 = vld [vmem:[#allocation72_spill] sm:$0xff] }
 0x334   : > { %v9122_v17 = vstv %s9070_s14  ;;  %v9125_v43 = vstv %s9072_s19  ;;  %v9128_v48 = vstv %s9083_s17  ;;  %v1633_v26 = vmul.f32 %v12733_v29, %v9114_v51  ;;  %s9360_s14 = sld [smem:[#allocation6 + $0x20b]]  ;;  %s9389_s17 = sld [smem:[#allocation6 + $0xc]] }
 0x335   : > { %12730 = vst [vmem:[#allocation273_spill] sm:$0xff] %v9122_v17  ;;  %12731 = vst [vmem:[#allocation281_spill] sm:$0xff] %v9125_v43  ;;  %v9133_v40 = vstv %s9085_s1  ;;  %v1617_v47 = vadd.f32 %v1613_v44, %v1607_v33  ;;  %v3195_v42 = vmul.f32 %v12735_v54, %v3189_v24  ;;  %v1562_v57 = vadd.f32 %v1558_v45, %v1552_v7  ;;  %v9146_v33 = vpop.permute.xlu1 %4167  ;;  %v12741_v45 = vld [vmem:[#allocation251_spill] sm:$0xff]  ;;  %v12742_v7 = vld [vmem:[#allocation184_spill] sm:$0xff]  ;;  %s9368_s19 = sld [smem:[#allocation6 + $0x28b]]  ;;  %s9406_s1 = sld [smem:[#allocation6 + $0x8c]] }
 0x336   : > { %12732 = vst [vmem:[#allocation286_spill] sm:$0xff] %v9128_v48  ;;  %12734 = vst [vmem:[#allocation256_spill] sm:$0xff] %v9133_v40  ;;  %2338 = vperm.xlu1 %5151, %v12550_v60   ;;  %v3379_v38 = vadd.f32 %v3375_v50, %v3369_v22  ;;  %v3547_v37 = vmul.f32 %v12588_v23, %v12736_v10  ;;  %v9140_v34 = vmul.f32 %v8978_v5, %v1470_v6  ;;  %v1601_v6 = vpop.permute.xlu0 %1600  ;;  %v12743_v24 = vld [vmem:[#allocation82_spill] sm:$0xff] }
 0x337   : > { %v1643_v41 = vmul.f32 %v12738_v16, %v9122_v17  ;;  %v1653_v2 = vmul.f32 %v12739_v1, %v9125_v43  ;;  %v1627_v8 = vadd.f32 %v1623_v36, %v1617_v47  ;;  %v9149_v44 = vstv %s9103_s9  ;;  %s9408_s9 = sld [smem:[#allocation6 + $0x10c]] }
 0x338   : > { %12737 = vst [vmem:[#allocation265_spill] sm:$0xff] %v9140_v34  ;;  %v3389_v60 = vadd.f32 %v3385_v13, %v3379_v38  ;;  %12740 = vst [vmem:[#allocation278_spill] sm:$0xff] %v9149_v44  ;;  %v3557_v22 = vmul.f32 %v12591_v35, %v12741_v45  ;;  %v3541_v50 = vadd.f32 %v12742_v7, %v9013_v30  ;;  %v12744_v34 = vld [vmem:[#allocation263_spill] sm:$0xff]  ;;  %vm1566_vm7 = vcmp.gt.f32.partialorder %v1562_v57, 0.0 }
 0x339   : > { %v1663_v54 = vmul.f32 %v12743_v24, %v9133_v40  ;;  %v1637_v10 = vadd.f32 %v1633_v26, %v1627_v8  ;;  %v3567_v5 = vmul.f32 %v12594_v55, %v12744_v34  ;;  %v1616_v36 = vmul.f32 %v12588_v23, %v9090_v61  ;;  %v12745_v45 = vld [vmem:[#allocation267_spill] sm:$0xff]  ;;  %v12746_v61 = vld [vmem:[#allocation269_spill] sm:$0xff] }
 0x33a   : > { %2342 = vperm.xlu1 %5151, %v5586_v28   ;;  %v9165_v13 = vadd.f32 %v3195_v42, %v9079_v63  ;;  %v1570_v30 = vmul.f32 0.2, %v1562_v57  ;;  %v3551_v47 = vadd.f32 %v3547_v37, %v3541_v50  ;;  %v3577_v8 = vmul.f32 %v12597_v4, %v12745_v45  ;;  %v12747_v50 = vld [vmem:[#allocation294_spill] sm:$0xff]  ;;  %v9182_v45 = vpop.permute.xlu1 %858 }
 0x33b   : > { %v1647_v38 = vadd.f32 %v1643_v41, %v1637_v10  ;;  %v1626_v26 = vmul.f32 %v12591_v35, %v9101_v15  ;;  %v1610_v34 = vadd.f32 %v9098_v12, %v1601_v6  ;;  %v3397_v7 = vmul.f32 0.2, %v3389_v60  ;;  %v12748_v12 = vld [vmem:[#allocation274_spill] sm:$0xff] }
 0x33c   : > { %v3587_v28 = vmul.f32 %v12599_v3, %v12746_v61  ;;  %v3561_v63 = vadd.f32 %v3557_v22, %v3551_v47  ;;  %v1636_v42 = vmul.f32 %v12594_v55, %v9114_v51  ;;  %vm3393_vm8 = vcmp.gt.f32.partialorder %v3389_v60, 0.0  ;;  %v12749_v47 = vld [vmem:[#allocation298_spill] sm:$0xff] }
 0x33d   : > { %v1657_v41 = vadd.f32 %v1653_v2, %v1647_v38  ;;  %v1620_v37 = vadd.f32 %v1616_v36, %v1610_v34  ;;  %v3759_v10 = vmul.f32 %v12588_v23, %v12747_v50  ;;  %v1574_v6 = vsel %vm1566_vm7, %v1562_v57, %v1570_v30  ;;  %v12750_v34 = vld [vmem:[#allocation192_spill] sm:$0xff] }
 0x33e   : > { %v3597_v15 = vmul.f32 %v12602_v49, %v12748_v12  ;;  %v3571_v61 = vadd.f32 %v3567_v5, %v3561_v63  ;;  %v1646_v22 = vmul.f32 %v12597_v4, %v9122_v17  ;;  %v3769_v38 = vmul.f32 %v12591_v35, %v12749_v47  ;;  %v12751_v63 = vld [vmem:[#allocation308_spill] sm:$0xff] }
 0x33f   : > { %v1667_v2 = vadd.f32 %v1663_v54, %v1657_v41  ;;  %v1630_v36 = vadd.f32 %v1626_v26, %v1620_v37  ;;  %v3753_v57 = vadd.f32 %v12750_v34, %v9064_v18  ;;  %v3401_v30 = vsel %vm3393_vm8, %v3389_v60, %v3397_v7 }
 0x340   : > { %v3581_v12 = vadd.f32 %v3577_v8, %v3571_v61  ;;  %v1656_v5 = vmul.f32 %v12599_v3, %v9125_v43  ;;  %v3779_v50 = vmul.f32 %v12594_v55, %v12751_v63  ;;  %v9202_v54 = vstv %s9161_s4  ;;  %v12754_v8 = vld [vmem:[#allocation276_spill] sm:$0xff]  ;;  %v9219_v61 = vpop.permute.xlu1 %1070  ;;  %v12778_v43 = vld [vmem:[#allocation357_spill] sm:$0xff]  ;;  %s9431_s4 = sld [smem:[#allocation6 + $0x18c]] }
 0x341   : > { %v1675_v17 = vmul.f32 0.2, %v1667_v2  ;;  %v1640_v51 = vadd.f32 %v1636_v42, %v1630_v36  ;;  %v3763_v14 = vadd.f32 %v3759_v10, %v3753_v57  ;;  %12752 = vst [vmem:[#allocation282_spill] sm:$0xff] %v9202_v54  ;;  %v9207_v26 = vmul.f32 %v9128_v48, %v1574_v6  ;;  %v1699_v10 = vpop.permute.xlu0 %1698  ;;  %v12756_v6 = vld [vmem:[#allocation309_spill] sm:$0xff]  ;;  %v12757_v36 = vld [vmem:[#allocation26_spill] sm:$0xff] }
 0x342   : > { %vm1671_vm9 = vcmp.gt.f32.partialorder %v1667_v2, 0.0  ;;  %v3591_v18 = vadd.f32 %v3587_v28, %v3581_v12  ;;  %v1666_v60 = vmul.f32 %v12602_v49, %v9133_v40  ;;  %v9212_v7 = vmul.f32 %v12754_v8, %v3401_v30 }
 0x343   : > { %12753 = vst [vmem:[#allocation288_spill] sm:$0xff] %v9207_v26  ;;  %v1650_v41 = vadd.f32 %v1646_v22, %v1640_v51  ;;  %v3773_v42 = vadd.f32 %v3769_v38, %v3763_v14  ;;  %v9215_v37 = vstv %s9172_s5  ;;  %v3789_v28 = vmul.f32 %v12597_v4, %v12756_v6  ;;  %s9437_s5 = sld [smem:[#allocation6 + $0x20c]] }
 0x344   : > { %12755 = vst [vmem:[#allocation300_spill] sm:$0xff] %v9215_v37  ;;  %v9225_v47 = vrot.slane %v12721_v53, %v12757_v36  ;;  %v1720_v51 = vmul.f32 %v12528_v21, %v9202_v54  ;;  %v9230_v22 = vstv %s9178_s0  ;;  %v1679_v14 = vsel %vm1671_vm9, %v1667_v2, %v1675_v17  ;;  %v12762_v36 = vld [vmem:[#allocation315_spill] sm:$0xff]  ;;  %v12763_v17 = vld [vmem:[#allocation320_spill] sm:$0xff]  ;;  %s9439_s0 = sld [smem:[#allocation6 + $0x28c]] }
 0x345   : > { %12759 = vst [vmem:[#allocation272_spill] sm:$0xff] %v9230_v22  ;;  %v3601_v38 = vadd.f32 %v3597_v15, %v3591_v18  ;;  %v1660_v34 = vadd.f32 %v1656_v5, %v1650_v41  ;;  %v3783_v57 = vadd.f32 %v3779_v50, %v3773_v42  ;;  %v1730_v30 = vmul.f32 %v12533_v19, %v9215_v37  ;;  %v12765_v41 = vld [vmem:[#allocation346_spill] sm:$0xff] }
 0x346   : > { %12758 = vst [vmem:[#allocation305_spill] sm:$0xff] %v9225_v47  ;;  %v9237_v12 = vstv %s9189_s27  ;;  %v9240_v63 = vstv %s9191_s30  ;;  %v1714_v8 = vadd.f32 %v9225_v47, %v1699_v10  ;;  %v3799_v26 = vmul.f32 %v12599_v3, %v12762_v36  ;;  %s9523_s27 = sld [smem:[#allocation6 + $0xd]] }
 0x347   : > { %12760 = vst [vmem:[#allocation280_spill] sm:$0xff] %v9237_v12  ;;  %12761 = vst [vmem:[#allocation284_spill] sm:$0xff] %v9240_v63  ;;  %v1670_v6 = vadd.f32 %v1666_v60, %v1660_v34  ;;  %v3809_v15 = vmul.f32 %v12602_v49, %v12763_v17  ;;  %v1740_v2 = vmul.f32 %v12534_v52, %v9230_v22  ;;  %v3609_v10 = vmul.f32 0.2, %v3601_v38  ;;  %s9531_s30 = sld [smem:[#allocation6 + $0x8d]] }
 0x348   : > { %v9252_v5 = vmul.f32 %v9149_v44, %v1679_v14  ;;  %v3793_v50 = vadd.f32 %v3789_v28, %v3783_v57  ;;  %v1724_v18 = vadd.f32 %v1720_v51, %v1714_v8  ;;  %v3971_v42 = vmul.f32 %v12588_v23, %v12765_v41  ;;  %v9265_v14 = vpop.permute.xlu1 %1282  ;;  %v12767_v51 = vld [vmem:[#allocation347_spill] sm:$0xff]  ;;  %v12768_v8 = vld [vmem:[#allocation200_spill] sm:$0xff] }
 0x349   : > { %v1750_v60 = vmul.f32 %v12501_v27, %v9237_v12  ;;  %v1760_v34 = vmul.f32 %v12715_v58, %v9240_v63  ;;  %v9261_v36 = vstv %s9204_s12  ;;  %vm3605_vm11 = vcmp.gt.f32.partialorder %v3601_v38, 0.0  ;;  %s9533_s12 = sld [smem:[#allocation6 + $0x10d]] }
 0x34a   : > { %12764 = vst [vmem:[#allocation301_spill] sm:$0xff] %v9252_v5  ;;  %12766 = vst [vmem:[#allocation307_spill] sm:$0xff] %v9261_v36  ;;  %v1734_v28 = vadd.f32 %v1730_v30, %v1724_v18  ;;  %v3981_v57 = vmul.f32 %v12591_v35, %v12767_v51  ;;  %v3965_v17 = vadd.f32 %v12768_v8, %v9108_v59  ;;  %vm1674_vm12 = vcmp.gt.f32.partialorder %v1670_v6, 0.0  ;;  %v12769_v5 = vld [vmem:[#allocation350_spill] sm:$0xff]  ;;  %v1801_v51 = vpop.permute.xlu0 %1800  ;;  %v12772_v8 = vld [vmem:[#allocation27_spill] sm:$0xff] }
 0x34b   : > { %v1678_v41 = vmul.f32 0.2, %v1670_v6  ;;  %v3991_v63 = vmul.f32 %v12594_v55, %v12769_v5  ;;  %v9278_v12 = vstv %s9217_s26  ;;  %v3803_v22 = vadd.f32 %v3799_v26, %v3793_v50  ;;  %v12774_v26 = vld [vmem:[#allocation351_spill] sm:$0xff]  ;;  %s9538_s26 = sld [smem:[#allocation6 + $0x18d]] }
 0x34c   : > { %12770 = vst [vmem:[#allocation324_spill] sm:$0xff] %v9278_v12  ;;  %v1744_v30 = vadd.f32 %v1740_v2, %v1734_v28  ;;  %v3975_v18 = vadd.f32 %v3971_v42, %v3965_v17  ;;  %v9281_v47 = vstv %s9232_s28  ;;  %v9283_v37 = vsel %vm3605_vm11, %v3601_v38, %v3609_v10  ;;  %v12776_v10 = vld [vmem:[#allocation355_spill] sm:$0xff]  ;;  %s9562_s28 = sld [smem:[#allocation6 + $0x20d]] }
 0x34d   : > { %12771 = vst [vmem:[#allocation283_spill] sm:$0xff] %v9281_v47  ;;  %v1770_v59 = vmul.f32 %v12718_v62, %v9261_v36  ;;  %v9289_v54 = vrot.slane %v12721_v53, %v12772_v8  ;;  %v1825_v5 = vmul.f32 %v12725_v11, %v9278_v12  ;;  %v4001_v2 = vmul.f32 %v12597_v4, %v12774_v26  ;;  %v9304_v36 = vpop.permute.xlu1 %742 }
 0x34e   : > { %v1754_v40 = vadd.f32 %v1750_v60, %v1744_v30  ;;  %v3985_v50 = vadd.f32 %v3981_v57, %v3975_v18  ;;  %v9296_v42 = vstv %s9243_s25  ;;  %v1682_v38 = vsel %vm1674_vm12, %v1670_v6, %v1678_v41  ;;  %v12777_v18 = vld [vmem:[#allocation369_spill] sm:$0xff]  ;;  %s9568_s25 = sld [smem:[#allocation6 + $0x28d]] }
 0x34f   : > { %12773 = vst [vmem:[#allocation291_spill] sm:$0xff] %v9289_v54  ;;  %12775 = vst [vmem:[#allocation304_spill] sm:$0xff] %v9296_v42  ;;  %v4011_v28 = vmul.f32 %v12599_v3, %v12776_v10  ;;  %v1835_v17 = vmul.f32 %v12729_v20, %v9281_v47  ;;  %v1819_v8 = vadd.f32 %v9289_v54, %v1801_v51  ;;  %v9315_v10 = vstv %s9263_s22  ;;  %s9641_s22 = sld [smem:[#allocation6 + $0xe]] }
 0x350   : > { %v9306_v60 = vadd.f32 %v3809_v15, %v3803_v22  ;;  %v1764_v30 = vadd.f32 %v1760_v34, %v1754_v40  ;;  %v3995_v57 = vadd.f32 %v3991_v63, %v3985_v50  ;;  %v4183_v26 = vmul.f32 %v12588_v23, %v12777_v18  ;;  %12779 = vst [vmem:[#allocation327_spill] sm:$0xff] %v9315_v10  ;;  %v12782_v40 = vld [vmem:[#allocation204_spill] sm:$0xff]  ;;  %v12784_v34 = vld [vmem:[#allocation371_spill] sm:$0xff]  ;;  %v1813_v18 = vpop.permute.xlu0 %1812 }
 0x351   : > { %v4021_v6 = vmul.f32 %v12602_v49, %v12778_v43  ;;  %v1845_v41 = vmul.f32 %v12733_v29, %v9296_v42  ;;  %v1829_v48 = vadd.f32 %v1825_v5, %v1819_v8  ;;  %v9318_v51 = vstv %s9271_s16  ;;  %s9646_s16 = sld [smem:[#allocation6 + $0x8e]] }
 0x352   : > { %v1774_v31 = vadd.f32 %v1770_v59, %v1764_v30  ;;  %12780 = vst [vmem:[#allocation260_spill] sm:$0xff] %v9318_v51  ;;  %v9321_v46 = vstv %s9273_s3  ;;  %v4177_v22 = vadd.f32 %v12782_v40, %v9146_v33  ;;  %v9328_v63 = vmul.f32 %v9149_v44, %v1682_v38  ;;  %s9662_s3 = sld [smem:[#allocation6 + $0x10e]] }
 0x353   : > { %12781 = vst [vmem:[#allocation277_spill] sm:$0xff] %v9321_v46  ;;  %v4005_v43 = vadd.f32 %v4001_v2, %v3995_v57  ;;  %v1839_v15 = vadd.f32 %v1835_v17, %v1829_v48  ;;  %v4193_v50 = vmul.f32 %v12591_v35, %v12784_v34  ;;  %v9333_v59 = vmul.f32 0.2, %v9306_v60  ;;  %v12785_v17 = vld [vmem:[#allocation372_spill] sm:$0xff]  ;;  %v9347_v57 = vpop.permute.xlu1 %2569 }
 0x354   : > { %12783 = vst [vmem:[#allocation334_spill] sm:$0xff] %v9328_v63  ;;  %v1855_v5 = vmul.f32 %v12738_v16, %v9315_v10  ;;  %v4187_v8 = vadd.f32 %v4183_v26, %v4177_v22  ;;  %v1828_v33 = vmul.f32 %v12588_v23, %v9278_v12  ;;  %v1865_v2 = vmul.f32 %v12739_v1, %v9318_v51  ;;  %v12787_v34 = vld [vmem:[#allocation376_spill] sm:$0xff] }
 0x355   : > { %v1875_v48 = vmul.f32 %v12743_v24, %v9321_v46  ;;  %v1849_v38 = vadd.f32 %v1845_v41, %v1839_v15  ;;  %v4203_v30 = vmul.f32 %v12594_v55, %v12785_v17  ;;  %12786 = vst [vmem:[#allocation295_spill] sm:$0xff] %v9347_v57  ;;  %v1782_v40 = vmul.f32 0.2, %v1774_v31  ;;  %v12788_v17 = vld [vmem:[#allocation92_spill] sm:$0xff] }
 0x356   : > { %v4213_v26 = vmul.f32 %v12597_v4, %v12787_v34  ;;  %v1838_v22 = vmul.f32 %v12591_v35, %v9281_v47  ;;  %v1822_v63 = vadd.f32 %v9289_v54, %v1813_v18  ;;  %vm1778_vm13 = vcmp.gt.f32.partialorder %v1774_v31, 0.0  ;;  %v12789_v34 = vld [vmem:[#allocation380_spill] sm:$0xff] }
 0x357   : > { %v4015_v41 = vadd.f32 %v4011_v28, %v4005_v43  ;;  %v4197_v15 = vadd.f32 %v4193_v50, %v4187_v8  ;;  %v874_v44 = vmul.f32 %v12588_v23, %v12788_v17  ;;  %v1859_v12 = vadd.f32 %v1855_v5, %v1849_v38  ;;  %v12790_v50 = vld [vmem:[#allocation96_spill] sm:$0xff]  ;;  %v12791_v8 = vld [vmem:[#allocation95_spill] sm:$0xff] }
 0x358   : > { %v9364_v57 = vmul.f32 %v12599_v3, %v12789_v34  ;;  %v1848_v18 = vmul.f32 %v12594_v55, %v9296_v42  ;;  %v1832_v54 = vadd.f32 %v1828_v33, %v1822_v63  ;;  %v1858_v28 = vmul.f32 %v12597_v4, %v9315_v10  ;;  %v12794_v47 = vld [vmem:[#allocation100_spill] sm:$0xff] }
 0x359   : > { %v1868_v43 = vmul.f32 %v12599_v3, %v9318_v51  ;;  %v884_v5 = vmul.f32 %v12591_v35, %v12790_v50  ;;  %v868_v38 = vadd.f32 %v12791_v8, %v9182_v45  ;;  %v9378_v17 = vsel %vm1778_vm13, %v1774_v31, %v1782_v40  ;;  %v9391_v45 = vpop.permute.xlu1 %2675  ;;  %v12796_v50 = vld [vmem:[#allocation103_spill] sm:$0xff] }
 0x35a   : > { %12792 = vst [vmem:[#allocation311_spill] sm:$0xff] %v9378_v17  ;;  %v1878_v63 = vmul.f32 %v12602_v49, %v9321_v46  ;;  %v1842_v33 = vadd.f32 %v1838_v22, %v1832_v54  ;;  %v9383_v34 = vstv %s9325_s23  ;;  %v9385_v42 = vadd.f32 %v4021_v6, %v4015_v41  ;;  %12795 = vst [vmem:[#allocation328_spill] sm:$0xff] %v9391_v45  ;;  %v1911_v6 = vpop.permute.xlu0 %1910  ;;  %s9667_s23 = sld [smem:[#allocation6 + $0x18e]] }
 0x35b   : > { %12793 = vst [vmem:[#allocation318_spill] sm:$0xff] %v9383_v34  ;;  %v4207_v10 = vadd.f32 %v4203_v30, %v4197_v15  ;;  %v894_v51 = vmul.f32 %v12594_v55, %v12794_v47  ;;  %v878_v9 = vadd.f32 %v874_v44, %v868_v38  ;;  %v1869_v31 = vadd.f32 %v1865_v2, %v1859_v12  ;;  %v12798_v30 = vld [vmem:[#allocation106_spill] sm:$0xff]  ;;  %v12799_v47 = vld [vmem:[#allocation28_spill] sm:$0xff] }
 0x35c   : > { %v1852_v40 = vadd.f32 %v1848_v18, %v1842_v33  ;;  %v904_v54 = vmul.f32 %v12597_v4, %v12796_v50  ;;  %v9396_v22 = vstv %s9339_s15  ;;  %v914_v41 = vmul.f32 %v12599_v3, %v12798_v30  ;;  %v12801_v18 = vld [vmem:[#allocation114_spill] sm:$0xff]  ;;  %s9669_s15 = sld [smem:[#allocation6 + $0x20e]] }
 0x35d   : > { %12797 = vst [vmem:[#allocation335_spill] sm:$0xff] %v9396_v22  ;;  %v888_v44 = vadd.f32 %v884_v5, %v878_v9  ;;  %v9402_v15 = vrot.slane %v12721_v53, %v12799_v47  ;;  %v1932_v12 = vmul.f32 %v12528_v21, %v9383_v34  ;;  %v924_v8 = vmul.f32 %v12602_v49, %v12801_v18 }
 0x35e   : > { %v1862_v2 = vadd.f32 %v1858_v28, %v1852_v40  ;;  %v9413_v38 = vstv %s9354_s13  ;;  %v9416_v33 = vstv %s9356_s24  ;;  %v1942_v5 = vmul.f32 %v12533_v19, %v9396_v22  ;;  %v12807_v28 = vld [vmem:[#allocation401_spill] sm:$0xff]  ;;  %s9679_s13 = sld [smem:[#allocation6 + $0x28e]]  ;;  %s9706_s24 = sld [smem:[#allocation6 + $0xf]] }
 0x35f   : > { %12800 = vst [vmem:[#allocation345_spill] sm:$0xff] %v9402_v15  ;;  %12802 = vst [vmem:[#allocation297_spill] sm:$0xff] %v9413_v38  ;;  %v898_v9 = vadd.f32 %v894_v51, %v888_v44  ;;  %v9421_v50 = vstv %s9360_s14  ;;  %v1926_v30 = vadd.f32 %v9402_v15, %v1911_v6  ;;  %v9424_v47 = vadd.f32 %v1875_v48, %v1869_v31  ;;  %v12809_v31 = vld [vmem:[#allocation405_spill] sm:$0xff]  ;;  %v12810_v6 = vld [vmem:[#allocation404_spill] sm:$0xff]  ;;  %s9723_s14 = sld [smem:[#allocation6 + $0x8f]] }
 0x360   : > { %12803 = vst [vmem:[#allocation322_spill] sm:$0xff] %v9416_v33  ;;  %12804 = vst [vmem:[#allocation330_spill] sm:$0xff] %v9421_v50  ;;  %v4217_v17 = vadd.f32 %v4213_v26, %v4207_v10  ;;  %v9427_v34 = vstv %s9368_s19  ;;  %v1086_v40 = vmul.f32 %v12588_v23, %v12807_v28  ;;  %v1952_v51 = vmul.f32 %v12534_v52, %v9413_v38  ;;  %v9441_v10 = vpop.permute.xlu1 %2781  ;;  %v12812_v15 = vld [vmem:[#allocation412_spill] sm:$0xff]  ;;  %s9751_s19 = sld [smem:[#allocation6 + $0x10f]] }
 0x361   : > { %12805 = vst [vmem:[#allocation349_spill] sm:$0xff] %v9424_v47  ;;  %12806 = vst [vmem:[#allocation279_spill] sm:$0xff] %v9427_v34  ;;  %v908_v18 = vadd.f32 %v904_v54, %v898_v9  ;;  %v1962_v44 = vmul.f32 %v12501_v27, %v9416_v33  ;;  %v1936_v22 = vadd.f32 %v1932_v12, %v1926_v30  ;;  %v9452_v33 = vstv %s9389_s17  ;;  %s9759_s17 = sld [smem:[#allocation6 + $0x18f]] }
 0x362   : > { %12808 = vst [vmem:[#allocation299_spill] sm:$0xff] %v9441_v10  ;;  %v1872_v48 = vadd.f32 %v1868_v43, %v1862_v2  ;;  %v1972_v26 = vmul.f32 %v12715_v58, %v9421_v50  ;;  %v1096_v54 = vmul.f32 %v12591_v35, %v12809_v31  ;;  %v1080_v9 = vadd.f32 %v12810_v6, %v9219_v61  ;;  %v12813_v43 = vld [vmem:[#allocation416_spill] sm:$0xff] }
 0x363   : > { %v918_v28 = vadd.f32 %v914_v41, %v908_v18  ;;  %v1982_v12 = vmul.f32 %v12718_v62, %v9427_v34  ;;  %v1946_v30 = vadd.f32 %v1942_v5, %v1936_v22  ;;  %12811 = vst [vmem:[#allocation325_spill] sm:$0xff] %v9452_v33  ;;  %v1106_v38 = vmul.f32 %v12594_v55, %v12812_v15  ;;  %v12814_v50 = vld [vmem:[#allocation420_spill] sm:$0xff]  ;;  %v2013_v22 = vpop.permute.xlu0 %2012  ;;  %v12818_v18 = vld [vmem:[#allocation29_spill] sm:$0xff] }
 0x364   : > { %v1116_v2 = vmul.f32 %v12597_v4, %v12813_v43  ;;  %v1126_v46 = vmul.f32 %v12599_v3, %v12814_v50  ;;  %v1090_v31 = vadd.f32 %v1086_v40, %v1080_v9  ;;  %v9461_v61 = vstv %s9406_s1  ;;  %s9761_s1 = sld [smem:[#allocation6 + $0x20f]] }
 0x365   : > { %v928_v10 = vadd.f32 %v924_v8, %v918_v28  ;;  %v1956_v45 = vadd.f32 %v1952_v51, %v1946_v30  ;;  %12815 = vst [vmem:[#allocation319_spill] sm:$0xff] %v9461_v61  ;;  %v9464_v41 = vstv %s9408_s9  ;;  %v9466_v5 = vadd.f32 %v1878_v63, %v1872_v48  ;;  %v12820_v51 = vld [vmem:[#allocation426_spill] sm:$0xff]  ;;  %v9476_v28 = vpop.permute.xlu1 %2993  ;;  %s10451_s9 = sld [smem:[#allocation7 + $0x9]] }
 0x366   : > { %12816 = vst [vmem:[#allocation341_spill] sm:$0xff] %v9464_v41  ;;  %v1100_v15 = vadd.f32 %v1096_v54, %v1090_v31  ;;  %v9470_v6 = vrot.slane %v12721_v53, %v12818_v18  ;;  %v2037_v50 = vmul.f32 %v12725_v11, %v9452_v33  ;;  %v1136_v9 = vmul.f32 %v12602_v49, %v12820_v51 }
 0x367   : > { %12817 = vst [vmem:[#allocation337_spill] sm:$0xff] %v9466_v5  ;;  %vm932_vm14 = vcmp.gt.f32.partialorder %v928_v10, 0.0  ;;  %v936_v8 = vmul.f32 0.2, %v928_v10  ;;  %v1966_v40 = vadd.f32 %v1962_v44, %v1956_v45  ;;  %12821 = vst [vmem:[#allocation303_spill] sm:$0xff] %v9476_v28  ;;  %v2047_v63 = vmul.f32 %v12729_v20, %v9461_v61  ;;  %v12825_v44 = vld [vmem:[#allocation145_spill] sm:$0xff] }
 0x368   : > { %12819 = vst [vmem:[#allocation353_spill] sm:$0xff] %v9470_v6  ;;  %v1110_v30 = vadd.f32 %v1106_v38, %v1100_v15  ;;  %v2057_v48 = vmul.f32 %v12733_v29, %v9464_v41  ;;  %v2031_v54 = vadd.f32 %v9470_v6, %v2013_v22  ;;  %v9484_v31 = vstv %s9431_s4  ;;  %s10462_s4 = sld [smem:[#allocation7 + $0xa]] }
 0x369   : > { %v940_v43 = vsel %vm932_vm14, %v928_v10, %v936_v8  ;;  %12822 = vst [vmem:[#allocation344_spill] sm:$0xff] %v9484_v31  ;;  %v9487_v18 = vstv %s9437_s5  ;;  %v9490_v45 = vstv %s9439_s0  ;;  %v1976_v34 = vadd.f32 %v1972_v26, %v1966_v40  ;;  %v12828_v10 = vld [vmem:[#allocation432_spill] sm:$0xff]  ;;  %s10474_s5 = sld [smem:[#allocation7 + $0xb]]  ;;  %s10485_s0 = sld [smem:[#allocation7 + $0xc]] }
 0x36a   : > { %12823 = vst [vmem:[#allocation354_spill] sm:$0xff] %v9487_v18  ;;  %12824 = vst [vmem:[#allocation306_spill] sm:$0xff] %v9490_v45  ;;  %v946_v51 = vmul.f32 %v12825_v44, %v940_v43  ;;  %v1120_v28 = vadd.f32 %v1116_v2, %v1110_v30  ;;  %v2041_v38 = vadd.f32 %v2037_v50, %v2031_v54  ;;  %v9494_v15 = vmul.f32 0.2, %v9424_v47  ;;  %v12830_v30 = vld [vmem:[#allocation435_spill] sm:$0xff] }
 0x36b   : > { %v9497_v20 = vadd.f32 %v9364_v57, %v4217_v17  ;;  %v9500_v22 = vmul.f32 0.2, %v9466_v5  ;;  %v1298_v8 = vmul.f32 %v12588_v23, %v12828_v10  ;;  %v2067_v11 = vmul.f32 %v12738_v16, %v9484_v31  ;;  %v12829_v17 = vld [vmem:[#allocation436_spill] sm:$0xff] }
 0x36c   : > { %12826 = vst [vmem:[#allocation326_spill] sm:$0xff] %v9494_v15  ;;  %v1130_v29 = vadd.f32 %v1126_v46, %v1120_v28  ;;  %v2077_v26 = vmul.f32 %v12739_v1, %v9487_v18  ;;  %v2051_v2 = vadd.f32 %v2047_v63, %v2041_v38  ;;  %v950_v50 = vadd.f32 %v946_v51, %v8952_v39  ;;  %v2025_v46 = vpop.permute.xlu0 %2024  ;;  %v9517_v28 = vpop.permute.xlu1 %3205  ;;  %v12832_v63 = vld [vmem:[#allocation444_spill] sm:$0xff]  ;;  %v12837_v15 = vld [vmem:[#allocation47_spill] sm:$0xff] }
 0x36d   : > { %12827 = vst [vmem:[#allocation338_spill] sm:$0xff] %v9500_v22  ;;  %v9511_v57 = vmul.f32 %v12743_v24, %v9490_v45  ;;  %v1308_v40 = vmul.f32 %v12591_v35, %v12829_v17  ;;  %v1292_v54 = vadd.f32 %v12830_v30, %v9265_v14  ;;  %v9519_v43 = vadd.f32 %v1982_v12, %v1976_v34  ;;  %v12833_v38 = vld [vmem:[#allocation448_spill] sm:$0xff] }
 0x36e   : > { %v1140_v44 = vadd.f32 %v1136_v9, %v1130_v29  ;;  %v2061_v10 = vadd.f32 %v2057_v48, %v2051_v2  ;;  %v2040_v39 = vmul.f32 %v12588_v23, %v9452_v33  ;;  %v1318_v51 = vmul.f32 %v12594_v55, %v12832_v63  ;;  %v12834_v22 = vld [vmem:[#allocation452_spill] sm:$0xff]  ;;  %v12835_v9 = vld [vmem:[#allocation171_spill] sm:$0xff]  ;;  %v12836_v2 = vld [vmem:[#allocation458_spill] sm:$0xff] }
 0x36f   : > { %12831 = vst [vmem:[#allocation356_spill] sm:$0xff] %v9519_v43  ;;  %v1328_v17 = vmul.f32 %v12597_v4, %v12833_v38  ;;  %v1338_v14 = vmul.f32 %v12599_v3, %v12834_v22  ;;  %v1302_v30 = vadd.f32 %v1298_v8, %v1292_v54  ;;  %v2050_v34 = vmul.f32 %v12591_v35, %v9461_v61  ;;  %v12838_v61 = vld [vmem:[#allocation158_spill] sm:$0xff] }
 0x370   : > { %vm1144_vm15 = vcmp.gt.f32.partialorder %v1140_v44, 0.0  ;;  %v1148_v29 = vmul.f32 0.2, %v1140_v44  ;;  %v2034_v12 = vadd.f32 %v9470_v6, %v2025_v46  ;;  %v1056_v48 = vadd.f32 %v12835_v9, %v950_v50  ;;  %v12840_v6 = vld [vmem:[#allocation483_spill] sm:$0xff] }
 0x371   : > { %v1348_v63 = vmul.f32 %v12602_v49, %v12836_v2  ;;  %v1312_v22 = vadd.f32 %v1308_v40, %v1302_v30  ;;  %v2060_v8 = vmul.f32 %v12594_v55, %v9464_v41  ;;  %v2071_v38 = vadd.f32 %v2067_v11, %v2061_v10  ;;  %v9554_v30 = vpop.permute.xlu1 %3417  ;;  %v12841_v10 = vld [vmem:[#allocation48_spill] sm:$0xff]  ;;  %v12843_v2 = vld [vmem:[#allocation63_spill] sm:$0xff]  ;;  %v12903_v41 = vld [vmem:[#allocation34_spill] sm:$0xff] }
 0x372   : > { %v1152_v54 = vsel %vm1144_vm15, %v1140_v44, %v1148_v29  ;;  %v2044_v5 = vadd.f32 %v2040_v39, %v2034_v12  ;;  %v766_v47 = vmul.f32 %v12528_v21, %v12837_v15  ;;  %vm3711_vm0 = vcmp.gt.f32.partialorder %v12838_v61, 0.0  ;;  %v12842_v39 = vld [vmem:[#allocation56_spill] sm:$0xff] }
 0x373   : > { %v9549_v46 = vmul.f32 0.2, %v9519_v43  ;;  %v1158_v50 = vmul.f32 %v12840_v6, %v1152_v54  ;;  %v1322_v9 = vadd.f32 %v1318_v51, %v1312_v22  ;;  %v2070_v40 = vmul.f32 %v12597_v4, %v9484_v31 }
 0x374   : > { %v2080_v11 = vmul.f32 %v12599_v3, %v9487_v18  ;;  %v2054_v44 = vadd.f32 %v2050_v34, %v2044_v5  ;;  %v776_v15 = vmul.f32 %v12533_v19, %v12841_v10  ;;  %v760_v29 = vadd.f32 %v12842_v39, %v9304_v36  ;;  %v12845_v36 = vld [vmem:[#allocation165_spill] sm:$0xff] }
 0x375   : > { %12839 = vst [vmem:[#allocation359_spill] sm:$0xff] %v9549_v46  ;;  %v1162_v6 = vadd.f32 %v1158_v50, %v1056_v48  ;;  %v1332_v51 = vadd.f32 %v1328_v17, %v1322_v9  ;;  %v2090_v12 = vmul.f32 %v12602_v49, %v9490_v45  ;;  %v786_v22 = vmul.f32 %v12534_v52, %v12843_v2  ;;  %v12846_v48 = vld [vmem:[#allocation66_spill] sm:$0xff] }
 0x376   : > { %v2081_v5 = vadd.f32 %v2077_v26, %v2071_v38  ;;  %v2064_v34 = vadd.f32 %v2060_v8, %v2054_v44  ;;  %v770_v54 = vadd.f32 %v766_v47, %v760_v29  ;;  %v9571_v10 = vstv %s9523_s27  ;;  %v12848_v9 = vld [vmem:[#allocation70_spill] sm:$0xff]  ;;  %v2123_v47 = vpop.permute.xlu0 %2122  ;;  %v12851_v38 = vld [vmem:[#allocation76_spill] sm:$0xff]  ;;  %s10499_s27 = sld [smem:[#allocation7 + $0xd]] }
 0x377   : > { %12844 = vst [vmem:[#allocation374_spill] sm:$0xff] %v9571_v10  ;;  %v9574_v39 = vadd.f32 %v12845_v36, %v1162_v6  ;;  %v1342_v46 = vadd.f32 %v1338_v14, %v1332_v51  ;;  %v796_v17 = vmul.f32 %v12501_v27, %v12846_v48  ;;  %v9579_v50 = vstv %s9531_s30  ;;  %v12852_v14 = vld [vmem:[#allocation30_spill] sm:$0xff]  ;;  %v9597_v51 = vpop.permute.xlu1 %3629  ;;  %s10505_s30 = sld [smem:[#allocation7 + $0xe]] }
 0x378   : > { %12847 = vst [vmem:[#allocation361_spill] sm:$0xff] %v9579_v50  ;;  %v806_v43 = vmul.f32 %v12715_v58, %v12848_v9  ;;  %v780_v2 = vadd.f32 %v776_v15, %v770_v54  ;;  %v9584_v45 = vstv %s9533_s12  ;;  %v9587_v26 = vstv %s9538_s26  ;;  %s10515_s12 = sld [smem:[#allocation6 + $0x28f]] }
 0x379   : > { %12849 = vst [vmem:[#allocation360_spill] sm:$0xff] %v9584_v45  ;;  %12850 = vst [vmem:[#allocation365_spill] sm:$0xff] %v9587_v26  ;;  %v1352_v8 = vadd.f32 %v1348_v63, %v1342_v46  ;;  %v816_v44 = vmul.f32 %v12718_v62, %v12851_v38  ;;  %v9593_v29 = vrot.slane %v12721_v53, %v12852_v14  ;;  %v12855_v38 = vld [vmem:[#allocation69_spill] sm:$0xff]  ;;  %v9611_v31 = vstv %s9562_s28  ;;  %s10517_s26 = sld [smem:[#allocation7 + $0xf]]  ;;  %s5349_s28 = smov 16  }
 0x37a   : > { %v2144_v6 = vmul.f32 %v12528_v21, %v9571_v10  ;;  %v9600_v15 = vadd.f32 %v9511_v57, %v2081_v5  ;;  %v2074_v54 = vadd.f32 %v2070_v40, %v2064_v34  ;;  %v790_v36 = vadd.f32 %v786_v22, %v780_v2  ;;  %12856 = vst [vmem:[#allocation379_spill] sm:$0xff] %v9611_v31  ;;  %v12857_v57 = vld [vmem:[#allocation141_spill] sm:$0xff] }
 0x37b   : > { %12853 = vst [vmem:[#allocation366_spill] sm:$0xff] %v9593_v29  ;;  %v2154_v63 = vmul.f32 %v12533_v19, %v9579_v50  ;;  %v2164_v46 = vmul.f32 %v12534_v52, %v9584_v45  ;;  %v2174_v48 = vmul.f32 %v12501_v27, %v9587_v26  ;;  %v2138_v9 = vadd.f32 %v9593_v29, %v2123_v47  ;;  %v12859_v29 = vld [vmem:[#allocation167_spill] sm:$0xff] }
 0x37c   : > { %12854 = vst [vmem:[#allocation375_spill] sm:$0xff] %v9600_v15  ;;  %v2439_v14 = vunpack.c.3.s8 %v12855_v38  ;;  %v1360_v10 = vmul.f32 0.2, %v1352_v8  ;;  %v800_v18 = vadd.f32 %v796_v17, %v790_v36  ;;  %v3305_v40 = vadd.f32 %v12857_v57, %v9165_v13  ;;  %v9626_v13 = vpop.permute.xlu1 %3841  ;;  %v12861_v57 = vld [vmem:[#allocation163_spill] sm:$0xff] }
 0x37d   : > { %vm1356_vm1 = vcmp.gt.f32.partialorder %v1352_v8, 0.0  ;;  %v9616_v22 = vstv %s9568_s25  ;;  %v2148_v5 = vadd.f32 %v2144_v6, %v2138_v9  ;;  %v3619_v47 = vmul.f32 %v12621_v56, %v9283_v37 }
 0x37e   : > { %12858 = vst [vmem:[#allocation310_spill] sm:$0xff] %v9616_v22  ;;  %v2446_v34 = vpack.c.b16 %v2439_v14, %v2439_v14  ;;  %v810_v2 = vadd.f32 %v806_v43, %v800_v18  ;;  %v3411_v45 = vadd.f32 %v9212_v7, %v3305_v40  ;;  %v3719_v17 = vsel %vm3711_vm0, %v12838_v61, %v12859_v29  ;;  %v12860_v18 = vld [vmem:[#allocation162_spill] sm:$0xff] }
 0x37f   : > { %v2084_v36 = vadd.f32 %v2080_v11, %v2074_v54  ;;  %v2158_v26 = vadd.f32 %v2154_v63, %v2148_v5  ;;  %vm3817_vm2 = vcmp.gt.f32.partialorder %v9306_v60, 0.0  ;;  %v1364_v6 = vsel %vm1356_vm1, %v1352_v8, %v1360_v10  ;;  %v12866_v5 = vld [vmem:[#allocation170_spill] sm:$0xff] }
 0x380   : > { %v2447_v50 = vpack.c.b8 %v2446_v34, %v2446_v34  ;;  %v820_v9 = vadd.f32 %v816_v44, %v810_v2  ;;  %v3517_v43 = vadd.f32 %v12860_v18, %v3411_v45  ;;  %v3825_v7 = vsel %vm3817_vm2, %v9306_v60, %v9333_v59  ;;  %v12863_v45 = vld [vmem:[#allocation169_spill] sm:$0xff]  ;;  %v9650_v34 = vpop.permute.xlu1 %4053  ;;  %v12869_v18 = vld [vmem:[#allocation210_spill] sm:$0xff] }
 0x381   : > { %v2168_v37 = vadd.f32 %v2164_v46, %v2158_v26  ;;  %v3725_v14 = vmul.f32 %v12628_v32, %v3719_v17  ;;  %vm3923_vm5 = vcmp.gt.f32.partialorder %v12861_v57, 0.0  ;;  %v3831_v29 = vmul.f32 %v12629_v25, %v3825_v7  ;;  %v12865_v46 = vld [vmem:[#allocation213_spill] sm:$0xff] }
 0x382   : > { %vm2451_vm3 = vnez %v2447_v50  ;;  %vm824_vm6 = vcmp.gt.f32.partialorder %v820_v9, 0.0  ;;  %v828_v61 = vmul.f32 0.2, %v820_v9  ;;  %v3623_v11 = vadd.f32 %v3619_v47, %v3517_v43  ;;  %v12867_v17 = vld [vmem:[#allocation189_spill] sm:$0xff] }
 0x383   : > { %v9634_v54 = vadd.f32 %v2090_v12, %v2084_v36  ;;  %v2184_v10 = vmul.f32 %v12715_v58, %v9611_v31  ;;  %v3931_v8 = vsel %vm3923_vm5, %v12861_v57, %v12863_v45  ;;  %vm4029_vm7 = vcmp.gt.f32.partialorder %v9385_v42, 0.0  ;;  %v12870_v7 = vld [vmem:[#allocation109_spill] sm:$0xff]  ;;  %v12873_v45 = vld [vmem:[#allocation42_spill] sm:$0xff]  ;;  %v12902_v31 = vld [vmem:[#allocation328_spill] sm:$0xff] }
 0x384   : > { %v1370_v60 = vmul.f32 %v12608_v0, %v1364_v6  ;;  %v12864_v59 = vmov 0   ;;  %v3729_v26 = vadd.f32 %v3725_v14, %v3623_v11  ;;  %v4033_v44 = vmul.f32 0.2, %v9385_v42 }
 0x385   : > { %12862 = vst [vmem:[#allocation342_spill] sm:$0xff] %v9634_v54  ;;  %v2455_v50 = vsel %vm2451_vm3, 16843009, %v12864_v59  ;;  %v832_v12 = vsel %vm824_vm6, %v820_v9, %v828_v61  ;;  %v2178_v63 = vadd.f32 %v2174_v48, %v2168_v37  ;;  %v3937_v40 = vmul.f32 %v12865_v46, %v3931_v8 }
 0x386   : > { %vm4135_vm8 = vcmp.gt.f32.partialorder %v12866_v5, 0.0  ;;  %v3835_v2 = vadd.f32 %v3831_v29, %v3729_v26  ;;  %v4037_v47 = vsel %vm4029_vm7, %v9385_v42, %v4033_v44  ;;  %v4139_v0 = vmul.f32 0.2, %v12866_v5  ;;  %v12874_v26 = vld [vmem:[#allocation209_spill] sm:$0xff] }
 0x387   : > { %v4233_v36 = vmul.f32 %v12602_v49, %v12867_v17  ;;  %v9657_v6 = vmul.f32 0.2, %v9600_v15  ;;  %v2194_v48 = vmul.f32 %v12718_v62, %v9616_v22  ;;  %v2459_v9 = vunpack.c.0.s8 %v2455_v50  ;;  %v2225_v50 = vpop.permute.xlu0 %2224 }
 0x388   : > { %v4043_v43 = vmul.f32 %v12869_v18, %v4037_v47  ;;  %v838_v37 = vmul.f32 %v12870_v7, %v832_v12  ;;  %v3941_v14 = vadd.f32 %v3937_v40, %v3835_v2  ;;  %v4143_v42 = vsel %vm4135_vm8, %v12866_v5, %v4139_v0  ;;  %v9693_v47 = vpop.permute.xlu1 %956  ;;  %v12882_v0 = vld [vmem:[#allocation205_spill] sm:$0xff] }
 0x389   : > { %12868 = vst [vmem:[#allocation362_spill] sm:$0xff] %v9657_v6  ;;  %v4237_v57 = vadd.f32 %v4233_v36, %v9497_v20  ;;  %v9672_v61 = vadd.f32 %v1370_v60, %v9574_v39  ;;  %v9675_v11 = vmul.f32 0.2, %v9634_v54  ;;  %v2188_v29 = vadd.f32 %v2184_v10, %v2178_v63  ;;  %v12878_v39 = vld [vmem:[#allocation43_spill] sm:$0xff]  ;;  %v12880_v63 = vld [vmem:[#allocation33_spill] sm:$0xff] }
 0x38a   : > { %v2591_v8 = vmul.f32 %v12528_v21, %v12873_v45  ;;  %v4047_v20 = vadd.f32 %v4043_v43, %v3941_v14  ;;  %v4149_v44 = vmul.f32 %v12874_v26, %v4143_v42  ;;  %vm9682_vm11 = vcmp.ne.s32.totalorder %v2459_v9, 0  ;;  %v12879_v10 = vld [vmem:[#allocation295_spill] sm:$0xff]  ;;  %v12939_v26 = vld [vmem:[#allocation196_spill] sm:$0xff]  ;;  %v12940_v18 = vld [vmem:[#allocation133_spill] sm:$0xff] }
 0x38b   : > { %12871 = vst [vmem:[#allocation378_spill] sm:$0xff] %v9672_v61  ;;  %12872 = vst [vmem:[#allocation384_spill] sm:$0xff] %v9675_v11  ;;  %vm4241_vm9 = vcmp.gt.f32.partialorder %v4237_v57, 0.0  ;;  %v4245_v12 = vmul.f32 0.2, %v4237_v57  ;;  %v12875_v40 = vmov 0  ;;  %v2601_v60 = vmul.f32 %v12533_v19, %v12878_v39  ;;  %v2237_v54 = vpop.permute.xlu0 %2236 }
 0x38c   : > { %v12876_v40 = vsel %vm9682_vm11, 4294967295, %v12875_v40  ;;  %v2585_v5 = vadd.f32 %v12880_v63, %v12879_v10  ;;  %v9691_v2 = vstv %s9641_s22  ;;  %v9696_v36 = vadd.f32 %v12882_v0, %v838_v37  ;;  %v12885_v42 = vld [vmem:[#allocation235_spill] sm:$0xff]  ;;  %v12886_v39 = vld [vmem:[#allocation50_spill] sm:$0xff]  ;;  %v12888_v0 = vld [vmem:[#allocation57_spill] sm:$0xff]  ;;  %v9743_v15 = vpop.permute.xlu1 %1168 }
 0x38d   : > { %12877 = vst [vmem:[#allocation370_spill] sm:$0xff] %v12876_v40  ;;  %12881 = vst [vmem:[#allocation329_spill] sm:$0xff] %v9691_v2  ;;  %v4153_v43 = vadd.f32 %v4149_v44, %v4047_v20  ;;  %v4249_v7 = vsel %vm4241_vm9, %v4237_v57, %v4245_v12  ;;  %v9699_v9 = vstv %s9646_s16  ;;  %v9701_v14 = vadd.f32 %v2194_v48, %v2188_v29  ;;  %v12887_v11 = vld [vmem:[#allocation55_spill] sm:$0xff]  ;;  %s4570_s16 = sshll.u32 %s5522_s8, 5 }
 0x38e   : > { %12883 = vst [vmem:[#allocation367_spill] sm:$0xff] %v9699_v9  ;;  %v4255_v45 = vmul.f32 %v12885_v42, %v4249_v7  ;;  %v2611_v10 = vmul.f32 %v12534_v52, %v12886_v39  ;;  %v2595_v63 = vadd.f32 %v2591_v8, %v2585_v5  ;;  %v2621_v37 = vmul.f32 %v12501_v27, %v12887_v11  ;;  %v12889_v20 = vld [vmem:[#allocation31_spill] sm:$0xff]  ;;  %v12892_v8 = vld [vmem:[#allocation64_spill] sm:$0xff] }
 0x38f   : > { %12884 = vst [vmem:[#allocation381_spill] sm:$0xff] %v9701_v14  ;;  %v2631_v57 = vmul.f32 %v12715_v58, %v12888_v0  ;;  %v9714_v48 = vrot.slane %v12721_v53, %v12889_v20  ;;  %v12891_v29 = vld [vmem:[#allocation51_spill] sm:$0xff]  ;;  %v2259_v5 = vmul.f32 %v12892_v8, %v9699_v9  ;;  %v9721_v39 = vstv %s9662_s3  ;;  %s485_s3 = scalar_lea.vmem [#allocation9], %s4570_s16 }
 0x390   : > { %v2249_v44 = vmul.f32 %v12891_v29, %v9691_v2  ;;  %v4259_v12 = vadd.f32 %v4255_v45, %v4153_v43  ;;  %v2605_v7 = vadd.f32 %v2601_v60, %v2595_v63  ;;  %12893 = vst [vmem:[#allocation352_spill] sm:$0xff] %v9721_v39  ;;  %v9726_v11 = vstv %s9667_s23  ;;  %v12897_v43 = vld [vmem:[#allocation62_spill] sm:$0xff]  ;;  %v12899_v14 = vld [vmem:[#allocation71_spill] sm:$0xff]  ;;  %s4836_s23 = sshll.u32 %s5434_s21, 9  ;;  %s5350_s21 = smov [#allocation9]  }
 0x391   : > { %12890 = vst [vmem:[#allocation382_spill] sm:$0xff] %v9714_v48  ;;  %12894 = vst [vmem:[#allocation388_spill] sm:$0xff] %v9726_v11  ;;  %v9729_v0 = vstv %s9669_s15  ;;  %v2243_v20 = vadd.f32 %v9714_v48, %v2225_v50  ;;  %v2252_v61 = vmul.f32 %v12588_v23, %v9691_v2  ;;  %v2641_v45 = vmul.f32 %v12718_v62, %v12897_v43  ;;  %s4439_s15 = sshll.u32 %s485_s3, 4  ;;  %s10715_s15 = int_to_ptr.vmem [resolvable:$true] %s4439_s15 }
 0x392   : > { %12895 = vst [vmem:[#allocation391_spill] sm:$0xff] %v9729_v0  ;;  %v9736_v60 = vsel %vm9682_vm11, %v4259_v12, -1e+30  ;;  %v2615_v63 = vadd.f32 %v2611_v10, %v2605_v7  ;;  %v9741_v6 = vstv %s9679_s13  ;;  %v2269_v50 = vmul.f32 %v12899_v14, %v9721_v39 }
 0x393   : > { %12896 = vst [vmem:[#allocation364_spill] sm:$0xff] %v9736_v60  ;;  %12898 = vst [vmem:[#allocation373_spill] sm:$0xff] %v9741_v6  ;;  %4270 = vmax.xlane.f32.xlu0 %v9736_v60  ;;  %v2253_v22 = vadd.f32 %v2249_v44, %v2243_v20  ;;  %v2262_v2 = vmul.f32 %v12591_v35, %v9699_v9  ;;  %v2246_v12 = vadd.f32 %v9714_v48, %v2237_v54  ;;  %v12900_v60 = vld [vmem:[#allocation79_spill] sm:$0xff]  ;;  %v12901_v48 = vld [vmem:[#allocation80_spill] sm:$0xff] }
 0x394   : > { %v2625_v43 = vadd.f32 %v2621_v37, %v2615_v63  ;;  %v2279_v10 = vmul.f32 %v12738_v16, %v9726_v11  ;;  %v2289_v7 = vmul.f32 %v12739_v1, %v9729_v0  ;;  %v2697_v40 = vmul.f32 %v12528_v21, %v12900_v60 }
 0x395   : > { %v2299_v54 = vmul.f32 %v12743_v24, %v9741_v6  ;;  %v2263_v44 = vadd.f32 %v2259_v5, %v2253_v22  ;;  %v2272_v37 = vmul.f32 %v12594_v55, %v9721_v39  ;;  %v2256_v20 = vadd.f32 %v2252_v61, %v2246_v12  ;;  %v12905_v39 = vld [vmem:[#allocation84_spill] sm:$0xff]  ;;  %v2335_v12 = vpop.permute.xlu0 %2334  ;;  %v12938_v55 = vld [vmem:[#allocation183_spill] sm:$0xff] }
 0x396   : > { %v2635_v63 = vadd.f32 %v2631_v57, %v2625_v43  ;;  %v2707_v9 = vmul.f32 %v12533_v19, %v12901_v48  ;;  %v2691_v60 = vadd.f32 %v12903_v41, %v12902_v31  ;;  %v9772_v33 = vstv %s9706_s24  ;;  %v9783_v41 = vpop.permute.xlu1 %1380  ;;  %v12907_v43 = vld [vmem:[#allocation52_spill] sm:$0xff] }
 0x397   : > { %12904 = vst [vmem:[#allocation390_spill] sm:$0xff] %v9772_v33  ;;  %v2273_v42 = vadd.f32 %v2269_v50, %v2263_v44  ;;  %v2282_v35 = vmul.f32 %v12597_v4, %v9726_v11  ;;  %v2292_v22 = vmul.f32 %v12599_v3, %v9729_v0  ;;  %v2266_v5 = vadd.f32 %v2262_v2, %v2256_v20 }
 0x398   : > { %v2645_v23 = vadd.f32 %v2641_v45, %v2635_v63  ;;  %v2717_v61 = vmul.f32 %v12534_v52, %v12905_v39  ;;  %v2701_v57 = vadd.f32 %v2697_v40, %v2691_v60  ;;  %v9781_v48 = vstv %s9723_s14  ;;  %v12909_v39 = vld [vmem:[#allocation88_spill] sm:$0xff]  ;;  %v12910_v63 = vld [vmem:[#allocation91_spill] sm:$0xff]  ;;  %s10713_s14 = scalar_lea.hbm %s10769_s11, %s4836_s23 }
 0x399   : > { %12906 = vst [vmem:[#allocation392_spill] sm:$0xff] %v9781_v48  ;;  %v2283_v31 = vadd.f32 %v2279_v10, %v2273_v42  ;;  %v2276_v50 = vadd.f32 %v2272_v37, %v2266_v5  ;;  %v9787_v44 = vrot.slane %v12721_v53, %v12907_v43  ;;  %v2356_v2 = vmul.f32 %v12528_v21, %v9772_v33 }
 0x39a   : > { %vm2649_vm12 = vcmp.gt.f32.partialorder %v2645_v23, 0.0  ;;  %v2653_v45 = vmul.f32 0.2, %v2645_v23  ;;  %v2727_v40 = vmul.f32 %v12501_v27, %v12909_v39  ;;  %v2711_v20 = vadd.f32 %v2707_v9, %v2701_v57 }
 0x39b   : > { %12908 = vst [vmem:[#allocation368_spill] sm:$0xff] %v9787_v44  ;;  %v2737_v60 = vmul.f32 %v12715_v58, %v12910_v63  ;;  %v2366_v42 = vmul.f32 %v12533_v19, %v9781_v48  ;;  %v9798_v10 = vstv %s9751_s19  ;;  %v2350_v53 = vadd.f32 %v9787_v44, %v2335_v12  ;;  %v12914_v63 = vld [vmem:[#allocation99_spill] sm:$0xff]  ;;  %s4426_s19 = scalar_lea.sflag [#allocation4], %s5522_s8 }
 0x39c   : > { %12911 = vst [vmem:[#allocation385_spill] sm:$0xff] %v9798_v10  ;;  %v2657_v37 = vsel %vm2649_vm12, %v2645_v23, %v2653_v45  ;;  %v2721_v5 = vadd.f32 %v2717_v61, %v2711_v20  ;;  %v9802_v43 = vstv %s9759_s17  ;;  %v9805_v33 = vstv %s9761_s1  ;;  %v12915_v23 = vld [vmem:[#allocation104_spill] sm:$0xff]  ;;  %v9817_v45 = vpop.permute.xlu1 %1384  ;;  %v12916_v20 = vld [vmem:[#allocation74_spill] sm:$0xff]  ;;  %s5234_s17 = scalar_lea.vmem %s10715_s15, 512  ;;  %s5238_s1 = sshll.u32 %s5350_s21, 4  ;;  %s5239_s1 = int_to_ptr.vmem [resolvable:$false] %s5238_s1 }
 0x39d   : > { %12912 = vst [vmem:[#allocation383_spill] sm:$0xff] %v9802_v43  ;;  %12913 = vst [vmem:[#allocation393_spill] sm:$0xff] %v9805_v33  ;;  %v2293_v0 = vadd.f32 %v2289_v7, %v2283_v31  ;;  %v9809_v9 = vmul.f32 %v12602_v49, %v9741_v6  ;;  %v2286_v57 = vadd.f32 %v2282_v35, %v2276_v50  ;;  %v12926_v49 = vld [vmem:[#allocation303_spill] sm:$0xff]  ;;  %p5235_p10 = scmp.ne.s32.totalorder %s10715_s15, %s5234_s17  ;;  %p5241_p12 = scmp.lt.s32.totalorder %s10715_s15, %s5239_s1 }
 0x39e   : > { %v2360_v39 = vadd.f32 %v2356_v2, %v2350_v53  ;;  %v2747_v48 = vmul.f32 %v12718_v62, %v12914_v63  ;;  %v2731_v11 = vadd.f32 %v2727_v40, %v2721_v5  ;;  %v2376_v12 = vmul.f32 %v12534_v52, %v9798_v10  ;;  %v12918_v40 = vld [vmem:[#allocation107_spill] sm:$0xff] }
 0x39f   : > { %v2803_v61 = vmul.f32 %v12528_v21, %v12915_v23  ;;  %v2663_v7 = vmul.f32 %v12916_v20, %v2657_v37  ;;  %v2386_v31 = vmul.f32 %v12501_v27, %v9802_v43  ;;  %v9824_v35 = vmul.f32 %v12715_v58, %v9805_v33  ;;  %v12919_v5 = vld [vmem:[#allocation299_spill] sm:$0xff]  ;;  %v12921_v23 = vld [vmem:[#allocation132_spill] sm:$0xff]  ;;  %p5236_p2 = pnand %p5235_p10, %p13189_p1 }
 0x3a0   : > { %v2370_v50 = vadd.f32 %v2366_v42, %v2360_v39  ;;  %v2741_v2 = vadd.f32 %v2737_v60, %v2731_v11  ;;  %v2813_v53 = vmul.f32 %v12533_v19, %v12918_v40  ;;  %v12920_v63 = vld [vmem:[#allocation35_spill] sm:$0xff]  ;;  %v3015_v10 = vmul.f32 %v12528_v21, %v12921_v23  ;;  %v12923_v20 = vld [vmem:[#allocation108_spill] sm:$0xff] }
 0x3a1   : > { %12917 = vst [vmem:[#allocation394_spill] sm:$0xff] %v9824_v35  ;;  %v2797_v44 = vadd.f32 %v12920_v63, %v12919_v5  ;;  %v9832_v6 = vadd.f32 %v2299_v54, %v2293_v0  ;;  %v9834_v37 = vadd.f32 %v2292_v22, %v2286_v57  ;;  %v2823_v43 = vmul.f32 %v12534_v52, %v12923_v20  ;;  %v12924_v33 = vld [vmem:[#allocation112_spill] sm:$0xff]  ;;  %v12927_v5 = vld [vmem:[#allocation39_spill] sm:$0xff]  ;;  %v12952_v35 = vld [vmem:[#allocation233_spill] sm:$0xff]  ;;  %p5237_p7 = pneg %p5236_p2 }
 0x3a2   : > { %v2833_v42 = vmul.f32 %v12501_v27, %v12924_v33  ;;  %v2751_v11 = vadd.f32 %v2747_v48, %v2741_v2  ;;  %v12925_v39 = vld [vmem:[#allocation136_spill] sm:$0xff]  ;;  %v3009_v63 = vadd.f32 %v12927_v5, %v12926_v49  ;;  %v2380_v3 = vadd.f32 %v2376_v12, %v2370_v50  ;;  %v12929_v54 = vld [vmem:[#allocation151_spill] sm:$0xff] }
 0x3a3   : > { %12922 = vst [vmem:[#allocation395_spill] sm:$0xff] %v9832_v6  ;;  %v2807_v60 = vadd.f32 %v2803_v61, %v2797_v44  ;;  %v3025_v40 = vmul.f32 %v12533_v19, %v12925_v39  ;;  %v12928_v23 = vld [vmem:[#allocation116_spill] sm:$0xff]  ;;  %v3035_v22 = vmul.f32 %v12534_v52, %v12929_v54  ;;  %v9850_v61 = vpop.permute.xlu1 %1482  ;;  %v12933_v50 = vld [vmem:[#allocation159_spill] sm:$0xff] }
 0x3a4   : > { %v2843_v0 = vmul.f32 %v12715_v58, %v12928_v23  ;;  %v12930_v57 = vld [vmem:[#allocation168_spill] sm:$0xff]  ;;  %vm2755_vm13 = vcmp.gt.f32.partialorder %v2751_v11, 0.0  ;;  %v2759_v33 = vmul.f32 0.2, %v2751_v11  ;;  %v3019_v44 = vadd.f32 %v3015_v10, %v3009_v63  ;;  %v12934_v23 = vld [vmem:[#allocation175_spill] sm:$0xff]  ;;  %v12937_v63 = vld [vmem:[#allocation166_spill] sm:$0xff] }
 0x3a5   : > { %v3227_v20 = vmul.f32 %v12528_v21, %v12930_v57  ;;  %v2817_v48 = vadd.f32 %v2813_v53, %v2807_v60  ;;  %v12931_v2 = vld [vmem:[#allocation120_spill] sm:$0xff]  ;;  %v3055_v5 = vmul.f32 %v12715_v58, %v12933_v50  ;;  %v3237_v54 = vmul.f32 %v12533_v19, %v12934_v23 }
 0x3a6   : > { %v2853_v39 = vmul.f32 %v12718_v62, %v12931_v2  ;;  %v12932_v49 = vld [vmem:[#allocation152_spill] sm:$0xff]  ;;  %v2763_v6 = vsel %vm2755_vm13, %v2751_v11, %v2759_v33  ;;  %v3029_v4 = vadd.f32 %v3025_v40, %v3019_v44  ;;  %v9862_v60 = vadd.f32 %v2386_v31, %v2380_v3  ;;  %v12941_v40 = vld [vmem:[#allocation194_spill] sm:$0xff]  ;;  %v12943_v31 = vld [vmem:[#allocation203_spill] sm:$0xff] }
 0x3a7   : > { %v3045_v12 = vmul.f32 %v12501_v27, %v12932_v49  ;;  %v2827_v57 = vadd.f32 %v2823_v43, %v2817_v48  ;;  %v12935_v53 = vld [vmem:[#allocation44_spill] sm:$0xff]  ;;  %v3065_v2 = vmul.f32 %v12718_v62, %v12937_v63  ;;  %v3247_v49 = vmul.f32 %v12534_v52, %v12938_v55 }
 0x3a8   : > { %v3221_v10 = vadd.f32 %v12935_v53, %v9517_v28  ;;  %12936 = vst [vmem:[#allocation397_spill] sm:$0xff] %v9862_v60  ;;  %v3439_v50 = vmul.f32 %v12528_v21, %v12939_v26  ;;  %v2769_v17 = vmul.f32 %v12940_v18, %v2763_v6  ;;  %v3039_v11 = vadd.f32 %v3035_v22, %v3029_v4  ;;  %v12942_v28 = vld [vmem:[#allocation198_spill] sm:$0xff]  ;;  %v12944_v44 = vld [vmem:[#allocation60_spill] sm:$0xff]  ;;  %v9881_v4 = vpop.permute.xlu1 %1490 }
 0x3a9   : > { %v2837_v23 = vadd.f32 %v2833_v42, %v2827_v57  ;;  %v3257_v33 = vmul.f32 %v12501_v27, %v12941_v40  ;;  %v3267_v3 = vmul.f32 %v12715_v58, %v12942_v28  ;;  %v3449_v48 = vmul.f32 %v12533_v19, %v12943_v31  ;;  %v12945_v26 = vld [vmem:[#allocation202_spill] sm:$0xff]  ;;  %v12948_v40 = vld [vmem:[#allocation219_spill] sm:$0xff] }
 0x3aa   : > { %v3231_v43 = vadd.f32 %v3227_v20, %v3221_v10  ;;  %v3433_v55 = vadd.f32 %v12944_v44, %v9554_v30  ;;  %v3049_v63 = vadd.f32 %v3045_v12, %v3039_v11  ;;  %v3277_v6 = vmul.f32 %v12718_v62, %v12945_v26  ;;  %v12946_v42 = vld [vmem:[#allocation214_spill] sm:$0xff]  ;;  %v12947_v20 = vld [vmem:[#allocation217_spill] sm:$0xff]  ;;  %v12951_v26 = vld [vmem:[#allocation148_spill] sm:$0xff] }
 0x3ab   : > { %v2847_v53 = vadd.f32 %v2843_v0, %v2837_v23  ;;  %v3459_v22 = vmul.f32 %v12534_v52, %v12946_v42  ;;  %v3469_v57 = vmul.f32 %v12501_v27, %v12947_v20  ;;  %v3651_v28 = vmul.f32 %v12528_v21, %v12948_v40  ;;  %v12949_v23 = vld [vmem:[#allocation221_spill] sm:$0xff] }
 0x3ac   : > { %v3241_v18 = vadd.f32 %v3237_v54, %v3231_v43  ;;  %v3443_v10 = vadd.f32 %v3439_v50, %v3433_v55  ;;  %v2773_v31 = vadd.f32 %v2769_v17, %v2663_v7  ;;  %v3059_v0 = vadd.f32 %v3055_v5, %v3049_v63  ;;  %v12950_v43 = vld [vmem:[#allocation223_spill] sm:$0xff] }
 0x3ad   : > { %v2857_v30 = vadd.f32 %v2853_v39, %v2847_v53  ;;  %v3479_v11 = vmul.f32 %v12715_v58, %v12949_v23  ;;  %v3661_v44 = vmul.f32 %v12533_v19, %v12950_v43  ;;  %v3645_v42 = vadd.f32 %v12951_v26, %v9597_v51  ;;  %v12953_v39 = vld [vmem:[#allocation231_spill] sm:$0xff]  ;;  %v12956_v23 = vld [vmem:[#allocation241_spill] sm:$0xff] }
 0x3ae   : > { %v3251_v12 = vadd.f32 %v3247_v49, %v3241_v18  ;;  %v3453_v54 = vadd.f32 %v3449_v48, %v3443_v10  ;;  %v3069_v50 = vadd.f32 %v3065_v2, %v3059_v0  ;;  %v3489_v17 = vmul.f32 %v12718_v62, %v12952_v35  ;;  %v9899_v18 = vpop.permute.xlu1 %1494  ;;  %v12955_v10 = vld [vmem:[#allocation153_spill] sm:$0xff] }
 0x3af   : > { %vm2861_vm14 = vcmp.gt.f32.partialorder %v2857_v30, 0.0  ;;  %v2865_v20 = vmul.f32 0.2, %v2857_v30  ;;  %v3671_v5 = vmul.f32 %v12534_v52, %v12953_v39  ;;  %v3655_v49 = vadd.f32 %v3651_v28, %v3645_v42  ;;  %12954 = vst [vmem:[#allocation24_spill] sm:$0xff] %v9899_v18  ;;  %v12959_v43 = vld [vmem:[#allocation201_spill] sm:$0xff] }
 0x3b0   : > { %v3261_v55 = vadd.f32 %v3257_v33, %v3251_v12  ;;  %v3463_v7 = vadd.f32 %v3459_v22, %v3453_v54  ;;  %vm3073_vm15 = vcmp.gt.f32.partialorder %v3069_v50, 0.0  ;;  %v3077_v48 = vmul.f32 0.2, %v3069_v50  ;;  %v12957_v22 = vld [vmem:[#allocation245_spill] sm:$0xff]  ;;  %v12958_v54 = vld [vmem:[#allocation242_spill] sm:$0xff] }
 0x3b1   : > { %v2869_v53 = vsel %vm2861_vm14, %v2857_v30, %v2865_v20  ;;  %v3681_v2 = vmul.f32 %v12501_v27, %v12956_v23  ;;  %v3665_v33 = vadd.f32 %v3661_v44, %v3655_v49  ;;  %v3691_v12 = vmul.f32 %v12715_v58, %v12957_v22  ;;  %v12961_v44 = vld [vmem:[#allocation176_spill] sm:$0xff]  ;;  %v12963_v49 = vld [vmem:[#allocation249_spill] sm:$0xff]  ;;  %v12968_v22 = vld [vmem:[#allocation266_spill] sm:$0xff] }
 0x3b2   : > { %v3271_v63 = vadd.f32 %v3267_v3, %v3261_v55  ;;  %v2875_v51 = vmul.f32 %v12955_v10, %v2869_v53  ;;  %v3473_v40 = vadd.f32 %v3469_v57, %v3463_v7  ;;  %v3081_v0 = vsel %vm3073_vm15, %v3069_v50, %v3077_v48  ;;  %v12960_v57 = vld [vmem:[#allocation243_spill] sm:$0xff] }
 0x3b3   : > { %v3863_v28 = vmul.f32 %v12528_v21, %v12958_v54  ;;  %v3087_v3 = vmul.f32 %v12959_v43, %v3081_v0  ;;  %v3675_v42 = vadd.f32 %v3671_v5, %v3665_v33  ;;  %v3873_v55 = vmul.f32 %v12533_v19, %v12960_v57  ;;  %v12965_v5 = vld [vmem:[#allocation261_spill] sm:$0xff]  ;;  %v12967_v33 = vld [vmem:[#allocation270_spill] sm:$0xff]  ;;  %v12969_v54 = vld [vmem:[#allocation271_spill] sm:$0xff] }
 0x3b4   : > { %v3281_v35 = vadd.f32 %v3277_v6, %v3271_v63  ;;  %v2879_v30 = vadd.f32 %v2875_v51, %v2773_v31  ;;  %v3483_v26 = vadd.f32 %v3479_v11, %v3473_v40  ;;  %v3857_v50 = vadd.f32 %v12961_v44, %v9626_v13  ;;  %v12962_v6 = vld [vmem:[#allocation177_spill] sm:$0xff]  ;;  %v12964_v63 = vld [vmem:[#allocation246_spill] sm:$0xff]  ;;  %v9920_v40 = vpop.permute.xlu1 %1592 }
 0x3b5   : > { %v3701_v53 = vmul.f32 %v12718_v62, %v12963_v49  ;;  %v3685_v48 = vadd.f32 %v3681_v2, %v3675_v42  ;;  %v3883_v11 = vmul.f32 %v12534_v52, %v12964_v63  ;;  %v3893_v10 = vmul.f32 %v12501_v27, %v12965_v5  ;;  %12966 = vst [vmem:[#allocation398_spill] sm:$0xff] %v9920_v40  ;;  %v12970_v43 = vld [vmem:[#allocation174_spill] sm:$0xff]  ;;  %v12971_v42 = vld [vmem:[#allocation236_spill] sm:$0xff]  ;;  %v12975_v49 = vld [vmem:[#allocation285_spill] sm:$0xff] }
 0x3b6   : > { %vm3285_vm0 = vcmp.gt.f32.partialorder %v3281_v35, 0.0  ;;  %v3289_v20 = vmul.f32 0.2, %v3281_v35  ;;  %v2985_v7 = vadd.f32 %v12962_v6, %v2879_v30  ;;  %v3493_v39 = vadd.f32 %v3489_v17, %v3483_v26  ;;  %v12976_v63 = vld [vmem:[#allocation287_spill] sm:$0xff]  ;;  %v13002_v40 = vld [vmem:[#allocation37_spill] sm:$0xff] }
 0x3b7   : > { %v3867_v51 = vadd.f32 %v3863_v28, %v3857_v50  ;;  %v4075_v17 = vmul.f32 %v12528_v21, %v12967_v33  ;;  %v3695_v0 = vadd.f32 %v3691_v12, %v3685_v48  ;;  %v3903_v2 = vmul.f32 %v12715_v58, %v12968_v22  ;;  %v12973_v50 = vld [vmem:[#allocation268_spill] sm:$0xff]  ;;  %v12980_v33 = vld [vmem:[#allocation290_spill] sm:$0xff] }
 0x3b8   : > { %v3293_v31 = vsel %vm3285_vm0, %v3281_v35, %v3289_v20  ;;  %v3091_v23 = vadd.f32 %v3087_v3, %v2985_v7  ;;  %vm3497_vm1 = vcmp.gt.f32.partialorder %v3493_v39, 0.0  ;;  %v3501_v13 = vmul.f32 0.2, %v3493_v39  ;;  %v12972_v3 = vld [vmem:[#allocation191_spill] sm:$0xff]  ;;  %v9953_v22 = vpop.permute.xlu1 %1596 }
 0x3b9   : > { %v3877_v35 = vadd.f32 %v3873_v55, %v3867_v51  ;;  %v4085_v30 = vmul.f32 %v12533_v19, %v12969_v54  ;;  %v3299_v28 = vmul.f32 %v12971_v42, %v3293_v31  ;;  %v4069_v57 = vadd.f32 %v12972_v3, %v9650_v34  ;;  %v12974_v7 = vld [vmem:[#allocation275_spill] sm:$0xff]  ;;  %v12978_v34 = vld [vmem:[#allocation264_spill] sm:$0xff]  ;;  %12981 = vst [vmem:[#allocation399_spill] sm:$0xff] %v9953_v22 }
 0x3ba   : > { %v3197_v26 = vadd.f32 %v12970_v43, %v3091_v23  ;;  %v3505_v20 = vsel %vm3497_vm1, %v3493_v39, %v3501_v13  ;;  %v9932_v44 = vadd.f32 %v3701_v53, %v3695_v0  ;;  %v3913_v12 = vmul.f32 %v12718_v62, %v12973_v50  ;;  %v12977_v39 = vld [vmem:[#allocation289_spill] sm:$0xff]  ;;  %v12979_v13 = vld [vmem:[#allocation296_spill] sm:$0xff] }
 0x3bb   : > { %v3887_v6 = vadd.f32 %v3883_v11, %v3877_v35  ;;  %v4095_v55 = vmul.f32 %v12534_v52, %v12974_v7  ;;  %v4105_v48 = vmul.f32 %v12501_v27, %v12975_v49  ;;  %v4115_v5 = vmul.f32 %v12715_v58, %v12976_v63  ;;  %v12983_v42 = vld [vmem:[#allocation292_spill] sm:$0xff] }
 0x3bc   : > { %v4079_v31 = vadd.f32 %v4075_v17, %v4069_v57  ;;  %v978_v51 = vmul.f32 %v12528_v21, %v12977_v39  ;;  %v9945_v53 = vmul.f32 %v12978_v34, %v3505_v20  ;;  %v9949_v11 = vmul.f32 %v12718_v62, %v12979_v13  ;;  %v12982_v17 = vld [vmem:[#allocation293_spill] sm:$0xff]  ;;  %v12984_v57 = vld [vmem:[#allocation302_spill] sm:$0xff]  ;;  %v12988_v39 = vld [vmem:[#allocation316_spill] sm:$0xff]  ;;  %v9990_v22 = vpop.permute.xlu1 %1694 }
 0x3bd   : > { %v3897_v23 = vadd.f32 %v3893_v10, %v3887_v6  ;;  %v988_v0 = vmul.f32 %v12533_v19, %v12980_v33  ;;  %v9955_v35 = vadd.f32 %v3299_v28, %v3197_v26  ;;  %v998_v43 = vmul.f32 %v12534_v52, %v12982_v17  ;;  %v12985_v6 = vld [vmem:[#allocation313_spill] sm:$0xff]  ;;  %v12986_v26 = vld [vmem:[#allocation312_spill] sm:$0xff]  ;;  %v12987_v28 = vld [vmem:[#allocation314_spill] sm:$0xff]  ;;  %12996 = vst [vmem:[#allocation386_spill] sm:$0xff] %v9990_v22 }
 0x3be   : > { %v4089_v54 = vadd.f32 %v4085_v30, %v4079_v31  ;;  %v972_v20 = vadd.f32 %v12983_v42, %v9693_v47  ;;  %v9962_v10 = vmul.f32 0.2, %v9932_v44  ;;  %v1008_v50 = vmul.f32 %v12501_v27, %v12984_v57  ;;  %v12989_v34 = vld [vmem:[#allocation317_spill] sm:$0xff]  ;;  %v12991_v33 = vld [vmem:[#allocation323_spill] sm:$0xff] }
 0x3bf   : > { %v3907_v3 = vadd.f32 %v3903_v2, %v3897_v23  ;;  %v1190_v7 = vmul.f32 %v12528_v21, %v12985_v6  ;;  %v1018_v30 = vmul.f32 %v12715_v58, %v12986_v26  ;;  %v1028_v63 = vmul.f32 %v12718_v62, %v12987_v28  ;;  %v12990_v23 = vld [vmem:[#allocation321_spill] sm:$0xff]  ;;  %v12992_v42 = vld [vmem:[#allocation331_spill] sm:$0xff] }
 0x3c0   : > { %v4099_v49 = vadd.f32 %v4095_v55, %v4089_v54  ;;  %v982_v31 = vadd.f32 %v978_v51, %v972_v20  ;;  %v1200_v47 = vmul.f32 %v12533_v19, %v12988_v39  ;;  %v1210_v2 = vmul.f32 %v12534_v52, %v12989_v34  ;;  %v12993_v6 = vld [vmem:[#allocation225_spill] sm:$0xff]  ;;  %v12995_v34 = vld [vmem:[#allocation216_spill] sm:$0xff] }
 0x3c1   : > { %v1220_v13 = vmul.f32 %v12501_v27, %v12990_v23  ;;  %v1184_v17 = vadd.f32 %v12991_v33, %v9743_v15  ;;  %v1230_v57 = vmul.f32 %v12715_v58, %v12992_v42  ;;  %v1402_v51 = vmul.f32 %v12528_v21, %v12993_v6  ;;  %v12994_v26 = vld [vmem:[#allocation333_spill] sm:$0xff]  ;;  %v12999_v33 = vld [vmem:[#allocation230_spill] sm:$0xff] }
 0x3c2   : > { %v4109_v55 = vadd.f32 %v4105_v48, %v4099_v49  ;;  %v992_v54 = vadd.f32 %v988_v0, %v982_v31  ;;  %v9984_v20 = vadd.f32 %v3913_v12, %v3907_v3  ;;  %v1240_v28 = vmul.f32 %v12718_v62, %v12994_v26  ;;  %v12997_v48 = vld [vmem:[#allocation228_spill] sm:$0xff]  ;;  %v13000_v42 = vld [vmem:[#allocation226_spill] sm:$0xff] }
 0x3c3   : > { %v1194_v39 = vadd.f32 %v1190_v7, %v1184_v17  ;;  %v1412_v23 = vmul.f32 %v12533_v19, %v12995_v34  ;;  %v1422_v0 = vmul.f32 %v12534_v52, %v12997_v48  ;;  %v12998_v49 = vld [vmem:[#allocation212_spill] sm:$0xff]  ;;  %v1396_v12 = vadd.f32 %v12999_v33, %v9783_v41  ;;  %v13003_v19 = vld [vmem:[#allocation38_spill] sm:$0xff]  ;;  %v13004_v41 = vld [vmem:[#allocation41_spill] sm:$0xff] }
 0x3c4   : > { %v1002_v15 = vadd.f32 %v998_v43, %v992_v54  ;;  %v1432_v31 = vmul.f32 %v12501_v27, %v12998_v49  ;;  %v1442_v26 = vmul.f32 %v12715_v58, %v13000_v42  ;;  %v13001_v7 = vld [vmem:[#allocation224_spill] sm:$0xff]  ;;  %v1403_v22 = vmul.f32 %v13002_v40, %v12993_v6 }
 0x3c5   : > { %v1204_v3 = vadd.f32 %v1200_v47, %v1194_v39  ;;  %v1452_v17 = vmul.f32 %v12718_v62, %v13001_v7  ;;  %v10004_v43 = vadd.f32 %v4115_v5, %v4109_v55  ;;  %v1406_v52 = vadd.f32 %v1402_v51, %v1396_v12  ;;  %v13005_v39 = vld [vmem:[#allocation45_spill] sm:$0xff]  ;;  %v13006_v5 = vld [vmem:[#allocation46_spill] sm:$0xff] }
 0x3c6   : > { %v1012_v54 = vadd.f32 %v1008_v50, %v1002_v15  ;;  %v1413_v27 = vmul.f32 %v13003_v19, %v12995_v34  ;;  %v1423_v47 = vmul.f32 %v13004_v41, %v12997_v48  ;;  %v1433_v58 = vmul.f32 %v13005_v39, %v12998_v49  ;;  %v13007_v50 = vld [vmem:[#allocation254_spill] sm:$0xff]  ;;  %v13009_v48 = vld [vmem:[#allocation237_spill] sm:$0xff]  ;;  %v10022_v49 = vpop.permute.xlu1 %1702 }
 0x3c7   : > { %v1214_v21 = vadd.f32 %v1210_v2, %v1204_v3  ;;  %v1397_v18 = vadd.f32 %v12999_v33, %v9817_v45  ;;  %v1416_v60 = vadd.f32 %v1412_v23, %v1406_v52  ;;  %v1443_v55 = vmul.f32 %v13006_v5, %v13000_v42  ;;  %v13008_v2 = vld [vmem:[#allocation49_spill] sm:$0xff]  ;;  %13010 = vst [vmem:[#allocation400_spill] sm:$0xff] %v10022_v49  ;;  %v13012_v23 = vld [vmem:[#allocation250_spill] sm:$0xff]  ;;  %v13015_v49 = vld [vmem:[#allocation259_spill] sm:$0xff] }
 0x3c8   : > { %v1022_v62 = vadd.f32 %v1018_v30, %v1012_v54  ;;  %v1507_v6 = vmul.f32 %v12891_v29, %v13007_v50  ;;  %v1453_v34 = vmul.f32 %v13008_v2, %v13001_v7  ;;  %v1517_v12 = vmul.f32 %v12892_v8, %v13009_v48  ;;  %v13011_v30 = vld [vmem:[#allocation244_spill] sm:$0xff]  ;;  %v13014_v7 = vld [vmem:[#allocation255_spill] sm:$0xff] }
 0x3c9   : > { %v1224_v51 = vadd.f32 %v1220_v13, %v1214_v21  ;;  %v1407_v15 = vadd.f32 %v1403_v22, %v1397_v18  ;;  %v1426_v45 = vadd.f32 %v1422_v0, %v1416_v60  ;;  %v1527_v52 = vmul.f32 %v12899_v14, %v13011_v30  ;;  %v13013_v21 = vld [vmem:[#allocation253_spill] sm:$0xff] }
 0x3ca   : > { %v1032_v3 = vadd.f32 %v1028_v63, %v1022_v62  ;;  %v1501_v33 = vadd.f32 %v13012_v23, %v9850_v61  ;;  %v1537_v13 = vmul.f32 %v12738_v16, %v13013_v21  ;;  %v1547_v18 = vmul.f32 %v12739_v1, %v13014_v7  ;;  %v13016_v1 = vld [vmem:[#allocation358_spill] sm:$0xff] }
 0x3cb   : > { %v1234_v42 = vadd.f32 %v1230_v57, %v1224_v51  ;;  %v1417_v54 = vadd.f32 %v1413_v27, %v1407_v15  ;;  %vm3709_vm2 = vcmp.gt.f32.partialorder %v9932_v44, 0.0  ;;  %v1436_v62 = vadd.f32 %v1432_v31, %v1426_v45 }
 0x3cc   : > { %vm1036_vm3 = vcmp.gt.f32.partialorder %v1032_v3, 0.0  ;;  %v1040_v22 = vmul.f32 0.2, %v1032_v3  ;;  %v1511_v60 = vadd.f32 %v1507_v6, %v1501_v33  ;;  %v1557_v14 = vmul.f32 %v12743_v24, %v13015_v49  ;;  %v10040_v6 = vpop.permute.xlu1 %1706 }
 0x3cd   : > { %v1244_v63 = vadd.f32 %v1240_v28, %v1234_v42  ;;  %v1427_v0 = vadd.f32 %v1423_v47, %v1417_v54  ;;  %v1509_v27 = vmul.f32 %v13002_v40, %v13007_v50  ;;  %v1446_v57 = vadd.f32 %v1442_v26, %v1436_v62  ;;  %v13018_v62 = vld [vmem:[#allocation208_spill] sm:$0xff] }
 0x3ce   : > { %v1044_v61 = vsel %vm1036_vm3, %v1032_v3, %v1040_v22  ;;  %v1521_v51 = vadd.f32 %v1517_v12, %v1511_v60  ;;  %v1519_v15 = vmul.f32 %v13003_v19, %v13009_v48  ;;  %v1529_v45 = vmul.f32 %v13004_v41, %v13011_v30 }
 0x3cf   : > { %v1050_v16 = vmul.f32 %v13016_v1, %v1044_v61  ;;  %vm1248_vm5 = vcmp.gt.f32.partialorder %v1244_v63, 0.0  ;;  %v1252_v8 = vmul.f32 0.2, %v1244_v63  ;;  %v1437_v31 = vadd.f32 %v1433_v58, %v1427_v0  ;;  %v13017_v1 = vld [vmem:[#allocation363_spill] sm:$0xff] }
 0x3d0   : > { %v1456_v28 = vadd.f32 %v1452_v17, %v1446_v57  ;;  %v1531_v47 = vadd.f32 %v1527_v52, %v1521_v51  ;;  %v1503_v3 = vadd.f32 %v13012_v23, %v9881_v4  ;;  %v2437_v42 = vunpack.c.1.s8 %v12855_v38  ;;  %v13020_v38 = vld [vmem:[#allocation239_spill] sm:$0xff]  ;;  %v10055_v51 = vpop.permute.xlu1 %1804 }
 0x3d1   : > { %v1054_v26 = vadd.f32 %v1050_v16, %v9696_v36  ;;  %v1256_v12 = vsel %vm1248_vm5, %v1244_v63, %v1252_v8  ;;  %v1447_v33 = vadd.f32 %v1443_v55, %v1437_v31  ;;  %v1539_v4 = vmul.f32 %v13005_v39, %v13013_v21  ;;  %v13019_v16 = vld [vmem:[#allocation182_spill] sm:$0xff] }
 0x3d2   : > { %v1262_v54 = vmul.f32 %v13017_v1, %v1256_v12  ;;  %vm1460_vm6 = vcmp.gt.f32.partialorder %v1456_v28, 0.0  ;;  %v1464_v58 = vmul.f32 0.2, %v1456_v28  ;;  %v1541_v22 = vadd.f32 %v1537_v13, %v1531_v47 }
 0x3d3   : > { %v1160_v17 = vadd.f32 %v13018_v62, %v1054_v26  ;;  %v1457_v52 = vadd.f32 %v1453_v34, %v1447_v33  ;;  %v1513_v60 = vadd.f32 %v1509_v27, %v1503_v3  ;;  %v2442_v0 = vpack.c.b16 %v2437_v42, %v2437_v42  ;;  %v13021_v27 = vld [vmem:[#allocation188_spill] sm:$0xff]  ;;  %v13023_v42 = vld [vmem:[#allocation190_spill] sm:$0xff] }
 0x3d4   : > { %v1468_v61 = vsel %vm1460_vm6, %v1456_v28, %v1464_v58  ;;  %v1551_v57 = vadd.f32 %v1547_v18, %v1541_v22  ;;  %v3409_v36 = vadd.f32 %v13019_v16, %v9955_v35  ;;  %v3617_v18 = vmul.f32 %v12621_v56, %v13021_v27  ;;  %v13022_v28 = vld [vmem:[#allocation229_spill] sm:$0xff]  ;;  %v13033_v27 = vld [vmem:[#allocation210_spill] sm:$0xff] }
 0x3d5   : > { %v1266_v8 = vadd.f32 %v1262_v54, %v1160_v17  ;;  %v1474_v55 = vmul.f32 %v13020_v38, %v1468_v61  ;;  %vm1461_vm7 = vcmp.gt.f32.partialorder %v1457_v52, 0.0  ;;  %v1465_v63 = vmul.f32 0.2, %v1457_v52  ;;  %v13025_v22 = vld [vmem:[#allocation193_spill] sm:$0xff]  ;;  %v10079_v17 = vpop.permute.xlu1 %1808 }
 0x3d6   : > { %v1523_v13 = vadd.f32 %v1519_v15, %v1513_v60  ;;  %v2443_v31 = vpack.c.b8 %v2442_v0, %v2442_v0  ;;  %v3515_v34 = vadd.f32 %v9945_v53, %v3409_v36  ;;  %v1561_v26 = vadd.f32 %v1557_v14, %v1551_v57 }
 0x3d7   : > { %v1372_v47 = vadd.f32 %v13022_v28, %v1266_v8  ;;  %v1469_v3 = vsel %vm1461_vm7, %v1457_v52, %v1465_v63  ;;  %v3717_v35 = vsel %vm3709_vm2, %v9932_v44, %v9962_v10  ;;  %v3925_v12 = vmul.f32 0.2, %v9984_v20  ;;  %v13029_v8 = vld [vmem:[#allocation394_spill] sm:$0xff] }
 0x3d8   : > { %v1549_v15 = vmul.f32 %v13006_v5, %v13014_v7  ;;  %v1533_v33 = vadd.f32 %v1529_v45, %v1523_v13  ;;  %vm3815_vm8 = vcmp.gt.f32.partialorder %v13023_v42, 0.0  ;;  %v4129_v56 = vadd.f32 %v9949_v11, %v10004_v43 }
 0x3d9   : > { %v10071_v53 = vadd.f32 %v1474_v55, %v1372_v47  ;;  %v3621_v1 = vadd.f32 %v3617_v18, %v3515_v34  ;;  %v3723_v14 = vmul.f32 %v12628_v32, %v3717_v35  ;;  %v1475_v54 = vmul.f32 %v13020_v38, %v1469_v3  ;;  %v13026_v32 = vld [vmem:[#allocation207_spill] sm:$0xff]  ;;  %v13031_v55 = vld [vmem:[#allocation189_spill] sm:$0xff]  ;;  %v10102_v47 = vpop.permute.xlu1 %1906 }
 0x3da   : > { %v1559_v44 = vmul.f32 %v13008_v2, %v13015_v49  ;;  %v1543_v10 = vadd.f32 %v1539_v4, %v1533_v33  ;;  %vm2449_vm9 = vnez %v2443_v31  ;;  %vm1565_vm12 = vcmp.gt.f32.partialorder %v1561_v26, 0.0  ;;  %13035 = vst [vmem:[#allocation387_spill] sm:$0xff] %v10102_v47  ;;  %v13036_v3 = vld [vmem:[#allocation149_spill] sm:$0xff]  ;;  %v13081_v47 = vld [vmem:[#allocation78_spill] sm:$0xff] }
 0x3db   : > { %13024 = vst [vmem:[#allocation409_spill] sm:$0xff] %v10071_v53  ;;  %v1569_v58 = vmul.f32 0.2, %v1561_v26  ;;  %v3727_v45 = vadd.f32 %v3723_v14, %v3621_v1  ;;  %v3823_v62 = vsel %vm3815_vm8, %v13023_v42, %v13025_v22  ;;  %vm3921_vm13 = vcmp.gt.f32.partialorder %v9984_v20, 0.0  ;;  %v13039_v42 = vld [vmem:[#allocation332_spill] sm:$0xff]  ;;  %v13040_v1 = vld [vmem:[#allocation286_spill] sm:$0xff] }
 0x3dc   : > { %v1553_v11 = vadd.f32 %v1549_v15, %v1543_v10  ;;  %v3829_v43 = vmul.f32 %v12629_v25, %v3823_v62  ;;  %vm4027_vm14 = vcmp.gt.f32.partialorder %v13026_v32, 0.0  ;;  %v2453_v52 = vsel %vm2449_vm9, 16843009, %v12864_v59  ;;  %v13028_v25 = vld [vmem:[#allocation397_spill] sm:$0xff]  ;;  %v13043_v22 = vld [vmem:[#allocation24_spill] sm:$0xff] }
 0x3dd   : > { %v3929_v60 = vsel %vm3921_vm13, %v9984_v20, %v3925_v12  ;;  %v4031_v0 = vmul.f32 0.2, %v13026_v32  ;;  %vm4133_vm15 = vcmp.gt.f32.partialorder %v4129_v56, 0.0  ;;  %v4137_v16 = vmul.f32 0.2, %v4129_v56  ;;  %v13032_v20 = vld [vmem:[#allocation61_spill] sm:$0xff] }
 0x3de   : > { %v1563_v61 = vadd.f32 %v1559_v44, %v1553_v11  ;;  %v3833_v57 = vadd.f32 %v3829_v43, %v3727_v45  ;;  %v3935_v4 = vmul.f32 %v12865_v46, %v3929_v60  ;;  %v10090_v36 = vadd.f32 %v9809_v9, %v9834_v37  ;;  %v13034_v9 = vld [vmem:[#allocation197_spill] sm:$0xff]  ;;  %v13044_v62 = vld [vmem:[#allocation252_spill] sm:$0xff] }
 0x3df   : > { %v10094_v38 = vadd.f32 %v13029_v8, %v13028_v25  ;;  %v4035_v59 = vsel %vm4027_vm14, %v13026_v32, %v4031_v0  ;;  %v4231_v63 = vmul.f32 %v13032_v20, %v13031_v55  ;;  %v1573_v13 = vsel %vm1565_vm12, %v1561_v26, %v1569_v58  ;;  %v13038_v15 = vld [vmem:[#allocation209_spill] sm:$0xff]  ;;  %v13045_v11 = vld [vmem:[#allocation468_spill] sm:$0xff]  ;;  %v13053_v25 = vld [vmem:[#allocation478_spill] sm:$0xff] }
 0x3e0   : > { %13027 = vst [vmem:[#allocation411_spill] sm:$0xff] %v10090_v36  ;;  %v1571_v31 = vmul.f32 0.2, %v1563_v61  ;;  %v3939_v34 = vadd.f32 %v3935_v4, %v3833_v57  ;;  %v4041_v46 = vmul.f32 %v13033_v27, %v4035_v59  ;;  %vm1567_vm0 = vcmp.gt.f32.partialorder %v1563_v61, 0.0  ;;  %v13050_v0 = vld [vmem:[#allocation340_spill] sm:$0xff]  ;;  %v13054_v8 = vld [vmem:[#allocation398_spill] sm:$0xff] }
 0x3e1   : > { %13030 = vst [vmem:[#allocation377_spill] sm:$0xff] %v10094_v38  ;;  %v2457_v18 = vunpack.c.0.s8 %v2453_v52  ;;  %v4141_v28 = vsel %vm4133_vm15, %v4129_v56, %v4137_v16  ;;  %v4235_v37 = vadd.f32 %v4231_v63, %v13034_v9  ;;  %v10105_v35 = vadd.f32 %v1475_v54, %v13036_v3  ;;  %v13042_v56 = vld [vmem:[#allocation336_spill] sm:$0xff]  ;;  %v13049_v52 = vld [vmem:[#allocation339_spill] sm:$0xff]  ;;  %v13052_v16 = vld [vmem:[#allocation262_spill] sm:$0xff]  ;;  %v4265_v63 = vpop.xlane.xlu0 %4264 }
 0x3e2   : > { %v4045_v12 = vadd.f32 %v4041_v46, %v3939_v34  ;;  %v4147_v33 = vmul.f32 %v13038_v15, %v4141_v28  ;;  %v1510_v26 = vmul.f32 %v13039_v42, %v13007_v50  ;;  %v10111_v14 = vmul.f32 %v13040_v1, %v1573_v13  ;;  %v13055_v59 = vld [vmem:[#allocation257_spill] sm:$0xff]  ;;  %v10141_v46 = vpop.permute.xlu1 %1914  ;;  %v13060_v9 = vld [vmem:[#allocation258_spill] sm:$0xff] }
 0x3e3   : > { %13037 = vst [vmem:[#allocation402_spill] sm:$0xff] %v10105_v35  ;;  %vm4239_vm1 = vcmp.gt.f32.partialorder %v4235_v37, 0.0  ;;  %v4243_v44 = vmul.f32 0.2, %v4235_v37  ;;  %v1520_v10 = vmul.f32 %v13042_v56, %v13009_v48  ;;  %v1575_v58 = vsel %vm1567_vm0, %v1563_v61, %v1571_v31  ;;  %v13051_v48 = vld [vmem:[#allocation235_spill] sm:$0xff]  ;;  %13059 = vst [vmem:[#allocation414_spill] sm:$0xff] %v10141_v46 }
 0x3e4   : > { %13041 = vst [vmem:[#allocation403_spill] sm:$0xff] %v10111_v14  ;;  %v4151_v45 = vadd.f32 %v4147_v33, %v4045_v12  ;;  %v1504_v54 = vadd.f32 %v13012_v23, %v13043_v22  ;;  %v1614_v43 = vmul.f32 %v13045_v11, %v13044_v62  ;;  %vm10119_vm2 = vcmp.ne.s32.totalorder %v2457_v18, 0  ;;  %v13057_v31 = vld [vmem:[#allocation343_spill] sm:$0xff]  ;;  %v13062_v15 = vld [vmem:[#allocation273_spill] sm:$0xff]  ;;  %v13078_v35 = vld [vmem:[#allocation72_spill] sm:$0xff] }
 0x3e5   : > { %v13046_v32 = vmov 0  ;;  %v4247_v50 = vsel %vm4239_vm1, %v4235_v37, %v4243_v44  ;;  %v1530_v60 = vmul.f32 %v13049_v52, %v13011_v30  ;;  %v1540_v57 = vmul.f32 %v13050_v0, %v13013_v21  ;;  %v13058_v30 = vld [vmem:[#allocation348_spill] sm:$0xff]  ;;  %v13061_v37 = vld [vmem:[#allocation481_spill] sm:$0xff]  ;;  %v13063_v33 = vld [vmem:[#allocation487_spill] sm:$0xff] }
 0x3e6   : > { %v13047_v32 = vsel %vm10119_vm2, 4294967295, %v13046_v32  ;;  %v4253_v61 = vmul.f32 %v13051_v48, %v4247_v50  ;;  %v1514_v4 = vadd.f32 %v1510_v26, %v1504_v54  ;;  %v1624_v23 = vmul.f32 %v13053_v25, %v13052_v16  ;;  %v13064_v44 = vld [vmem:[#allocation281_spill] sm:$0xff]  ;;  %v13066_v22 = vld [vmem:[#allocation399_spill] sm:$0xff]  ;;  %v13068_v50 = vld [vmem:[#allocation234_spill] sm:$0xff]  ;;  %v10175_v36 = vpop.permute.xlu1 %1918 }
 0x3e7   : > { %13048 = vst [vmem:[#allocation396_spill] sm:$0xff] %v13047_v32  ;;  %v1608_v55 = vadd.f32 %v13055_v59, %v13054_v8  ;;  %v10133_v13 = vmul.f32 %v13040_v1, %v1575_v58  ;;  %v1550_v34 = vmul.f32 %v13057_v31, %v13014_v7  ;;  %v1560_v27 = vmul.f32 %v13058_v30, %v13015_v49  ;;  %v13065_v58 = vld [vmem:[#allocation54_spill] sm:$0xff]  ;;  %v13069_v48 = vld [vmem:[#allocation256_spill] sm:$0xff] }
 0x3e8   : > { %v1615_v21 = vmul.f32 %v13002_v40, %v13044_v62  ;;  %v4257_v18 = vadd.f32 %v4253_v61, %v4151_v45  ;;  %v1524_v28 = vadd.f32 %v1520_v10, %v1514_v4  ;;  %v1634_v3 = vmul.f32 %v13061_v37, %v13060_v9  ;;  %v13070_v8 = vld [vmem:[#allocation282_spill] sm:$0xff]  ;;  %v13080_v46 = vld [vmem:[#allocation284_spill] sm:$0xff] }
 0x3e9   : > { %13056 = vst [vmem:[#allocation408_spill] sm:$0xff] %v10133_v13  ;;  %v1618_v12 = vadd.f32 %v1614_v43, %v1608_v55  ;;  %v1644_v26 = vmul.f32 %v13063_v33, %v13062_v15  ;;  %v1654_v7 = vmul.f32 %v13065_v58, %v13064_v44  ;;  %v1625_v49 = vmul.f32 %v13003_v19, %v13052_v16  ;;  %v13077_v13 = vld [vmem:[#allocation280_spill] sm:$0xff] }
 0x3ea   : > { %v1609_v54 = vadd.f32 %v13055_v59, %v13066_v22  ;;  %v10155_v45 = vsel %vm10119_vm2, %v4257_v18, -1e+30  ;;  %v1534_v10 = vadd.f32 %v1530_v60, %v1524_v28  ;;  %v4272_v43 = vsub.f32 %v13068_v50, %v4265_v63  ;;  %v4269_v63 = vpop.xlane.xlu0 %4268  ;;  %v13072_v50 = vld [vmem:[#allocation64_spill] sm:$0xff] }
 0x3eb   : > { %13067 = vst [vmem:[#allocation415_spill] sm:$0xff] %v10155_v45  ;;  %v1628_v62 = vadd.f32 %v1624_v23, %v1618_v12  ;;  %4266 = vmax.xlane.f32.xlu1 %v10155_v45  ;;  %v1664_v61 = vmul.f32 %v13032_v20, %v13069_v48  ;;  %v1635_v4 = vmul.f32 %v13004_v41, %v13060_v9  ;;  %v13071_v12 = vld [vmem:[#allocation300_spill] sm:$0xff] }
 0x3ec   : > { %v1619_v16 = vadd.f32 %v1615_v21, %v1609_v54  ;;  %v1719_v59 = vmul.f32 %v12891_v29, %v13070_v8  ;;  %v1544_v55 = vadd.f32 %v1540_v57, %v1534_v10  ;;  %v1645_v60 = vmul.f32 %v13005_v39, %v13062_v15  ;;  %v13073_v21 = vld [vmem:[#allocation386_spill] sm:$0xff]  ;;  %v13074_v54 = vld [vmem:[#allocation305_spill] sm:$0xff]  ;;  %v13075_v15 = vld [vmem:[#allocation272_spill] sm:$0xff] }
 0x3ed   : > { %v1638_v22 = vadd.f32 %v1634_v3, %v1628_v62  ;;  %v1655_v23 = vmul.f32 %v13006_v5, %v13064_v44  ;;  %v1665_v18 = vmul.f32 %v13008_v2, %v13069_v48  ;;  %v1729_v9 = vmul.f32 %v13072_v50, %v13071_v12  ;;  %v13076_v62 = vld [vmem:[#allocation71_spill] sm:$0xff] }
 0x3ee   : > { %v1629_v28 = vadd.f32 %v1625_v49, %v1619_v16  ;;  %v1713_v45 = vadd.f32 %v13074_v54, %v13073_v21  ;;  %v1554_v57 = vadd.f32 %v1550_v34, %v1544_v55  ;;  %v4276_v10 = vmul.f32 1.442695, %v4272_v43  ;;  %v13079_v49 = vld [vmem:[#allocation240_spill] sm:$0xff]  ;;  %v13082_v43 = vld [vmem:[#allocation307_spill] sm:$0xff] }
 0x3ef   : > { %v1648_v3 = vadd.f32 %v1644_v26, %v1638_v22  ;;  %v1739_v32 = vmul.f32 %v13076_v62, %v13075_v15  ;;  %v1749_v38 = vmul.f32 %v13078_v35, %v13077_v13  ;;  %v4274_v16 = vsub.f32 %v13079_v49, %v4269_v63  ;;  %v13083_v63 = vld [vmem:[#allocation400_spill] sm:$0xff] }
 0x3f0   : > { %v1639_v44 = vadd.f32 %v1635_v4, %v1629_v28  ;;  %v1723_v48 = vadd.f32 %v1719_v59, %v1713_v45  ;;  %v1564_v14 = vadd.f32 %v1560_v27, %v1554_v57  ;;  %v1759_v21 = vmul.f32 %v13081_v47, %v13080_v46 }
 0x3f1   : > { %v1658_v53 = vadd.f32 %v1654_v7, %v1648_v3  ;;  %v1721_v34 = vmul.f32 %v13002_v40, %v13070_v8  ;;  %v1769_v55 = vmul.f32 %v12743_v24, %v13082_v43  ;;  %v1731_v4 = vmul.f32 %v13003_v19, %v13071_v12  ;;  %v10194_v3 = vpop.permute.xlu1 %2016 }
 0x3f2   : > { %v1649_v26 = vadd.f32 %v1645_v60, %v1639_v44  ;;  %v1733_v22 = vadd.f32 %v1729_v9, %v1723_v48  ;;  %vm1568_vm3 = vcmp.gt.f32.partialorder %v1564_v14, 0.0  ;;  %v1572_v45 = vmul.f32 0.2, %v1564_v14 }
 0x3f3   : > { %v1668_v59 = vadd.f32 %v1664_v61, %v1658_v53  ;;  %v1715_v27 = vadd.f32 %v13074_v54, %v13083_v63  ;;  %5158 = vpow2.f32 %v4276_v10  ;;  %v10192_v57 = vmul.f32 1.442695, %v4274_v16 }
 0x3f4   : > { %v1659_v7 = vadd.f32 %v1655_v23, %v1649_v26  ;;  %v1743_v28 = vadd.f32 %v1739_v32, %v1733_v22  ;;  %v1741_v9 = vmul.f32 %v13004_v41, %v13075_v15  ;;  %v1751_v44 = vmul.f32 %v13005_v39, %v13077_v13 }
 0x3f5   : > { %13084 = vst [vmem:[#allocation406_spill] sm:$0xff] %v10192_v57  ;;  %v1676_v60 = vmul.f32 0.2, %v1668_v59  ;;  %v1725_v48 = vadd.f32 %v1721_v34, %v1715_v27  ;;  %v1576_v49 = vsel %vm1568_vm3, %v1564_v14, %v1572_v45  ;;  %vm1672_vm5 = vcmp.gt.f32.partialorder %v1668_v59, 0.0  ;;  %v10219_v27 = vpop.permute.xlu1 %2020  ;;  %v13103_v57 = vld [vmem:[#allocation322_spill] sm:$0xff] }
 0x3f6   : > { %v1669_v53 = vadd.f32 %v1665_v18, %v1659_v7  ;;  %v1753_v61 = vadd.f32 %v1749_v38, %v1743_v28  ;;  %v1761_v23 = vmul.f32 %v13006_v5, %v13080_v46  ;;  %v1771_v32 = vmul.f32 %v13008_v2, %v13082_v43 }
 0x3f7   : > { %v1735_v10 = vadd.f32 %v1731_v4, %v1725_v48  ;;  %v1722_v16 = vmul.f32 %v13039_v42, %v13070_v8  ;;  %v1732_v34 = vmul.f32 %v13042_v56, %v13071_v12  ;;  %v10209_v14 = vmul.f32 %v13040_v1, %v1576_v49  ;;  %v13090_v48 = vld [vmem:[#allocation291_spill] sm:$0xff] }
 0x3f8   : > { %vm1673_vm6 = vcmp.gt.f32.partialorder %v1669_v53, 0.0  ;;  %v1677_v26 = vmul.f32 0.2, %v1669_v53  ;;  %v1763_v22 = vadd.f32 %v1759_v21, %v1753_v61  ;;  %v1680_v38 = vsel %vm1672_vm5, %v1668_v59, %v1676_v60  ;;  %v13086_v59 = vld [vmem:[#allocation324_spill] sm:$0xff]  ;;  %v13087_v60 = vld [vmem:[#allocation278_spill] sm:$0xff] }
 0x3f9   : > { %13085 = vst [vmem:[#allocation407_spill] sm:$0xff] %v10209_v14  ;;  %v1745_v18 = vadd.f32 %v1741_v9, %v1735_v10  ;;  %v1716_v45 = vadd.f32 %v13074_v54, %v10040_v6  ;;  %v1742_v4 = vmul.f32 %v13049_v52, %v13075_v15  ;;  %v1752_v8 = vmul.f32 %v13050_v0, %v13077_v13  ;;  %v13093_v61 = vld [vmem:[#allocation304_spill] sm:$0xff] }
 0x3fa   : > { %v1773_v63 = vadd.f32 %v1769_v55, %v1763_v22  ;;  %v1762_v21 = vmul.f32 %v13057_v31, %v13080_v46  ;;  %v1681_v12 = vsel %vm1673_vm6, %v1669_v53, %v1677_v26  ;;  %v1826_v28 = vmul.f32 %v13045_v11, %v13086_v59  ;;  %v13089_v55 = vld [vmem:[#allocation283_spill] sm:$0xff] }
 0x3fb   : > { %v1755_v1 = vadd.f32 %v1751_v44, %v1745_v18  ;;  %v1726_v7 = vadd.f32 %v1722_v16, %v1716_v45  ;;  %v10224_v6 = vmul.f32 %v13087_v60, %v1680_v38  ;;  %v1772_v15 = vmul.f32 %v13058_v30, %v13082_v43  ;;  %v13094_v16 = vld [vmem:[#allocation327_spill] sm:$0xff]  ;;  %v13097_v45 = vld [vmem:[#allocation277_spill] sm:$0xff] }
 0x3fc   : > { %v1781_v54 = vmul.f32 0.2, %v1773_v63  ;;  %v1836_v13 = vmul.f32 %v13053_v25, %v13089_v55  ;;  %vm1777_vm7 = vcmp.gt.f32.partialorder %v1773_v63, 0.0  ;;  %v1820_v44 = vadd.f32 %v13090_v48, %v10055_v51 }
 0x3fd   : > { %13088 = vst [vmem:[#allocation410_spill] sm:$0xff] %v10224_v6  ;;  %v1765_v46 = vadd.f32 %v1761_v23, %v1755_v1  ;;  %v1736_v9 = vadd.f32 %v1732_v34, %v1726_v7  ;;  %v10232_v49 = vpop.eup %5158  ;;  %v10235_v53 = vmul.f32 %v13087_v60, %v1681_v12  ;;  %v1846_v10 = vmul.f32 %v13061_v37, %v13093_v61  ;;  %v13095_v34 = vld [vmem:[#allocation260_spill] sm:$0xff]  ;;  %v10253_v60 = vpop.permute.xlu1 %2118 }
 0x3fe   : > { %13091 = vst [vmem:[#allocation419_spill] sm:$0xff] %v10232_v49  ;;  %v1856_v43 = vmul.f32 %v13063_v33, %v13094_v16  ;;  %v1827_v26 = vmul.f32 %v13002_v40, %v13086_v59  ;;  %v1866_v38 = vmul.f32 %v13065_v58, %v13095_v34  ;;  %v1830_v51 = vadd.f32 %v1826_v28, %v1820_v44  ;;  %v13099_v44 = vld [vmem:[#allocation335_spill] sm:$0xff]  ;;  %v13102_v49 = vld [vmem:[#allocation345_spill] sm:$0xff] }
 0x3ff   : > { %13092 = vst [vmem:[#allocation423_spill] sm:$0xff] %v10235_v53  ;;  %v1775_v22 = vadd.f32 %v1771_v32, %v1765_v46  ;;  %v1746_v23 = vadd.f32 %v1742_v4, %v1736_v9  ;;  %v10245_v18 = vsel %vm1777_vm7, %v1773_v63, %v1781_v54  ;;  %v1876_v12 = vmul.f32 %v13032_v20, %v13097_v45  ;;  %v13098_v9 = vld [vmem:[#allocation318_spill] sm:$0xff] }
 0x400   : > { %13096 = vst [vmem:[#allocation413_spill] sm:$0xff] %v10245_v18  ;;  %v1837_v1 = vmul.f32 %v13003_v19, %v13089_v55  ;;  %v1821_v7 = vadd.f32 %v13090_v48, %v10079_v17  ;;  %v1840_v32 = vadd.f32 %v1836_v13, %v1830_v51  ;;  %v1847_v4 = vmul.f32 %v13004_v41, %v13093_v61  ;;  %v13101_v51 = vld [vmem:[#allocation387_spill] sm:$0xff] }
 0x401   : > { %v1756_v59 = vadd.f32 %v1752_v8, %v1746_v23  ;;  %v1857_v63 = vmul.f32 %v13005_v39, %v13094_v16  ;;  %v1783_v28 = vmul.f32 0.2, %v1775_v22  ;;  %v1867_v54 = vmul.f32 %v13006_v5, %v13095_v34  ;;  %v13100_v23 = vld [vmem:[#allocation297_spill] sm:$0xff] }
 0x402   : > { %v1831_v46 = vadd.f32 %v1827_v26, %v1821_v7  ;;  %v1931_v55 = vmul.f32 %v12891_v29, %v13098_v9  ;;  %vm1779_vm8 = vcmp.gt.f32.partialorder %v1775_v22, 0.0  ;;  %v1850_v48 = vadd.f32 %v1846_v10, %v1840_v32 }
 0x403   : > { %v1766_v17 = vadd.f32 %v1762_v21, %v1756_v59  ;;  %v1877_v8 = vmul.f32 %v13008_v2, %v13097_v45  ;;  %v1941_v61 = vmul.f32 %v13072_v50, %v13099_v44  ;;  %v1951_v16 = vmul.f32 %v13076_v62, %v13100_v23 }
 0x404   : > { %v1841_v13 = vadd.f32 %v1837_v1, %v1831_v46  ;;  %v1925_v34 = vadd.f32 %v13102_v49, %v13101_v51  ;;  %v1860_v7 = vadd.f32 %v1856_v43, %v1850_v48  ;;  %v1961_v14 = vmul.f32 %v13078_v35, %v13103_v57  ;;  %v13105_v1 = vld [vmem:[#allocation330_spill] sm:$0xff]  ;;  %v10279_v46 = vpop.permute.xlu1 %2126  ;;  %v13108_v51 = vld [vmem:[#allocation279_spill] sm:$0xff] }
 0x405   : > { %v1776_v26 = vadd.f32 %v1772_v15, %v1766_v17  ;;  %v1933_v21 = vmul.f32 %v13002_v40, %v13098_v9  ;;  %v10275_v10 = vsel %vm1779_vm8, %v1775_v22, %v1783_v28  ;;  %v1971_v59 = vmul.f32 %v13081_v47, %v13105_v1  ;;  %13106 = vst [vmem:[#allocation425_spill] sm:$0xff] %v10279_v46  ;;  %v13107_v43 = vld [vmem:[#allocation414_spill] sm:$0xff] }
 0x406   : > { %13104 = vst [vmem:[#allocation418_spill] sm:$0xff] %v10275_v10  ;;  %v1851_v45 = vadd.f32 %v1847_v4, %v1841_v13  ;;  %v1935_v32 = vadd.f32 %v1931_v55, %v1925_v34  ;;  %v1870_v18 = vadd.f32 %v1866_v38, %v1860_v7  ;;  %v1943_v15 = vmul.f32 %v13003_v19, %v13099_v44 }
 0x407   : > { %v1784_v53 = vmul.f32 0.2, %v1776_v26  ;;  %v1927_v17 = vadd.f32 %v13102_v49, %v13107_v43  ;;  %vm1780_vm9 = vcmp.gt.f32.partialorder %v1776_v26, 0.0  ;;  %v1981_v22 = vmul.f32 %v12743_v24, %v13108_v51 }
 0x408   : > { %v1861_v48 = vadd.f32 %v1857_v63, %v1851_v45  ;;  %v1945_v4 = vadd.f32 %v1941_v61, %v1935_v32  ;;  %v1953_v28 = vmul.f32 %v13004_v41, %v13100_v23  ;;  %v1963_v55 = vmul.f32 %v13005_v39, %v13103_v57 }
 0x409   : > { %v1973_v38 = vmul.f32 %v13006_v5, %v13105_v1  ;;  %v1937_v13 = vadd.f32 %v1933_v21, %v1927_v17  ;;  %v10293_v34 = vadd.f32 %v1876_v12, %v1870_v18  ;;  %v1934_v63 = vmul.f32 %v13039_v42, %v13098_v9  ;;  %v13112_v21 = vld [vmem:[#allocation319_spill] sm:$0xff]  ;;  %v13113_v17 = vld [vmem:[#allocation341_spill] sm:$0xff] }
 0x40a   : > { %v1871_v7 = vadd.f32 %v1867_v54, %v1861_v48  ;;  %v1955_v43 = vadd.f32 %v1951_v16, %v1945_v4  ;;  %v10297_v45 = vsel %vm1780_vm9, %v1776_v26, %v1784_v53  ;;  %v1983_v61 = vmul.f32 %v13008_v2, %v13108_v51  ;;  %v10309_v54 = vpop.permute.xlu1 %2130  ;;  %v13111_v26 = vld [vmem:[#allocation325_spill] sm:$0xff] }
 0x40b   : > { %13109 = vst [vmem:[#allocation417_spill] sm:$0xff] %v10297_v45  ;;  %v1947_v32 = vadd.f32 %v1943_v15, %v1937_v13  ;;  %v1944_v10 = vmul.f32 %v13042_v56, %v13099_v44  ;;  %v1954_v18 = vmul.f32 %v13049_v52, %v13100_v23  ;;  %v1928_v12 = vadd.f32 %v13102_v49, %v10175_v36 }
 0x40c   : > { %v10303_v6 = vadd.f32 %v1877_v8, %v1871_v7  ;;  %v1965_v46 = vadd.f32 %v1961_v14, %v1955_v43  ;;  %v1964_v9 = vmul.f32 %v13050_v0, %v13103_v57  ;;  %v1974_v16 = vmul.f32 %v13057_v31, %v13105_v1  ;;  %v13114_v1 = vld [vmem:[#allocation353_spill] sm:$0xff] }
 0x40d   : > { %v1957_v53 = vadd.f32 %v1953_v28, %v1947_v32  ;;  %v2038_v8 = vmul.f32 %v13045_v11, %v13111_v26  ;;  %v10318_v14 = vmul.f32 0.2, %v10293_v34  ;;  %v1984_v23 = vmul.f32 %v13058_v30, %v13108_v51 }
 0x40e   : > { %13110 = vst [vmem:[#allocation424_spill] sm:$0xff] %v10303_v6  ;;  %v1975_v44 = vadd.f32 %v1971_v59, %v1965_v46  ;;  %v1938_v36 = vadd.f32 %v1934_v63, %v1928_v12  ;;  %v2048_v15 = vmul.f32 %v13053_v25, %v13112_v21  ;;  %v2058_v57 = vmul.f32 %v13061_v37, %v13113_v17  ;;  %v13117_v46 = vld [vmem:[#allocation344_spill] sm:$0xff]  ;;  %v13119_v12 = vld [vmem:[#allocation306_spill] sm:$0xff] }
 0x40f   : > { %v1967_v49 = vadd.f32 %v1963_v55, %v1957_v53  ;;  %v2032_v48 = vadd.f32 %v13114_v1, %v10194_v3  ;;  %v10329_v4 = vmul.f32 0.2, %v10303_v6  ;;  %v2068_v51 = vmul.f32 %v13063_v33, %v13117_v46  ;;  %v13118_v55 = vld [vmem:[#allocation354_spill] sm:$0xff]  ;;  %v2229_v53 = vpop.permute.xlu1 %2228 }
 0x410   : > { %v10331_v28 = vadd.f32 %v1981_v22, %v1975_v44  ;;  %v1948_v59 = vadd.f32 %v1944_v10, %v1938_v36  ;;  %v2078_v7 = vmul.f32 %v13065_v58, %v13118_v55  ;;  %v2039_v63 = vmul.f32 %v13002_v40, %v13111_v26 }
 0x411   : > { %13115 = vst [vmem:[#allocation422_spill] sm:$0xff] %v10329_v4  ;;  %v1977_v13 = vadd.f32 %v1973_v38, %v1967_v49  ;;  %v2042_v43 = vadd.f32 %v2038_v8, %v2032_v48  ;;  %v2088_v3 = vmul.f32 %v13032_v20, %v13119_v12  ;;  %v2049_v22 = vmul.f32 %v13003_v19, %v13112_v21  ;;  %v13122_v21 = vld [vmem:[#allocation374_spill] sm:$0xff] }
 0x412   : > { %13116 = vst [vmem:[#allocation430_spill] sm:$0xff] %v10331_v28  ;;  %v1958_v32 = vadd.f32 %v1954_v18, %v1948_v59  ;;  %v2059_v10 = vmul.f32 %v13004_v41, %v13113_v17  ;;  %v2069_v8 = vmul.f32 %v13005_v39, %v13117_v46  ;;  %v2033_v26 = vadd.f32 %v13114_v1, %v10219_v27  ;;  %v13123_v59 = vld [vmem:[#allocation361_spill] sm:$0xff]  ;;  %v13124_v27 = vld [vmem:[#allocation360_spill] sm:$0xff] }
 0x413   : > { %v10345_v44 = vadd.f32 %v1983_v61, %v1977_v13  ;;  %v2052_v38 = vadd.f32 %v2048_v15, %v2042_v43  ;;  %v10352_v18 = vmul.f32 0.2, %v10331_v28  ;;  %v2079_v49 = vmul.f32 %v13006_v5, %v13118_v55  ;;  %v13125_v43 = vld [vmem:[#allocation365_spill] sm:$0xff]  ;;  %v13126_v55 = vld [vmem:[#allocation366_spill] sm:$0xff]  ;;  %v2233_v28 = vpop.permute.xlu1 %2232 }
 0x414   : > { %v1968_v36 = vadd.f32 %v1964_v9, %v1958_v32  ;;  %v2143_v17 = vmul.f32 %v12891_v29, %v13122_v21  ;;  %v2089_v61 = vmul.f32 %v13008_v2, %v13119_v12  ;;  %v2043_v15 = vadd.f32 %v2039_v63, %v2033_v26 }
 0x415   : > { %13120 = vst [vmem:[#allocation421_spill] sm:$0xff] %v10345_v44  ;;  %13121 = vst [vmem:[#allocation427_spill] sm:$0xff] %v10352_v18  ;;  %v2062_v48 = vadd.f32 %v2058_v57, %v2052_v38  ;;  %v2153_v46 = vmul.f32 %v13072_v50, %v13123_v59  ;;  %v2163_v1 = vmul.f32 %v13076_v62, %v13124_v27  ;;  %v10369_v45 = vmul.f32 0.2, %v10345_v44 }
 0x416   : > { %v1978_v13 = vadd.f32 %v1974_v16, %v1968_v36  ;;  %v2173_v9 = vmul.f32 %v13078_v35, %v13125_v43  ;;  %v2137_v32 = vadd.f32 %v13126_v55, %v10253_v60  ;;  %v2053_v38 = vadd.f32 %v2049_v22, %v2043_v15  ;;  %v13128_v16 = vld [vmem:[#allocation379_spill] sm:$0xff]  ;;  %v13129_v36 = vld [vmem:[#allocation310_spill] sm:$0xff] }
 0x417   : > { %13127 = vst [vmem:[#allocation428_spill] sm:$0xff] %v10369_v45  ;;  %v2072_v57 = vadd.f32 %v2068_v51, %v2062_v48  ;;  %v2145_v63 = vmul.f32 %v13002_v40, %v13122_v21  ;;  %v2183_v26 = vmul.f32 %v13081_v47, %v13128_v16  ;;  %v2193_v4 = vmul.f32 %v12743_v24, %v13129_v36  ;;  %v13130_v51 = vld [vmem:[#allocation425_spill] sm:$0xff] }
 0x418   : > { %v10373_v12 = vadd.f32 %v1984_v23, %v1978_v13  ;;  %v2147_v18 = vadd.f32 %v2143_v17, %v2137_v32  ;;  %v2063_v60 = vadd.f32 %v2059_v10, %v2053_v38  ;;  %v2155_v45 = vmul.f32 %v13003_v19, %v13123_v59 }
 0x419   : > { %v2082_v6 = vadd.f32 %v2078_v7, %v2072_v57  ;;  %v2139_v22 = vadd.f32 %v13126_v55, %v13130_v51  ;;  %v2165_v23 = vmul.f32 %v13004_v41, %v13124_v27  ;;  %v2175_v15 = vmul.f32 %v13005_v39, %v13125_v43 }
 0x41a   : > { %v2157_v48 = vadd.f32 %v2153_v46, %v2147_v18  ;;  %v2185_v13 = vmul.f32 %v13006_v5, %v13128_v16  ;;  %v2073_v17 = vadd.f32 %v2069_v8, %v2063_v60  ;;  %v2195_v7 = vmul.f32 %v13008_v2, %v13129_v36 }
 0x41b   : > { %v2149_v10 = vadd.f32 %v2145_v63, %v2139_v22  ;;  %v2146_v32 = vmul.f32 %v13039_v42, %v13122_v21  ;;  %v10394_v57 = vmul.f32 0.2, %v10373_v12  ;;  %v10396_v18 = vadd.f32 %v2088_v3, %v2082_v6  ;;  %v13131_v3 = vld [vmem:[#allocation329_spill] sm:$0xff]  ;;  %v2331_v22 = vpop.permute.xlu1 %2330 }
 0x41c   : > { %v2167_v46 = vadd.f32 %v2163_v1, %v2157_v48  ;;  %v2156_v38 = vmul.f32 %v13042_v56, %v13123_v59  ;;  %v2083_v51 = vadd.f32 %v2079_v49, %v2073_v17  ;;  %v2166_v8 = vmul.f32 %v13049_v52, %v13124_v27  ;;  %v13133_v48 = vld [vmem:[#allocation382_spill] sm:$0xff] }
 0x41d   : > { %v2159_v44 = vadd.f32 %v2155_v45, %v2149_v10  ;;  %v2140_v63 = vadd.f32 %v13126_v55, %v10309_v54  ;;  %v2176_v21 = vmul.f32 %v13050_v0, %v13125_v43  ;;  %v2186_v6 = vmul.f32 %v13057_v31, %v13128_v16  ;;  %v13132_v55 = vld [vmem:[#allocation367_spill] sm:$0xff] }
 0x41e   : > { %v2177_v60 = vadd.f32 %v2173_v9, %v2167_v46  ;;  %v2250_v1 = vmul.f32 %v13045_v11, %v13131_v3  ;;  %v10410_v59 = vadd.f32 %v2089_v61, %v2083_v51  ;;  %v2196_v49 = vmul.f32 %v13058_v30, %v13129_v36  ;;  %v13134_v11 = vld [vmem:[#allocation352_spill] sm:$0xff] }
 0x41f   : > { %v2169_v45 = vadd.f32 %v2165_v23, %v2159_v44  ;;  %v2150_v27 = vadd.f32 %v2146_v32, %v2140_v63  ;;  %v10415_v54 = vmul.f32 0.2, %v10396_v18  ;;  %v2260_v43 = vmul.f32 %v13053_v25, %v13132_v55  ;;  %v13135_v46 = vld [vmem:[#allocation388_spill] sm:$0xff]  ;;  %v13136_v23 = vld [vmem:[#allocation391_spill] sm:$0xff]  ;;  %v13137_v32 = vld [vmem:[#allocation373_spill] sm:$0xff] }
 0x420   : > { %v2187_v9 = vadd.f32 %v2183_v26, %v2177_v60  ;;  %v2244_v16 = vadd.f32 %v13133_v48, %v2229_v53  ;;  %v2270_v61 = vmul.f32 %v13061_v37, %v13134_v11  ;;  %v2280_v44 = vmul.f32 %v13063_v33, %v13135_v46 }
 0x421   : > { %v2179_v17 = vadd.f32 %v2175_v15, %v2169_v45  ;;  %v2160_v10 = vadd.f32 %v2156_v38, %v2150_v27  ;;  %v2290_v36 = vmul.f32 %v13065_v58, %v13136_v23  ;;  %v2300_v51 = vmul.f32 %v13032_v20, %v13137_v32 }
 0x422   : > { %v2254_v26 = vadd.f32 %v2250_v1, %v2244_v16  ;;  %v2251_v25 = vmul.f32 %v13002_v40, %v13131_v3  ;;  %vm1884_vm12 = vcmp.gt.f32.partialorder %v10293_v34, 0.0  ;;  %v10432_v53 = vmul.f32 0.2, %v10410_v59  ;;  %v2339_v1 = vpop.permute.xlu1 %2338  ;;  %v13140_v16 = vld [vmem:[#allocation385_spill] sm:$0xff] }
 0x423   : > { %v10434_v15 = vadd.f32 %v2193_v4, %v2187_v9  ;;  %v2189_v37 = vadd.f32 %v2185_v13, %v2179_v17  ;;  %v2170_v38 = vadd.f32 %v2166_v8, %v2160_v10  ;;  %v2261_v58 = vmul.f32 %v13003_v19, %v13132_v55  ;;  %v13138_v55 = vld [vmem:[#allocation390_spill] sm:$0xff]  ;;  %v13141_v10 = vld [vmem:[#allocation383_spill] sm:$0xff] }
 0x424   : > { %v2264_v33 = vadd.f32 %v2260_v43, %v2254_v26  ;;  %v2271_v63 = vmul.f32 %v13004_v41, %v13134_v11  ;;  %v2245_v60 = vadd.f32 %v13133_v48, %v2233_v28  ;;  %v2281_v45 = vmul.f32 %v13005_v39, %v13135_v46 }
 0x425   : > { %v2180_v3 = vadd.f32 %v2176_v21, %v2170_v38  ;;  %v2291_v4 = vmul.f32 %v13006_v5, %v13136_v23  ;;  %v2301_v13 = vmul.f32 %v13008_v2, %v13137_v32  ;;  %v10447_v8 = vadd.f32 %v2195_v7, %v2189_v37  ;;  %v13139_v21 = vld [vmem:[#allocation392_spill] sm:$0xff]  ;;  %v13142_v23 = vld [vmem:[#allocation393_spill] sm:$0xff] }
 0x426   : > { %v2274_v27 = vadd.f32 %v2270_v61, %v2264_v33  ;;  %v2255_v9 = vadd.f32 %v2251_v25, %v2245_v60  ;;  %v2355_v43 = vmul.f32 %v12891_v29, %v13138_v55  ;;  %v2365_v48 = vmul.f32 %v13072_v50, %v13139_v21  ;;  %v13143_v32 = vld [vmem:[#allocation368_spill] sm:$0xff] }
 0x427   : > { %v2190_v28 = vadd.f32 %v2186_v6, %v2180_v3  ;;  %v2375_v17 = vmul.f32 %v13076_v62, %v13140_v16  ;;  %v2385_v11 = vmul.f32 %v13078_v35, %v13141_v10  ;;  %v2395_v61 = vmul.f32 %v13081_v47, %v13142_v23  ;;  %v13146_v3 = vld [vmem:[#allocation349_spill] sm:$0xff] }
 0x428   : > { %v2284_v46 = vadd.f32 %v2280_v44, %v2274_v27  ;;  %v2265_v7 = vadd.f32 %v2261_v58, %v2255_v9  ;;  %v2349_v26 = vadd.f32 %v13143_v32, %v2331_v22  ;;  %v2357_v50 = vmul.f32 %v13002_v40, %v13138_v55  ;;  %v2343_v22 = vpop.permute.xlu1 %2342  ;;  %v13147_v27 = vld [vmem:[#allocation410_spill] sm:$0xff] }
 0x429   : > { %v10464_v29 = vadd.f32 %v2196_v49, %v2190_v28  ;;  %v2367_v62 = vmul.f32 %v13003_v19, %v13139_v21  ;;  %v2377_v35 = vmul.f32 %v13004_v41, %v13140_v16  ;;  %v2387_v47 = vmul.f32 %v13005_v39, %v13141_v10 }
 0x42a   : > { %v2294_v6 = vadd.f32 %v2290_v36, %v2284_v46  ;;  %v2275_v44 = vadd.f32 %v2271_v63, %v2265_v7  ;;  %v2359_v25 = vadd.f32 %v2355_v43, %v2349_v26  ;;  %v2397_v49 = vmul.f32 %v13006_v5, %v13142_v23  ;;  %v13144_v63 = vld [vmem:[#allocation409_spill] sm:$0xff] }
 0x42b   : > { %v2351_v40 = vadd.f32 %v13143_v32, %v2339_v1  ;;  %v2358_v19 = vmul.f32 %v13039_v42, %v13138_v55  ;;  %v2368_v41 = vmul.f32 %v13042_v56, %v13139_v21  ;;  %v2378_v39 = vmul.f32 %v13049_v52, %v13140_v16  ;;  %v13145_v42 = vld [vmem:[#allocation288_spill] sm:$0xff]  ;;  %v13148_v55 = vld [vmem:[#allocation311_spill] sm:$0xff] }
 0x42c   : > { %v2304_v36 = vadd.f32 %v2300_v51, %v2294_v6  ;;  %v2285_v37 = vadd.f32 %v2281_v45, %v2275_v44  ;;  %v2369_v38 = vadd.f32 %v2365_v48, %v2359_v25  ;;  %v2388_v5 = vmul.f32 %v13050_v0, %v13141_v10 }
 0x42d   : > { %v2361_v33 = vadd.f32 %v2357_v50, %v2351_v40  ;;  %v2352_v58 = vadd.f32 %v13143_v32, %v2343_v22  ;;  %v1584_v60 = vadd.f32 %v13145_v42, %v13144_v63  ;;  %v10493_v51 = vstv %s10451_s9  ;;  %v13152_v22 = vld [vmem:[#allocation424_spill] sm:$0xff]  ;;  %s5240_s9 = scalar_lea.vmem %s5239_s1, 1024 }
 0x42e   : > { %v2295_v1 = vadd.f32 %v2291_v4, %v2285_v37  ;;  %v2379_v56 = vadd.f32 %v2375_v17, %v2369_v38  ;;  %v1892_v52 = vsel %vm1884_vm12, %v10293_v34, %v10318_v14  ;;  %vm1883_vm13 = vcmp.gt.f32.partialorder %v13146_v3, 0.0  ;;  %v13149_v14 = vld [vmem:[#allocation356_spill] sm:$0xff]  ;;  %p5242_p4 = scmp.lt.s32.totalorder %s5240_s9, %s5234_s17 }
 0x42f   : > { %v2371_v0 = vadd.f32 %v2367_v62, %v2361_v33  ;;  %v2362_v45 = vadd.f32 %v2358_v19, %v2352_v58  ;;  %v1690_v9 = vadd.f32 %v13147_v27, %v1584_v60  ;;  %v1792_v4 = vmul.f32 %v10493_v51, %v13148_v55  ;;  %v13153_v33 = vld [vmem:[#allocation248_spill] sm:$0xff]  ;;  %v13154_v58 = vld [vmem:[#allocation403_spill] sm:$0xff]  ;;  %v13158_v27 = vld [vmem:[#allocation430_spill] sm:$0xff] }
 0x430   : > { %v2389_v43 = vadd.f32 %v2385_v11, %v2379_v56  ;;  %v10509_v28 = vmul.f32 %v13057_v31, %v13142_v23  ;;  %v10512_v34 = vstv %s10462_s4  ;;  %vm1990_vm14 = vcmp.gt.f32.partialorder %v13149_v14, 0.0  ;;  %v13150_v11 = vld [vmem:[#allocation359_spill] sm:$0xff]  ;;  %p5243_p5 = por %p5242_p4, %p5241_p12 }
 0x431   : > { %v2381_v21 = vadd.f32 %v2377_v35, %v2371_v0  ;;  %v2372_v48 = vadd.f32 %v2368_v41, %v2362_v45  ;;  %v1796_v16 = vadd.f32 %v1792_v4, %v1690_v9  ;;  %v1898_v17 = vmul.f32 %v10512_v34, %v1892_v52  ;;  %v13156_v52 = vld [vmem:[#allocation301_spill] sm:$0xff]  ;;  %v13157_v45 = vld [vmem:[#allocation326_spill] sm:$0xff]  ;;  %v13159_v9 = vld [vmem:[#allocation375_spill] sm:$0xff] }
 0x432   : > { %v10520_v10 = vadd.f32 %v2301_v13, %v2295_v1  ;;  %v1998_v31 = vsel %vm1990_vm14, %v13149_v14, %v13150_v11  ;;  %v10525_v46 = vstv %s10474_s5  ;;  %vm2096_vm15 = vcmp.gt.f32.partialorder %v10396_v18, 0.0  ;;  %v13151_v13 = vld [vmem:[#allocation381_spill] sm:$0xff]  ;;  %p5244_p6 = pnand %p5243_p5, %p5237_p7 }
 0x433   : > { %v2391_v7 = vadd.f32 %v2387_v47, %v2381_v21  ;;  %v2382_v23 = vadd.f32 %v2378_v39, %v2372_v48  ;;  %v1902_v32 = vadd.f32 %v1898_v17, %v1796_v16  ;;  %v2004_v26 = vmul.f32 %v10525_v46, %v1998_v31  ;;  %v13155_v1 = vld [vmem:[#allocation413_spill] sm:$0xff]  ;;  %v13162_v17 = vld [vmem:[#allocation362_spill] sm:$0xff] }
 0x434   : > { %v2104_v50 = vsel %vm2096_vm15, %v10396_v18, %v10415_v54  ;;  %v10532_v62 = vstv %s10485_s0  ;;  %vm2202_vm0 = vcmp.gt.f32.partialorder %v13151_v13, 0.0  ;;  %v2206_v35 = vmul.f32 0.2, %v13151_v13  ;;  %v13160_v4 = vld [vmem:[#allocation377_spill] sm:$0xff] }
 0x435   : > { %v2399_v6 = vadd.f32 %v2395_v61, %v2389_v43  ;;  %v10536_v44 = vadd.f32 %v2397_v49, %v2391_v7  ;;  %v2008_v25 = vadd.f32 %v2004_v26, %v1902_v32  ;;  %v2110_v47 = vmul.f32 %v10532_v62, %v2104_v50  ;;  %v13163_v32 = vld [vmem:[#allocation395_spill] sm:$0xff] }
 0x436   : > { %vm1885_vm1 = vcmp.gt.f32.partialorder %v13152_v22, 0.0  ;;  %v2210_v40 = vsel %vm2202_vm0, %v13151_v13, %v2206_v35  ;;  %v10542_v18 = vstv %s10499_s27  ;;  %vm2308_vm3 = vcmp.gt.f32.partialorder %v2304_v36, 0.0  ;;  %v13164_v13 = vld [vmem:[#allocation337_spill] sm:$0xff] }
 0x437   : > { %v2312_v54 = vmul.f32 0.2, %v2304_v36  ;;  %v10544_v19 = vadd.f32 %v2388_v5, %v2382_v23  ;;  %v2114_v41 = vadd.f32 %v2110_v47, %v2008_v25  ;;  %v2216_v37 = vmul.f32 %v10542_v18, %v2210_v40  ;;  %v13165_v47 = vld [vmem:[#allocation402_spill] sm:$0xff]  ;;  %v13166_v40 = vld [vmem:[#allocation408_spill] sm:$0xff] }
 0x438   : > { %v10548_v38 = vstv %s10505_s30  ;;  %v10551_v49 = vstv %s10515_s12  ;;  %v10554_v39 = vstv %s10517_s26  ;;  %v1583_v63 = vadd.f32 %v13154_v58, %v13153_v33 }
 0x439   : > { %v2316_v61 = vsel %vm2308_vm3, %v2304_v36, %v2312_v54  ;;  %v2220_v42 = vadd.f32 %v2216_v37, %v2114_v41  ;;  %v2406_v5 = vmul.f32 %v13032_v20, %v10551_v49  ;;  %v1791_v56 = vmul.f32 %v10493_v51, %v13155_v1  ;;  %v13161_v20 = vld [vmem:[#allocation427_spill] sm:$0xff]  ;;  %v13167_v41 = vld [vmem:[#allocation418_spill] sm:$0xff] }
 0x43a   : > { %v2322_v60 = vmul.f32 %v10548_v38, %v2316_v61  ;;  %v1689_v0 = vadd.f32 %v13156_v52, %v1583_v63  ;;  %v1891_v36 = vsel %vm1883_vm13, %v13146_v3, %v13157_v45  ;;  %vm1989_vm5 = vcmp.gt.f32.partialorder %v13158_v27, 0.0  ;;  %v13169_v1 = vld [vmem:[#allocation422_spill] sm:$0xff]  ;;  %v13170_v45 = vld [vmem:[#allocation421_spill] sm:$0xff] }
 0x43b   : > { %vm2095_vm6 = vcmp.gt.f32.partialorder %v13159_v9, 0.0  ;;  %v2410_v43 = vadd.f32 %v2406_v5, %v13160_v4  ;;  %v1897_v14 = vmul.f32 %v10512_v34, %v1891_v36  ;;  %v1997_v21 = vsel %vm1989_vm5, %v13158_v27, %v13161_v20 }
 0x43c   : > { %v2326_v55 = vadd.f32 %v2322_v60, %v2220_v42  ;;  %v1795_v48 = vadd.f32 %v1791_v56, %v1689_v0  ;;  %v2003_v16 = vmul.f32 %v10525_v46, %v1997_v21  ;;  %v2103_v11 = vsel %vm2095_vm6, %v13159_v9, %v13162_v17  ;;  %v13168_v60 = vld [vmem:[#allocation423_spill] sm:$0xff]  ;;  %v13171_v9 = vld [vmem:[#allocation428_spill] sm:$0xff] }
 0x43d   : > { %vm2201_vm7 = vcmp.gt.f32.partialorder %v10434_v15, 0.0  ;;  %vm2414_vm8 = vcmp.gt.f32.partialorder %v2410_v43, 0.0  ;;  %v2418_v3 = vmul.f32 0.2, %v2410_v43  ;;  %v2109_v31 = vmul.f32 %v10532_v62, %v2103_v11 }
 0x43e   : > { %v2205_v7 = vmul.f32 0.2, %v10434_v15  ;;  %v1901_v23 = vadd.f32 %v1897_v14, %v1795_v48  ;;  %vm2307_vm9 = vcmp.gt.f32.partialorder %v13163_v32, 0.0  ;;  %v2311_v26 = vmul.f32 0.2, %v13163_v32 }
 0x43f   : > { %v2405_v50 = vmul.f32 %v12743_v24, %v10551_v49  ;;  %vm1886_vm12 = vcmp.gt.f32.partialorder %v13164_v13, 0.0  ;;  %v2422_v35 = vsel %vm2414_vm8, %v2410_v43, %v2418_v3  ;;  %v1585_v54 = vadd.f32 %v13166_v40, %v13165_v47 }
 0x440   : > { %v2209_v25 = vsel %vm2201_vm7, %v10434_v15, %v2205_v7  ;;  %v1793_v37 = vmul.f32 %v10493_v51, %v13167_v41  ;;  %v2428_v61 = vmul.f32 %v10554_v39, %v2422_v35  ;;  %v2007_v33 = vadd.f32 %v2003_v16, %v1901_v23 }
 0x441   : > { %v2215_v58 = vmul.f32 %v10542_v18, %v2209_v25  ;;  %v2315_v63 = vsel %vm2307_vm9, %v13163_v32, %v2311_v26  ;;  %v2409_v42 = vadd.f32 %v2405_v50, %v2399_v6  ;;  %v1691_v5 = vadd.f32 %v13168_v60, %v1585_v54  ;;  %v13174_v32 = vld [vmem:[#allocation265_spill] sm:$0xff]  ;;  %v13181_v60 = vld [vmem:[#allocation342_spill] sm:$0xff] }
 0x442   : > { %v2321_v24 = vmul.f32 %v10548_v38, %v2315_v63  ;;  %v1893_v15 = vsel %vm1885_vm1, %v13152_v22, %v13169_v1  ;;  %v2432_v56 = vadd.f32 %v2428_v61, %v2326_v55  ;;  %v2113_v52 = vadd.f32 %v2109_v31, %v2007_v33  ;;  %v13175_v50 = vld [vmem:[#allocation417_spill] sm:$0xff]  ;;  %v13178_v33 = vld [vmem:[#allocation338_spill] sm:$0xff] }
 0x443   : > { %v1899_v0 = vmul.f32 %v10512_v34, %v1893_v15  ;;  %vm1991_vm13 = vcmp.gt.f32.partialorder %v13170_v45, 0.0  ;;  %vm2413_vm14 = vcmp.gt.f32.partialorder %v2409_v42, 0.0  ;;  %v2417_v36 = vmul.f32 0.2, %v2409_v42 }
 0x444   : > { %v1797_v27 = vadd.f32 %v1793_v37, %v1691_v5  ;;  %v1999_v4 = vsel %vm1991_vm13, %v13170_v45, %v13171_v9  ;;  %v10605_v43 = vsel %vm10119_vm2, %v2432_v56, -1e+30  ;;  %v2219_v14 = vadd.f32 %v2215_v58, %v2113_v52  ;;  %v13179_v58 = vld [vmem:[#allocation406_spill] sm:$0xff]  ;;  %v13182_v52 = vld [vmem:[#allocation384_spill] sm:$0xff] }
 0x445   : > { %v2005_v20 = vmul.f32 %v10525_v46, %v1999_v4  ;;  %vm2097_vm15 = vcmp.gt.f32.partialorder %v10410_v59, 0.0  ;;  %2470 = vmax.xlane.f32.xlu0 %v10605_v43  ;;  %v2421_v22 = vsel %vm2413_vm14, %v2409_v42, %v2417_v36  ;;  %vm2203_vm0 = vcmp.gt.f32.partialorder %v10447_v8, 0.0  ;;  %v13183_v36 = vld [vmem:[#allocation411_spill] sm:$0xff] }
 0x446   : > { %v1903_v55 = vadd.f32 %v1899_v0, %v1797_v27  ;;  %v2105_v21 = vsel %vm2097_vm15, %v10410_v59, %v10432_v53  ;;  %v2325_v48 = vadd.f32 %v2321_v24, %v2219_v14  ;;  %v2427_v16 = vmul.f32 %v10554_v39, %v2421_v22  ;;  %v13173_v53 = vld [vmem:[#allocation378_spill] sm:$0xff] }
 0x447   : > { %v2111_v17 = vmul.f32 %v10532_v62, %v2105_v21  ;;  %v2207_v11 = vmul.f32 0.2, %v10447_v8  ;;  %vm2309_vm1 = vcmp.gt.f32.partialorder %v10520_v10, 0.0  ;;  %v2313_v31 = vmul.f32 0.2, %v10520_v10  ;;  %v13180_v24 = vld [vmem:[#allocation334_spill] sm:$0xff] }
 0x448   : > { %v2009_v3 = vadd.f32 %v2005_v20, %v1903_v55  ;;  %v2407_v7 = vmul.f32 %v13008_v2, %v10551_v49  ;;  %v2431_v23 = vadd.f32 %v2427_v16, %v2325_v48  ;;  %v1480_v26 = vadd.f32 %v13174_v32, %v13173_v53 }
 0x449   : > { %v2211_v59 = vsel %vm2203_vm0, %v10447_v8, %v2207_v11  ;;  %v1794_v35 = vmul.f32 %v10493_v51, %v13175_v50  ;;  %v2317_v40 = vsel %vm2309_vm1, %v10520_v10, %v2313_v31  ;;  %v13177_v8 = vld [vmem:[#allocation407_spill] sm:$0xff]  ;;  %v1894_v51 = vsel %vm1886_vm12, %v13164_v13, %v13178_v33 }
 0x44a   : > { %v2115_v25 = vadd.f32 %v2111_v17, %v2009_v3  ;;  %v2217_v47 = vmul.f32 %v10542_v18, %v2211_v59  ;;  %v2411_v54 = vadd.f32 %v2407_v7, %v10536_v44  ;;  %v10630_v37 = vsel %vm8849_vm10, %v2431_v23, -1e+30  ;;  %v13185_v3 = vld [vmem:[#allocation419_spill] sm:$0xff]  ;;  %v13187_v59 = vld [vmem:[#allocation364_spill] sm:$0xff] }
 0x44b   : > { %v2323_v2 = vmul.f32 %v10548_v38, %v2317_v40  ;;  %v1586_v61 = vadd.f32 %v13177_v8, %v1480_v26  ;;  %5160 = vpow2.f32 %v13179_v58  ;;  %v2402_v10 = vadd.f32 %v10509_v28, %v10544_v19  ;;  %2468 = vmax.xlane.f32.xlu1 %v10630_v37  ;;  %v13188_v26 = vld [vmem:[#allocation415_spill] sm:$0xff] }
 0x44c   : > { %vm2415_vm3 = vcmp.gt.f32.partialorder %v2411_v54, 0.0  ;;  %v2419_v44 = vmul.f32 0.2, %v2411_v54  ;;  %v2221_v63 = vadd.f32 %v2217_v47, %v2115_v25  ;;  %vm1992_vm5 = vcmp.gt.f32.partialorder %v10373_v12, 0.0 }
 0x44d   : > { %v1692_v42 = vadd.f32 %v13180_v24, %v1586_v61  ;;  %vm2098_vm6 = vcmp.gt.f32.partialorder %v13181_v60, 0.0  ;;  %v1900_v1 = vmul.f32 %v10512_v34, %v1894_v51  ;;  %v2000_v13 = vsel %vm1992_vm5, %v10373_v12, %v10394_v57 }
 0x44e   : > { %v2423_v5 = vsel %vm2415_vm3, %v2411_v54, %v2419_v44  ;;  %vm2204_vm7 = vcmp.gt.f32.partialorder %v10464_v29, 0.0  ;;  %v2327_v28 = vadd.f32 %v2323_v2, %v2221_v63  ;;  %v2006_v56 = vmul.f32 %v10525_v46, %v2000_v13 }
 0x44f   : > { %v2429_v19 = vmul.f32 %v10554_v39, %v2423_v5  ;;  %v1798_v15 = vadd.f32 %v1794_v35, %v1692_v42  ;;  %v2106_v0 = vsel %vm2098_vm6, %v13181_v60, %v13182_v52  ;;  %v2208_v45 = vmul.f32 0.2, %v10464_v29 }
 0x450   : > { %v2314_v27 = vmul.f32 0.2, %v13183_v36  ;;  %v2408_v34 = vmul.f32 %v13058_v30, %v10551_v49  ;;  %vm2310_vm8 = vcmp.gt.f32.partialorder %v13183_v36, 0.0  ;;  %v2112_v22 = vmul.f32 %v10532_v62, %v2106_v0 }
 0x451   : > { %v2433_v9 = vadd.f32 %v2429_v19, %v2327_v28  ;;  %v1904_v12 = vadd.f32 %v1900_v1, %v1798_v15  ;;  %v2212_v57 = vsel %vm2204_vm7, %v10464_v29, %v2208_v45  ;;  %v10669_v31 = vsel %vm8849_vm10, %v13185_v3, 0.0 }
 0x452   : > { %v2412_v4 = vadd.f32 %v2408_v34, %v2402_v10  ;;  %v2218_v55 = vmul.f32 %v10542_v18, %v2212_v57  ;;  %v2318_v21 = vsel %vm2310_vm8, %v13183_v36, %v2314_v27 }
 0x453   : > { %v2466_v46 = vsel %vm8987_vm4, %v2433_v9, -1e+30  ;;  %v2010_v20 = vadd.f32 %v2006_v56, %v1904_v12  ;;  %v2324_v29 = vmul.f32 %v10548_v38, %v2318_v21 }
 0x454   : > { %2472 = vmax.xlane.f32.xlu1 %v2466_v46  ;;  %vm2416_vm9 = vcmp.gt.f32.partialorder %v2412_v4, 0.0  ;;  %v2420_v30 = vmul.f32 0.2, %v2412_v4 }
 0x455   : > { %v2116_v49 = vadd.f32 %v2112_v22, %v2010_v20  ;;  %v5161_v48 = vpop.eup %5160 }
 0x456   : > { %v2424_v16 = vsel %vm2416_vm9, %v2412_v4, %v2420_v30  ;;  %v10674_v7 = vsel %vm8987_vm4, %v5161_v48, 0.0 }
 0x457   : > { %v2222_v17 = vadd.f32 %v2218_v55, %v2116_v49  ;;  %v2430_v11 = vmul.f32 %v10554_v39, %v2424_v16  ;;  %v4271_v39 = vpop.xlane.xlu0 %4270 }
 0x458   : > { %4288 = vadd.xlane.f32.xlu1 %v10669_v31  ;;  %v4275_v53 = vsub.f32 %v13187_v59, %v4271_v39 }
 0x459   : > { %v2328_v62 = vadd.f32 %v2324_v29, %v2222_v17 }
 0x45a   : > { %v4282_v35 = vmul.f32 1.442695, %v4275_v53 }
 0x45b   : > { %v2434_v18 = vadd.f32 %v2430_v11, %v2328_v62 }
 0x45c   : > { %4292 = vadd.xlane.f32.xlu1 %v10674_v7 }
 0x45d   : > { %v2467_v38 = vsel %vm9682_vm11, %v2434_v18, -1e+30 }
 0x45e   : > { %2474 = vmax.xlane.f32.xlu0 %v2467_v38 }
 0x478   : > { %v4267_v32 = vpop.xlane.xlu1 %4266 }
 0x479   : > { %v4273_v50 = vsub.f32 %v13188_v26, %v4267_v32 }
 0x47b   : > { %v4278_v25 = vmul.f32 1.442695, %v4273_v50 }
 0x47d   : > { %5162 = vpow2.f32 %v4278_v25 }
 0x47e   : > { %5164 = vpow2.f32 %v4282_v35 }
 0x487   : > { %v5163_v47 = vpop.eup %5162 }
 0x488   : > { %v4285_v40 = vsel %vm10119_vm2, %v5163_v47, 0.0  ;;  %v5165_v54 = vpop.eup %5164 }
 0x489   : > { %4290 = vadd.xlane.f32.xlu0 %v4285_v40  ;;  %v4287_v2 = vsel %vm9682_vm11, %v5165_v54, 0.0 }
 0x48d   : > { %4294 = vadd.xlane.f32.xlu0 %v4287_v2 }
 0x4d2   : > { %v2471_v8 = vpop.xlane.xlu0 %2470 }
 0x4d3   : > { %v2477_v61 = vsub.f32 %v10605_v43, %v2471_v8  ;;  %v4825_v8 = vld [vmem:[%s10768_s10] ss:$0 sm:$0xff] }
 0x4d5   : > { %v2482_v33 = vmul.f32 1.442695, %v2477_v61 }
 0x4d7   : > { %5166 = vpow2.f32 %v2482_v33 }
 0x4d8   : > { %v2469_v51 = vpop.xlane.xlu1 %2468 }
 0x4d9   : > { %v2476_v58 = vsub.f32 %v10630_v37, %v2469_v51 }
 0x4db   : > { %v2480_v10 = vmul.f32 1.442695, %v2476_v58 }
 0x4dd   : > { %5168 = vpow2.f32 %v2480_v10 }
 0x4e1   : > { %v2473_v44 = vpop.xlane.xlu1 %2472  ;;  %v5167_v63 = vpop.eup %5166 }
 0x4e2   : > { %v2478_v24 = vsub.f32 %v2466_v46, %v2473_v44  ;;  %v2489_v42 = vsel %vm10119_vm2, %v5167_v63, 0.0 }
 0x4e3   : > { %2494 = vadd.xlane.f32.xlu0 %v2489_v42 }
 0x4e4   : > { %v2484_v60 = vmul.f32 1.442695, %v2478_v24 }
 0x4e5   : > { %v4289_v56 = vpop.xlane.xlu1 %4288 }
 0x4e6   : > { %5170 = vpow2.f32 %v2484_v60  ;;  %v4296_v52 = vmax.f32 %v4289_v56, 1e-20 }
 0x4e7   : > { %v5169_v5 = vpop.eup %5168 }
 0x4e8   : > { %v2488_v43 = vsel %vm8849_vm10, %v5169_v5, 0.0  ;;  %vm4376_vm10 = vcmask 130048  }
 0x4e9   : > { %2492 = vadd.xlane.f32.xlu1 %v2488_v43  ;;  %v4293_v0 = vpop.xlane.xlu1 %4292 }
 0x4ea   : > { %v4298_v45 = vmax.f32 %v4293_v0, 1e-20 }
 0x4eb   : > { %v2475_v1 = vpop.xlane.xlu0 %2474 }
 0x4ec   : > { %v2479_v13 = vsub.f32 %v2467_v38, %v2475_v1 }
 0x4ee   : > { %v2486_v28 = vmul.f32 1.442695, %v2479_v13 }
 0x4f0   : > { %v5171_v37 = vpop.eup %5170  ;;  %5172 = vpow2.f32 %v2486_v28 }
 0x4f1   : > { %v2490_v19 = vsel %vm8987_vm4, %v5171_v37, 0.0  ;;  %5174 = vrcp.f32 %v4296_v52  ;;  %vm4381_vm4 = vcmask 261120  }
 0x4f2   : > { %2496 = vadd.xlane.f32.xlu1 %v2490_v19 }
 0x4fa   : > { %v5173_v15 = vpop.eup %5172 }
 0x4fb   : > { %v2491_v6 = vsel %vm9682_vm11, %v5173_v15, 0.0  ;;  %v5175_v9 = vpop.eup %5174 }
 0x4fc   : > { %2498 = vadd.xlane.f32.xlu0 %v2491_v6  ;;  %v4304_v57 = vmul.f32 %v5175_v9, %v10669_v31 }
 0x516   : > { %v4291_v41 = vpop.xlane.xlu0 %4290 }
 0x517   : > { %v4297_v36 = vmax.f32 %v4291_v41, 1e-20 }
 0x519   : > { %5176 = vrcp.f32 %v4297_v36 }
 0x51a   : > { %v4295_v27 = vpop.xlane.xlu0 %4294  ;;  %5178 = vrcp.f32 %v4298_v45 }
 0x51b   : > { %v4299_v34 = vmax.f32 %v4295_v27, 1e-20 }
 0x51d   : > { %5180 = vrcp.f32 %v4299_v34 }
 0x523   : > { %v5177_v12 = vpop.eup %5176 }
 0x524   : > { %v4305_v4 = vmul.f32 %v5177_v12, %v4285_v40  ;;  %v5179_v14 = vpop.eup %5178 }
 0x525   : > { %v4306_v22 = vmul.f32 %v5179_v14, %v10674_v7 }
 0x526   : > { %v4308_v46 = vpack.c.bf16 %v4305_v4, %v4304_v57 }
 0x527   : > { %v5181_v20 = vpop.eup %5180 }
 0x528   : > { %4928 = vmatprep.mubr.bf16.mxu1 %v4308_v46  ;;  %v4307_v55 = vmul.f32 %v5181_v20, %v4287_v2 }
 0x52a   : > { %v4309_v21 = vpack.c.bf16 %v4307_v55, %v4306_v22 }
 0x52c   : > { %4929 = vmatmul.mubr.bf16.vlgmr.msra.gmra.mrb[4].mxu1 %v4309_v21 }
 0x570   : > { %v2495_v30 = vpop.xlane.xlu0 %2494 }
 0x571   : > { %v2501_v49 = vmax.f32 %v2495_v30, 1e-20 }
 0x573   : > { %5182 = vrcp.f32 %v2501_v49 }
 0x576   : > { %v2493_v48 = vpop.xlane.xlu1 %2492 }
 0x577   : > { %v2500_v16 = vmax.f32 %v2493_v48, 1e-20 }
 0x579   : > { %5184 = vrcp.f32 %v2500_v16 }
 0x57d   : > { %v5183_v17 = vpop.eup %5182 }
 0x57e   : > { %v2509_v31 = vmul.f32 %v5183_v17, %v2489_v42 }
 0x57f   : > { %v2497_v29 = vpop.xlane.xlu1 %2496 }
 0x580   : > { %v2502_v62 = vmax.f32 %v2497_v29, 1e-20 }
 0x582   : > { %5186 = vrcp.f32 %v2502_v62 }
 0x583   : > { %v5185_v11 = vpop.eup %5184 }
 0x584   : > { %v2508_v3 = vmul.f32 %v5185_v11, %v2488_v43 }
 0x586   : > { %v2512_v18 = vpack.c.bf16 %v2509_v31, %v2508_v3 }
 0x588   : > { %4922 = vmatprep.mubr.bf16.mxu0 %v2512_v18 }
 0x589   : > { %v2499_v23 = vpop.xlane.xlu0 %2498 }
 0x58a   : > { %v2503_v7 = vmax.f32 %v2499_v23, 1e-20 }
 0x58c   : > { %5188 = vrcp.f32 %v2503_v7  ;;  %v5187_v38 = vpop.eup %5186 }
 0x58d   : > { %v2510_v59 = vmul.f32 %v5187_v38, %v2490_v19 }
 0x596   : > { %v5189_v39 = vpop.eup %5188 }
 0x597   : > { %v2511_v53 = vmul.f32 %v5189_v39, %v2491_v6 }
 0x599   : > { %v2513_v32 = vpack.c.bf16 %v2511_v53, %v2510_v59 }
 0x59b   : > { %4923 = vmatmul.mubr.bf16.vlgmr.msra.gmra.mrb[4].mxu0 %v2513_v32 }
 0x5ff   : > { %v4930_v26 = vpop.f32.mrb[4].mxu1 }
 0x600   : > { %v4345_v50 = vpop.f32.mrb[5].mxu1 }
 0x601   : > { %4364 = vrot.lane.b32.xlu1 %v4345_v50, %s5349_s28  ;;  %v4931_v35 = vpop.f32.mrb[6].mxu1 }
 0x602   : > { %v4348_v25 = vpop.f32.mrb[7].mxu1 }
 0x603   : > { %4366 = vrot.lane.b32.xlu0 %v4348_v25, %s5349_s28 }
 0x605   : > { %4368 = vrot.lane.b32.xlu1 %v4930_v26, %s5349_s28 }
 0x609   : > { %4370 = vrot.lane.b32.xlu1 %v4931_v35, %s5349_s28 }
 0x66e   : > { %v4924_v47 = vpop.f32.mrb[4].mxu0 }
 0x66f   : > { %v2549_v40 = vpop.f32.mrb[5].mxu0 }
 0x670   : > { %v4925_v54 = vpop.f32.mrb[6].mxu0 }
 0x671   : > { %v2552_v2 = vpop.f32.mrb[7].mxu0 }
 0x673   : > { %v4365_v61 = vpop.permute.xlu1 %4364 }
 0x674   : > { %v4377_v33 = vsel %vm4376_vm10, %v2549_v40, %v4365_v61 }
 0x675   : > { %v4382_v51 = vsel %vm4381_vm4, %v4377_v33, 0.0  ;;  %v4367_v58 = vpop.permute.xlu0 %4366 }
 0x676   : > { %v4393_v10 = vadd.f32 %v4825_v8, %v4382_v51  ;;  %v4378_v44 = vsel %vm4376_vm10, %v2552_v2, %v4367_v58 }
 0x677   : > { %v4383_v63 = vsel %vm4381_vm4, %v4378_v44, 0.0  ;;  %v4369_v24 = vpop.permute.xlu1 %4368 }
 0x678   : > { %v4401_v42 = vmin.f32 %v4393_v10, 0.0  ;;  %v4394_v60 = vadd.f32 %v4825_v8, %v4383_v63  ;;  %v4379_v5 = vsel %vm4376_vm10, %v4924_v47, %v4369_v24  ;;  %vm4397_vm11 = vcmp.gt.f32.partialorder %v4393_v10, 0.0 }
 0x679   : > { %v4384_v43 = vsel %vm4381_vm4, %v4379_v5, 0.0 }
 0x67a   : > { %v4405_v1 = vmul.f32 1.442695, %v4401_v42  ;;  %v4402_v13 = vmin.f32 %v4394_v60, 0.0  ;;  %v4395_v28 = vadd.f32 %v4825_v8, %v4384_v43  ;;  %vm4398_vm2 = vcmp.gt.f32.partialorder %v4394_v60, 0.0 }
 0x67b   : > { %v4371_v37 = vpop.permute.xlu1 %4370 }
 0x67c   : > { %5190 = vpow2.f32 %v4405_v1  ;;  %v4407_v19 = vmul.f32 1.442695, %v4402_v13  ;;  %v4403_v15 = vmin.f32 %v4395_v28, 0.0  ;;  %v4380_v6 = vsel %vm4376_vm10, %v4925_v54, %v4371_v37 }
 0x67d   : > { %v4385_v52 = vsel %vm4381_vm4, %v4380_v6, 0.0  ;;  %vm4399_vm12 = vcmp.gt.f32.partialorder %v4395_v28, 0.0 }
 0x67e   : > { %5192 = vpow2.f32 %v4407_v19  ;;  %v4409_v56 = vmul.f32 1.442695, %v4403_v15  ;;  %v4396_v0 = vadd.f32 %v4825_v8, %v4385_v52 }
 0x680   : > { %5194 = vpow2.f32 %v4409_v56  ;;  %v4404_v41 = vmin.f32 %v4396_v0, 0.0  ;;  %vm4400_vm13 = vcmp.gt.f32.partialorder %v4396_v0, 0.0 }
 0x682   : > { %v4411_v45 = vmul.f32 1.442695, %v4404_v41 }
 0x684   : > { %5196 = vpow2.f32 %v4411_v45 }
 0x686   : > { %v5191_v36 = vpop.eup %5190 }
 0x687   : > { %v4826_v27 = vadd.f32 -1.0, %v5191_v36 }
 0x688   : > { %v5193_v34 = vpop.eup %5192 }
 0x689   : > { %v4417_v9 = vsel %vm4397_vm11, %v4393_v10, %v4826_v27  ;;  %v4827_v12 = vadd.f32 -1.0, %v5193_v34 }
 0x68a   : > { %v5195_v57 = vpop.eup %5194  ;;  %4421 = vst [vmem:[%s485_s3] sm:$0xff] %v4417_v9 }
 0x68b   : > { %v4418_v4 = vsel %vm4398_vm2, %v4394_v60, %v4827_v12  ;;  %v4828_v14 = vadd.f32 -1.0, %v5195_v57 }
 0x68c   : > { %4422 = vst [vmem:[%s485_s3 + $0x8] sm:$0xff] %v4418_v4 }
 0x68d   : > { %v4419_v46 = vsel %vm4399_vm12, %v4395_v28, %v4828_v14 }
 0x68e   : > { %4423 = vst [vmem:[%s485_s3 + $0x10] sm:$0xff] %v4419_v46  ;;  %v5197_v20 = vpop.eup %5196 }
 0x68f   : > { %v4829_v22 = vadd.f32 -1.0, %v5197_v20 }
 0x691   : > { %v4420_v55 = vsel %vm4400_vm13, %v4396_v0, %v4829_v22 }
 0x692   : > { %4424 = vst [vmem:[%s485_s3 + $0x18] sm:$0xff] %v4420_v55 }
 0x693   : > { %5247 = shalt.err (!%p5244_p6)
}
 0x694   : > { %s5248_s4 = scalar_lea.hbm %s10713_s14, 512  ;;  %s5252_s27 = scalar_lea.hbm %s10769_s11, 2048 }
 0x695   : > { %p5249_p11 = scmp.ne.s32.totalorder %s10713_s14, %s5248_s4  ;;  %p5253_p3 = scmp.lt.u32.totalorder %s10713_s14, %s10769_s11 }
 0x696   : > { %p5254_p8 = scmp.lt.u32.totalorder %s5252_s27, %s5248_s4  ;;  %p5256_p10 = scmp.lt.u32.totalorder %s5248_s4, %s10713_s14 }
 0x697   : > { %p5250_p13 = pnand %p5249_p11, %p13189_p1 }
 0x698   : > { %p5255_p9 = por %p5254_p8, %p5253_p3 }
 0x699   : > { %p5251_p0 = pneg %p5250_p13 }
 0x69a   : > { %p5257_p2 = por %p5256_p10, %p5255_p9 }
 0x69c   : > { %p5258_p7 = pnand %p5257_p2, %p5251_p0 }
 0x69e   : > { %5261 = shalt.err (!%p5258_p7)
}
 0x69f   : > { %s5351_s26 = smov 128   ;;  %s5352_s28 = smov 8  }
 0x6a0   : > { %4953 = dma.vmem_to_hbm [thread:$0]  (%p13189_p1), %s10715_s15, 512, %s10713_s14, %s4426_s19, %s5351_s26, %s5351_s26, %s5352_s28  }
 0x6a1 PF: > { %s13190_s25 = sld [smem:[#allocation17_spill]]  ;;  %s13191_s22 = sld [smem:[#allocation21_spill]] }
 0x6a2   : > { %p4970_p12 = scmp.ge.s32.totalorder %s5308_s20, 2 }
 0x6a7   : > { %s4454_s16 = sand.u32 1, %s13190_s25   ;;  %p13192_p4 = scmp.ne.s32.totalorder %s13191_s22, 0 }
 0x6a8   : > { %s4455_s3 = scalar_lea.sflag [#allocation4], %s4454_s16 }
 0x6a9   : > { %p4963_p5 = pnand %p4970_p12, %p13192_p4 }
 0x6ab   : > { %5291 = dma.done.wait (!%p4963_p5), %s4455_s3, 512  }
 0x6ac   : > { %5293 = vsyncadd (!%p4963_p5), %s4455_s3, 4294966784  ;;  %s13193_s20 = sld [smem:[#allocation19_spill]]  ;;  %s13194_s23 = sld [smem:[#allocation18_spill]] }
 0x6ad   : > { %s13195_s19 = sld [smem:[#allocation20_spill]]  ;;  %s13196_s17 = smov %s5300_s18 }
 0x6b2   : > { %p26_p6 = scmp.ge.s32.totalorder %s13193_s20, 6   ;;  %s13197_s18 = smov %s13194_s23 }
 0x6b4   :  { %28 = sbr.rel (!%p26_p6) target bundleno = 15 (0xf), region = 134 }
 0x6bb   :  { %4460 = vsyncpa [#allocation3], 1 }
 0x6bc   :  { %4462 = vsyncpa [#allocation3 + $0x1], 1 }
 0x6bd   :  { %4463 = vsyncpa [#allocation4], 1 }
 0x6be   :  { %4465 = vsyncpa [#allocation4 + $0x1], 1 }
 0x6bf   :  { %4466 = vsyncpa [#allocation5], 1 }
 0x6c0   :  { %4468 = vsyncpa [#allocation5 + $0x1], 1 }
 0x6c1   :  { %4469 = vsyncpa [#allocation8], 1 }

</bundles_post_ra>
